<compile_context>
chip_gen: v7x
topology: tpu7x:2x2x1
jax: 0.10.0
libtpu: 0.0.40
codegen_flags: <defaults>
</compile_context>

<pallas_src>
import jax
import jax.numpy as jnp
from jax import lax
from jax.experimental import pallas as pl
from jax.experimental.pallas import tpu as pltpu


_LAYER_SPECS = [(1, 32), (32, 32), (32, 32), (32, 64)]  # (Cin, Cout) per conv


# ----------------------------------------------------------------------------
# Fused Pallas kernel: 3 x (conv3x3 + ReLU + maxpool2) + conv3x3 + ReLU + global max
# ----------------------------------------------------------------------------
def _make_fused_kernel(H, W, BB):
    """Builds the kernel for BB batch elements of an (H, W) spectrogram."""
    H1, W1 = H // 2, W // 2          # after pool 1
    H2, W2 = H1 // 2, W1 // 2        # after pool 2
    H3, W3 = H2 // 2, W2 // 2        # after pool 3

    def conv3x3(src_ref, h, w, cin, w_ref):
        # src_ref: (BB, h+2, w+2, cin) zero-haloed activation in VMEM.
        # w_ref:   (9, cin, cout) weights, pre-split per 3x3 tap.
        # 9 accumulating matmuls (f32 accumulation): no im2col lane-concat and
        # no materialized cols buffer (removes the XLU/vst hot spot of v2).
        m = BB * h * w
        acc = None
        k = 0
        for dy in range(3):
            for dx in range(3):
                tap = src_ref[:, dy:dy + h, dx:dx + w, :].reshape(m, cin)
                if cin == 1:
                    # Rank-1 update: VPU broadcast-multiply beats a K=1 MXU pass.
                    contrib = tap * w_ref[k]
                else:
                    contrib = jnp.dot(tap, w_ref[k],
                                      preferred_element_type=jnp.float32)
                acc = contrib if acc is None else acc + contrib
                k += 1
        return acc                                           # (BB*h*w, cout) f32

    def pool2_bias_relu(acc, h, w, b_ref):
        # acc: (BB*h*w, C) raw conv output.  2x2 max-pool first, then ONE
        # bias+ReLU on the pooled tile (ReLU(x+b) is monotone -> max commutes).
        c = acc.shape[-1]
        r = acc.reshape(BB * (h // 2), 2, w, c)      # split H pairs above the tile (free)
        r = jnp.maximum(r[:, 0], r[:, 1])            # (BB*h/2, w, c)
        r = r.reshape(BB * (h // 2), w // 2, 2, c)   # split W pairs (sublane)
        r = jnp.maximum(r[:, :, 0, :], r[:, :, 1, :])  # (BB*h/2, w/2, c)
        r = r.reshape(BB, h // 2, w // 2, c)
        return jnp.maximum(r + b_ref[...], 0.0)      # (BB, h/2, w/2, c)

    def store_haloed(dst_ref, val):
        # dst_ref: (BB, h+2, w+2, C) halo-padded scratch; val: (BB, h, w, C).
        # Only the four 1-wide borders are zeroed (not the whole buffer), and
        # together with the interior write the scratch is fully overwritten
        # every grid step -> no cross-step persistence, megacore-safe.
        bb, h, w, c = val.shape
        z_row = jnp.zeros((bb, 1, w + 2, c), dst_ref.dtype)
        dst_ref[:, 0:1, :, :] = z_row                       # top halo row
        dst_ref[:, h + 1:h + 2, :, :] = z_row               # bottom halo row
        z_col = jnp.zeros((bb, h + 2, 1, c), dst_ref.dtype)
        dst_ref[:, :, 0:1, :] = z_col                       # left halo column
        dst_ref[:, :, w + 1:w + 2, :] = z_col               # right halo column
        # Interior (offset-1 in W is a masked sublane store; accepted).
        dst_ref[:, 1:1 + h, 1:1 + w, :] = val.astype(dst_ref.dtype)

    def kernel(x_ref, w1, b1, w2, b2, w3, b3, w4, b4, o_ref, a1, a2, a3):
        # x_ref: (BB, H+2, W+2, 1) halo-padded input block.
        # a1/a2/a3: halo-padded VMEM activations after layers 1/2/3.
        # TODO(synk): nn.Dropout(0.3) is train-time only; identity at inference.
        store_haloed(a1, pool2_bias_relu(conv3x3(x_ref, H, W, 1, w1), H, W, b1))
        store_haloed(a2, pool2_bias_relu(conv3x3(a1, H1, W1, 32, w2), H1, W1, b2))
        store_haloed(a3, pool2_bias_relu(conv3x3(a2, H2, W2, 32, w3), H2, W2, b3))

        # Layer 4: conv + ReLU + global spatial max (max commutes with the
        # monotone bias+ReLU, so reduce first, then bias+ReLU once).
        r = conv3x3(a3, H3, W3, 32, w4)                     # (BB*H3*W3, 64)
        r = r.reshape(BB, H3 * W3, r.shape[-1])
        m = jnp.max(r, axis=1)                              # (BB, 64)
        o_ref[...] = jnp.maximum(m + b4[...], 0.0).reshape(BB, 1, -1).astype(o_ref.dtype)

    return kernel


# ----------------------------------------------------------------------------
# Wrapper
# ----------------------------------------------------------------------------
def _pick_block_batch(B):
    for bb in (8, 4, 2, 1):
        if B % bb == 0:
            return bb
    return 1


def dnsmos_encoder(speech_spectrum, params, block_batch=None):
    """speech_spectrum: (B, 1, H, W) NCHW (PyTorch convention). Returns (B, 64)."""
    B, cin, H, W = speech_spectrum.shape
    assert cin == 1, cin
    # Three 2x2 max-pools -> H and W must be even at every stage.
    assert H % 8 == 0 and W % 8 == 0, (H, W)

    BB = _pick_block_batch(B) if block_batch is None else block_batch
    assert B % BB == 0, (B, BB)

    x = jnp.transpose(speech_spectrum, (0, 2, 3, 1))        # NCHW -> NHWC
    xp = jnp.pad(x, ((0, 0), (1, 1), (1, 1), (0, 0)))       # 1-pixel SAME halo

    H1, W1 = H // 2, W // 2
    H2, W2 = H1 // 2, W1 // 2
    H3, W3 = H2 // 2, W2 // 2
    c_final = _LAYER_SPECS[-1][1]

    def const_spec(shape):
        # Full-array block with a constant index map: fetched once, resident in
        # VMEM across the whole grid.  (pl.Buffered(1) would drop the unused
        # second buffer; left at default for maximally portable lowering.)
        return pl.BlockSpec(shape, lambda b, _n=len(shape): (0,) * _n)

    weight_args, weight_specs = [], []
    for p in params:
        weight_args += [p["w_taps"], p["b"]]
        weight_specs += [const_spec(p["w_taps"].shape), const_spec(p["b"].shape)]

    out = pl.pallas_call(
        _make_fused_kernel(H, W, BB),
        out_shape=jax.ShapeDtypeStruct((B, 1, c_final), jnp.float32),
        grid_spec=pltpu.PrefetchScalarGridSpec(
            num_scalar_prefetch=0,
            grid=(B // BB,),
            in_specs=[pl.BlockSpec((BB, H + 2, W + 2, 1),
                                   lambda b: (b, 0, 0, 0))] + weight_specs,
            out_specs=pl.BlockSpec((BB, 1, c_final), lambda b: (b, 0, 0)),
            scratch_shapes=[
                pltpu.VMEM((BB, H1 + 2, W1 + 2, 32), jnp.float32),
                pltpu.VMEM((BB, H2 + 2, W2 + 2, 32), jnp.float32),
                pltpu.VMEM((BB, H3 + 2, W3 + 2, 32), jnp.float32),
            ],
        ),
        compiler_params=pltpu.CompilerParams(
            dimension_semantics=("parallel",),
            # Sized against v7x's 64 MiB physical VMEM (C=32 scratches pad 4x
            # to 128 lanes), with headroom for the double-buffered input block.
            vmem_limit_bytes=48 * 1024 * 1024),
    )(xp, *weight_args)
    return out.reshape(B, c_final)


# ----------------------------------------------------------------------------
# Parameters (deterministic synthetic; not a checkpoint load)
# ----------------------------------------------------------------------------
def init_params(key):
    params = []
    keys = jax.random.split(key, 2 * len(_LAYER_SPECS))
    for i, (cin, cout) in enumerate(_LAYER_SPECS):
        w_hwio = jax.random.normal(keys[2 * i], (3, 3, cin, cout), jnp.float32) * 0.2
        bias = jax.random.normal(keys[2 * i + 1], (1, cout), jnp.float32) * 0.1
        params.append({
            "w_hwio": w_hwio,                            # (3,3,Cin,Cout) reference form
            "w_taps": w_hwio.reshape(9, cin, cout),      # per-tap kernel form
            "b": bias,                                   # (1, Cout)
        })
    return params


# ----------------------------------------------------------------------------
# Pure-JAX reference (for correctness check)
# ----------------------------------------------------------------------------
def reference_forward(speech_spectrum, params):
    x = jnp.transpose(speech_spectrum, (0, 2, 3, 1))

    def conv_relu(x, w_hwio, b):
        y = lax.conv_general_dilated(
            x, w_hwio, window_strides=(1, 1), padding="SAME",
            dimension_numbers=("NHWC", "HWIO", "NHWC"),
            precision=lax.Precision.HIGHEST)
        return jnp.maximum(y + b.reshape(1, 1, 1, -1), 0.0)

    def pool2(x):
        return lax.reduce_window(x, -jnp.inf, lax.max,
                                 (1, 2, 2, 1), (1, 2, 2, 1), "VALID")

    for i in range(3):
        x = pool2(conv_relu(x, params[i]["w_hwio"], params[i]["b"]))
    x = conv_relu(x, params[3]["w_hwio"], params[3]["b"])
    return jnp.max(x, axis=(1, 2))


if __name__ == "__main__":
    key = jax.random.PRNGKey(0)
    pkey, xkey = jax.random.split(key)
    params = init_params(pkey)

    # Small input consistent with the module: (batch=2, channels=1, 16x16 spectrum)
    speech_spectrum = jax.random.normal(xkey, (2, 1, 16, 16), jnp.float32)

    encoder = jax.jit(dnsmos_encoder)
    emb = jax.block_until_ready(encoder(speech_spectrum, params))
    ref = jax.block_until_ready(reference_forward(speech_spectrum, params))

    assert emb.shape == (2, 64), emb.shape
    if not bool(jnp.allclose(emb, ref, rtol=1e-3, atol=1e-3)):
        max_err = float(jnp.max(jnp.abs(emb - ref)))
        raise AssertionError(f"mismatch vs reference, max abs err = {max_err}")
    print("KERNEL_OK")
</pallas_src>

<mosaic_0001>
module attributes {stable_mosaic.version = 11 : i64} {
  func.func @kernel(%arg0: i32, %arg1: memref<2x18x18x1xf32, #tpu.memory_space<vmem>>, %arg2: memref<9x1x32xf32, #tpu.memory_space<vmem>>, %arg3: memref<1x32xf32, #tpu.memory_space<vmem>>, %arg4: memref<9x32x32xf32, #tpu.memory_space<vmem>>, %arg5: memref<1x32xf32, #tpu.memory_space<vmem>>, %arg6: memref<9x32x32xf32, #tpu.memory_space<vmem>>, %arg7: memref<1x32xf32, #tpu.memory_space<vmem>>, %arg8: memref<9x32x64xf32, #tpu.memory_space<vmem>>, %arg9: memref<1x64xf32, #tpu.memory_space<vmem>>, %arg10: memref<2x1x64xf32, #tpu.memory_space<vmem>>, %arg11: memref<2x10x10x32xf32, #tpu.memory_space<vmem>>, %arg12: memref<2x6x6x32xf32, #tpu.memory_space<vmem>>, %arg13: memref<2x4x4x32xf32, #tpu.memory_space<vmem>>) attributes {dimension_semantics = [#tpu.dimension_semantics<parallel>], iteration_bounds = array<i64: 1>, scalar_prefetch = 0 : i64, scratch_operands = 3 : i64, tpu.core_type = #tpu.core_type<tc>, window_params = [{transform_indices = @transform_0, window_bounds = array<i64: 2, 18, 18, 1>}, {pipeline_mode = #tpu.pipeline_mode<synchronous>, transform_indices = @transform_1, window_bounds = array<i64: 9, 1, 32>}, {pipeline_mode = #tpu.pipeline_mode<synchronous>, transform_indices = @transform_2, window_bounds = array<i64: 1, 32>}, {pipeline_mode = #tpu.pipeline_mode<synchronous>, transform_indices = @transform_3, window_bounds = array<i64: 9, 32, 32>}, {pipeline_mode = #tpu.pipeline_mode<synchronous>, transform_indices = @transform_4, window_bounds = array<i64: 1, 32>}, {pipeline_mode = #tpu.pipeline_mode<synchronous>, transform_indices = @transform_5, window_bounds = array<i64: 9, 32, 32>}, {pipeline_mode = #tpu.pipeline_mode<synchronous>, transform_indices = @transform_6, window_bounds = array<i64: 1, 32>}, {pipeline_mode = #tpu.pipeline_mode<synchronous>, transform_indices = @transform_7, window_bounds = array<i64: 9, 32, 64>}, {pipeline_mode = #tpu.pipeline_mode<synchronous>, transform_indices = @transform_8, window_bounds = array<i64: 1, 64>}, {transform_indices = @transform_9, window_bounds = array<i64: 2, 1, 64>}]} {
    %c0 = arith.constant 0 : index
    %c0_0 = arith.constant 0 : index
    %c0_1 = arith.constant 0 : index
    %c0_2 = arith.constant 0 : index
    %0 = vector.load %arg1[%c0, %c0_0, %c0_1, %c0_2] : memref<2x18x18x1xf32, #tpu.memory_space<vmem>>, vector<2x16x16x1xf32>
    %1 = vector.shape_cast %0 : vector<2x16x16x1xf32> to vector<512x1xf32>
    %c0_3 = arith.constant 0 : index
    %c0_4 = arith.constant 0 : index
    %c0_5 = arith.constant 0 : index
    %2 = vector.load %arg2[%c0_3, %c0_4, %c0_5] : memref<9x1x32xf32, #tpu.memory_space<vmem>>, vector<1x1x32xf32>
    %3 = vector.shape_cast %2 : vector<1x1x32xf32> to vector<1x32xf32>
    %4 = vector.broadcast %1 : vector<512x1xf32> to vector<512x32xf32>
    %5 = vector.broadcast %3 : vector<1x32xf32> to vector<512x32xf32>
    %6 = arith.mulf %4, %5 : vector<512x32xf32>
    %c0_6 = arith.constant 0 : index
    %c0_7 = arith.constant 0 : index
    %c1 = arith.constant 1 : index
    %c0_8 = arith.constant 0 : index
    %7 = vector.load %arg1[%c0_6, %c0_7, %c1, %c0_8] : memref<2x18x18x1xf32, #tpu.memory_space<vmem>>, vector<2x16x16x1xf32>
    %8 = vector.shape_cast %7 : vector<2x16x16x1xf32> to vector<512x1xf32>
    %c1_9 = arith.constant 1 : index
    %c0_10 = arith.constant 0 : index
    %c0_11 = arith.constant 0 : index
    %9 = vector.load %arg2[%c1_9, %c0_10, %c0_11] : memref<9x1x32xf32, #tpu.memory_space<vmem>>, vector<1x1x32xf32>
    %10 = vector.shape_cast %9 : vector<1x1x32xf32> to vector<1x32xf32>
    %11 = vector.broadcast %8 : vector<512x1xf32> to vector<512x32xf32>
    %12 = vector.broadcast %10 : vector<1x32xf32> to vector<512x32xf32>
    %13 = arith.mulf %11, %12 : vector<512x32xf32>
    %14 = arith.addf %6, %13 : vector<512x32xf32>
    %c0_12 = arith.constant 0 : index
    %c0_13 = arith.constant 0 : index
    %c2 = arith.constant 2 : index
    %c0_14 = arith.constant 0 : index
    %15 = vector.load %arg1[%c0_12, %c0_13, %c2, %c0_14] : memref<2x18x18x1xf32, #tpu.memory_space<vmem>>, vector<2x16x16x1xf32>
    %16 = vector.shape_cast %15 : vector<2x16x16x1xf32> to vector<512x1xf32>
    %c2_15 = arith.constant 2 : index
    %c0_16 = arith.constant 0 : index
    %c0_17 = arith.constant 0 : index
    %17 = vector.load %arg2[%c2_15, %c0_16, %c0_17] : memref<9x1x32xf32, #tpu.memory_space<vmem>>, vector<1x1x32xf32>
    %18 = vector.shape_cast %17 : vector<1x1x32xf32> to vector<1x32xf32>
    %19 = vector.broadcast %16 : vector<512x1xf32> to vector<512x32xf32>
    %20 = vector.broadcast %18 : vector<1x32xf32> to vector<512x32xf32>
    %21 = arith.mulf %19, %20 : vector<512x32xf32>
    %22 = arith.addf %14, %21 : vector<512x32xf32>
    %c0_18 = arith.constant 0 : index
    %c1_19 = arith.constant 1 : index
    %c0_20 = arith.constant 0 : index
    %c0_21 = arith.constant 0 : index
    %23 = vector.load %arg1[%c0_18, %c1_19, %c0_20, %c0_21] : memref<2x18x18x1xf32, #tpu.memory_space<vmem>>, vector<2x16x16x1xf32>
    %24 = vector.shape_cast %23 : vector<2x16x16x1xf32> to vector<512x1xf32>
    %c3 = arith.constant 3 : index
    %c0_22 = arith.constant 0 : index
    %c0_23 = arith.constant 0 : index
    %25 = vector.load %arg2[%c3, %c0_22, %c0_23] : memref<9x1x32xf32, #tpu.memory_space<vmem>>, vector<1x1x32xf32>
    %26 = vector.shape_cast %25 : vector<1x1x32xf32> to vector<1x32xf32>
    %27 = vector.broadcast %24 : vector<512x1xf32> to vector<512x32xf32>
    %28 = vector.broadcast %26 : vector<1x32xf32> to vector<512x32xf32>
    %29 = arith.mulf %27, %28 : vector<512x32xf32>
    %30 = arith.addf %22, %29 : vector<512x32xf32>
    %c0_24 = arith.constant 0 : index
    %c1_25 = arith.constant 1 : index
    %c1_26 = arith.constant 1 : index
    %c0_27 = arith.constant 0 : index
    %31 = vector.load %arg1[%c0_24, %c1_25, %c1_26, %c0_27] : memref<2x18x18x1xf32, #tpu.memory_space<vmem>>, vector<2x16x16x1xf32>
    %32 = vector.shape_cast %31 : vector<2x16x16x1xf32> to vector<512x1xf32>
    %c4 = arith.constant 4 : index
    %c0_28 = arith.constant 0 : index
    %c0_29 = arith.constant 0 : index
    %33 = vector.load %arg2[%c4, %c0_28, %c0_29] : memref<9x1x32xf32, #tpu.memory_space<vmem>>, vector<1x1x32xf32>
    %34 = vector.shape_cast %33 : vector<1x1x32xf32> to vector<1x32xf32>
    %35 = vector.broadcast %32 : vector<512x1xf32> to vector<512x32xf32>
    %36 = vector.broadcast %34 : vector<1x32xf32> to vector<512x32xf32>
    %37 = arith.mulf %35, %36 : vector<512x32xf32>
    %38 = arith.addf %30, %37 : vector<512x32xf32>
    %c0_30 = arith.constant 0 : index
    %c1_31 = arith.constant 1 : index
    %c2_32 = arith.constant 2 : index
    %c0_33 = arith.constant 0 : index
    %39 = vector.load %arg1[%c0_30, %c1_31, %c2_32, %c0_33] : memref<2x18x18x1xf32, #tpu.memory_space<vmem>>, vector<2x16x16x1xf32>
    %40 = vector.shape_cast %39 : vector<2x16x16x1xf32> to vector<512x1xf32>
    %c5 = arith.constant 5 : index
    %c0_34 = arith.constant 0 : index
    %c0_35 = arith.constant 0 : index
    %41 = vector.load %arg2[%c5, %c0_34, %c0_35] : memref<9x1x32xf32, #tpu.memory_space<vmem>>, vector<1x1x32xf32>
    %42 = vector.shape_cast %41 : vector<1x1x32xf32> to vector<1x32xf32>
    %43 = vector.broadcast %40 : vector<512x1xf32> to vector<512x32xf32>
    %44 = vector.broadcast %42 : vector<1x32xf32> to vector<512x32xf32>
    %45 = arith.mulf %43, %44 : vector<512x32xf32>
    %46 = arith.addf %38, %45 : vector<512x32xf32>
    %c0_36 = arith.constant 0 : index
    %c2_37 = arith.constant 2 : index
    %c0_38 = arith.constant 0 : index
    %c0_39 = arith.constant 0 : index
    %47 = vector.load %arg1[%c0_36, %c2_37, %c0_38, %c0_39] : memref<2x18x18x1xf32, #tpu.memory_space<vmem>>, vector<2x16x16x1xf32>
    %48 = vector.shape_cast %47 : vector<2x16x16x1xf32> to vector<512x1xf32>
    %c6 = arith.constant 6 : index
    %c0_40 = arith.constant 0 : index
    %c0_41 = arith.constant 0 : index
    %49 = vector.load %arg2[%c6, %c0_40, %c0_41] : memref<9x1x32xf32, #tpu.memory_space<vmem>>, vector<1x1x32xf32>
    %50 = vector.shape_cast %49 : vector<1x1x32xf32> to vector<1x32xf32>
    %51 = vector.broadcast %48 : vector<512x1xf32> to vector<512x32xf32>
    %52 = vector.broadcast %50 : vector<1x32xf32> to vector<512x32xf32>
    %53 = arith.mulf %51, %52 : vector<512x32xf32>
    %54 = arith.addf %46, %53 : vector<512x32xf32>
    %c0_42 = arith.constant 0 : index
    %c2_43 = arith.constant 2 : index
    %c1_44 = arith.constant 1 : index
    %c0_45 = arith.constant 0 : index
    %55 = vector.load %arg1[%c0_42, %c2_43, %c1_44, %c0_45] : memref<2x18x18x1xf32, #tpu.memory_space<vmem>>, vector<2x16x16x1xf32>
    %56 = vector.shape_cast %55 : vector<2x16x16x1xf32> to vector<512x1xf32>
    %c7 = arith.constant 7 : index
    %c0_46 = arith.constant 0 : index
    %c0_47 = arith.constant 0 : index
    %57 = vector.load %arg2[%c7, %c0_46, %c0_47] : memref<9x1x32xf32, #tpu.memory_space<vmem>>, vector<1x1x32xf32>
    %58 = vector.shape_cast %57 : vector<1x1x32xf32> to vector<1x32xf32>
    %59 = vector.broadcast %56 : vector<512x1xf32> to vector<512x32xf32>
    %60 = vector.broadcast %58 : vector<1x32xf32> to vector<512x32xf32>
    %61 = arith.mulf %59, %60 : vector<512x32xf32>
    %62 = arith.addf %54, %61 : vector<512x32xf32>
    %c0_48 = arith.constant 0 : index
    %c2_49 = arith.constant 2 : index
    %c2_50 = arith.constant 2 : index
    %c0_51 = arith.constant 0 : index
    %63 = vector.load %arg1[%c0_48, %c2_49, %c2_50, %c0_51] : memref<2x18x18x1xf32, #tpu.memory_space<vmem>>, vector<2x16x16x1xf32>
    %64 = vector.shape_cast %63 : vector<2x16x16x1xf32> to vector<512x1xf32>
    %c8 = arith.constant 8 : index
    %c0_52 = arith.constant 0 : index
    %c0_53 = arith.constant 0 : index
    %65 = vector.load %arg2[%c8, %c0_52, %c0_53] : memref<9x1x32xf32, #tpu.memory_space<vmem>>, vector<1x1x32xf32>
    %66 = vector.shape_cast %65 : vector<1x1x32xf32> to vector<1x32xf32>
    %67 = vector.broadcast %64 : vector<512x1xf32> to vector<512x32xf32>
    %68 = vector.broadcast %66 : vector<1x32xf32> to vector<512x32xf32>
    %69 = arith.mulf %67, %68 : vector<512x32xf32>
    %70 = arith.addf %62, %69 : vector<512x32xf32>
    %71 = vector.shape_cast %70 : vector<512x32xf32> to vector<16x2x16x32xf32>
    %72 = vector.extract_strided_slice %71 {offsets = [0, 0, 0, 0], sizes = [16, 1, 16, 32], strides = [1, 1, 1, 1]} : vector<16x2x16x32xf32> to vector<16x1x16x32xf32>
    %73 = vector.shape_cast %72 : vector<16x1x16x32xf32> to vector<16x16x32xf32>
    %74 = vector.extract_strided_slice %71 {offsets = [0, 1, 0, 0], sizes = [16, 1, 16, 32], strides = [1, 1, 1, 1]} : vector<16x2x16x32xf32> to vector<16x1x16x32xf32>
    %75 = vector.shape_cast %74 : vector<16x1x16x32xf32> to vector<16x16x32xf32>
    %76 = arith.maximumf %73, %75 : vector<16x16x32xf32>
    %77 = vector.shape_cast %76 : vector<16x16x32xf32> to vector<16x8x2x32xf32>
    %78 = vector.extract_strided_slice %77 {offsets = [0, 0, 0, 0], sizes = [16, 8, 1, 32], strides = [1, 1, 1, 1]} : vector<16x8x2x32xf32> to vector<16x8x1x32xf32>
    %79 = vector.shape_cast %78 : vector<16x8x1x32xf32> to vector<16x8x32xf32>
    %80 = vector.extract_strided_slice %77 {offsets = [0, 0, 1, 0], sizes = [16, 8, 1, 32], strides = [1, 1, 1, 1]} : vector<16x8x2x32xf32> to vector<16x8x1x32xf32>
    %81 = vector.shape_cast %80 : vector<16x8x1x32xf32> to vector<16x8x32xf32>
    %82 = arith.maximumf %79, %81 : vector<16x8x32xf32>
    %83 = vector.shape_cast %82 : vector<16x8x32xf32> to vector<2x8x8x32xf32>
    %c0_54 = arith.constant 0 : index
    %c0_55 = arith.constant 0 : index
    %84 = vector.load %arg3[%c0_54, %c0_55] : memref<1x32xf32, #tpu.memory_space<vmem>>, vector<1x32xf32>
    %85 = vector.shape_cast %84 : vector<1x32xf32> to vector<1x1x1x32xf32>
    %86 = vector.broadcast %85 : vector<1x1x1x32xf32> to vector<2x8x8x32xf32>
    %87 = arith.addf %83, %86 : vector<2x8x8x32xf32>
    %cst = arith.constant 0.000000e+00 : f32
    %88 = vector.broadcast %cst : f32 to vector<2x8x8x32xf32>
    %89 = arith.maximumf %87, %88 : vector<2x8x8x32xf32>
    %cst_56 = arith.constant 0.000000e+00 : f32
    %90 = vector.broadcast %cst_56 : f32 to vector<2x1x10x32xf32>
    %c0_57 = arith.constant 0 : index
    %c0_58 = arith.constant 0 : index
    %c0_59 = arith.constant 0 : index
    %c0_60 = arith.constant 0 : index
    %91 = vector.load %arg11[%c0_57, %c0_58, %c0_59, %c0_60] : memref<2x10x10x32xf32, #tpu.memory_space<vmem>>, vector<2x1x10x32xf32>
    tpu.vector_store %arg11[%c0_57, %c0_58, %c0_59, %c0_60], %90 {strides = array<i32>} : memref<2x10x10x32xf32, #tpu.memory_space<vmem>>, vector<2x1x10x32xf32>,
    %c0_61 = arith.constant 0 : index
    %c9 = arith.constant 9 : index
    %c0_62 = arith.constant 0 : index
    %c0_63 = arith.constant 0 : index
    %92 = vector.load %arg11[%c0_61, %c9, %c0_62, %c0_63] : memref<2x10x10x32xf32, #tpu.memory_space<vmem>>, vector<2x1x10x32xf32>
    tpu.vector_store %arg11[%c0_61, %c9, %c0_62, %c0_63], %90 {strides = array<i32>} : memref<2x10x10x32xf32, #tpu.memory_space<vmem>>, vector<2x1x10x32xf32>,
    %cst_64 = arith.constant 0.000000e+00 : f32
    %93 = vector.broadcast %cst_64 : f32 to vector<2x10x1x32xf32>
    %c0_65 = arith.constant 0 : index
    %c0_66 = arith.constant 0 : index
    %c0_67 = arith.constant 0 : index
    %c0_68 = arith.constant 0 : index
    %94 = vector.load %arg11[%c0_65, %c0_66, %c0_67, %c0_68] : memref<2x10x10x32xf32, #tpu.memory_space<vmem>>, vector<2x10x1x32xf32>
    tpu.vector_store %arg11[%c0_65, %c0_66, %c0_67, %c0_68], %93 {strides = array<i32>} : memref<2x10x10x32xf32, #tpu.memory_space<vmem>>, vector<2x10x1x32xf32>,
    %c0_69 = arith.constant 0 : index
    %c0_70 = arith.constant 0 : index
    %c9_71 = arith.constant 9 : index
    %c0_72 = arith.constant 0 : index
    %95 = vector.load %arg11[%c0_69, %c0_70, %c9_71, %c0_72] : memref<2x10x10x32xf32, #tpu.memory_space<vmem>>, vector<2x10x1x32xf32>
    tpu.vector_store %arg11[%c0_69, %c0_70, %c9_71, %c0_72], %93 {strides = array<i32>} : memref<2x10x10x32xf32, #tpu.memory_space<vmem>>, vector<2x10x1x32xf32>,
    %c0_73 = arith.constant 0 : index
    %c1_74 = arith.constant 1 : index
    %c1_75 = arith.constant 1 : index
    %c0_76 = arith.constant 0 : index
    %96 = vector.load %arg11[%c0_73, %c1_74, %c1_75, %c0_76] : memref<2x10x10x32xf32, #tpu.memory_space<vmem>>, vector<2x8x8x32xf32>
    tpu.vector_store %arg11[%c0_73, %c1_74, %c1_75, %c0_76], %89 {strides = array<i32>} : memref<2x10x10x32xf32, #tpu.memory_space<vmem>>, vector<2x8x8x32xf32>,
    %c0_77 = arith.constant 0 : index
    %c0_78 = arith.constant 0 : index
    %c0_79 = arith.constant 0 : index
    %c0_80 = arith.constant 0 : index
    %97 = vector.load %arg11[%c0_77, %c0_78, %c0_79, %c0_80] : memref<2x10x10x32xf32, #tpu.memory_space<vmem>>, vector<2x8x8x32xf32>
    %98 = vector.shape_cast %97 : vector<2x8x8x32xf32> to vector<128x32xf32>
    %c0_81 = arith.constant 0 : index
    %c0_82 = arith.constant 0 : index
    %c0_83 = arith.constant 0 : index
    %99 = vector.load %arg4[%c0_81, %c0_82, %c0_83] : memref<9x32x32xf32, #tpu.memory_space<vmem>>, vector<1x32x32xf32>
    %100 = vector.shape_cast %99 : vector<1x32x32xf32> to vector<32x32xf32>
    %cst_84 = arith.constant dense<0.000000e+00> : vector<128x32xf32>
    %101 = tpu.matmul %98, %100, %cst_84 {dimension_numbers = #tpu.dot_dimension_numbers<[1], [0], [0], [1], [0, 0, 1, 1], [], []>} : vector<128x32xf32>, vector<32x32xf32>, vector<128x32xf32> -> vector<128x32xf32>
    %c0_85 = arith.constant 0 : index
    %c0_86 = arith.constant 0 : index
    %c1_87 = arith.constant 1 : index
    %c0_88 = arith.constant 0 : index
    %102 = vector.load %arg11[%c0_85, %c0_86, %c1_87, %c0_88] : memref<2x10x10x32xf32, #tpu.memory_space<vmem>>, vector<2x8x8x32xf32>
    %103 = vector.shape_cast %102 : vector<2x8x8x32xf32> to vector<128x32xf32>
    %c1_89 = arith.constant 1 : index
    %c0_90 = arith.constant 0 : index
    %c0_91 = arith.constant 0 : index
    %104 = vector.load %arg4[%c1_89, %c0_90, %c0_91] : memref<9x32x32xf32, #tpu.memory_space<vmem>>, vector<1x32x32xf32>
    %105 = vector.shape_cast %104 : vector<1x32x32xf32> to vector<32x32xf32>
    %cst_92 = arith.constant dense<0.000000e+00> : vector<128x32xf32>
    %106 = tpu.matmul %103, %105, %cst_92 {dimension_numbers = #tpu.dot_dimension_numbers<[1], [0], [0], [1], [0, 0, 1, 1], [], []>} : vector<128x32xf32>, vector<32x32xf32>, vector<128x32xf32> -> vector<128x32xf32>
    %107 = arith.addf %101, %106 : vector<128x32xf32>
    %c0_93 = arith.constant 0 : index
    %c0_94 = arith.constant 0 : index
    %c2_95 = arith.constant 2 : index
    %c0_96 = arith.constant 0 : index
    %108 = vector.load %arg11[%c0_93, %c0_94, %c2_95, %c0_96] : memref<2x10x10x32xf32, #tpu.memory_space<vmem>>, vector<2x8x8x32xf32>
    %109 = vector.shape_cast %108 : vector<2x8x8x32xf32> to vector<128x32xf32>
    %c2_97 = arith.constant 2 : index
    %c0_98 = arith.constant 0 : index
    %c0_99 = arith.constant 0 : index
    %110 = vector.load %arg4[%c2_97, %c0_98, %c0_99] : memref<9x32x32xf32, #tpu.memory_space<vmem>>, vector<1x32x32xf32>
    %111 = vector.shape_cast %110 : vector<1x32x32xf32> to vector<32x32xf32>
    %cst_100 = arith.constant dense<0.000000e+00> : vector<128x32xf32>
    %112 = tpu.matmul %109, %111, %cst_100 {dimension_numbers = #tpu.dot_dimension_numbers<[1], [0], [0], [1], [0, 0, 1, 1], [], []>} : vector<128x32xf32>, vector<32x32xf32>, vector<128x32xf32> -> vector<128x32xf32>
    %113 = arith.addf %107, %112 : vector<128x32xf32>
    %c0_101 = arith.constant 0 : index
    %c1_102 = arith.constant 1 : index
    %c0_103 = arith.constant 0 : index
    %c0_104 = arith.constant 0 : index
    %114 = vector.load %arg11[%c0_101, %c1_102, %c0_103, %c0_104] : memref<2x10x10x32xf32, #tpu.memory_space<vmem>>, vector<2x8x8x32xf32>
    %115 = vector.shape_cast %114 : vector<2x8x8x32xf32> to vector<128x32xf32>
    %c3_105 = arith.constant 3 : index
    %c0_106 = arith.constant 0 : index
    %c0_107 = arith.constant 0 : index
    %116 = vector.load %arg4[%c3_105, %c0_106, %c0_107] : memref<9x32x32xf32, #tpu.memory_space<vmem>>, vector<1x32x32xf32>
    %117 = vector.shape_cast %116 : vector<1x32x32xf32> to vector<32x32xf32>
    %cst_108 = arith.constant dense<0.000000e+00> : vector<128x32xf32>
    %118 = tpu.matmul %115, %117, %cst_108 {dimension_numbers = #tpu.dot_dimension_numbers<[1], [0], [0], [1], [0, 0, 1, 1], [], []>} : vector<128x32xf32>, vector<32x32xf32>, vector<128x32xf32> -> vector<128x32xf32>
    %119 = arith.addf %113, %118 : vector<128x32xf32>
    %c0_109 = arith.constant 0 : index
    %c1_110 = arith.constant 1 : index
    %c1_111 = arith.constant 1 : index
    %c0_112 = arith.constant 0 : index
    %120 = vector.load %arg11[%c0_109, %c1_110, %c1_111, %c0_112] : memref<2x10x10x32xf32, #tpu.memory_space<vmem>>, vector<2x8x8x32xf32>
    %121 = vector.shape_cast %120 : vector<2x8x8x32xf32> to vector<128x32xf32>
    %c4_113 = arith.constant 4 : index
    %c0_114 = arith.constant 0 : index
    %c0_115 = arith.constant 0 : index
    %122 = vector.load %arg4[%c4_113, %c0_114, %c0_115] : memref<9x32x32xf32, #tpu.memory_space<vmem>>, vector<1x32x32xf32>
    %123 = vector.shape_cast %122 : vector<1x32x32xf32> to vector<32x32xf32>
    %cst_116 = arith.constant dense<0.000000e+00> : vector<128x32xf32>
    %124 = tpu.matmul %121, %123, %cst_116 {dimension_numbers = #tpu.dot_dimension_numbers<[1], [0], [0], [1], [0, 0, 1, 1], [], []>} : vector<128x32xf32>, vector<32x32xf32>, vector<128x32xf32> -> vector<128x32xf32>
    %125 = arith.addf %119, %124 : vector<128x32xf32>
    %c0_117 = arith.constant 0 : index
    %c1_118 = arith.constant 1 : index
    %c2_119 = arith.constant 2 : index
    %c0_120 = arith.constant 0 : index
    %126 = vector.load %arg11[%c0_117, %c1_118, %c2_119, %c0_120] : memref<2x10x10x32xf32, #tpu.memory_space<vmem>>, vector<2x8x8x32xf32>
    %127 = vector.shape_cast %126 : vector<2x8x8x32xf32> to vector<128x32xf32>
    %c5_121 = arith.constant 5 : index
    %c0_122 = arith.constant 0 : index
    %c0_123 = arith.constant 0 : index
    %128 = vector.load %arg4[%c5_121, %c0_122, %c0_123] : memref<9x32x32xf32, #tpu.memory_space<vmem>>, vector<1x32x32xf32>
    %129 = vector.shape_cast %128 : vector<1x32x32xf32> to vector<32x32xf32>
    %cst_124 = arith.constant dense<0.000000e+00> : vector<128x32xf32>
    %130 = tpu.matmul %127, %129, %cst_124 {dimension_numbers = #tpu.dot_dimension_numbers<[1], [0], [0], [1], [0, 0, 1, 1], [], []>} : vector<128x32xf32>, vector<32x32xf32>, vector<128x32xf32> -> vector<128x32xf32>
    %131 = arith.addf %125, %130 : vector<128x32xf32>
    %c0_125 = arith.constant 0 : index
    %c2_126 = arith.constant 2 : index
    %c0_127 = arith.constant 0 : index
    %c0_128 = arith.constant 0 : index
    %132 = vector.load %arg11[%c0_125, %c2_126, %c0_127, %c0_128] : memref<2x10x10x32xf32, #tpu.memory_space<vmem>>, vector<2x8x8x32xf32>
    %133 = vector.shape_cast %132 : vector<2x8x8x32xf32> to vector<128x32xf32>
    %c6_129 = arith.constant 6 : index
    %c0_130 = arith.constant 0 : index
    %c0_131 = arith.constant 0 : index
    %134 = vector.load %arg4[%c6_129, %c0_130, %c0_131] : memref<9x32x32xf32, #tpu.memory_space<vmem>>, vector<1x32x32xf32>
    %135 = vector.shape_cast %134 : vector<1x32x32xf32> to vector<32x32xf32>
    %cst_132 = arith.constant dense<0.000000e+00> : vector<128x32xf32>
    %136 = tpu.matmul %133, %135, %cst_132 {dimension_numbers = #tpu.dot_dimension_numbers<[1], [0], [0], [1], [0, 0, 1, 1], [], []>} : vector<128x32xf32>, vector<32x32xf32>, vector<128x32xf32> -> vector<128x32xf32>
    %137 = arith.addf %131, %136 : vector<128x32xf32>
    %c0_133 = arith.constant 0 : index
    %c2_134 = arith.constant 2 : index
    %c1_135 = arith.constant 1 : index
    %c0_136 = arith.constant 0 : index
    %138 = vector.load %arg11[%c0_133, %c2_134, %c1_135, %c0_136] : memref<2x10x10x32xf32, #tpu.memory_space<vmem>>, vector<2x8x8x32xf32>
    %139 = vector.shape_cast %138 : vector<2x8x8x32xf32> to vector<128x32xf32>
    %c7_137 = arith.constant 7 : index
    %c0_138 = arith.constant 0 : index
    %c0_139 = arith.constant 0 : index
    %140 = vector.load %arg4[%c7_137, %c0_138, %c0_139] : memref<9x32x32xf32, #tpu.memory_space<vmem>>, vector<1x32x32xf32>
    %141 = vector.shape_cast %140 : vector<1x32x32xf32> to vector<32x32xf32>
    %cst_140 = arith.constant dense<0.000000e+00> : vector<128x32xf32>
    %142 = tpu.matmul %139, %141, %cst_140 {dimension_numbers = #tpu.dot_dimension_numbers<[1], [0], [0], [1], [0, 0, 1, 1], [], []>} : vector<128x32xf32>, vector<32x32xf32>, vector<128x32xf32> -> vector<128x32xf32>
    %143 = arith.addf %137, %142 : vector<128x32xf32>
    %c0_141 = arith.constant 0 : index
    %c2_142 = arith.constant 2 : index
    %c2_143 = arith.constant 2 : index
    %c0_144 = arith.constant 0 : index
    %144 = vector.load %arg11[%c0_141, %c2_142, %c2_143, %c0_144] : memref<2x10x10x32xf32, #tpu.memory_space<vmem>>, vector<2x8x8x32xf32>
    %145 = vector.shape_cast %144 : vector<2x8x8x32xf32> to vector<128x32xf32>
    %c8_145 = arith.constant 8 : index
    %c0_146 = arith.constant 0 : index
    %c0_147 = arith.constant 0 : index
    %146 = vector.load %arg4[%c8_145, %c0_146, %c0_147] : memref<9x32x32xf32, #tpu.memory_space<vmem>>, vector<1x32x32xf32>
    %147 = vector.shape_cast %146 : vector<1x32x32xf32> to vector<32x32xf32>
    %cst_148 = arith.constant dense<0.000000e+00> : vector<128x32xf32>
    %148 = tpu.matmul %145, %147, %cst_148 {dimension_numbers = #tpu.dot_dimension_numbers<[1], [0], [0], [1], [0, 0, 1, 1], [], []>} : vector<128x32xf32>, vector<32x32xf32>, vector<128x32xf32> -> vector<128x32xf32>
    %149 = arith.addf %143, %148 : vector<128x32xf32>
    %150 = vector.shape_cast %149 : vector<128x32xf32> to vector<8x2x8x32xf32>
    %151 = vector.extract_strided_slice %150 {offsets = [0, 0, 0, 0], sizes = [8, 1, 8, 32], strides = [1, 1, 1, 1]} : vector<8x2x8x32xf32> to vector<8x1x8x32xf32>
    %152 = vector.shape_cast %151 : vector<8x1x8x32xf32> to vector<8x8x32xf32>
    %153 = vector.extract_strided_slice %150 {offsets = [0, 1, 0, 0], sizes = [8, 1, 8, 32], strides = [1, 1, 1, 1]} : vector<8x2x8x32xf32> to vector<8x1x8x32xf32>
    %154 = vector.shape_cast %153 : vector<8x1x8x32xf32> to vector<8x8x32xf32>
    %155 = arith.maximumf %152, %154 : vector<8x8x32xf32>
    %156 = vector.shape_cast %155 : vector<8x8x32xf32> to vector<8x4x2x32xf32>
    %157 = vector.extract_strided_slice %156 {offsets = [0, 0, 0, 0], sizes = [8, 4, 1, 32], strides = [1, 1, 1, 1]} : vector<8x4x2x32xf32> to vector<8x4x1x32xf32>
    %158 = vector.shape_cast %157 : vector<8x4x1x32xf32> to vector<8x4x32xf32>
    %159 = vector.extract_strided_slice %156 {offsets = [0, 0, 1, 0], sizes = [8, 4, 1, 32], strides = [1, 1, 1, 1]} : vector<8x4x2x32xf32> to vector<8x4x1x32xf32>
    %160 = vector.shape_cast %159 : vector<8x4x1x32xf32> to vector<8x4x32xf32>
    %161 = arith.maximumf %158, %160 : vector<8x4x32xf32>
    %162 = vector.shape_cast %161 : vector<8x4x32xf32> to vector<2x4x4x32xf32>
    %c0_149 = arith.constant 0 : index
    %c0_150 = arith.constant 0 : index
    %163 = vector.load %arg5[%c0_149, %c0_150] : memref<1x32xf32, #tpu.memory_space<vmem>>, vector<1x32xf32>
    %164 = vector.shape_cast %163 : vector<1x32xf32> to vector<1x1x1x32xf32>
    %165 = vector.broadcast %164 : vector<1x1x1x32xf32> to vector<2x4x4x32xf32>
    %166 = arith.addf %162, %165 : vector<2x4x4x32xf32>
    %cst_151 = arith.constant 0.000000e+00 : f32
    %167 = vector.broadcast %cst_151 : f32 to vector<2x4x4x32xf32>
    %168 = arith.maximumf %166, %167 : vector<2x4x4x32xf32>
    %cst_152 = arith.constant 0.000000e+00 : f32
    %169 = vector.broadcast %cst_152 : f32 to vector<2x1x6x32xf32>
    %c0_153 = arith.constant 0 : index
    %c0_154 = arith.constant 0 : index
    %c0_155 = arith.constant 0 : index
    %c0_156 = arith.constant 0 : index
    %170 = vector.load %arg12[%c0_153, %c0_154, %c0_155, %c0_156] : memref<2x6x6x32xf32, #tpu.memory_space<vmem>>, vector<2x1x6x32xf32>
    tpu.vector_store %arg12[%c0_153, %c0_154, %c0_155, %c0_156], %169 {strides = array<i32>} : memref<2x6x6x32xf32, #tpu.memory_space<vmem>>, vector<2x1x6x32xf32>,
    %c0_157 = arith.constant 0 : index
    %c5_158 = arith.constant 5 : index
    %c0_159 = arith.constant 0 : index
    %c0_160 = arith.constant 0 : index
    %171 = vector.load %arg12[%c0_157, %c5_158, %c0_159, %c0_160] : memref<2x6x6x32xf32, #tpu.memory_space<vmem>>, vector<2x1x6x32xf32>
    tpu.vector_store %arg12[%c0_157, %c5_158, %c0_159, %c0_160], %169 {strides = array<i32>} : memref<2x6x6x32xf32, #tpu.memory_space<vmem>>, vector<2x1x6x32xf32>,
    %cst_161 = arith.constant 0.000000e+00 : f32
    %172 = vector.broadcast %cst_161 : f32 to vector<2x6x1x32xf32>
    %c0_162 = arith.constant 0 : index
    %c0_163 = arith.constant 0 : index
    %c0_164 = arith.constant 0 : index
    %c0_165 = arith.constant 0 : index
    %173 = vector.load %arg12[%c0_162, %c0_163, %c0_164, %c0_165] : memref<2x6x6x32xf32, #tpu.memory_space<vmem>>, vector<2x6x1x32xf32>
    tpu.vector_store %arg12[%c0_162, %c0_163, %c0_164, %c0_165], %172 {strides = array<i32>} : memref<2x6x6x32xf32, #tpu.memory_space<vmem>>, vector<2x6x1x32xf32>,
    %c0_166 = arith.constant 0 : index
    %c0_167 = arith.constant 0 : index
    %c5_168 = arith.constant 5 : index
    %c0_169 = arith.constant 0 : index
    %174 = vector.load %arg12[%c0_166, %c0_167, %c5_168, %c0_169] : memref<2x6x6x32xf32, #tpu.memory_space<vmem>>, vector<2x6x1x32xf32>
    tpu.vector_store %arg12[%c0_166, %c0_167, %c5_168, %c0_169], %172 {strides = array<i32>} : memref<2x6x6x32xf32, #tpu.memory_space<vmem>>, vector<2x6x1x32xf32>,
    %c0_170 = arith.constant 0 : index
    %c1_171 = arith.constant 1 : index
    %c1_172 = arith.constant 1 : index
    %c0_173 = arith.constant 0 : index
    %175 = vector.load %arg12[%c0_170, %c1_171, %c1_172, %c0_173] : memref<2x6x6x32xf32, #tpu.memory_space<vmem>>, vector<2x4x4x32xf32>
    tpu.vector_store %arg12[%c0_170, %c1_171, %c1_172, %c0_173], %168 {strides = array<i32>} : memref<2x6x6x32xf32, #tpu.memory_space<vmem>>, vector<2x4x4x32xf32>,
    %c0_174 = arith.constant 0 : index
    %c0_175 = arith.constant 0 : index
    %c0_176 = arith.constant 0 : index
    %c0_177 = arith.constant 0 : index
    %176 = vector.load %arg12[%c0_174, %c0_175, %c0_176, %c0_177] : memref<2x6x6x32xf32, #tpu.memory_space<vmem>>, vector<2x4x4x32xf32>
    %177 = vector.shape_cast %176 : vector<2x4x4x32xf32> to vector<32x32xf32>
    %c0_178 = arith.constant 0 : index
    %c0_179 = arith.constant 0 : index
    %c0_180 = arith.constant 0 : index
    %178 = vector.load %arg6[%c0_178, %c0_179, %c0_180] : memref<9x32x32xf32, #tpu.memory_space<vmem>>, vector<1x32x32xf32>
    %179 = vector.shape_cast %178 : vector<1x32x32xf32> to vector<32x32xf32>
    %cst_181 = arith.constant dense<0.000000e+00> : vector<32x32xf32>
    %180 = tpu.matmul %177, %179, %cst_181 {dimension_numbers = #tpu.dot_dimension_numbers<[1], [0], [0], [1], [0, 0, 1, 1], [], []>} : vector<32x32xf32>, vector<32x32xf32>, vector<32x32xf32> -> vector<32x32xf32>
    %c0_182 = arith.constant 0 : index
    %c0_183 = arith.constant 0 : index
    %c1_184 = arith.constant 1 : index
    %c0_185 = arith.constant 0 : index
    %181 = vector.load %arg12[%c0_182, %c0_183, %c1_184, %c0_185] : memref<2x6x6x32xf32, #tpu.memory_space<vmem>>, vector<2x4x4x32xf32>
    %182 = vector.shape_cast %181 : vector<2x4x4x32xf32> to vector<32x32xf32>
    %c1_186 = arith.constant 1 : index
    %c0_187 = arith.constant 0 : index
    %c0_188 = arith.constant 0 : index
    %183 = vector.load %arg6[%c1_186, %c0_187, %c0_188] : memref<9x32x32xf32, #tpu.memory_space<vmem>>, vector<1x32x32xf32>
    %184 = vector.shape_cast %183 : vector<1x32x32xf32> to vector<32x32xf32>
    %cst_189 = arith.constant dense<0.000000e+00> : vector<32x32xf32>
    %185 = tpu.matmul %182, %184, %cst_189 {dimension_numbers = #tpu.dot_dimension_numbers<[1], [0], [0], [1], [0, 0, 1, 1], [], []>} : vector<32x32xf32>, vector<32x32xf32>, vector<32x32xf32> -> vector<32x32xf32>
    %186 = arith.addf %180, %185 : vector<32x32xf32>
    %c0_190 = arith.constant 0 : index
    %c0_191 = arith.constant 0 : index
    %c2_192 = arith.constant 2 : index
    %c0_193 = arith.constant 0 : index
    %187 = vector.load %arg12[%c0_190, %c0_191, %c2_192, %c0_193] : memref<2x6x6x32xf32, #tpu.memory_space<vmem>>, vector<2x4x4x32xf32>
    %188 = vector.shape_cast %187 : vector<2x4x4x32xf32> to vector<32x32xf32>
    %c2_194 = arith.constant 2 : index
    %c0_195 = arith.constant 0 : index
    %c0_196 = arith.constant 0 : index
    %189 = vector.load %arg6[%c2_194, %c0_195, %c0_196] : memref<9x32x32xf32, #tpu.memory_space<vmem>>, vector<1x32x32xf32>
    %190 = vector.shape_cast %189 : vector<1x32x32xf32> to vector<32x32xf32>
    %cst_197 = arith.constant dense<0.000000e+00> : vector<32x32xf32>
    %191 = tpu.matmul %188, %190, %cst_197 {dimension_numbers = #tpu.dot_dimension_numbers<[1], [0], [0], [1], [0, 0, 1, 1], [], []>} : vector<32x32xf32>, vector<32x32xf32>, vector<32x32xf32> -> vector<32x32xf32>
    %192 = arith.addf %186, %191 : vector<32x32xf32>
    %c0_198 = arith.constant 0 : index
    %c1_199 = arith.constant 1 : index
    %c0_200 = arith.constant 0 : index
    %c0_201 = arith.constant 0 : index
    %193 = vector.load %arg12[%c0_198, %c1_199, %c0_200, %c0_201] : memref<2x6x6x32xf32, #tpu.memory_space<vmem>>, vector<2x4x4x32xf32>
    %194 = vector.shape_cast %193 : vector<2x4x4x32xf32> to vector<32x32xf32>
    %c3_202 = arith.constant 3 : index
    %c0_203 = arith.constant 0 : index
    %c0_204 = arith.constant 0 : index
    %195 = vector.load %arg6[%c3_202, %c0_203, %c0_204] : memref<9x32x32xf32, #tpu.memory_space<vmem>>, vector<1x32x32xf32>
    %196 = vector.shape_cast %195 : vector<1x32x32xf32> to vector<32x32xf32>
    %cst_205 = arith.constant dense<0.000000e+00> : vector<32x32xf32>
    %197 = tpu.matmul %194, %196, %cst_205 {dimension_numbers = #tpu.dot_dimension_numbers<[1], [0], [0], [1], [0, 0, 1, 1], [], []>} : vector<32x32xf32>, vector<32x32xf32>, vector<32x32xf32> -> vector<32x32xf32>
    %198 = arith.addf %192, %197 : vector<32x32xf32>
    %c0_206 = arith.constant 0 : index
    %c1_207 = arith.constant 1 : index
    %c1_208 = arith.constant 1 : index
    %c0_209 = arith.constant 0 : index
    %199 = vector.load %arg12[%c0_206, %c1_207, %c1_208, %c0_209] : memref<2x6x6x32xf32, #tpu.memory_space<vmem>>, vector<2x4x4x32xf32>
    %200 = vector.shape_cast %199 : vector<2x4x4x32xf32> to vector<32x32xf32>
    %c4_210 = arith.constant 4 : index
    %c0_211 = arith.constant 0 : index
    %c0_212 = arith.constant 0 : index
    %201 = vector.load %arg6[%c4_210, %c0_211, %c0_212] : memref<9x32x32xf32, #tpu.memory_space<vmem>>, vector<1x32x32xf32>
    %202 = vector.shape_cast %201 : vector<1x32x32xf32> to vector<32x32xf32>
    %cst_213 = arith.constant dense<0.000000e+00> : vector<32x32xf32>
    %203 = tpu.matmul %200, %202, %cst_213 {dimension_numbers = #tpu.dot_dimension_numbers<[1], [0], [0], [1], [0, 0, 1, 1], [], []>} : vector<32x32xf32>, vector<32x32xf32>, vector<32x32xf32> -> vector<32x32xf32>
    %204 = arith.addf %198, %203 : vector<32x32xf32>
    %c0_214 = arith.constant 0 : index
    %c1_215 = arith.constant 1 : index
    %c2_216 = arith.constant 2 : index
    %c0_217 = arith.constant 0 : index
    %205 = vector.load %arg12[%c0_214, %c1_215, %c2_216, %c0_217] : memref<2x6x6x32xf32, #tpu.memory_space<vmem>>, vector<2x4x4x32xf32>
    %206 = vector.shape_cast %205 : vector<2x4x4x32xf32> to vector<32x32xf32>
    %c5_218 = arith.constant 5 : index
    %c0_219 = arith.constant 0 : index
    %c0_220 = arith.constant 0 : index
    %207 = vector.load %arg6[%c5_218, %c0_219, %c0_220] : memref<9x32x32xf32, #tpu.memory_space<vmem>>, vector<1x32x32xf32>
    %208 = vector.shape_cast %207 : vector<1x32x32xf32> to vector<32x32xf32>
    %cst_221 = arith.constant dense<0.000000e+00> : vector<32x32xf32>
    %209 = tpu.matmul %206, %208, %cst_221 {dimension_numbers = #tpu.dot_dimension_numbers<[1], [0], [0], [1], [0, 0, 1, 1], [], []>} : vector<32x32xf32>, vector<32x32xf32>, vector<32x32xf32> -> vector<32x32xf32>
    %210 = arith.addf %204, %209 : vector<32x32xf32>
    %c0_222 = arith.constant 0 : index
    %c2_223 = arith.constant 2 : index
    %c0_224 = arith.constant 0 : index
    %c0_225 = arith.constant 0 : index
    %211 = vector.load %arg12[%c0_222, %c2_223, %c0_224, %c0_225] : memref<2x6x6x32xf32, #tpu.memory_space<vmem>>, vector<2x4x4x32xf32>
    %212 = vector.shape_cast %211 : vector<2x4x4x32xf32> to vector<32x32xf32>
    %c6_226 = arith.constant 6 : index
    %c0_227 = arith.constant 0 : index
    %c0_228 = arith.constant 0 : index
    %213 = vector.load %arg6[%c6_226, %c0_227, %c0_228] : memref<9x32x32xf32, #tpu.memory_space<vmem>>, vector<1x32x32xf32>
    %214 = vector.shape_cast %213 : vector<1x32x32xf32> to vector<32x32xf32>
    %cst_229 = arith.constant dense<0.000000e+00> : vector<32x32xf32>
    %215 = tpu.matmul %212, %214, %cst_229 {dimension_numbers = #tpu.dot_dimension_numbers<[1], [0], [0], [1], [0, 0, 1, 1], [], []>} : vector<32x32xf32>, vector<32x32xf32>, vector<32x32xf32> -> vector<32x32xf32>
    %216 = arith.addf %210, %215 : vector<32x32xf32>
    %c0_230 = arith.constant 0 : index
    %c2_231 = arith.constant 2 : index
    %c1_232 = arith.constant 1 : index
    %c0_233 = arith.constant 0 : index
    %217 = vector.load %arg12[%c0_230, %c2_231, %c1_232, %c0_233] : memref<2x6x6x32xf32, #tpu.memory_space<vmem>>, vector<2x4x4x32xf32>
    %218 = vector.shape_cast %217 : vector<2x4x4x32xf32> to vector<32x32xf32>
    %c7_234 = arith.constant 7 : index
    %c0_235 = arith.constant 0 : index
    %c0_236 = arith.constant 0 : index
    %219 = vector.load %arg6[%c7_234, %c0_235, %c0_236] : memref<9x32x32xf32, #tpu.memory_space<vmem>>, vector<1x32x32xf32>
    %220 = vector.shape_cast %219 : vector<1x32x32xf32> to vector<32x32xf32>
    %cst_237 = arith.constant dense<0.000000e+00> : vector<32x32xf32>
    %221 = tpu.matmul %218, %220, %cst_237 {dimension_numbers = #tpu.dot_dimension_numbers<[1], [0], [0], [1], [0, 0, 1, 1], [], []>} : vector<32x32xf32>, vector<32x32xf32>, vector<32x32xf32> -> vector<32x32xf32>
    %222 = arith.addf %216, %221 : vector<32x32xf32>
    %c0_238 = arith.constant 0 : index
    %c2_239 = arith.constant 2 : index
    %c2_240 = arith.constant 2 : index
    %c0_241 = arith.constant 0 : index
    %223 = vector.load %arg12[%c0_238, %c2_239, %c2_240, %c0_241] : memref<2x6x6x32xf32, #tpu.memory_space<vmem>>, vector<2x4x4x32xf32>
    %224 = vector.shape_cast %223 : vector<2x4x4x32xf32> to vector<32x32xf32>
    %c8_242 = arith.constant 8 : index
    %c0_243 = arith.constant 0 : index
    %c0_244 = arith.constant 0 : index
    %225 = vector.load %arg6[%c8_242, %c0_243, %c0_244] : memref<9x32x32xf32, #tpu.memory_space<vmem>>, vector<1x32x32xf32>
    %226 = vector.shape_cast %225 : vector<1x32x32xf32> to vector<32x32xf32>
    %cst_245 = arith.constant dense<0.000000e+00> : vector<32x32xf32>
    %227 = tpu.matmul %224, %226, %cst_245 {dimension_numbers = #tpu.dot_dimension_numbers<[1], [0], [0], [1], [0, 0, 1, 1], [], []>} : vector<32x32xf32>, vector<32x32xf32>, vector<32x32xf32> -> vector<32x32xf32>
    %228 = arith.addf %222, %227 : vector<32x32xf32>
    %229 = vector.shape_cast %228 : vector<32x32xf32> to vector<4x2x4x32xf32>
    %230 = vector.extract_strided_slice %229 {offsets = [0, 0, 0, 0], sizes = [4, 1, 4, 32], strides = [1, 1, 1, 1]} : vector<4x2x4x32xf32> to vector<4x1x4x32xf32>
    %231 = vector.shape_cast %230 : vector<4x1x4x32xf32> to vector<4x4x32xf32>
    %232 = vector.extract_strided_slice %229 {offsets = [0, 1, 0, 0], sizes = [4, 1, 4, 32], strides = [1, 1, 1, 1]} : vector<4x2x4x32xf32> to vector<4x1x4x32xf32>
    %233 = vector.shape_cast %232 : vector<4x1x4x32xf32> to vector<4x4x32xf32>
    %234 = arith.maximumf %231, %233 : vector<4x4x32xf32>
    %235 = vector.shape_cast %234 : vector<4x4x32xf32> to vector<4x2x2x32xf32>
    %236 = vector.extract_strided_slice %235 {offsets = [0, 0, 0, 0], sizes = [4, 2, 1, 32], strides = [1, 1, 1, 1]} : vector<4x2x2x32xf32> to vector<4x2x1x32xf32>
    %237 = vector.shape_cast %236 : vector<4x2x1x32xf32> to vector<4x2x32xf32>
    %238 = vector.extract_strided_slice %235 {offsets = [0, 0, 1, 0], sizes = [4, 2, 1, 32], strides = [1, 1, 1, 1]} : vector<4x2x2x32xf32> to vector<4x2x1x32xf32>
    %239 = vector.shape_cast %238 : vector<4x2x1x32xf32> to vector<4x2x32xf32>
    %240 = arith.maximumf %237, %239 : vector<4x2x32xf32>
    %241 = vector.shape_cast %240 : vector<4x2x32xf32> to vector<2x2x2x32xf32>
    %c0_246 = arith.constant 0 : index
    %c0_247 = arith.constant 0 : index
    %242 = vector.load %arg7[%c0_246, %c0_247] : memref<1x32xf32, #tpu.memory_space<vmem>>, vector<1x32xf32>
    %243 = vector.shape_cast %242 : vector<1x32xf32> to vector<1x1x1x32xf32>
    %244 = vector.broadcast %243 : vector<1x1x1x32xf32> to vector<2x2x2x32xf32>
    %245 = arith.addf %241, %244 : vector<2x2x2x32xf32>
    %cst_248 = arith.constant 0.000000e+00 : f32
    %246 = vector.broadcast %cst_248 : f32 to vector<2x2x2x32xf32>
    %247 = arith.maximumf %245, %246 : vector<2x2x2x32xf32>
    %cst_249 = arith.constant 0.000000e+00 : f32
    %248 = vector.broadcast %cst_249 : f32 to vector<2x1x4x32xf32>
    %c0_250 = arith.constant 0 : index
    %c0_251 = arith.constant 0 : index
    %c0_252 = arith.constant 0 : index
    %c0_253 = arith.constant 0 : index
    %249 = vector.load %arg13[%c0_250, %c0_251, %c0_252, %c0_253] : memref<2x4x4x32xf32, #tpu.memory_space<vmem>>, vector<2x1x4x32xf32>
    tpu.vector_store %arg13[%c0_250, %c0_251, %c0_252, %c0_253], %248 {strides = array<i32>} : memref<2x4x4x32xf32, #tpu.memory_space<vmem>>, vector<2x1x4x32xf32>,
    %c0_254 = arith.constant 0 : index
    %c3_255 = arith.constant 3 : index
    %c0_256 = arith.constant 0 : index
    %c0_257 = arith.constant 0 : index
    %250 = vector.load %arg13[%c0_254, %c3_255, %c0_256, %c0_257] : memref<2x4x4x32xf32, #tpu.memory_space<vmem>>, vector<2x1x4x32xf32>
    tpu.vector_store %arg13[%c0_254, %c3_255, %c0_256, %c0_257], %248 {strides = array<i32>} : memref<2x4x4x32xf32, #tpu.memory_space<vmem>>, vector<2x1x4x32xf32>,
    %cst_258 = arith.constant 0.000000e+00 : f32
    %251 = vector.broadcast %cst_258 : f32 to vector<2x4x1x32xf32>
    %c0_259 = arith.constant 0 : index
    %c0_260 = arith.constant 0 : index
    %c0_261 = arith.constant 0 : index
    %c0_262 = arith.constant 0 : index
    %252 = vector.load %arg13[%c0_259, %c0_260, %c0_261, %c0_262] : memref<2x4x4x32xf32, #tpu.memory_space<vmem>>, vector<2x4x1x32xf32>
    tpu.vector_store %arg13[%c0_259, %c0_260, %c0_261, %c0_262], %251 {strides = array<i32>} : memref<2x4x4x32xf32, #tpu.memory_space<vmem>>, vector<2x4x1x32xf32>,
    %c0_263 = arith.constant 0 : index
    %c0_264 = arith.constant 0 : index
    %c3_265 = arith.constant 3 : index
    %c0_266 = arith.constant 0 : index
    %253 = vector.load %arg13[%c0_263, %c0_264, %c3_265, %c0_266] : memref<2x4x4x32xf32, #tpu.memory_space<vmem>>, vector<2x4x1x32xf32>
    tpu.vector_store %arg13[%c0_263, %c0_264, %c3_265, %c0_266], %251 {strides = array<i32>} : memref<2x4x4x32xf32, #tpu.memory_space<vmem>>, vector<2x4x1x32xf32>,
    %c0_267 = arith.constant 0 : index
    %c1_268 = arith.constant 1 : index
    %c1_269 = arith.constant 1 : index
    %c0_270 = arith.constant 0 : index
    %254 = vector.load %arg13[%c0_267, %c1_268, %c1_269, %c0_270] : memref<2x4x4x32xf32, #tpu.memory_space<vmem>>, vector<2x2x2x32xf32>
    tpu.vector_store %arg13[%c0_267, %c1_268, %c1_269, %c0_270], %247 {strides = array<i32>} : memref<2x4x4x32xf32, #tpu.memory_space<vmem>>, vector<2x2x2x32xf32>,
    %c0_271 = arith.constant 0 : index
    %c0_272 = arith.constant 0 : index
    %c0_273 = arith.constant 0 : index
    %c0_274 = arith.constant 0 : index
    %255 = vector.load %arg13[%c0_271, %c0_272, %c0_273, %c0_274] : memref<2x4x4x32xf32, #tpu.memory_space<vmem>>, vector<2x2x2x32xf32>
    %256 = vector.shape_cast %255 : vector<2x2x2x32xf32> to vector<8x32xf32>
    %c0_275 = arith.constant 0 : index
    %c0_276 = arith.constant 0 : index
    %c0_277 = arith.constant 0 : index
    %257 = vector.load %arg8[%c0_275, %c0_276, %c0_277] : memref<9x32x64xf32, #tpu.memory_space<vmem>>, vector<1x32x64xf32>
    %258 = vector.shape_cast %257 : vector<1x32x64xf32> to vector<32x64xf32>
    %cst_278 = arith.constant dense<0.000000e+00> : vector<8x64xf32>
    %259 = tpu.matmul %256, %258, %cst_278 {dimension_numbers = #tpu.dot_dimension_numbers<[1], [0], [0], [1], [0, 0, 1, 1], [], []>} : vector<8x32xf32>, vector<32x64xf32>, vector<8x64xf32> -> vector<8x64xf32>
    %c0_279 = arith.constant 0 : index
    %c0_280 = arith.constant 0 : index
    %c1_281 = arith.constant 1 : index
    %c0_282 = arith.constant 0 : index
    %260 = vector.load %arg13[%c0_279, %c0_280, %c1_281, %c0_282] : memref<2x4x4x32xf32, #tpu.memory_space<vmem>>, vector<2x2x2x32xf32>
    %261 = vector.shape_cast %260 : vector<2x2x2x32xf32> to vector<8x32xf32>
    %c1_283 = arith.constant 1 : index
    %c0_284 = arith.constant 0 : index
    %c0_285 = arith.constant 0 : index
    %262 = vector.load %arg8[%c1_283, %c0_284, %c0_285] : memref<9x32x64xf32, #tpu.memory_space<vmem>>, vector<1x32x64xf32>
    %263 = vector.shape_cast %262 : vector<1x32x64xf32> to vector<32x64xf32>
    %cst_286 = arith.constant dense<0.000000e+00> : vector<8x64xf32>
    %264 = tpu.matmul %261, %263, %cst_286 {dimension_numbers = #tpu.dot_dimension_numbers<[1], [0], [0], [1], [0, 0, 1, 1], [], []>} : vector<8x32xf32>, vector<32x64xf32>, vector<8x64xf32> -> vector<8x64xf32>
    %265 = arith.addf %259, %264 : vector<8x64xf32>
    %c0_287 = arith.constant 0 : index
    %c0_288 = arith.constant 0 : index
    %c2_289 = arith.constant 2 : index
    %c0_290 = arith.constant 0 : index
    %266 = vector.load %arg13[%c0_287, %c0_288, %c2_289, %c0_290] : memref<2x4x4x32xf32, #tpu.memory_space<vmem>>, vector<2x2x2x32xf32>
    %267 = vector.shape_cast %266 : vector<2x2x2x32xf32> to vector<8x32xf32>
    %c2_291 = arith.constant 2 : index
    %c0_292 = arith.constant 0 : index
    %c0_293 = arith.constant 0 : index
    %268 = vector.load %arg8[%c2_291, %c0_292, %c0_293] : memref<9x32x64xf32, #tpu.memory_space<vmem>>, vector<1x32x64xf32>
    %269 = vector.shape_cast %268 : vector<1x32x64xf32> to vector<32x64xf32>
    %cst_294 = arith.constant dense<0.000000e+00> : vector<8x64xf32>
    %270 = tpu.matmul %267, %269, %cst_294 {dimension_numbers = #tpu.dot_dimension_numbers<[1], [0], [0], [1], [0, 0, 1, 1], [], []>} : vector<8x32xf32>, vector<32x64xf32>, vector<8x64xf32> -> vector<8x64xf32>
    %271 = arith.addf %265, %270 : vector<8x64xf32>
    %c0_295 = arith.constant 0 : index
    %c1_296 = arith.constant 1 : index
    %c0_297 = arith.constant 0 : index
    %c0_298 = arith.constant 0 : index
    %272 = vector.load %arg13[%c0_295, %c1_296, %c0_297, %c0_298] : memref<2x4x4x32xf32, #tpu.memory_space<vmem>>, vector<2x2x2x32xf32>
    %273 = vector.shape_cast %272 : vector<2x2x2x32xf32> to vector<8x32xf32>
    %c3_299 = arith.constant 3 : index
    %c0_300 = arith.constant 0 : index
    %c0_301 = arith.constant 0 : index
    %274 = vector.load %arg8[%c3_299, %c0_300, %c0_301] : memref<9x32x64xf32, #tpu.memory_space<vmem>>, vector<1x32x64xf32>
    %275 = vector.shape_cast %274 : vector<1x32x64xf32> to vector<32x64xf32>
    %cst_302 = arith.constant dense<0.000000e+00> : vector<8x64xf32>
    %276 = tpu.matmul %273, %275, %cst_302 {dimension_numbers = #tpu.dot_dimension_numbers<[1], [0], [0], [1], [0, 0, 1, 1], [], []>} : vector<8x32xf32>, vector<32x64xf32>, vector<8x64xf32> -> vector<8x64xf32>
    %277 = arith.addf %271, %276 : vector<8x64xf32>
    %c0_303 = arith.constant 0 : index
    %c1_304 = arith.constant 1 : index
    %c1_305 = arith.constant 1 : index
    %c0_306 = arith.constant 0 : index
    %278 = vector.load %arg13[%c0_303, %c1_304, %c1_305, %c0_306] : memref<2x4x4x32xf32, #tpu.memory_space<vmem>>, vector<2x2x2x32xf32>
    %279 = vector.shape_cast %278 : vector<2x2x2x32xf32> to vector<8x32xf32>
    %c4_307 = arith.constant 4 : index
    %c0_308 = arith.constant 0 : index
    %c0_309 = arith.constant 0 : index
    %280 = vector.load %arg8[%c4_307, %c0_308, %c0_309] : memref<9x32x64xf32, #tpu.memory_space<vmem>>, vector<1x32x64xf32>
    %281 = vector.shape_cast %280 : vector<1x32x64xf32> to vector<32x64xf32>
    %cst_310 = arith.constant dense<0.000000e+00> : vector<8x64xf32>
    %282 = tpu.matmul %279, %281, %cst_310 {dimension_numbers = #tpu.dot_dimension_numbers<[1], [0], [0], [1], [0, 0, 1, 1], [], []>} : vector<8x32xf32>, vector<32x64xf32>, vector<8x64xf32> -> vector<8x64xf32>
    %283 = arith.addf %277, %282 : vector<8x64xf32>
    %c0_311 = arith.constant 0 : index
    %c1_312 = arith.constant 1 : index
    %c2_313 = arith.constant 2 : index
    %c0_314 = arith.constant 0 : index
    %284 = vector.load %arg13[%c0_311, %c1_312, %c2_313, %c0_314] : memref<2x4x4x32xf32, #tpu.memory_space<vmem>>, vector<2x2x2x32xf32>
    %285 = vector.shape_cast %284 : vector<2x2x2x32xf32> to vector<8x32xf32>
    %c5_315 = arith.constant 5 : index
    %c0_316 = arith.constant 0 : index
    %c0_317 = arith.constant 0 : index
    %286 = vector.load %arg8[%c5_315, %c0_316, %c0_317] : memref<9x32x64xf32, #tpu.memory_space<vmem>>, vector<1x32x64xf32>
    %287 = vector.shape_cast %286 : vector<1x32x64xf32> to vector<32x64xf32>
    %cst_318 = arith.constant dense<0.000000e+00> : vector<8x64xf32>
    %288 = tpu.matmul %285, %287, %cst_318 {dimension_numbers = #tpu.dot_dimension_numbers<[1], [0], [0], [1], [0, 0, 1, 1], [], []>} : vector<8x32xf32>, vector<32x64xf32>, vector<8x64xf32> -> vector<8x64xf32>
    %289 = arith.addf %283, %288 : vector<8x64xf32>
    %c0_319 = arith.constant 0 : index
    %c2_320 = arith.constant 2 : index
    %c0_321 = arith.constant 0 : index
    %c0_322 = arith.constant 0 : index
    %290 = vector.load %arg13[%c0_319, %c2_320, %c0_321, %c0_322] : memref<2x4x4x32xf32, #tpu.memory_space<vmem>>, vector<2x2x2x32xf32>
    %291 = vector.shape_cast %290 : vector<2x2x2x32xf32> to vector<8x32xf32>
    %c6_323 = arith.constant 6 : index
    %c0_324 = arith.constant 0 : index
    %c0_325 = arith.constant 0 : index
    %292 = vector.load %arg8[%c6_323, %c0_324, %c0_325] : memref<9x32x64xf32, #tpu.memory_space<vmem>>, vector<1x32x64xf32>
    %293 = vector.shape_cast %292 : vector<1x32x64xf32> to vector<32x64xf32>
    %cst_326 = arith.constant dense<0.000000e+00> : vector<8x64xf32>
    %294 = tpu.matmul %291, %293, %cst_326 {dimension_numbers = #tpu.dot_dimension_numbers<[1], [0], [0], [1], [0, 0, 1, 1], [], []>} : vector<8x32xf32>, vector<32x64xf32>, vector<8x64xf32> -> vector<8x64xf32>
    %295 = arith.addf %289, %294 : vector<8x64xf32>
    %c0_327 = arith.constant 0 : index
    %c2_328 = arith.constant 2 : index
    %c1_329 = arith.constant 1 : index
    %c0_330 = arith.constant 0 : index
    %296 = vector.load %arg13[%c0_327, %c2_328, %c1_329, %c0_330] : memref<2x4x4x32xf32, #tpu.memory_space<vmem>>, vector<2x2x2x32xf32>
    %297 = vector.shape_cast %296 : vector<2x2x2x32xf32> to vector<8x32xf32>
    %c7_331 = arith.constant 7 : index
    %c0_332 = arith.constant 0 : index
    %c0_333 = arith.constant 0 : index
    %298 = vector.load %arg8[%c7_331, %c0_332, %c0_333] : memref<9x32x64xf32, #tpu.memory_space<vmem>>, vector<1x32x64xf32>
    %299 = vector.shape_cast %298 : vector<1x32x64xf32> to vector<32x64xf32>
    %cst_334 = arith.constant dense<0.000000e+00> : vector<8x64xf32>
    %300 = tpu.matmul %297, %299, %cst_334 {dimension_numbers = #tpu.dot_dimension_numbers<[1], [0], [0], [1], [0, 0, 1, 1], [], []>} : vector<8x32xf32>, vector<32x64xf32>, vector<8x64xf32> -> vector<8x64xf32>
    %301 = arith.addf %295, %300 : vector<8x64xf32>
    %c0_335 = arith.constant 0 : index
    %c2_336 = arith.constant 2 : index
    %c2_337 = arith.constant 2 : index
    %c0_338 = arith.constant 0 : index
    %302 = vector.load %arg13[%c0_335, %c2_336, %c2_337, %c0_338] : memref<2x4x4x32xf32, #tpu.memory_space<vmem>>, vector<2x2x2x32xf32>
    %303 = vector.shape_cast %302 : vector<2x2x2x32xf32> to vector<8x32xf32>
    %c8_339 = arith.constant 8 : index
    %c0_340 = arith.constant 0 : index
    %c0_341 = arith.constant 0 : index
    %304 = vector.load %arg8[%c8_339, %c0_340, %c0_341] : memref<9x32x64xf32, #tpu.memory_space<vmem>>, vector<1x32x64xf32>
    %305 = vector.shape_cast %304 : vector<1x32x64xf32> to vector<32x64xf32>
    %cst_342 = arith.constant dense<0.000000e+00> : vector<8x64xf32>
    %306 = tpu.matmul %303, %305, %cst_342 {dimension_numbers = #tpu.dot_dimension_numbers<[1], [0], [0], [1], [0, 0, 1, 1], [], []>} : vector<8x32xf32>, vector<32x64xf32>, vector<8x64xf32> -> vector<8x64xf32>
    %307 = arith.addf %301, %306 : vector<8x64xf32>
    %308 = vector.shape_cast %307 : vector<8x64xf32> to vector<2x4x64xf32>
    %cst_343 = arith.constant dense<0xFF800000> : vector<2x64xf32>
    %309 = vector.multi_reduction <maximumf>, %308, %cst_343 [1] : vector<2x4x64xf32> to vector<2x64xf32>
    %c0_344 = arith.constant 0 : index
    %c0_345 = arith.constant 0 : index
    %310 = vector.load %arg9[%c0_344, %c0_345] : memref<1x64xf32, #tpu.memory_space<vmem>>, vector<1x64xf32>
    %311 = vector.broadcast %310 : vector<1x64xf32> to vector<2x64xf32>
    %312 = arith.addf %309, %311 : vector<2x64xf32>
    %cst_346 = arith.constant 0.000000e+00 : f32
    %313 = vector.broadcast %cst_346 : f32 to vector<2x64xf32>
    %314 = arith.maximumf %312, %313 : vector<2x64xf32>
    %315 = vector.shape_cast %314 : vector<2x64xf32> to vector<2x1x64xf32>
    %c0_347 = arith.constant 0 : index
    %c0_348 = arith.constant 0 : index
    %c0_349 = arith.constant 0 : index
    %316 = vector.load %arg10[%c0_347, %c0_348, %c0_349] : memref<2x1x64xf32, #tpu.memory_space<vmem>>, vector<2x1x64xf32>
    tpu.vector_store %arg10[%c0_347, %c0_348, %c0_349], %315 {strides = array<i32>} : memref<2x1x64xf32, #tpu.memory_space<vmem>>, vector<2x1x64xf32>,
    return
  }
  func.func @transform_0(%arg0: i32) -> (i32, i32, i32, i32) {
    %c0_i32 = arith.constant 0 : i32
    %c0_i32_0 = arith.constant 0 : i32
    %c0_i32_1 = arith.constant 0 : i32
    %c0_i32_2 = arith.constant 0 : i32
    return %arg0, %c0_i32, %c0_i32_0, %c0_i32_1 : i32, i32, i32, i32
  }
  func.func @transform_1(%arg0: i32) -> (i32, i32, i32) {
    %c0_i32 = arith.constant 0 : i32
    %c0_i32_0 = arith.constant 0 : i32
    %c0_i32_1 = arith.constant 0 : i32
    %c0_i32_2 = arith.constant 0 : i32
    return %c0_i32, %c0_i32_0, %c0_i32_1 : i32, i32, i32
  }
  func.func @transform_2(%arg0: i32) -> (i32, i32) {
    %c0_i32 = arith.constant 0 : i32
    %c0_i32_0 = arith.constant 0 : i32
    %c0_i32_1 = arith.constant 0 : i32
    return %c0_i32, %c0_i32_0 : i32, i32
  }
  func.func @transform_3(%arg0: i32) -> (i32, i32, i32) {
    %c0_i32 = arith.constant 0 : i32
    %c0_i32_0 = arith.constant 0 : i32
    %c0_i32_1 = arith.constant 0 : i32
    %c0_i32_2 = arith.constant 0 : i32
    return %c0_i32, %c0_i32_0, %c0_i32_1 : i32, i32, i32
  }
  func.func @transform_4(%arg0: i32) -> (i32, i32) {
    %c0_i32 = arith.constant 0 : i32
    %c0_i32_0 = arith.constant 0 : i32
    %c0_i32_1 = arith.constant 0 : i32
    return %c0_i32, %c0_i32_0 : i32, i32
  }
  func.func @transform_5(%arg0: i32) -> (i32, i32, i32) {
    %c0_i32 = arith.constant 0 : i32
    %c0_i32_0 = arith.constant 0 : i32
    %c0_i32_1 = arith.constant 0 : i32
    %c0_i32_2 = arith.constant 0 : i32
    return %c0_i32, %c0_i32_0, %c0_i32_1 : i32, i32, i32
  }
  func.func @transform_6(%arg0: i32) -> (i32, i32) {
    %c0_i32 = arith.constant 0 : i32
    %c0_i32_0 = arith.constant 0 : i32
    %c0_i32_1 = arith.constant 0 : i32
    return %c0_i32, %c0_i32_0 : i32, i32
  }
  func.func @transform_7(%arg0: i32) -> (i32, i32, i32) {
    %c0_i32 = arith.constant 0 : i32
    %c0_i32_0 = arith.constant 0 : i32
    %c0_i32_1 = arith.constant 0 : i32
    %c0_i32_2 = arith.constant 0 : i32
    return %c0_i32, %c0_i32_0, %c0_i32_1 : i32, i32, i32
  }
  func.func @transform_8(%arg0: i32) -> (i32, i32) {
    %c0_i32 = arith.constant 0 : i32
    %c0_i32_0 = arith.constant 0 : i32
    %c0_i32_1 = arith.constant 0 : i32
    return %c0_i32, %c0_i32_0 : i32, i32
  }
  func.func @transform_9(%arg0: i32) -> (i32, i32, i32) {
    %c0_i32 = arith.constant 0 : i32
    %c0_i32_0 = arith.constant 0 : i32
    %c0_i32_1 = arith.constant 0 : i32
    return %arg0, %c0_i32, %c0_i32_0 : i32, i32, i32
  }
}

</mosaic_0001>

<bundles_post_ra>
// kernel: dnsmos_encoder.1
= control target key start
LH: loop header
LB: loop body
LE: loop exit
PB: predicated region body
PF: predicated region fallthrough
CT: control target
= control target key end

     0   :  { %v14156_v2 = vmov 0   ;;  %s20702_s0 = inlined_call_operand.vmem [shape: f32[2,18,18,1], index: 0, kind: input, shape index: {}]   ;;  %s20703_s1 = inlined_call_operand.vmem [shape: f32[9,1,32], index: 1, kind: input, shape index: {}]   ;;  %s20704_s2 = inlined_call_operand.vmem [shape: f32[1,32], index: 2, kind: input, shape index: {}]   ;;  %s20705_s3 = inlined_call_operand.vmem [shape: f32[9,32,32], index: 3, kind: input, shape index: {}]   ;;  %s20706_s4 = inlined_call_operand.vmem [shape: f32[1,32], index: 4, kind: input, shape index: {}]   ;;  %s20707_s5 = inlined_call_operand.vmem [shape: f32[9,32,32], index: 5, kind: input, shape index: {}]   ;;  %s20708_s6 = inlined_call_operand.vmem [shape: f32[1,32], index: 6, kind: input, shape index: {}]   ;;  %s20709_s7 = inlined_call_operand.vmem [shape: f32[9,32,64], index: 7, kind: input, shape index: {}]   ;;  %s20710_s8 = inlined_call_operand.vmem [shape: f32[1,64], index: 8, kind: input, shape index: {}]   ;;  %s20711_s9 = inlined_call_operand.hbm [shape: f32[2,1,64], index: 9, kind: output, shape index: {}]  }
   0x1   :  { %v35_v0 = vld [vmem:[%s20702_s0 + $0x18] sm:$0xff]  ;;  %v33_v1 = vld [vmem:[%s20702_s0] sm:$0xff]  ;;  %14015 = vset.pattern.permute.xlu1 %v14156_v2  ;;  %14014 = vset.pattern.permute.xlu0 %v14156_v2  ;;  %v34_v4 = vld [vmem:[%s20702_s0 + $0x8] sm:$0xff] }
   0x2   :  { %110 = vperm.xlu1 %14015, %v35_v0   ;;  %100 = vperm.xlu0 %14014, %v33_v1   ;;  %v36_v3 = vld [vmem:[%s20702_s0 + $0x20] sm:$0xff]  ;;  %v38_v5 = vld [vmem:[%s20702_s0 + $0x38] sm:$0xff]  ;;  %v37_v6 = vld [vmem:[%s20702_s0 + $0x30] sm:$0xff] }
   0x3   :  { %v40_v7 = vld [vmem:[%s20702_s0 + $0x50] sm:$0xff]  ;;  %v39_v8 = vld [vmem:[%s20702_s0 + $0x48] sm:$0xff]  ;;  %v41_v10 = vld [vmem:[%s20702_s0 + $0x60] sm:$0xff] }
   0x4   :  { %v42_v9 = vld [vmem:[%s20702_s0 + $0x68] sm:$0xff]  ;;  %v44_v11 = vld [vmem:[%s20702_s0 + $0x80] sm:$0xff]  ;;  %v43_v12 = vld [vmem:[%s20702_s0 + $0x78] sm:$0xff] }
   0x5   :  { %v46_v13 = vld [vmem:[%s20702_s0 + $0x98] sm:$0xff]  ;;  %v45_v14 = vld [vmem:[%s20702_s0 + $0x90] sm:$0xff] }
   0x6   :  { %115 = vperm.xlu1 %14015, %v36_v3   ;;  %105 = vperm.xlu0 %14014, %v34_v4  }
   0xa   :  { %125 = vperm.xlu1 %14015, %v38_v5   ;;  %120 = vperm.xlu0 %14014, %v37_v6  }
   0xe   :  { %135 = vperm.xlu1 %14015, %v40_v7   ;;  %130 = vperm.xlu0 %14014, %v39_v8  }
  0x12   :  { %145 = vperm.xlu1 %14015, %v42_v9   ;;  %140 = vperm.xlu0 %14014, %v41_v10  }
  0x16   :  { %155 = vperm.xlu1 %14015, %v44_v11   ;;  %150 = vperm.xlu0 %14014, %v43_v12  }
  0x1a   :  { %165 = vperm.xlu1 %14015, %v46_v13   ;;  %160 = vperm.xlu0 %14014, %v45_v14  }
  0x1b   :  { %14 = vsyncpa [#allocation6], 0  ;;  %v48_v15 = vld [vmem:[%s20702_s0 + $0xb0] sm:$0xff]  ;;  %v47_v16 = vld [vmem:[%s20702_s0 + $0xa8] sm:$0xff]  ;;  %vm6189_vm0 = vcmask 261120   ;;  %vm6191_vm1 = vcmask 254976  }
  0x1c   :  { %v50_v17 = vld [vmem:[%s20702_s0 + $0xc8] sm:$0xff]  ;;  %v49_v18 = vld [vmem:[%s20702_s0 + $0xc0] sm:$0xff]  ;;  %v51_v20 = vld [vmem:[%s20702_s0 + $0xd8] sm:$0xff]  ;;  %vm6200_vm2 = vcmask 253952   ;;  %vm6881_vm3 = vcmask 1041409   ;;  %vm6883_vm4 = vcmask 1042434  }
  0x1d   :  { %v52_v19 = vld [vmem:[%s20702_s0 + $0xe0] sm:$0xff]  ;;  %v54_v21 = vld [vmem:[%s20702_s0 + $0xf8] sm:$0xff]  ;;  %v53_v22 = vld [vmem:[%s20702_s0 + $0xf0] sm:$0xff]  ;;  %vm6885_vm5 = vcmask 1043459   ;;  %vm6887_vm6 = vcmask 1044484   ;;  %vm6889_vm7 = vcmask 1045509  }
  0x1e   :  { %175 = vperm.xlu1 %14015, %v48_v15   ;;  %170 = vperm.xlu0 %14014, %v47_v16   ;;  %v56_v23 = vld [vmem:[%s20702_s0 + $0x110] sm:$0xff]  ;;  %v55_v24 = vld [vmem:[%s20702_s0 + $0x108] sm:$0xff]  ;;  %v57_v26 = vld [vmem:[%s20702_s0 + $0x120] sm:$0xff]  ;;  %vm6891_vm8 = vcmask 1046534   ;;  %vm6893_vm9 = vcmask 1047559   ;;  %vm9690_vm10 = vcmask 257024  }
  0x1f   :  { %v58_v25 = vld [vmem:[%s20702_s0 + $0x128] sm:$0xff]  ;;  %v60_v27 = vld [vmem:[%s20702_s0 + $0x140] sm:$0xff]  ;;  %v59_v28 = vld [vmem:[%s20702_s0 + $0x138] sm:$0xff]  ;;  %vm9467_vm11 = vcmask 259072   ;;  %vm14160_vm12 = vmmov 0   ;;  %vm11915_vm13 = vcmask 519168  }
  0x20   :  { %v62_v29 = vld [vmem:[%s20702_s0 + $0x158] sm:$0xff]  ;;  %v61_v30 = vld [vmem:[%s20702_s0 + $0x150] sm:$0xff]  ;;  %v63_v32 = vld [vmem:[%s20702_s0 + $0x168] sm:$0xff]  ;;  %vm11941_vm14 = vcmask 516096   ;;  %s14161_s11 = smov [#allocation5]  }
  0x21   :  { %v64_v31 = vld [vmem:[%s20702_s0 + $0x170] sm:$0xff]  ;;  %v66_v33 = vld [vmem:[%s20702_s0 + $0x1b8] sm:$0xff]  ;;  %v67_v36 = vld [vmem:[%s20702_s0 + $0x1c8] sm:$0xff] }
  0x22   :  { %185 = vperm.xlu1 %14015, %v50_v17   ;;  %180 = vperm.xlu0 %14014, %v49_v18   ;;  %v65_v34 = vld [vmem:[%s20702_s0 + $0x1b0] sm:$0xff]  ;;  %v70_v37 = vld [vmem:[%s20702_s0 + $0x1e8] sm:$0xff]  ;;  %v69_v38 = vld [vmem:[%s20702_s0 + $0x1e0] sm:$0xff] }
  0x23   :  { %v68_v35 = vld [vmem:[%s20702_s0 + $0x1d0] sm:$0xff]  ;;  %v72_v39 = vld [vmem:[%s20702_s0 + $0x200] sm:$0xff]  ;;  %v71_v40 = vld [vmem:[%s20702_s0 + $0x1f8] sm:$0xff] }
  0x24   :  { %v74_v41 = vld [vmem:[%s20702_s0 + $0x218] sm:$0xff]  ;;  %v73_v42 = vld [vmem:[%s20702_s0 + $0x210] sm:$0xff]  ;;  %v75_v44 = vld [vmem:[%s20702_s0 + $0x228] sm:$0xff] }
  0x25   :  { %v76_v43 = vld [vmem:[%s20702_s0 + $0x230] sm:$0xff]  ;;  %v78_v45 = vld [vmem:[%s20702_s0 + $0x248] sm:$0xff]  ;;  %v77_v46 = vld [vmem:[%s20702_s0 + $0x240] sm:$0xff] }
  0x26   :  { %195 = vperm.xlu1 %14015, %v52_v19   ;;  %190 = vperm.xlu0 %14014, %v51_v20   ;;  %v80_v47 = vld [vmem:[%s20702_s0 + $0x260] sm:$0xff]  ;;  %v79_v48 = vld [vmem:[%s20702_s0 + $0x258] sm:$0xff]  ;;  %v81_v50 = vld [vmem:[%s20702_s0 + $0x270] sm:$0xff] }
  0x27   :  { %v82_v49 = vld [vmem:[%s20702_s0 + $0x278] sm:$0xff]  ;;  %v84_v51 = vld [vmem:[%s20702_s0 + $0x290] sm:$0xff]  ;;  %v83_v52 = vld [vmem:[%s20702_s0 + $0x288] sm:$0xff] }
  0x28   :  { %v86_v53 = vld [vmem:[%s20702_s0 + $0x2a8] sm:$0xff]  ;;  %v85_v54 = vld [vmem:[%s20702_s0 + $0x2a0] sm:$0xff]  ;;  %v87_v56 = vld [vmem:[%s20702_s0 + $0x2b8] sm:$0xff] }
  0x29   :  { %v88_v55 = vld [vmem:[%s20702_s0 + $0x2c0] sm:$0xff]  ;;  %v90_v57 = vld [vmem:[%s20702_s0 + $0x2d8] sm:$0xff]  ;;  %v89_v58 = vld [vmem:[%s20702_s0 + $0x2d0] sm:$0xff] }
  0x2a   :  { %205 = vperm.xlu1 %14015, %v54_v21   ;;  %200 = vperm.xlu0 %14014, %v53_v22   ;;  %v92_v59 = vld [vmem:[%s20702_s0 + $0x2f0] sm:$0xff]  ;;  %v91_v60 = vld [vmem:[%s20702_s0 + $0x2e8] sm:$0xff]  ;;  %v93_v62 = vld [vmem:[%s20702_s0 + $0x300] sm:$0xff] }
  0x2b   :  { %v94_v61 = vld [vmem:[%s20702_s0 + $0x308] sm:$0xff]  ;;  %v96_v63 = vld [vmem:[%s20702_s0 + $0x320] sm:$0xff]  ;;  %v95_v0 = vld [vmem:[%s20702_s0 + $0x318] sm:$0xff] }
  0x2c   :  { %v489_v1 = vld [vmem:[%s20702_s0 + $0x9] sm:$0xff]  ;;  %v488_v2 = vld [vmem:[%s20702_s0 + $0x1] sm:$0xff]  ;;  %v490_v6 = vld [vmem:[%s20702_s0 + $0x19] sm:$0xff] }
  0x2d   :  { %v491_v5 = vld [vmem:[%s20702_s0 + $0x21] sm:$0xff]  ;;  %v493_v9 = vld [vmem:[%s20702_s0 + $0x39] sm:$0xff]  ;;  %v492_v10 = vld [vmem:[%s20702_s0 + $0x31] sm:$0xff] }
  0x2e   :  { %215 = vperm.xlu1 %14015, %v56_v23   ;;  %210 = vperm.xlu0 %14014, %v55_v24   ;;  %v495_v13 = vld [vmem:[%s20702_s0 + $0x51] sm:$0xff]  ;;  %v494_v14 = vld [vmem:[%s20702_s0 + $0x49] sm:$0xff]  ;;  %v496_v18 = vld [vmem:[%s20702_s0 + $0x61] sm:$0xff] }
  0x2f   :  { %v497_v17 = vld [vmem:[%s20702_s0 + $0x69] sm:$0xff]  ;;  %v499_v21 = vld [vmem:[%s20702_s0 + $0x81] sm:$0xff]  ;;  %v498_v22 = vld [vmem:[%s20702_s0 + $0x79] sm:$0xff] }
  0x32   :  { %225 = vperm.xlu1 %14015, %v58_v25   ;;  %220 = vperm.xlu0 %14014, %v57_v26   ;;  %v501_v25 = vld [vmem:[%s20702_s0 + $0x99] sm:$0xff]  ;;  %v500_v26 = vld [vmem:[%s20702_s0 + $0x91] sm:$0xff] }
  0x36   :  { %235 = vperm.xlu1 %14015, %v60_v27   ;;  %230 = vperm.xlu0 %14014, %v59_v28  }
  0x3a   :  { %245 = vperm.xlu1 %14015, %v62_v29   ;;  %240 = vperm.xlu0 %14014, %v61_v30   ;;  %v503_v29 = vld [vmem:[%s20702_s0 + $0xb1] sm:$0xff]  ;;  %v502_v30 = vld [vmem:[%s20702_s0 + $0xa9] sm:$0xff] }
  0x3e   :  { %255 = vperm.xlu1 %14015, %v64_v31   ;;  %250 = vperm.xlu0 %14014, %v63_v32  }
  0x42   :  { %265 = vperm.xlu1 %14015, %v66_v33   ;;  %260 = vperm.xlu0 %14014, %v65_v34   ;;  %v505_v33 = vld [vmem:[%s20702_s0 + $0xc9] sm:$0xff]  ;;  %v504_v34 = vld [vmem:[%s20702_s0 + $0xc1] sm:$0xff] }
  0x46   :  { %275 = vperm.xlu1 %14015, %v68_v35   ;;  %270 = vperm.xlu0 %14014, %v67_v36  }
  0x4a   :  { %285 = vperm.xlu1 %14015, %v70_v37   ;;  %280 = vperm.xlu0 %14014, %v69_v38   ;;  %v507_v37 = vld [vmem:[%s20702_s0 + $0xe1] sm:$0xff]  ;;  %v506_v38 = vld [vmem:[%s20702_s0 + $0xd9] sm:$0xff] }
  0x4e   :  { %295 = vperm.xlu1 %14015, %v72_v39   ;;  %290 = vperm.xlu0 %14014, %v71_v40  }
  0x52   :  { %305 = vperm.xlu1 %14015, %v74_v41   ;;  %300 = vperm.xlu0 %14014, %v73_v42   ;;  %v509_v41 = vld [vmem:[%s20702_s0 + $0xf9] sm:$0xff]  ;;  %v508_v42 = vld [vmem:[%s20702_s0 + $0xf1] sm:$0xff] }
  0x56   :  { %315 = vperm.xlu1 %14015, %v76_v43   ;;  %310 = vperm.xlu0 %14014, %v75_v44  }
  0x5a   :  { %325 = vperm.xlu1 %14015, %v78_v45   ;;  %320 = vperm.xlu0 %14014, %v77_v46   ;;  %v511_v45 = vld [vmem:[%s20702_s0 + $0x111] sm:$0xff]  ;;  %v510_v46 = vld [vmem:[%s20702_s0 + $0x109] sm:$0xff] }
  0x5e   :  { %335 = vperm.xlu1 %14015, %v80_v47   ;;  %330 = vperm.xlu0 %14014, %v79_v48  }
  0x62   :  { %345 = vperm.xlu1 %14015, %v82_v49   ;;  %340 = vperm.xlu0 %14014, %v81_v50   ;;  %v513_v49 = vld [vmem:[%s20702_s0 + $0x129] sm:$0xff]  ;;  %v512_v50 = vld [vmem:[%s20702_s0 + $0x121] sm:$0xff] }
  0x66   :  { %355 = vperm.xlu1 %14015, %v84_v51   ;;  %350 = vperm.xlu0 %14014, %v83_v52  }
  0x6a   :  { %365 = vperm.xlu1 %14015, %v86_v53   ;;  %360 = vperm.xlu0 %14014, %v85_v54   ;;  %v515_v53 = vld [vmem:[%s20702_s0 + $0x141] sm:$0xff]  ;;  %v514_v54 = vld [vmem:[%s20702_s0 + $0x139] sm:$0xff] }
  0x6e   :  { %375 = vperm.xlu1 %14015, %v88_v55   ;;  %370 = vperm.xlu0 %14014, %v87_v56  }
  0x72   :  { %385 = vperm.xlu1 %14015, %v90_v57   ;;  %380 = vperm.xlu0 %14014, %v89_v58   ;;  %v517_v57 = vld [vmem:[%s20702_s0 + $0x159] sm:$0xff]  ;;  %v516_v58 = vld [vmem:[%s20702_s0 + $0x151] sm:$0xff] }
  0x76   :  { %395 = vperm.xlu1 %14015, %v92_v59   ;;  %390 = vperm.xlu0 %14014, %v91_v60  }
  0x7a   :  { %405 = vperm.xlu1 %14015, %v94_v61   ;;  %400 = vperm.xlu0 %14014, %v93_v62   ;;  %v519_v61 = vld [vmem:[%s20702_s0 + $0x171] sm:$0xff]  ;;  %v518_v62 = vld [vmem:[%s20702_s0 + $0x169] sm:$0xff] }
  0x7e   :  { %415 = vperm.xlu1 %14015, %v96_v63   ;;  %410 = vperm.xlu0 %14014, %v95_v0  }
  0x81   :  { %v14412_v3 = vpop.permute.xlu1 %110  ;;  %v14414_v4 = vpop.permute.xlu0 %100 }
  0x82   :  { %561 = vperm.xlu1 %14015, %v489_v1   ;;  %556 = vperm.xlu0 %14014, %v488_v2   ;;  %v521_v1 = vld [vmem:[%s20702_s0 + $0x1b9] sm:$0xff]  ;;  %v520_v2 = vld [vmem:[%s20702_s0 + $0x1b1] sm:$0xff] }
  0x85   :  { %v14422_v7 = vpop.permute.xlu1 %115  ;;  %v14424_v8 = vpop.permute.xlu0 %105 }
  0x86   :  { %571 = vperm.xlu1 %14015, %v491_v5   ;;  %566 = vperm.xlu0 %14014, %v490_v6  }
  0x89   :  { %v14432_v11 = vpop.permute.xlu1 %125  ;;  %v14434_v12 = vpop.permute.xlu0 %120 }
  0x8a   :  { %581 = vperm.xlu1 %14015, %v493_v9   ;;  %576 = vperm.xlu0 %14014, %v492_v10   ;;  %v523_v9 = vld [vmem:[%s20702_s0 + $0x1d1] sm:$0xff]  ;;  %v522_v10 = vld [vmem:[%s20702_s0 + $0x1c9] sm:$0xff] }
  0x8d   :  { %v14442_v15 = vpop.permute.xlu1 %135  ;;  %v14444_v16 = vpop.permute.xlu0 %130 }
  0x8e   :  { %591 = vperm.xlu1 %14015, %v495_v13   ;;  %586 = vperm.xlu0 %14014, %v494_v14  }
  0x91   :  { %v14452_v19 = vpop.permute.xlu1 %145  ;;  %v14454_v20 = vpop.permute.xlu0 %140 }
  0x92   :  { %601 = vperm.xlu1 %14015, %v497_v17   ;;  %596 = vperm.xlu0 %14014, %v496_v18   ;;  %v525_v17 = vld [vmem:[%s20702_s0 + $0x1e9] sm:$0xff]  ;;  %v524_v18 = vld [vmem:[%s20702_s0 + $0x1e1] sm:$0xff] }
  0x95   :  { %v14462_v23 = vpop.permute.xlu1 %155  ;;  %v14464_v24 = vpop.permute.xlu0 %150 }
  0x96   :  { %611 = vperm.xlu1 %14015, %v499_v21   ;;  %606 = vperm.xlu0 %14014, %v498_v22  }
  0x99   :  { %v14472_v27 = vpop.permute.xlu1 %165  ;;  %v14474_v28 = vpop.permute.xlu0 %160 }
  0x9a   :  { %621 = vperm.xlu1 %14015, %v501_v25   ;;  %616 = vperm.xlu0 %14014, %v500_v26   ;;  %v527_v25 = vld [vmem:[%s20702_s0 + $0x201] sm:$0xff]  ;;  %v526_v26 = vld [vmem:[%s20702_s0 + $0x1f9] sm:$0xff] }
  0x9d   :  { %v14482_v31 = vpop.permute.xlu1 %175  ;;  %v14484_v32 = vpop.permute.xlu0 %170 }
  0x9e   :  { %631 = vperm.xlu1 %14015, %v503_v29   ;;  %626 = vperm.xlu0 %14014, %v502_v30  }
  0xa1   :  { %v14492_v35 = vpop.permute.xlu1 %185  ;;  %v14494_v36 = vpop.permute.xlu0 %180 }
  0xa2   :  { %641 = vperm.xlu1 %14015, %v505_v33   ;;  %636 = vperm.xlu0 %14014, %v504_v34   ;;  %v529_v33 = vld [vmem:[%s20702_s0 + $0x219] sm:$0xff]  ;;  %v528_v34 = vld [vmem:[%s20702_s0 + $0x211] sm:$0xff] }
  0xa5   :  { %v14502_v39 = vpop.permute.xlu1 %195  ;;  %v14504_v40 = vpop.permute.xlu0 %190 }
  0xa6   :  { %651 = vperm.xlu1 %14015, %v507_v37   ;;  %646 = vperm.xlu0 %14014, %v506_v38  }
  0xa9   :  { %v14512_v43 = vpop.permute.xlu1 %205  ;;  %v14514_v44 = vpop.permute.xlu0 %200 }
  0xaa   :  { %661 = vperm.xlu1 %14015, %v509_v41   ;;  %656 = vperm.xlu0 %14014, %v508_v42   ;;  %v531_v41 = vld [vmem:[%s20702_s0 + $0x231] sm:$0xff]  ;;  %v530_v42 = vld [vmem:[%s20702_s0 + $0x229] sm:$0xff] }
  0xad   :  { %v14522_v47 = vpop.permute.xlu1 %215  ;;  %v14524_v48 = vpop.permute.xlu0 %210 }
  0xae   :  { %671 = vperm.xlu1 %14015, %v511_v45   ;;  %666 = vperm.xlu0 %14014, %v510_v46  }
  0xb1   :  { %v14532_v51 = vpop.permute.xlu1 %225  ;;  %v14534_v52 = vpop.permute.xlu0 %220 }
  0xb2   :  { %681 = vperm.xlu1 %14015, %v513_v49   ;;  %676 = vperm.xlu0 %14014, %v512_v50   ;;  %v533_v49 = vld [vmem:[%s20702_s0 + $0x249] sm:$0xff]  ;;  %v532_v50 = vld [vmem:[%s20702_s0 + $0x241] sm:$0xff] }
  0xb5   :  { %v14542_v55 = vpop.permute.xlu1 %235  ;;  %v14544_v56 = vpop.permute.xlu0 %230 }
  0xb6   :  { %691 = vperm.xlu1 %14015, %v515_v53   ;;  %686 = vperm.xlu0 %14014, %v514_v54  }
  0xb9   :  { %v14552_v59 = vpop.permute.xlu1 %245  ;;  %v14554_v60 = vpop.permute.xlu0 %240 }
  0xba   :  { %20791 = vst [vmem:[#allocation8_spill] sm:$0xff] %v14552_v59  ;;  %701 = vperm.xlu1 %14015, %v517_v57   ;;  %696 = vperm.xlu0 %14014, %v516_v58   ;;  %v535_v57 = vld [vmem:[%s20702_s0 + $0x261] sm:$0xff]  ;;  %v534_v58 = vld [vmem:[%s20702_s0 + $0x259] sm:$0xff] }
  0xbd   :  { %v14562_v63 = vpop.permute.xlu1 %255  ;;  %v14564_v0 = vpop.permute.xlu0 %250 }
  0xbe   :  { %20792 = vst [vmem:[#allocation9_spill] sm:$0xff] %v14562_v63  ;;  %711 = vperm.xlu1 %14015, %v519_v61   ;;  %706 = vperm.xlu0 %14014, %v518_v62   ;;  %v1025_v63 = vld [vmem:[%s20702_s0 + $0xca] sm:$0xff] }
  0xc1   :  { %v14572_v5 = vpop.permute.xlu1 %265  ;;  %v14574_v6 = vpop.permute.xlu0 %260 }
  0xc2   :  { %20793 = vst [vmem:[#allocation10_spill] sm:$0xff] %v14572_v5  ;;  %20794 = vst [vmem:[#allocation11_spill] sm:$0xff] %v14574_v6  ;;  %721 = vperm.xlu1 %14015, %v521_v1   ;;  %716 = vperm.xlu0 %14014, %v520_v2   ;;  %v537_v1 = vld [vmem:[%s20702_s0 + $0x279] sm:$0xff]  ;;  %v536_v2 = vld [vmem:[%s20702_s0 + $0x271] sm:$0xff] }
  0xc3   :  { %v12164_v5 = vld [vmem:[%s20702_s0 + $0x38] sm:$0xff] }
  0xc5   :  { %v14582_v13 = vpop.permute.xlu1 %275  ;;  %v14584_v14 = vpop.permute.xlu0 %270 }
  0xc6   :  { %20795 = vst [vmem:[#allocation12_spill] sm:$0xff] %v14582_v13  ;;  %20796 = vst [vmem:[#allocation13_spill] sm:$0xff] %v14584_v14  ;;  %731 = vperm.xlu1 %14015, %v523_v9   ;;  %726 = vperm.xlu0 %14014, %v522_v10  }
  0xc9   :  { %v14592_v21 = vpop.permute.xlu1 %285  ;;  %v14594_v22 = vpop.permute.xlu0 %280 }
  0xca   :  { %20797 = vst [vmem:[#allocation14_spill] sm:$0xff] %v14592_v21  ;;  %20798 = vst [vmem:[#allocation15_spill] sm:$0xff] %v14594_v22  ;;  %741 = vperm.xlu1 %14015, %v525_v17   ;;  %736 = vperm.xlu0 %14014, %v524_v18   ;;  %v539_v17 = vld [vmem:[%s20702_s0 + $0x291] sm:$0xff]  ;;  %v538_v18 = vld [vmem:[%s20702_s0 + $0x289] sm:$0xff] }
  0xcd   :  { %v14602_v29 = vpop.permute.xlu1 %295  ;;  %v14604_v30 = vpop.permute.xlu0 %290 }
  0xce   :  { %20799 = vst [vmem:[#allocation16_spill] sm:$0xff] %v14602_v29  ;;  %20800 = vst [vmem:[#allocation17_spill] sm:$0xff] %v14604_v30  ;;  %751 = vperm.xlu1 %14015, %v527_v25   ;;  %746 = vperm.xlu0 %14014, %v526_v26  }
  0xd1   :  { %v14612_v37 = vpop.permute.xlu1 %305  ;;  %v14614_v38 = vpop.permute.xlu0 %300 }
  0xd2   :  { %20801 = vst [vmem:[#allocation18_spill] sm:$0xff] %v14612_v37  ;;  %20802 = vst [vmem:[#allocation19_spill] sm:$0xff] %v14614_v38  ;;  %761 = vperm.xlu1 %14015, %v529_v33   ;;  %756 = vperm.xlu0 %14014, %v528_v34   ;;  %v541_v33 = vld [vmem:[%s20702_s0 + $0x2a9] sm:$0xff]  ;;  %v540_v34 = vld [vmem:[%s20702_s0 + $0x2a1] sm:$0xff] }
  0xd5   :  { %v14622_v45 = vpop.permute.xlu1 %315  ;;  %v14624_v46 = vpop.permute.xlu0 %310 }
  0xd6   :  { %20803 = vst [vmem:[#allocation20_spill] sm:$0xff] %v14622_v45  ;;  %20804 = vst [vmem:[#allocation21_spill] sm:$0xff] %v14624_v46  ;;  %771 = vperm.xlu1 %14015, %v531_v41   ;;  %766 = vperm.xlu0 %14014, %v530_v42   ;;  %v15434_v46 = vld [vmem:[%s20702_s0 + $0x61] sm:$0xff] }
  0xd9   :  { %v14632_v53 = vpop.permute.xlu1 %325  ;;  %v14634_v54 = vpop.permute.xlu0 %320 }
  0xda   :  { %20805 = vst [vmem:[#allocation22_spill] sm:$0xff] %v14632_v53  ;;  %20806 = vst [vmem:[#allocation23_spill] sm:$0xff] %v14634_v54  ;;  %781 = vperm.xlu1 %14015, %v533_v49   ;;  %776 = vperm.xlu0 %14014, %v532_v50   ;;  %v543_v49 = vld [vmem:[%s20702_s0 + $0x2c1] sm:$0xff]  ;;  %v542_v50 = vld [vmem:[%s20702_s0 + $0x2b9] sm:$0xff] }
  0xdb   :  { %v1023_v54 = vld [vmem:[%s20702_s0 + $0xb2] sm:$0xff] }
  0xdd   :  { %v14642_v61 = vpop.permute.xlu1 %335  ;;  %v14644_v62 = vpop.permute.xlu0 %330 }
  0xde   :  { %20807 = vst [vmem:[#allocation24_spill] sm:$0xff] %v14642_v61  ;;  %20808 = vst [vmem:[#allocation25_spill] sm:$0xff] %v14644_v62  ;;  %791 = vperm.xlu1 %14015, %v535_v57   ;;  %786 = vperm.xlu0 %14014, %v534_v58   ;;  %v1021_v62 = vld [vmem:[%s20702_s0 + $0x9a] sm:$0xff] }
  0xe1   :  { %v14652_v9 = vpop.permute.xlu1 %345  ;;  %v14654_v10 = vpop.permute.xlu0 %340 }
  0xe2   :  { %20809 = vst [vmem:[#allocation26_spill] sm:$0xff] %v14652_v9  ;;  %20810 = vst [vmem:[#allocation27_spill] sm:$0xff] %v14654_v10  ;;  %801 = vperm.xlu1 %14015, %v537_v1   ;;  %796 = vperm.xlu0 %14014, %v536_v2   ;;  %v545_v1 = vld [vmem:[%s20702_s0 + $0x2d9] sm:$0xff]  ;;  %v544_v2 = vld [vmem:[%s20702_s0 + $0x2d1] sm:$0xff] }
  0xe5   :  { %v14662_v25 = vpop.permute.xlu1 %355  ;;  %v14664_v26 = vpop.permute.xlu0 %350 }
  0xe6   :  { %20811 = vst [vmem:[#allocation28_spill] sm:$0xff] %v14662_v25  ;;  %20812 = vst [vmem:[#allocation29_spill] sm:$0xff] %v14664_v26  ;;  %811 = vperm.xlu1 %14015, %v539_v17   ;;  %806 = vperm.xlu0 %14014, %v538_v18   ;;  %v1015_v25 = vld [vmem:[%s20702_s0 + $0x52] sm:$0xff]  ;;  %v1019_v26 = vld [vmem:[%s20702_s0 + $0x82] sm:$0xff] }
  0xe9   :  { %v14672_v41 = vpop.permute.xlu1 %365  ;;  %v14674_v42 = vpop.permute.xlu0 %360 }
  0xea   :  { %20813 = vst [vmem:[#allocation30_spill] sm:$0xff] %v14672_v41  ;;  %20814 = vst [vmem:[#allocation31_spill] sm:$0xff] %v14674_v42  ;;  %821 = vperm.xlu1 %14015, %v541_v33   ;;  %816 = vperm.xlu0 %14014, %v540_v34   ;;  %v547_v33 = vld [vmem:[%s20702_s0 + $0x2f1] sm:$0xff]  ;;  %v546_v34 = vld [vmem:[%s20702_s0 + $0x2e9] sm:$0xff] }
  0xed   :  { %v14682_v57 = vpop.permute.xlu1 %375  ;;  %v14684_v58 = vpop.permute.xlu0 %370 }
  0xee   :  { %20815 = vst [vmem:[#allocation32_spill] sm:$0xff] %v14682_v57  ;;  %20816 = vst [vmem:[#allocation33_spill] sm:$0xff] %v14684_v58  ;;  %831 = vperm.xlu1 %14015, %v543_v49   ;;  %826 = vperm.xlu0 %14014, %v542_v50   ;;  %v1017_v58 = vld [vmem:[%s20702_s0 + $0x6a] sm:$0xff] }
  0xf1   :  { %v14692_v17 = vpop.permute.xlu1 %385  ;;  %v14694_v18 = vpop.permute.xlu0 %380 }
  0xf2   :  { %20817 = vst [vmem:[#allocation34_spill] sm:$0xff] %v14692_v17  ;;  %20818 = vst [vmem:[#allocation35_spill] sm:$0xff] %v14694_v18  ;;  %841 = vperm.xlu1 %14015, %v545_v1   ;;  %836 = vperm.xlu0 %14014, %v544_v2   ;;  %v549_v17 = vld [vmem:[%s20702_s0 + $0x309] sm:$0xff]  ;;  %v548_v1 = vld [vmem:[%s20702_s0 + $0x301] sm:$0xff] }
  0xf3   :  { %v1013_v18 = vld [vmem:[%s20702_s0 + $0x3a] sm:$0xff] }
  0xf5   :  { %v14702_v49 = vpop.permute.xlu1 %395  ;;  %v14704_v50 = vpop.permute.xlu0 %390 }
  0xf6   :  { %20819 = vst [vmem:[#allocation36_spill] sm:$0xff] %v14702_v49  ;;  %20820 = vst [vmem:[#allocation37_spill] sm:$0xff] %v14704_v50  ;;  %851 = vperm.xlu1 %14015, %v547_v33   ;;  %846 = vperm.xlu0 %14014, %v546_v34   ;;  %v551_v49 = vld [vmem:[%s20702_s0 + $0x321] sm:$0xff]  ;;  %v550_v33 = vld [vmem:[%s20702_s0 + $0x319] sm:$0xff] }
  0xf9   :  { %v14712_v2 = vpop.permute.xlu1 %405  ;;  %v14714_v41 = vpop.permute.xlu0 %400 }
  0xfa   :  { %20821 = vst [vmem:[#allocation38_spill] sm:$0xff] %v14712_v2  ;;  %20822 = vst [vmem:[#allocation39_spill] sm:$0xff] %v14714_v41  ;;  %861 = vperm.xlu1 %14015, %v549_v17   ;;  %856 = vperm.xlu0 %14014, %v548_v1   ;;  %v1009_v2 = vld [vmem:[%s20702_s0 + $0xa] sm:$0xff]  ;;  %v1008_v17 = vld [vmem:[%s20702_s0 + $0x2] sm:$0xff] }
  0xfd   :  { %v14722_v34 = vpop.permute.xlu1 %415  ;;  %v14724_v50 = vpop.permute.xlu0 %410 }
  0xfe   :  { %20823 = vst [vmem:[#allocation40_spill] sm:$0xff] %v14722_v34  ;;  %20824 = vst [vmem:[#allocation41_spill] sm:$0xff] %v14724_v50  ;;  %871 = vperm.xlu1 %14015, %v551_v49   ;;  %866 = vperm.xlu0 %14014, %v550_v33   ;;  %v1011_v34 = vld [vmem:[%s20702_s0 + $0x22] sm:$0xff]  ;;  %v1010_v49 = vld [vmem:[%s20702_s0 + $0x1a] sm:$0xff] }
 0x101   :  { %v14732_v1 = vpop.permute.xlu1 %561  ;;  %v14734_v41 = vpop.permute.xlu0 %556 }
 0x102   :  { %20825 = vst [vmem:[#allocation42_spill] sm:$0xff] %v14732_v1  ;;  %20826 = vst [vmem:[#allocation43_spill] sm:$0xff] %v14734_v41  ;;  %1081 = vperm.xlu1 %14015, %v1009_v2   ;;  %1076 = vperm.xlu0 %14014, %v1008_v17   ;;  %v1012_v2 = vld [vmem:[%s20702_s0 + $0x32] sm:$0xff] }
 0x105   :  { %v14742_v33 = vpop.permute.xlu1 %571  ;;  %v14744_v50 = vpop.permute.xlu0 %566 }
 0x106   :  { %20827 = vst [vmem:[#allocation44_spill] sm:$0xff] %v14742_v33  ;;  %1091 = vperm.xlu1 %14015, %v1011_v34   ;;  %1086 = vperm.xlu0 %14014, %v1010_v49   ;;  %v1014_v34 = vld [vmem:[%s20702_s0 + $0x4a] sm:$0xff] }
 0x109   :  { %v14752_v17 = vpop.permute.xlu1 %581  ;;  %v14754_v57 = vpop.permute.xlu0 %576 }
 0x10a   :  { %20828 = vst [vmem:[#allocation45_spill] sm:$0xff] %v14752_v17  ;;  %20829 = vst [vmem:[#allocation46_spill] sm:$0xff] %v14754_v57  ;;  %1101 = vperm.xlu1 %14015, %v1013_v18   ;;  %1096 = vperm.xlu0 %14014, %v1012_v2   ;;  %v1016_v18 = vld [vmem:[%s20702_s0 + $0x62] sm:$0xff] }
 0x10d   :  { %v14762_v49 = vpop.permute.xlu1 %591  ;;  %v14764_v9 = vpop.permute.xlu0 %586 }
 0x10e   :  { %20830 = vst [vmem:[#allocation47_spill] sm:$0xff] %v14762_v49  ;;  %20831 = vst [vmem:[#allocation48_spill] sm:$0xff] %v14764_v9  ;;  %1111 = vperm.xlu1 %14015, %v1015_v25   ;;  %1106 = vperm.xlu0 %14014, %v1014_v34   ;;  %v1018_v25 = vld [vmem:[%s20702_s0 + $0x7a] sm:$0xff] }
 0x111   :  { %v14772_v2 = vpop.permute.xlu1 %601  ;;  %v14774_v42 = vpop.permute.xlu0 %596 }
 0x112   :  { %20832 = vst [vmem:[#allocation49_spill] sm:$0xff] %v14772_v2  ;;  %20833 = vst [vmem:[#allocation50_spill] sm:$0xff] %v14774_v42  ;;  %1121 = vperm.xlu1 %14015, %v1017_v58   ;;  %1116 = vperm.xlu0 %14014, %v1016_v18   ;;  %v1020_v58 = vld [vmem:[%s20702_s0 + $0x92] sm:$0xff] }
 0x115   :  { %v14782_v34 = vpop.permute.xlu1 %611  ;;  %v14784_v10 = vpop.permute.xlu0 %606 }
 0x116   :  { %20834 = vst [vmem:[#allocation51_spill] sm:$0xff] %v14782_v34  ;;  %20835 = vst [vmem:[#allocation52_spill] sm:$0xff] %v14784_v10  ;;  %1131 = vperm.xlu1 %14015, %v1019_v26   ;;  %1126 = vperm.xlu0 %14014, %v1018_v25   ;;  %v1022_v26 = vld [vmem:[%s20702_s0 + $0xaa] sm:$0xff] }
 0x119   :  { %v14792_v18 = vpop.permute.xlu1 %621  ;;  %v14794_v61 = vpop.permute.xlu0 %616 }
 0x11a   :  { %20836 = vst [vmem:[#allocation53_spill] sm:$0xff] %v14792_v18  ;;  %20837 = vst [vmem:[#allocation54_spill] sm:$0xff] %v14794_v61  ;;  %1141 = vperm.xlu1 %14015, %v1021_v62   ;;  %1136 = vperm.xlu0 %14014, %v1020_v58   ;;  %v1024_v62 = vld [vmem:[%s20702_s0 + $0xc2] sm:$0xff] }
 0x11d   :  { %v14802_v25 = vpop.permute.xlu1 %631  ;;  %v14804_v53 = vpop.permute.xlu0 %626 }
 0x11e   :  { %20838 = vst [vmem:[#allocation55_spill] sm:$0xff] %v14802_v25  ;;  %20839 = vst [vmem:[#allocation56_spill] sm:$0xff] %v14804_v53  ;;  %1151 = vperm.xlu1 %14015, %v1023_v54   ;;  %1146 = vperm.xlu0 %14014, %v1022_v26   ;;  %v1027_v53 = vld [vmem:[%s20702_s0 + $0xe2] sm:$0xff]  ;;  %v1026_v54 = vld [vmem:[%s20702_s0 + $0xda] sm:$0xff] }
 0x121   :  { %v14812_v58 = vpop.permute.xlu1 %641  ;;  %v14814_v59 = vpop.permute.xlu0 %636 }
 0x122   :  { %20840 = vst [vmem:[#allocation57_spill] sm:$0xff] %v14812_v58  ;;  %20841 = vst [vmem:[#allocation58_spill] sm:$0xff] %v14814_v59  ;;  %1161 = vperm.xlu1 %14015, %v1025_v63   ;;  %1156 = vperm.xlu0 %14014, %v1024_v62   ;;  %v1029_v59 = vld [vmem:[%s20702_s0 + $0xfa] sm:$0xff]  ;;  %v1028_v63 = vld [vmem:[%s20702_s0 + $0xf2] sm:$0xff] }
 0x125   :  { %v14822_v26 = vpop.permute.xlu1 %651  ;;  %v14824_v25 = vpop.permute.xlu0 %646 }
 0x126   :  { %20842 = vst [vmem:[#allocation59_spill] sm:$0xff] %v14822_v26  ;;  %20843 = vst [vmem:[#allocation60_spill] sm:$0xff] %v14824_v25  ;;  %1171 = vperm.xlu1 %14015, %v1027_v53   ;;  %1166 = vperm.xlu0 %14014, %v1026_v54   ;;  %v1031_v25 = vld [vmem:[%s20702_s0 + $0x112] sm:$0xff]  ;;  %v1030_v53 = vld [vmem:[%s20702_s0 + $0x10a] sm:$0xff] }
 0x129   :  { %v14832_v62 = vpop.permute.xlu1 %661  ;;  %v14834_v58 = vpop.permute.xlu0 %656 }
 0x12a   :  { %20844 = vst [vmem:[#allocation61_spill] sm:$0xff] %v14832_v62  ;;  %20845 = vst [vmem:[#allocation62_spill] sm:$0xff] %v14834_v58  ;;  %1181 = vperm.xlu1 %14015, %v1029_v59   ;;  %1176 = vperm.xlu0 %14014, %v1028_v63   ;;  %v1033_v58 = vld [vmem:[%s20702_s0 + $0x12a] sm:$0xff]  ;;  %v1032_v59 = vld [vmem:[%s20702_s0 + $0x122] sm:$0xff] }
 0x12d   :  { %v14842_v54 = vpop.permute.xlu1 %671  ;;  %v14844_v26 = vpop.permute.xlu0 %666 }
 0x12e   :  { %20846 = vst [vmem:[#allocation63_spill] sm:$0xff] %v14842_v54  ;;  %20847 = vst [vmem:[#allocation64_spill] sm:$0xff] %v14844_v26  ;;  %1191 = vperm.xlu1 %14015, %v1031_v25   ;;  %1186 = vperm.xlu0 %14014, %v1030_v53   ;;  %v1035_v26 = vld [vmem:[%s20702_s0 + $0x142] sm:$0xff]  ;;  %v1034_v25 = vld [vmem:[%s20702_s0 + $0x13a] sm:$0xff] }
 0x131   :  { %v14852_v63 = vpop.permute.xlu1 %681  ;;  %v14854_v62 = vpop.permute.xlu0 %676 }
 0x132   :  { %20848 = vst [vmem:[#allocation65_spill] sm:$0xff] %v14852_v63  ;;  %20849 = vst [vmem:[#allocation66_spill] sm:$0xff] %v14854_v62  ;;  %1201 = vperm.xlu1 %14015, %v1033_v58   ;;  %1196 = vperm.xlu0 %14014, %v1032_v59   ;;  %v1037_v62 = vld [vmem:[%s20702_s0 + $0x15a] sm:$0xff]  ;;  %v1036_v58 = vld [vmem:[%s20702_s0 + $0x152] sm:$0xff] }
 0x135   :  { %v14862_v53 = vpop.permute.xlu1 %691  ;;  %v14864_v54 = vpop.permute.xlu0 %686 }
 0x136   :  { %20850 = vst [vmem:[#allocation67_spill] sm:$0xff] %v14862_v53  ;;  %20851 = vst [vmem:[#allocation68_spill] sm:$0xff] %v14864_v54  ;;  %1211 = vperm.xlu1 %14015, %v1035_v26   ;;  %1206 = vperm.xlu0 %14014, %v1034_v25   ;;  %v1039_v54 = vld [vmem:[%s20702_s0 + $0x172] sm:$0xff]  ;;  %v1038_v26 = vld [vmem:[%s20702_s0 + $0x16a] sm:$0xff] }
 0x139   :  { %v14872_v59 = vpop.permute.xlu1 %701  ;;  %v14874_v63 = vpop.permute.xlu0 %696 }
 0x13a   :  { %20852 = vst [vmem:[#allocation69_spill] sm:$0xff] %v14872_v59  ;;  %20853 = vst [vmem:[#allocation70_spill] sm:$0xff] %v14874_v63  ;;  %1221 = vperm.xlu1 %14015, %v1037_v62   ;;  %1216 = vperm.xlu0 %14014, %v1036_v58   ;;  %v1041_v59 = vld [vmem:[%s20702_s0 + $0x1ba] sm:$0xff]  ;;  %v1040_v62 = vld [vmem:[%s20702_s0 + $0x1b2] sm:$0xff] }
 0x13d   :  { %v14882_v25 = vpop.permute.xlu1 %711  ;;  %v14884_v53 = vpop.permute.xlu0 %706 }
 0x13e   :  { %20854 = vst [vmem:[#allocation71_spill] sm:$0xff] %v14882_v25  ;;  %20855 = vst [vmem:[#allocation72_spill] sm:$0xff] %v14884_v53  ;;  %1231 = vperm.xlu1 %14015, %v1039_v54   ;;  %1226 = vperm.xlu0 %14014, %v1038_v26   ;;  %v1043_v25 = vld [vmem:[%s20702_s0 + $0x1d2] sm:$0xff]  ;;  %v1042_v54 = vld [vmem:[%s20702_s0 + $0x1ca] sm:$0xff] }
 0x141   :  { %v14892_v58 = vpop.permute.xlu1 %721  ;;  %v14894_v63 = vpop.permute.xlu0 %716 }
 0x142   :  { %20856 = vst [vmem:[#allocation73_spill] sm:$0xff] %v14892_v58  ;;  %20857 = vst [vmem:[#allocation74_spill] sm:$0xff] %v14894_v63  ;;  %1241 = vperm.xlu1 %14015, %v1041_v59   ;;  %1236 = vperm.xlu0 %14014, %v1040_v62   ;;  %v1045_v63 = vld [vmem:[%s20702_s0 + $0x1ea] sm:$0xff]  ;;  %v1044_v59 = vld [vmem:[%s20702_s0 + $0x1e2] sm:$0xff] }
 0x145   :  { %v14902_v26 = vpop.permute.xlu1 %731  ;;  %v14904_v53 = vpop.permute.xlu0 %726 }
 0x146   :  { %20858 = vst [vmem:[#allocation75_spill] sm:$0xff] %v14902_v26  ;;  %20859 = vst [vmem:[#allocation76_spill] sm:$0xff] %v14904_v53  ;;  %1251 = vperm.xlu1 %14015, %v1043_v25   ;;  %1246 = vperm.xlu0 %14014, %v1042_v54   ;;  %v1047_v53 = vld [vmem:[%s20702_s0 + $0x202] sm:$0xff]  ;;  %v1046_v25 = vld [vmem:[%s20702_s0 + $0x1fa] sm:$0xff] }
 0x149   :  { %v14912_v62 = vpop.permute.xlu1 %741  ;;  %v14914_v58 = vpop.permute.xlu0 %736 }
 0x14a   :  { %20860 = vst [vmem:[#allocation77_spill] sm:$0xff] %v14912_v62  ;;  %20861 = vst [vmem:[#allocation78_spill] sm:$0xff] %v14914_v58  ;;  %1261 = vperm.xlu1 %14015, %v1045_v63   ;;  %1256 = vperm.xlu0 %14014, %v1044_v59   ;;  %v1049_v58 = vld [vmem:[%s20702_s0 + $0x21a] sm:$0xff]  ;;  %v1048_v63 = vld [vmem:[%s20702_s0 + $0x212] sm:$0xff] }
 0x14d   :  { %v14922_v54 = vpop.permute.xlu1 %751  ;;  %v14924_v26 = vpop.permute.xlu0 %746 }
 0x14e   :  { %20862 = vst [vmem:[#allocation79_spill] sm:$0xff] %v14922_v54  ;;  %20863 = vst [vmem:[#allocation80_spill] sm:$0xff] %v14924_v26  ;;  %1271 = vperm.xlu1 %14015, %v1047_v53   ;;  %1266 = vperm.xlu0 %14014, %v1046_v25   ;;  %v1051_v26 = vld [vmem:[%s20702_s0 + $0x232] sm:$0xff]  ;;  %v1050_v53 = vld [vmem:[%s20702_s0 + $0x22a] sm:$0xff] }
 0x151   :  { %v14932_v59 = vpop.permute.xlu1 %761  ;;  %v14934_v62 = vpop.permute.xlu0 %756 }
 0x152   :  { %20864 = vst [vmem:[#allocation81_spill] sm:$0xff] %v14932_v59  ;;  %20865 = vst [vmem:[#allocation82_spill] sm:$0xff] %v14934_v62  ;;  %1281 = vperm.xlu1 %14015, %v1049_v58   ;;  %1276 = vperm.xlu0 %14014, %v1048_v63   ;;  %v1053_v62 = vld [vmem:[%s20702_s0 + $0x24a] sm:$0xff]  ;;  %v1052_v58 = vld [vmem:[%s20702_s0 + $0x242] sm:$0xff] }
 0x155   :  { %v14942_v25 = vpop.permute.xlu1 %771  ;;  %v14944_v54 = vpop.permute.xlu0 %766 }
 0x156   :  { %20866 = vst [vmem:[#allocation83_spill] sm:$0xff] %v14942_v25  ;;  %20867 = vst [vmem:[#allocation84_spill] sm:$0xff] %v14944_v54  ;;  %1291 = vperm.xlu1 %14015, %v1051_v26   ;;  %1286 = vperm.xlu0 %14014, %v1050_v53   ;;  %v1055_v54 = vld [vmem:[%s20702_s0 + $0x262] sm:$0xff]  ;;  %v1054_v26 = vld [vmem:[%s20702_s0 + $0x25a] sm:$0xff] }
 0x159   :  { %v14952_v63 = vpop.permute.xlu1 %781  ;;  %v14954_v59 = vpop.permute.xlu0 %776 }
 0x15a   :  { %20868 = vst [vmem:[#allocation85_spill] sm:$0xff] %v14952_v63  ;;  %20869 = vst [vmem:[#allocation86_spill] sm:$0xff] %v14954_v59  ;;  %1301 = vperm.xlu1 %14015, %v1053_v62   ;;  %1296 = vperm.xlu0 %14014, %v1052_v58   ;;  %v1057_v59 = vld [vmem:[%s20702_s0 + $0x27a] sm:$0xff]  ;;  %v1056_v62 = vld [vmem:[%s20702_s0 + $0x272] sm:$0xff] }
 0x15d   :  { %v14962_v53 = vpop.permute.xlu1 %791  ;;  %v14964_v25 = vpop.permute.xlu0 %786 }
 0x15e   :  { %20870 = vst [vmem:[#allocation87_spill] sm:$0xff] %v14962_v53  ;;  %20871 = vst [vmem:[#allocation88_spill] sm:$0xff] %v14964_v25  ;;  %1311 = vperm.xlu1 %14015, %v1055_v54   ;;  %1306 = vperm.xlu0 %14014, %v1054_v26   ;;  %v1059_v25 = vld [vmem:[%s20702_s0 + $0x292] sm:$0xff]  ;;  %v1058_v54 = vld [vmem:[%s20702_s0 + $0x28a] sm:$0xff] }
 0x161   :  { %v14972_v58 = vpop.permute.xlu1 %801  ;;  %v14974_v63 = vpop.permute.xlu0 %796 }
 0x162   :  { %20872 = vst [vmem:[#allocation89_spill] sm:$0xff] %v14972_v58  ;;  %20873 = vst [vmem:[#allocation90_spill] sm:$0xff] %v14974_v63  ;;  %1321 = vperm.xlu1 %14015, %v1057_v59   ;;  %1316 = vperm.xlu0 %14014, %v1056_v62   ;;  %v1061_v58 = vld [vmem:[%s20702_s0 + $0x2aa] sm:$0xff]  ;;  %v1060_v59 = vld [vmem:[%s20702_s0 + $0x2a2] sm:$0xff] }
 0x165   :  { %v14982_v26 = vpop.permute.xlu1 %811  ;;  %v14984_v53 = vpop.permute.xlu0 %806 }
 0x166   :  { %20874 = vst [vmem:[#allocation91_spill] sm:$0xff] %v14982_v26  ;;  %20875 = vst [vmem:[#allocation92_spill] sm:$0xff] %v14984_v53  ;;  %1331 = vperm.xlu1 %14015, %v1059_v25   ;;  %1326 = vperm.xlu0 %14014, %v1058_v54   ;;  %v1063_v26 = vld [vmem:[%s20702_s0 + $0x2c2] sm:$0xff]  ;;  %v1062_v25 = vld [vmem:[%s20702_s0 + $0x2ba] sm:$0xff] }
 0x169   :  { %v14992_v62 = vpop.permute.xlu1 %821  ;;  %v14994_v63 = vpop.permute.xlu0 %816 }
 0x16a   :  { %20876 = vst [vmem:[#allocation93_spill] sm:$0xff] %v14992_v62  ;;  %20877 = vst [vmem:[#allocation94_spill] sm:$0xff] %v14994_v63  ;;  %1341 = vperm.xlu1 %14015, %v1061_v58   ;;  %1336 = vperm.xlu0 %14014, %v1060_v59   ;;  %v1065_v62 = vld [vmem:[%s20702_s0 + $0x2da] sm:$0xff]  ;;  %v1064_v58 = vld [vmem:[%s20702_s0 + $0x2d2] sm:$0xff] }
 0x16d   :  { %v15002_v54 = vpop.permute.xlu1 %831  ;;  %v15004_v53 = vpop.permute.xlu0 %826 }
 0x16e   :  { %20878 = vst [vmem:[#allocation95_spill] sm:$0xff] %v15002_v54  ;;  %20879 = vst [vmem:[#allocation96_spill] sm:$0xff] %v15004_v53  ;;  %1351 = vperm.xlu1 %14015, %v1063_v26   ;;  %1346 = vperm.xlu0 %14014, %v1062_v25   ;;  %v1067_v54 = vld [vmem:[%s20702_s0 + $0x2f2] sm:$0xff]  ;;  %v1066_v26 = vld [vmem:[%s20702_s0 + $0x2ea] sm:$0xff] }
 0x171   :  { %v15012_v59 = vpop.permute.xlu1 %841  ;;  %v15014_v63 = vpop.permute.xlu0 %836 }
 0x172   :  { %20880 = vst [vmem:[#allocation97_spill] sm:$0xff] %v15012_v59  ;;  %20881 = vst [vmem:[#allocation98_spill] sm:$0xff] %v15014_v63  ;;  %1361 = vperm.xlu1 %14015, %v1065_v62   ;;  %1356 = vperm.xlu0 %14014, %v1064_v58   ;;  %v1069_v59 = vld [vmem:[%s20702_s0 + $0x30a] sm:$0xff]  ;;  %v1068_v62 = vld [vmem:[%s20702_s0 + $0x302] sm:$0xff] }
 0x175   :  { %v15022_v25 = vpop.permute.xlu1 %851  ;;  %v15024_v53 = vpop.permute.xlu0 %846 }
 0x176   :  { %20882 = vst [vmem:[#allocation99_spill] sm:$0xff] %v15022_v25  ;;  %20883 = vst [vmem:[#allocation100_spill] sm:$0xff] %v15024_v53  ;;  %1371 = vperm.xlu1 %14015, %v1067_v54   ;;  %1366 = vperm.xlu0 %14014, %v1066_v26   ;;  %v1071_v25 = vld [vmem:[%s20702_s0 + $0x322] sm:$0xff]  ;;  %v1070_v54 = vld [vmem:[%s20702_s0 + $0x31a] sm:$0xff] }
 0x179   :  { %v15032_v58 = vpop.permute.xlu1 %861  ;;  %v15034_v63 = vpop.permute.xlu0 %856 }
 0x17a   :  { %20884 = vst [vmem:[#allocation101_spill] sm:$0xff] %v15032_v58  ;;  %20885 = vst [vmem:[#allocation102_spill] sm:$0xff] %v15034_v63  ;;  %1381 = vperm.xlu1 %14015, %v1069_v59   ;;  %1376 = vperm.xlu0 %14014, %v1068_v62   ;;  %v11966_v58 = vld [vmem:[%s20702_s0 + $0x20] sm:$0xff]  ;;  %v11965_v59 = vld [vmem:[%s20702_s0 + $0x18] sm:$0xff] }
 0x17d   :  { %v15042_v26 = vpop.permute.xlu1 %871  ;;  %v15044_v53 = vpop.permute.xlu0 %866 }
 0x17e   :  { %20886 = vst [vmem:[#allocation103_spill] sm:$0xff] %v15042_v26  ;;  %20887 = vst [vmem:[#allocation104_spill] sm:$0xff] %v15044_v53  ;;  %1391 = vperm.xlu1 %14015, %v1071_v25   ;;  %1386 = vperm.xlu0 %14014, %v1070_v54   ;;  %v11968_v26 = vld [vmem:[%s20702_s0 + $0x38] sm:$0xff]  ;;  %v15062_v25 = vld [vmem:[%s20702_s0 + $0x30] sm:$0xff] }
 0x181   :  { %v15052_v62 = vpop.permute.xlu1 %1081  ;;  %v15054_v63 = vpop.permute.xlu0 %1076 }
 0x182   :  { %20888 = vst [vmem:[#allocation105_spill] sm:$0xff] %v15052_v62  ;;  %20889 = vst [vmem:[#allocation106_spill] sm:$0xff] %v15054_v63  ;;  %1602 = vperm.xlu1 %14015, %v11966_v58   ;;  %1597 = vperm.xlu0 %14014, %v11965_v59   ;;  %v11970_v58 = vld [vmem:[%s20702_s0 + $0x50] sm:$0xff]  ;;  %v15075_v59 = vld [vmem:[%s20702_s0 + $0x48] sm:$0xff] }
 0x185   :  { %v15064_v54 = vpop.permute.xlu1 %1091  ;;  %v15066_v53 = vpop.permute.xlu0 %1086 }
 0x186   :  { %20890 = vst [vmem:[#allocation107_spill] sm:$0xff] %v15064_v54  ;;  %20891 = vst [vmem:[#allocation108_spill] sm:$0xff] %v15066_v53  ;;  %1612 = vperm.xlu1 %14015, %v11968_v26   ;;  %1607 = vperm.xlu0 %14014, %v15062_v25   ;;  %v11972_v26 = vld [vmem:[%s20702_s0 + $0x68] sm:$0xff]  ;;  %v15088_v54 = vld [vmem:[%s20702_s0 + $0x60] sm:$0xff] }
 0x189   :  { %v15077_v62 = vpop.permute.xlu1 %1101  ;;  %v15079_v61 = vpop.permute.xlu0 %1096 }
 0x18a   :  { %20892 = vst [vmem:[#allocation109_spill] sm:$0xff] %v15077_v62  ;;  %20893 = vst [vmem:[#allocation110_spill] sm:$0xff] %v15079_v61  ;;  %1622 = vperm.xlu1 %14015, %v11970_v58   ;;  %1617 = vperm.xlu0 %14014, %v15075_v59   ;;  %v11974_v58 = vld [vmem:[%s20702_s0 + $0x80] sm:$0xff]  ;;  %v15101_v61 = vld [vmem:[%s20702_s0 + $0x78] sm:$0xff] }
 0x18d   :  { %v15090_v18 = vpop.permute.xlu1 %1111  ;;  %v15092_v10 = vpop.permute.xlu0 %1106 }
 0x18e   :  { %20894 = vst [vmem:[#allocation111_spill] sm:$0xff] %v15090_v18  ;;  %20895 = vst [vmem:[#allocation112_spill] sm:$0xff] %v15092_v10  ;;  %1632 = vperm.xlu1 %14015, %v11972_v26   ;;  %1627 = vperm.xlu0 %14014, %v15088_v54   ;;  %v11976_v26 = vld [vmem:[%s20702_s0 + $0x98] sm:$0xff]  ;;  %v15114_v18 = vld [vmem:[%s20702_s0 + $0x90] sm:$0xff] }
 0x191   :  { %v15103_v62 = vpop.permute.xlu1 %1121  ;;  %v15105_v34 = vpop.permute.xlu0 %1116 }
 0x192   :  { %20896 = vst [vmem:[#allocation113_spill] sm:$0xff] %v15103_v62  ;;  %20897 = vst [vmem:[#allocation114_spill] sm:$0xff] %v15105_v34  ;;  %1642 = vperm.xlu1 %14015, %v11974_v58   ;;  %1637 = vperm.xlu0 %14014, %v15101_v61   ;;  %v11978_v58 = vld [vmem:[%s20702_s0 + $0xb0] sm:$0xff]  ;;  %v15127_v34 = vld [vmem:[%s20702_s0 + $0xa8] sm:$0xff] }
 0x195   :  { %v15116_v10 = vpop.permute.xlu1 %1131  ;;  %v15118_v42 = vpop.permute.xlu0 %1126 }
 0x196   :  { %20898 = vst [vmem:[#allocation115_spill] sm:$0xff] %v15116_v10  ;;  %20899 = vst [vmem:[#allocation116_spill] sm:$0xff] %v15118_v42  ;;  %1652 = vperm.xlu1 %14015, %v11976_v26   ;;  %1647 = vperm.xlu0 %14014, %v15114_v18   ;;  %v11980_v26 = vld [vmem:[%s20702_s0 + $0xc8] sm:$0xff]  ;;  %v11979_v42 = vld [vmem:[%s20702_s0 + $0xc0] sm:$0xff] }
 0x199   :  { %v15129_v62 = vpop.permute.xlu1 %1141  ;;  %v15131_v2 = vpop.permute.xlu0 %1136 }
 0x19a   :  { %20900 = vst [vmem:[#allocation117_spill] sm:$0xff] %v15129_v62  ;;  %20901 = vst [vmem:[#allocation118_spill] sm:$0xff] %v15131_v2  ;;  %1662 = vperm.xlu1 %14015, %v11978_v58   ;;  %1657 = vperm.xlu0 %14014, %v15127_v34   ;;  %v11982_v58 = vld [vmem:[%s20702_s0 + $0xe0] sm:$0xff]  ;;  %v11981_v2 = vld [vmem:[%s20702_s0 + $0xd8] sm:$0xff] }
 0x19d   :  { %v15140_v10 = vpop.permute.xlu1 %1151  ;;  %v15142_v9 = vpop.permute.xlu0 %1146 }
 0x19e   :  { %20902 = vst [vmem:[#allocation119_spill] sm:$0xff] %v15140_v10  ;;  %20903 = vst [vmem:[#allocation120_spill] sm:$0xff] %v15142_v9  ;;  %1672 = vperm.xlu1 %14015, %v11980_v26   ;;  %1667 = vperm.xlu0 %14014, %v11979_v42   ;;  %v11984_v9 = vld [vmem:[%s20702_s0 + $0xf8] sm:$0xff]  ;;  %v11983_v42 = vld [vmem:[%s20702_s0 + $0xf0] sm:$0xff] }
 0x1a1   :  { %v15150_v62 = vpop.permute.xlu1 %1161  ;;  %v15152_v49 = vpop.permute.xlu0 %1156 }
 0x1a2   :  { %20904 = vst [vmem:[#allocation121_spill] sm:$0xff] %v15150_v62  ;;  %20905 = vst [vmem:[#allocation122_spill] sm:$0xff] %v15152_v49  ;;  %1682 = vperm.xlu1 %14015, %v11982_v58   ;;  %1677 = vperm.xlu0 %14014, %v11981_v2   ;;  %v11986_v49 = vld [vmem:[%s20702_s0 + $0x110] sm:$0xff]  ;;  %v11985_v2 = vld [vmem:[%s20702_s0 + $0x108] sm:$0xff] }
 0x1a5   :  { %v15160_v26 = vpop.permute.xlu1 %1171  ;;  %v15162_v10 = vpop.permute.xlu0 %1166 }
 0x1a6   :  { %20906 = vst [vmem:[#allocation123_spill] sm:$0xff] %v15160_v26  ;;  %20907 = vst [vmem:[#allocation124_spill] sm:$0xff] %v15162_v10  ;;  %1692 = vperm.xlu1 %14015, %v11984_v9   ;;  %1687 = vperm.xlu0 %14014, %v11983_v42   ;;  %v11988_v10 = vld [vmem:[%s20702_s0 + $0x128] sm:$0xff]  ;;  %v11987_v9 = vld [vmem:[%s20702_s0 + $0x120] sm:$0xff] }
 0x1a9   :  { %v15170_v58 = vpop.permute.xlu1 %1181  ;;  %v15172_v62 = vpop.permute.xlu0 %1176 }
 0x1aa   :  { %20908 = vst [vmem:[#allocation125_spill] sm:$0xff] %v15170_v58  ;;  %20909 = vst [vmem:[#allocation126_spill] sm:$0xff] %v15172_v62  ;;  %1702 = vperm.xlu1 %14015, %v11986_v49   ;;  %1697 = vperm.xlu0 %14014, %v11985_v2   ;;  %v11990_v62 = vld [vmem:[%s20702_s0 + $0x140] sm:$0xff]  ;;  %v11989_v49 = vld [vmem:[%s20702_s0 + $0x138] sm:$0xff] }
 0x1ad   :  { %v15180_v42 = vpop.permute.xlu1 %1191  ;;  %v15182_v26 = vpop.permute.xlu0 %1186 }
 0x1ae   :  { %20910 = vst [vmem:[#allocation127_spill] sm:$0xff] %v15180_v42  ;;  %20911 = vst [vmem:[#allocation128_spill] sm:$0xff] %v15182_v26  ;;  %1712 = vperm.xlu1 %14015, %v11988_v10   ;;  %1707 = vperm.xlu0 %14014, %v11987_v9   ;;  %v11992_v26 = vld [vmem:[%s20702_s0 + $0x158] sm:$0xff]  ;;  %v11991_v10 = vld [vmem:[%s20702_s0 + $0x150] sm:$0xff] }
 0x1b1   :  { %v15190_v2 = vpop.permute.xlu1 %1201  ;;  %v15192_v58 = vpop.permute.xlu0 %1196 }
 0x1b2   :  { %20912 = vst [vmem:[#allocation129_spill] sm:$0xff] %v15190_v2  ;;  %20913 = vst [vmem:[#allocation130_spill] sm:$0xff] %v15192_v58  ;;  %1722 = vperm.xlu1 %14015, %v11990_v62   ;;  %1717 = vperm.xlu0 %14014, %v11989_v49   ;;  %v11994_v58 = vld [vmem:[%s20702_s0 + $0x170] sm:$0xff]  ;;  %v11993_v62 = vld [vmem:[%s20702_s0 + $0x168] sm:$0xff] }
 0x1b5   :  { %v15200_v9 = vpop.permute.xlu1 %1211  ;;  %v15202_v42 = vpop.permute.xlu0 %1206 }
 0x1b6   :  { %20914 = vst [vmem:[#allocation131_spill] sm:$0xff] %v15200_v9  ;;  %20915 = vst [vmem:[#allocation132_spill] sm:$0xff] %v15202_v42  ;;  %1732 = vperm.xlu1 %14015, %v11992_v26   ;;  %1727 = vperm.xlu0 %14014, %v11991_v10   ;;  %v11996_v42 = vld [vmem:[%s20702_s0 + $0x188] sm:$0xff]  ;;  %v11995_v26 = vld [vmem:[%s20702_s0 + $0x180] sm:$0xff] }
 0x1b9   :  { %v15210_v49 = vpop.permute.xlu1 %1221  ;;  %v15212_v2 = vpop.permute.xlu0 %1216 }
 0x1ba   :  { %20916 = vst [vmem:[#allocation133_spill] sm:$0xff] %v15210_v49  ;;  %20917 = vst [vmem:[#allocation134_spill] sm:$0xff] %v15212_v2  ;;  %1742 = vperm.xlu1 %14015, %v11994_v58   ;;  %1737 = vperm.xlu0 %14014, %v11993_v62   ;;  %v11998_v49 = vld [vmem:[%s20702_s0 + $0x1d0] sm:$0xff]  ;;  %v11997_v58 = vld [vmem:[%s20702_s0 + $0x1c8] sm:$0xff] }
 0x1bd   :  { %v15220_v10 = vpop.permute.xlu1 %1231  ;;  %v15222_v9 = vpop.permute.xlu0 %1226 }
 0x1be   :  { %20918 = vst [vmem:[#allocation135_spill] sm:$0xff] %v15220_v10  ;;  %20919 = vst [vmem:[#allocation136_spill] sm:$0xff] %v15222_v9  ;;  %1752 = vperm.xlu1 %14015, %v11996_v42   ;;  %1747 = vperm.xlu0 %14014, %v11995_v26   ;;  %v12000_v10 = vld [vmem:[%s20702_s0 + $0x1e8] sm:$0xff]  ;;  %v11999_v42 = vld [vmem:[%s20702_s0 + $0x1e0] sm:$0xff] }
 0x1c1   :  { %v15230_v62 = vpop.permute.xlu1 %1241  ;;  %v15232_v2 = vpop.permute.xlu0 %1236 }
 0x1c2   :  { %20920 = vst [vmem:[#allocation137_spill] sm:$0xff] %v15230_v62  ;;  %20921 = vst [vmem:[#allocation138_spill] sm:$0xff] %v15232_v2  ;;  %1762 = vperm.xlu1 %14015, %v11998_v49   ;;  %1757 = vperm.xlu0 %14014, %v11997_v58   ;;  %v12002_v2 = vld [vmem:[%s20702_s0 + $0x200] sm:$0xff]  ;;  %v12001_v49 = vld [vmem:[%s20702_s0 + $0x1f8] sm:$0xff] }
 0x1c5   :  { %v15240_v26 = vpop.permute.xlu1 %1251  ;;  %v15242_v9 = vpop.permute.xlu0 %1246 }
 0x1c6   :  { %20922 = vst [vmem:[#allocation139_spill] sm:$0xff] %v15240_v26  ;;  %20923 = vst [vmem:[#allocation140_spill] sm:$0xff] %v15242_v9  ;;  %1772 = vperm.xlu1 %14015, %v12000_v10   ;;  %1767 = vperm.xlu0 %14014, %v11999_v42   ;;  %v12004_v9 = vld [vmem:[%s20702_s0 + $0x218] sm:$0xff]  ;;  %v12003_v10 = vld [vmem:[%s20702_s0 + $0x210] sm:$0xff] }
 0x1c9   :  { %v15250_v58 = vpop.permute.xlu1 %1261  ;;  %v15252_v62 = vpop.permute.xlu0 %1256 }
 0x1ca   :  { %20924 = vst [vmem:[#allocation141_spill] sm:$0xff] %v15250_v58  ;;  %20925 = vst [vmem:[#allocation142_spill] sm:$0xff] %v15252_v62  ;;  %1782 = vperm.xlu1 %14015, %v12002_v2   ;;  %1777 = vperm.xlu0 %14014, %v12001_v49   ;;  %v12006_v62 = vld [vmem:[%s20702_s0 + $0x230] sm:$0xff]  ;;  %v12005_v2 = vld [vmem:[%s20702_s0 + $0x228] sm:$0xff] }
 0x1cd   :  { %v15260_v42 = vpop.permute.xlu1 %1271  ;;  %v15262_v26 = vpop.permute.xlu0 %1266 }
 0x1ce   :  { %20926 = vst [vmem:[#allocation143_spill] sm:$0xff] %v15260_v42  ;;  %20927 = vst [vmem:[#allocation144_spill] sm:$0xff] %v15262_v26  ;;  %1792 = vperm.xlu1 %14015, %v12004_v9   ;;  %1787 = vperm.xlu0 %14014, %v12003_v10   ;;  %v12008_v26 = vld [vmem:[%s20702_s0 + $0x248] sm:$0xff]  ;;  %v12007_v9 = vld [vmem:[%s20702_s0 + $0x240] sm:$0xff] }
 0x1d1   :  { %v15270_v49 = vpop.permute.xlu1 %1281  ;;  %v15272_v58 = vpop.permute.xlu0 %1276 }
 0x1d2   :  { %20928 = vst [vmem:[#allocation145_spill] sm:$0xff] %v15270_v49  ;;  %20929 = vst [vmem:[#allocation146_spill] sm:$0xff] %v15272_v58  ;;  %1802 = vperm.xlu1 %14015, %v12006_v62   ;;  %1797 = vperm.xlu0 %14014, %v12005_v2   ;;  %v12010_v58 = vld [vmem:[%s20702_s0 + $0x260] sm:$0xff]  ;;  %v12009_v62 = vld [vmem:[%s20702_s0 + $0x258] sm:$0xff] }
 0x1d5   :  { %v15280_v10 = vpop.permute.xlu1 %1291  ;;  %v15282_v42 = vpop.permute.xlu0 %1286 }
 0x1d6   :  { %20930 = vst [vmem:[#allocation147_spill] sm:$0xff] %v15280_v10  ;;  %20931 = vst [vmem:[#allocation148_spill] sm:$0xff] %v15282_v42  ;;  %1812 = vperm.xlu1 %14015, %v12008_v26   ;;  %1807 = vperm.xlu0 %14014, %v12007_v9   ;;  %v12012_v42 = vld [vmem:[%s20702_s0 + $0x278] sm:$0xff]  ;;  %v12011_v26 = vld [vmem:[%s20702_s0 + $0x270] sm:$0xff] }
 0x1d9   :  { %v15290_v2 = vpop.permute.xlu1 %1301  ;;  %v15292_v49 = vpop.permute.xlu0 %1296 }
 0x1da   :  { %20932 = vst [vmem:[#allocation149_spill] sm:$0xff] %v15290_v2  ;;  %20933 = vst [vmem:[#allocation150_spill] sm:$0xff] %v15292_v49  ;;  %1822 = vperm.xlu1 %14015, %v12010_v58   ;;  %1817 = vperm.xlu0 %14014, %v12009_v62   ;;  %v12014_v49 = vld [vmem:[%s20702_s0 + $0x290] sm:$0xff]  ;;  %v12013_v58 = vld [vmem:[%s20702_s0 + $0x288] sm:$0xff] }
 0x1dd   :  { %v15300_v9 = vpop.permute.xlu1 %1311  ;;  %v15302_v10 = vpop.permute.xlu0 %1306 }
 0x1de   :  { %20934 = vst [vmem:[#allocation151_spill] sm:$0xff] %v15300_v9  ;;  %20935 = vst [vmem:[#allocation152_spill] sm:$0xff] %v15302_v10  ;;  %1832 = vperm.xlu1 %14015, %v12012_v42   ;;  %1827 = vperm.xlu0 %14014, %v12011_v26   ;;  %v12016_v10 = vld [vmem:[%s20702_s0 + $0x2a8] sm:$0xff]  ;;  %v12015_v42 = vld [vmem:[%s20702_s0 + $0x2a0] sm:$0xff] }
 0x1e1   :  { %v15310_v62 = vpop.permute.xlu1 %1321  ;;  %v15312_v2 = vpop.permute.xlu0 %1316 }
 0x1e2   :  { %20936 = vst [vmem:[#allocation153_spill] sm:$0xff] %v15310_v62  ;;  %20937 = vst [vmem:[#allocation154_spill] sm:$0xff] %v15312_v2  ;;  %1842 = vperm.xlu1 %14015, %v12014_v49   ;;  %1837 = vperm.xlu0 %14014, %v12013_v58   ;;  %v12018_v62 = vld [vmem:[%s20702_s0 + $0x2c0] sm:$0xff]  ;;  %v12017_v49 = vld [vmem:[%s20702_s0 + $0x2b8] sm:$0xff] }
 0x1e5   :  { %v15320_v26 = vpop.permute.xlu1 %1331  ;;  %v15322_v9 = vpop.permute.xlu0 %1326 }
 0x1e6   :  { %20938 = vst [vmem:[#allocation155_spill] sm:$0xff] %v15320_v26  ;;  %20939 = vst [vmem:[#allocation156_spill] sm:$0xff] %v15322_v9  ;;  %1852 = vperm.xlu1 %14015, %v12016_v10   ;;  %1847 = vperm.xlu0 %14014, %v12015_v42   ;;  %v12020_v26 = vld [vmem:[%s20702_s0 + $0x2d8] sm:$0xff]  ;;  %v12019_v10 = vld [vmem:[%s20702_s0 + $0x2d0] sm:$0xff] }
 0x1e9   :  { %v15330_v58 = vpop.permute.xlu1 %1341  ;;  %v15332_v2 = vpop.permute.xlu0 %1336 }
 0x1ea   :  { %20940 = vst [vmem:[#allocation157_spill] sm:$0xff] %v15330_v58  ;;  %20941 = vst [vmem:[#allocation158_spill] sm:$0xff] %v15332_v2  ;;  %1862 = vperm.xlu1 %14015, %v12018_v62   ;;  %1857 = vperm.xlu0 %14014, %v12017_v49   ;;  %v12022_v58 = vld [vmem:[%s20702_s0 + $0x2f0] sm:$0xff]  ;;  %v12021_v62 = vld [vmem:[%s20702_s0 + $0x2e8] sm:$0xff] }
 0x1ed   :  { %v15340_v42 = vpop.permute.xlu1 %1351  ;;  %v15342_v9 = vpop.permute.xlu0 %1346 }
 0x1ee   :  { %20942 = vst [vmem:[#allocation159_spill] sm:$0xff] %v15340_v42  ;;  %20943 = vst [vmem:[#allocation160_spill] sm:$0xff] %v15342_v9  ;;  %1872 = vperm.xlu1 %14015, %v12020_v26   ;;  %1867 = vperm.xlu0 %14014, %v12019_v10   ;;  %v12024_v42 = vld [vmem:[%s20702_s0 + $0x308] sm:$0xff]  ;;  %v12023_v26 = vld [vmem:[%s20702_s0 + $0x300] sm:$0xff] }
 0x1f1   :  { %v15350_v49 = vpop.permute.xlu1 %1361  ;;  %v15352_v2 = vpop.permute.xlu0 %1356 }
 0x1f2   :  { %20944 = vst [vmem:[#allocation161_spill] sm:$0xff] %v15350_v49  ;;  %20945 = vst [vmem:[#allocation162_spill] sm:$0xff] %v15352_v2  ;;  %1882 = vperm.xlu1 %14015, %v12022_v58   ;;  %1877 = vperm.xlu0 %14014, %v12021_v62   ;;  %v12026_v49 = vld [vmem:[%s20702_s0 + $0x320] sm:$0xff]  ;;  %v12025_v58 = vld [vmem:[%s20702_s0 + $0x318] sm:$0xff] }
 0x1f5   :  { %v15360_v10 = vpop.permute.xlu1 %1371  ;;  %v15362_v9 = vpop.permute.xlu0 %1366 }
 0x1f6   :  { %20946 = vst [vmem:[#allocation163_spill] sm:$0xff] %v15360_v10  ;;  %20947 = vst [vmem:[#allocation164_spill] sm:$0xff] %v15362_v9  ;;  %1892 = vperm.xlu1 %14015, %v12024_v42   ;;  %1887 = vperm.xlu0 %14014, %v12023_v26   ;;  %v12028_v10 = vld [vmem:[%s20702_s0 + $0x338] sm:$0xff]  ;;  %v12027_v42 = vld [vmem:[%s20702_s0 + $0x330] sm:$0xff] }
 0x1f9   :  { %v15370_v62 = vpop.permute.xlu1 %1381  ;;  %v15372_v2 = vpop.permute.xlu0 %1376 }
 0x1fa   :  { %20948 = vst [vmem:[#allocation165_spill] sm:$0xff] %v15370_v62  ;;  %20949 = vst [vmem:[#allocation166_spill] sm:$0xff] %v15372_v2  ;;  %1902 = vperm.xlu1 %14015, %v12026_v49   ;;  %1897 = vperm.xlu0 %14014, %v12025_v58   ;;  %v12032_v62 = vld [vmem:[%s20702_s0 + $0x21] sm:$0xff]  ;;  %v12031_v49 = vld [vmem:[%s20702_s0 + $0x19] sm:$0xff] }
 0x1fd   :  { %v15380_v26 = vpop.permute.xlu1 %1391  ;;  %v15382_v9 = vpop.permute.xlu0 %1386 }
 0x1fe   :  { %20950 = vst [vmem:[#allocation167_spill] sm:$0xff] %v15380_v26  ;;  %20951 = vst [vmem:[#allocation168_spill] sm:$0xff] %v15382_v9  ;;  %1912 = vperm.xlu1 %14015, %v12028_v10   ;;  %1907 = vperm.xlu0 %14014, %v12027_v42   ;;  %v15397_v26 = vld [vmem:[%s20702_s0 + $0x39] sm:$0xff]  ;;  %v15402_v10 = vld [vmem:[%s20702_s0 + $0x31] sm:$0xff] }
 0x201   :  { %v15390_v58 = vpop.permute.xlu1 %1602  ;;  %v15392_v2 = vpop.permute.xlu0 %1597 }
 0x202   :  { %20952 = vst [vmem:[#allocation169_spill] sm:$0xff] %v15390_v58  ;;  %20953 = vst [vmem:[#allocation170_spill] sm:$0xff] %v15392_v2  ;;  %2122 = vperm.xlu1 %14015, %v12032_v62   ;;  %2117 = vperm.xlu0 %14014, %v12031_v49   ;;  %v15413_v62 = vld [vmem:[%s20702_s0 + $0x51] sm:$0xff]  ;;  %v15418_v49 = vld [vmem:[%s20702_s0 + $0x49] sm:$0xff] }
 0x205   :  { %v15404_v42 = vpop.permute.xlu1 %1612  ;;  %v15406_v9 = vpop.permute.xlu0 %1607 }
 0x206   :  { %20954 = vst [vmem:[#allocation171_spill] sm:$0xff] %v15404_v42  ;;  %20955 = vst [vmem:[#allocation172_spill] sm:$0xff] %v15406_v9  ;;  %2132 = vperm.xlu1 %14015, %v15397_v26   ;;  %2127 = vperm.xlu0 %14014, %v15402_v10   ;;  %v15429_v42 = vld [vmem:[%s20702_s0 + $0x69] sm:$0xff] }
 0x209   :  { %v15420_v58 = vpop.permute.xlu1 %1622  ;;  %v15422_v57 = vpop.permute.xlu0 %1617 }
 0x20a   :  { %20956 = vst [vmem:[#allocation173_spill] sm:$0xff] %v15420_v58  ;;  %20957 = vst [vmem:[#allocation174_spill] sm:$0xff] %v15422_v57  ;;  %2142 = vperm.xlu1 %14015, %v15413_v62   ;;  %2137 = vperm.xlu0 %14014, %v15418_v49   ;;  %v15445_v58 = vld [vmem:[%s20702_s0 + $0x81] sm:$0xff]  ;;  %v15450_v57 = vld [vmem:[%s20702_s0 + $0x79] sm:$0xff] }
 0x20d   :  { %v15436_v45 = vpop.permute.xlu1 %1632  ;;  %v15438_v38 = vpop.permute.xlu0 %1627 }
 0x20e   :  { %20958 = vst [vmem:[#allocation175_spill] sm:$0xff] %v15436_v45  ;;  %20959 = vst [vmem:[#allocation176_spill] sm:$0xff] %v15438_v38  ;;  %2152 = vperm.xlu1 %14015, %v15429_v42   ;;  %2147 = vperm.xlu0 %14014, %v15434_v46   ;;  %v15461_v45 = vld [vmem:[%s20702_s0 + $0x99] sm:$0xff]  ;;  %v15466_v38 = vld [vmem:[%s20702_s0 + $0x91] sm:$0xff] }
 0x211   :  { %v15452_v2 = vpop.permute.xlu1 %1642  ;;  %v15454_v17 = vpop.permute.xlu0 %1637 }
 0x212   :  { %20960 = vst [vmem:[#allocation177_spill] sm:$0xff] %v15452_v2  ;;  %20961 = vst [vmem:[#allocation178_spill] sm:$0xff] %v15454_v17  ;;  %2162 = vperm.xlu1 %14015, %v15445_v58   ;;  %2157 = vperm.xlu0 %14014, %v15450_v57   ;;  %v15477_v2 = vld [vmem:[%s20702_s0 + $0xb1] sm:$0xff]  ;;  %v15482_v17 = vld [vmem:[%s20702_s0 + $0xa9] sm:$0xff] }
 0x215   :  { %v15468_v33 = vpop.permute.xlu1 %1652  ;;  %v15470_v9 = vpop.permute.xlu0 %1647 }
 0x216   :  { %20962 = vst [vmem:[#allocation179_spill] sm:$0xff] %v15468_v33  ;;  %20963 = vst [vmem:[#allocation180_spill] sm:$0xff] %v15470_v9  ;;  %2172 = vperm.xlu1 %14015, %v15461_v45   ;;  %2167 = vperm.xlu0 %14014, %v15466_v38   ;;  %v12046_v33 = vld [vmem:[%s20702_s0 + $0xc9] sm:$0xff]  ;;  %v15496_v9 = vld [vmem:[%s20702_s0 + $0xc1] sm:$0xff] }
 0x219   :  { %v15484_v1 = vpop.permute.xlu1 %1662  ;;  %v15486_v63 = vpop.permute.xlu0 %1657 }
 0x21a   :  { %20964 = vst [vmem:[#allocation181_spill] sm:$0xff] %v15484_v1  ;;  %20965 = vst [vmem:[#allocation182_spill] sm:$0xff] %v15486_v63  ;;  %2182 = vperm.xlu1 %14015, %v15477_v2   ;;  %2177 = vperm.xlu0 %14014, %v15482_v17   ;;  %v12048_v1 = vld [vmem:[%s20702_s0 + $0xe1] sm:$0xff]  ;;  %v15509_v63 = vld [vmem:[%s20702_s0 + $0xd9] sm:$0xff] }
 0x21d   :  { %v15498_v37 = vpop.permute.xlu1 %1672  ;;  %v15500_v30 = vpop.permute.xlu0 %1667 }
 0x21e   :  { %20966 = vst [vmem:[#allocation183_spill] sm:$0xff] %v15498_v37  ;;  %20967 = vst [vmem:[#allocation184_spill] sm:$0xff] %v15500_v30  ;;  %2192 = vperm.xlu1 %14015, %v12046_v33   ;;  %2187 = vperm.xlu0 %14014, %v15496_v9   ;;  %v12050_v33 = vld [vmem:[%s20702_s0 + $0xf9] sm:$0xff]  ;;  %v15522_v37 = vld [vmem:[%s20702_s0 + $0xf1] sm:$0xff] }
 0x221   :  { %v15511_v29 = vpop.permute.xlu1 %1682  ;;  %v15513_v53 = vpop.permute.xlu0 %1677 }
 0x222   :  { %20968 = vst [vmem:[#allocation185_spill] sm:$0xff] %v15511_v29  ;;  %20969 = vst [vmem:[#allocation186_spill] sm:$0xff] %v15513_v53  ;;  %2202 = vperm.xlu1 %14015, %v12048_v1   ;;  %2197 = vperm.xlu0 %14014, %v15509_v63   ;;  %v12052_v1 = vld [vmem:[%s20702_s0 + $0x111] sm:$0xff]  ;;  %v15535_v53 = vld [vmem:[%s20702_s0 + $0x109] sm:$0xff] }
 0x225   :  { %v15524_v30 = vpop.permute.xlu1 %1692  ;;  %v15526_v22 = vpop.permute.xlu0 %1687 }
 0x226   :  { %20970 = vst [vmem:[#allocation187_spill] sm:$0xff] %v15524_v30  ;;  %20971 = vst [vmem:[#allocation188_spill] sm:$0xff] %v15526_v22  ;;  %2212 = vperm.xlu1 %14015, %v12050_v33   ;;  %2207 = vperm.xlu0 %14014, %v15522_v37   ;;  %v12054_v33 = vld [vmem:[%s20702_s0 + $0x129] sm:$0xff]  ;;  %v15548_v22 = vld [vmem:[%s20702_s0 + $0x121] sm:$0xff] }
 0x229   :  { %v15537_v29 = vpop.permute.xlu1 %1702  ;;  %v15539_v21 = vpop.permute.xlu0 %1697 }
 0x22a   :  { %20972 = vst [vmem:[#allocation189_spill] sm:$0xff] %v15537_v29  ;;  %20973 = vst [vmem:[#allocation190_spill] sm:$0xff] %v15539_v21  ;;  %2222 = vperm.xlu1 %14015, %v12052_v1   ;;  %2217 = vperm.xlu0 %14014, %v15535_v53   ;;  %v12056_v1 = vld [vmem:[%s20702_s0 + $0x141] sm:$0xff]  ;;  %v15561_v21 = vld [vmem:[%s20702_s0 + $0x139] sm:$0xff] }
 0x22b   :  { %20976 = vst [vmem:[#allocation193_spill] sm:$0xff] %v15561_v21 }
 0x22d   :  { %v15550_v30 = vpop.permute.xlu1 %1712  ;;  %v15552_v14 = vpop.permute.xlu0 %1707 }
 0x22e   :  { %20974 = vst [vmem:[#allocation191_spill] sm:$0xff] %v15550_v30  ;;  %20975 = vst [vmem:[#allocation192_spill] sm:$0xff] %v15552_v14  ;;  %2232 = vperm.xlu1 %14015, %v12054_v33   ;;  %2227 = vperm.xlu0 %14014, %v15548_v22   ;;  %v12058_v33 = vld [vmem:[%s20702_s0 + $0x159] sm:$0xff]  ;;  %v12057_v14 = vld [vmem:[%s20702_s0 + $0x151] sm:$0xff] }
 0x231   :  { %v15563_v29 = vpop.permute.xlu1 %1722  ;;  %v15565_v41 = vpop.permute.xlu0 %1717 }
 0x232   :  { %20977 = vst [vmem:[#allocation194_spill] sm:$0xff] %v15563_v29  ;;  %20978 = vst [vmem:[#allocation195_spill] sm:$0xff] %v15565_v41  ;;  %2242 = vperm.xlu1 %14015, %v12056_v1   ;;  %2237 = vperm.xlu0 %14014, %v15561_v21   ;;  %v12097_v1 = vld [vmem:[%s20702_s0 + $0x1a] sm:$0xff]  ;;  %v12059_v41 = vld [vmem:[%s20702_s0 + $0x169] sm:$0xff] }
 0x235   :  { %v15574_v30 = vpop.permute.xlu1 %1732  ;;  %v15576_v13 = vpop.permute.xlu0 %1727 }
 0x236   :  { %20979 = vst [vmem:[#allocation196_spill] sm:$0xff] %v15574_v30  ;;  %20980 = vst [vmem:[#allocation197_spill] sm:$0xff] %v15576_v13  ;;  %2252 = vperm.xlu1 %14015, %v12058_v33   ;;  %2247 = vperm.xlu0 %14014, %v12057_v14   ;;  %v12099_v13 = vld [vmem:[%s20702_s0 + $0x32] sm:$0xff]  ;;  %v12101_v30 = vld [vmem:[%s20702_s0 + $0x4a] sm:$0xff] }
 0x239   :  { %v15584_v29 = vpop.permute.xlu1 %1742  ;;  %v15586_v6 = vpop.permute.xlu0 %1737 }
 0x23a   :  { %20981 = vst [vmem:[#allocation198_spill] sm:$0xff] %v15584_v29  ;;  %20982 = vst [vmem:[#allocation199_spill] sm:$0xff] %v15586_v6  ;;  %2637 = vperm.xlu1 %14015, %v12097_v1   ;;  %2257 = vperm.xlu0 %14014, %v12059_v41   ;;  %v12098_v41 = vld [vmem:[%s20702_s0 + $0x22] sm:$0xff] }
 0x23d   :  { %v15591_v33 = vpop.permute.xlu1 %1752  ;;  %v15593_v14 = vpop.permute.xlu0 %1747 }
 0x23e   :  { %20983 = vst [vmem:[#allocation200_spill] sm:$0xff] %v15591_v33  ;;  %20984 = vst [vmem:[#allocation201_spill] sm:$0xff] %v15593_v14  ;;  %3158 = vperm.xlu1 %14015, %v15062_v25   ;;  %2647 = vperm.xlu0 %14014, %v12099_v13   ;;  %v15610_v25 = vld [vmem:[%s20702_s0 + $0x62] sm:$0xff]  ;;  %v15625_v14 = vld [vmem:[%s20702_s0 + $0x3a] sm:$0xff] }
 0x241   :  { %v15599_v29 = vpop.permute.xlu1 %1762  ;;  %v15601_v6 = vpop.permute.xlu0 %1757 }
 0x242   :  { %20985 = vst [vmem:[#allocation202_spill] sm:$0xff] %v15599_v29  ;;  %20986 = vst [vmem:[#allocation203_spill] sm:$0xff] %v15601_v6  ;;  %2657 = vperm.xlu1 %14015, %v12101_v30   ;;  %3168 = vperm.xlu0 %14014, %v15075_v59   ;;  %v15620_v59 = vld [vmem:[%s20702_s0 + $0x7a] sm:$0xff] }
 0x245   :  { %v15612_v1 = vpop.permute.xlu1 %1772  ;;  %v15614_v33 = vpop.permute.xlu0 %1767 }
 0x246   :  { %20987 = vst [vmem:[#allocation204_spill] sm:$0xff] %v15612_v1  ;;  %20988 = vst [vmem:[#allocation205_spill] sm:$0xff] %v15614_v33  ;;  %2642 = vperm.xlu1 %14015, %v12098_v41   ;;  %2667 = vperm.xlu0 %14014, %v15610_v25   ;;  %v15636_v41 = vld [vmem:[%s20702_s0 + $0x92] sm:$0xff] }
 0x249   :  { %v15627_v6 = vpop.permute.xlu1 %1782  ;;  %v15629_v29 = vpop.permute.xlu0 %1777 }
 0x24a   :  { %20989 = vst [vmem:[#allocation206_spill] sm:$0xff] %v15627_v6  ;;  %20990 = vst [vmem:[#allocation207_spill] sm:$0xff] %v15629_v29  ;;  %2677 = vperm.xlu1 %14015, %v15620_v59   ;;  %2652 = vperm.xlu0 %14014, %v15625_v14  }
 0x24d   :  { %v15638_v33 = vpop.permute.xlu1 %1792  ;;  %v15640_v1 = vpop.permute.xlu0 %1787 }
 0x24e   :  { %20991 = vst [vmem:[#allocation208_spill] sm:$0xff] %v15638_v33  ;;  %20992 = vst [vmem:[#allocation209_spill] sm:$0xff] %v15640_v1  ;;  %3678 = vperm.xlu1 %14015, %v15402_v10   ;;  %2687 = vperm.xlu0 %14014, %v15636_v41   ;;  %v12166_v10 = vld [vmem:[%s20702_s0 + $0x50] sm:$0xff] }
 0x251   :  { %v15644_v6 = vpop.permute.xlu1 %1802  ;;  %v15646_v29 = vpop.permute.xlu0 %1797 }
 0x252   :  { %20993 = vst [vmem:[#allocation210_spill] sm:$0xff] %v15644_v6  ;;  %20994 = vst [vmem:[#allocation211_spill] sm:$0xff] %v15646_v29  ;;  %3178 = vperm.xlu1 %14015, %v15088_v54   ;;  %3688 = vperm.xlu0 %14014, %v15418_v49  }
 0x255   :  { %v15653_v21 = vpop.permute.xlu1 %1812  ;;  %v15655_v33 = vpop.permute.xlu0 %1807 }
 0x256   :  { %20995 = vst [vmem:[#allocation212_spill] sm:$0xff] %v15653_v21  ;;  %20996 = vst [vmem:[#allocation213_spill] sm:$0xff] %v15655_v33  ;;  %3163 = vperm.xlu1 %14015, %v12164_v5   ;;  %3188 = vperm.xlu0 %14014, %v15101_v61   ;;  %v15674_v5 = vld [vmem:[%s20702_s0 + $0x52] sm:$0xff] }
 0x259   :  { %v15661_v29 = vpop.permute.xlu1 %1822  ;;  %v15663_v54 = vpop.permute.xlu0 %1817 }
 0x25a   :  { %20997 = vst [vmem:[#allocation214_spill] sm:$0xff] %v15661_v29  ;;  %20998 = vst [vmem:[#allocation215_spill] sm:$0xff] %v15663_v54  ;;  %3198 = vperm.xlu1 %14015, %v15114_v18   ;;  %3173 = vperm.xlu0 %14014, %v12166_v10   ;;  %v15684_v18 = vld [vmem:[%s20702_s0 + $0xaa] sm:$0xff] }
 0x25b   :  { %v12168_v54 = vld [vmem:[%s20702_s0 + $0x68] sm:$0xff] }
 0x25d   :  { %v15666_v49 = vpop.permute.xlu1 %1832  ;;  %v15668_v6 = vpop.permute.xlu0 %1827 }
 0x25e   :  { %20999 = vst [vmem:[#allocation216_spill] sm:$0xff] %v15666_v49  ;;  %21000 = vst [vmem:[#allocation217_spill] sm:$0xff] %v15668_v6  ;;  %4198 = vperm.xlu1 %14015, %v12099_v13   ;;  %3208 = vperm.xlu0 %14014, %v15127_v34   ;;  %v15689_v13 = vld [vmem:[%s20702_s0 + $0x6a] sm:$0xff] }
 0x261   :  { %v15676_v61 = vpop.permute.xlu1 %1842  ;;  %v15678_v29 = vpop.permute.xlu0 %1837 }
 0x262   :  { %21001 = vst [vmem:[#allocation218_spill] sm:$0xff] %v15676_v61  ;;  %21002 = vst [vmem:[#allocation219_spill] sm:$0xff] %v15678_v29  ;;  %2662 = vperm.xlu1 %14015, %v15674_v5   ;;  %4208 = vperm.xlu0 %14014, %v12101_v30   ;;  %v15700_v30 = vld [vmem:[%s20702_s0 + $0xc2] sm:$0xff] }
 0x265   :  { %v15691_v34 = vpop.permute.xlu1 %1852  ;;  %v15693_v10 = vpop.permute.xlu0 %1847 }
 0x266   :  { %21003 = vst [vmem:[#allocation220_spill] sm:$0xff] %v15691_v34  ;;  %21004 = vst [vmem:[#allocation221_spill] sm:$0xff] %v15693_v10  ;;  %2697 = vperm.xlu1 %14015, %v15684_v18   ;;  %2672 = vperm.xlu0 %14014, %v15689_v13   ;;  %v15711_v34 = vld [vmem:[%s20702_s0 + $0x82] sm:$0xff] }
 0x269   :  { %v15702_v61 = vpop.permute.xlu1 %1862  ;;  %v15704_v29 = vpop.permute.xlu0 %1857 }
 0x26a   :  { %21005 = vst [vmem:[#allocation222_spill] sm:$0xff] %v15702_v61  ;;  %21006 = vst [vmem:[#allocation223_spill] sm:$0xff] %v15704_v29  ;;  %3698 = vperm.xlu1 %14015, %v15434_v46   ;;  %2707 = vperm.xlu0 %14014, %v15700_v30   ;;  %v15722_v61 = vld [vmem:[%s20702_s0 + $0xda] sm:$0xff] }
 0x26b   :  { %v15727_v46 = vld [vmem:[%s20702_s0 + $0x9a] sm:$0xff] }
 0x26d   :  { %v15713_v10 = vpop.permute.xlu1 %1872  ;;  %v15715_v6 = vpop.permute.xlu0 %1867 }
 0x26e   :  { %21007 = vst [vmem:[#allocation224_spill] sm:$0xff] %v15713_v10  ;;  %21008 = vst [vmem:[#allocation225_spill] sm:$0xff] %v15715_v6  ;;  %2682 = vperm.xlu1 %14015, %v15711_v34   ;;  %3708 = vperm.xlu0 %14014, %v15450_v57   ;;  %v15738_v57 = vld [vmem:[%s20702_s0 + $0xf2] sm:$0xff] }
 0x271   :  { %v15729_v29 = vpop.permute.xlu1 %1882  ;;  %v15731_v49 = vpop.permute.xlu0 %1877 }
 0x272   :  { %21009 = vst [vmem:[#allocation226_spill] sm:$0xff] %v15729_v29  ;;  %21010 = vst [vmem:[#allocation227_spill] sm:$0xff] %v15731_v49  ;;  %2717 = vperm.xlu1 %14015, %v15722_v61   ;;  %2692 = vperm.xlu0 %14014, %v15727_v46  }
 0x275   :  { %v15740_v10 = vpop.permute.xlu1 %1892  ;;  %v15742_v6 = vpop.permute.xlu0 %1887 }
 0x276   :  { %21011 = vst [vmem:[#allocation228_spill] sm:$0xff] %v15740_v10  ;;  %21012 = vst [vmem:[#allocation229_spill] sm:$0xff] %v15742_v6  ;;  %3683 = vperm.xlu1 %14015, %v15397_v26   ;;  %2727 = vperm.xlu0 %14014, %v15738_v57   ;;  %v12175_v26 = vld [vmem:[%s20702_s0 + $0xc0] sm:$0xff] }
 0x279   :  { %v15746_v29 = vpop.permute.xlu1 %1902  ;;  %v15748_v49 = vpop.permute.xlu0 %1897 }
 0x27a   :  { %21013 = vst [vmem:[#allocation230_spill] sm:$0xff] %v15746_v29  ;;  %21014 = vst [vmem:[#allocation231_spill] sm:$0xff] %v15748_v49  ;;  %3718 = vperm.xlu1 %14015, %v15466_v38   ;;  %3693 = vperm.xlu0 %14014, %v15413_v62   ;;  %v12170_v38 = vld [vmem:[%s20702_s0 + $0x80] sm:$0xff]  ;;  %v12172_v49 = vld [vmem:[%s20702_s0 + $0x98] sm:$0xff] }
 0x27d   :  { %v15755_v33 = vpop.permute.xlu1 %1912  ;;  %v15757_v10 = vpop.permute.xlu0 %1907 }
 0x27e   :  { %21015 = vst [vmem:[#allocation232_spill] sm:$0xff] %v15755_v33  ;;  %21016 = vst [vmem:[#allocation233_spill] sm:$0xff] %v15757_v10  ;;  %3183 = vperm.xlu1 %14015, %v12168_v54   ;;  %3728 = vperm.xlu0 %14014, %v15482_v17   ;;  %v12177_v54 = vld [vmem:[%s20702_s0 + $0xd8] sm:$0xff] }
 0x281   :  { %v15766_v62 = vpop.permute.xlu1 %2122  ;;  %v15768_v29 = vpop.permute.xlu0 %2117 }
 0x282   :  { %21017 = vst [vmem:[#allocation234_spill] sm:$0xff] %v15766_v62  ;;  %3218 = vperm.xlu1 %14015, %v12175_v26   ;;  %3193 = vperm.xlu0 %14014, %v12170_v38   ;;  %v12179_v26 = vld [vmem:[%s20702_s0 + $0xf0] sm:$0xff]  ;;  %v21088_v62 = vld [vmem:[#allocation16_spill] sm:$0xff] }
 0x285   :  { %v15773_v33 = vpop.permute.xlu1 %2132  ;;  %v15775_v17 = vpop.permute.xlu0 %2127 }
 0x286   :  { %21018 = vst [vmem:[#allocation235_spill] sm:$0xff] %v15773_v33  ;;  %4218 = vperm.xlu1 %14015, %v15610_v25   ;;  %3228 = vperm.xlu0 %14014, %v12177_v54   ;;  %v12174_v25 = vld [vmem:[%s20702_s0 + $0xb0] sm:$0xff]  ;;  %v16377_v33 = vld [vmem:[%s20703_s1 + $0x3] ss:$0 sm:$0xff] }
 0x289   :  { %v15781_v10 = vpop.permute.xlu1 %2142  ;;  %v15783_v6 = vpop.permute.xlu0 %2137 }
 0x28a   :  { %21019 = vst [vmem:[#allocation236_spill] sm:$0xff] %v15781_v10  ;;  %21020 = vst [vmem:[#allocation237_spill] sm:$0xff] %v15783_v6  ;;  %3203 = vperm.xlu1 %14015, %v12172_v49   ;;  %4228 = vperm.xlu0 %14014, %v15620_v59   ;;  %v12181_v49 = vld [vmem:[%s20702_s0 + $0x108] sm:$0xff] }
 0x28d   :  { %v15792_v38 = vpop.permute.xlu1 %2152  ;;  %v15794_v54 = vpop.permute.xlu0 %2147 }
 0x28e   :  { %21021 = vst [vmem:[#allocation238_spill] sm:$0xff] %v15792_v38  ;;  %21022 = vst [vmem:[#allocation239_spill] sm:$0xff] %v15794_v54  ;;  %3238 = vperm.xlu1 %14015, %v12179_v26   ;;  %3213 = vperm.xlu0 %14014, %v12174_v25   ;;  %v15813_v26 = vld [vmem:[%s20702_s0 + $0xb2] sm:$0xff]  ;;  %v20715_v38 = vmov 0.0  }
 0x28f   :  { %6190 = vst.msk [vmem:[#allocation2] sm:$0xff] %vm6189_vm0, %v20715_v38  ;;  %6193 = vst.msk [vmem:[#allocation2 + $0xa0] sm:$0xff] %vm6189_vm0, %v20715_v38 }
 0x290   :  { %6192 = vst.msk [vmem:[#allocation2 + $0x8] sm:$0x3] %vm6191_vm1, %v20715_v38  ;;  %6194 = vst.msk [vmem:[#allocation2 + $0xa8] sm:$0x3] %vm6191_vm1, %v20715_v38 }
 0x291   :  { %v15799_v21 = vpop.permute.xlu1 %2162  ;;  %v15801_v59 = vpop.permute.xlu0 %2157  ;;  %6196 = vst.msk [vmem:[#allocation2 + $0x90] sm:$0xff] %vm6189_vm0, %v20715_v38  ;;  %6198 = vst.msk [vmem:[#allocation2 + $0x130] sm:$0xff] %vm6189_vm0, %v20715_v38 }
 0x292   :  { %21023 = vst [vmem:[#allocation240_spill] sm:$0xff] %v15799_v21  ;;  %21024 = vst [vmem:[#allocation241_spill] sm:$0xff] %v15801_v59  ;;  %4203 = vperm.xlu1 %14015, %v15625_v14   ;;  %3248 = vperm.xlu0 %14014, %v12181_v49   ;;  %v15824_v14 = vld [vmem:[%s20702_s0 + $0x10a] sm:$0xff] }
 0x293   :  { %6197 = vst.msk [vmem:[#allocation2 + $0x98] sm:$0x3] %vm6191_vm1, %v20715_v38  ;;  %6199 = vst.msk [vmem:[#allocation2 + $0x138] sm:$0x3] %vm6191_vm1, %v20715_v38  ;;  %v15937_v59 = vld [vmem:[%s20705_s3 + $0x50] sm:$0xff] }
 0x294   :  { %6221 = vst.msk [vmem:[#allocation2 + $0x9] sm:$0x1] %vm6200_vm2, %v20715_v38  ;;  %6201 = vst.msk [vmem:[#allocation2] sm:$0x1] %vm6200_vm2, %v20715_v38 }
 0x295   :  { %v15804_v1 = vpop.permute.xlu1 %2172  ;;  %v15806_v10 = vpop.permute.xlu0 %2167  ;;  %6202 = vst.msk [vmem:[#allocation2 + $0x10] sm:$0x1] %vm6200_vm2, %v20715_v38  ;;  %6203 = vst.msk [vmem:[#allocation2 + $0x20] sm:$0x1] %vm6200_vm2, %v20715_v38 }
 0x296   :  { %21025 = vst [vmem:[#allocation242_spill] sm:$0xff] %v15804_v1  ;;  %21026 = vst [vmem:[#allocation243_spill] sm:$0xff] %v15806_v10  ;;  %4238 = vperm.xlu1 %14015, %v15636_v41   ;;  %4213 = vperm.xlu0 %14014, %v15674_v5   ;;  %v15829_v41 = vld [vmem:[%s20702_s0 + $0xca] sm:$0xff]  ;;  %v15857_v1 = vld [vmem:[%s20702_s0 + $0xe2] sm:$0xff] }
 0x297   :  { %21035 = vst [vmem:[#allocation252_spill] sm:$0xff] %v15857_v1  ;;  %6204 = vst.msk [vmem:[#allocation2 + $0x30] sm:$0x1] %vm6200_vm2, %v20715_v38 }
 0x298   :  { %6205 = vst.msk [vmem:[#allocation2 + $0x40] sm:$0x1] %vm6200_vm2, %v20715_v38  ;;  %6206 = vst.msk [vmem:[#allocation2 + $0x50] sm:$0x1] %vm6200_vm2, %v20715_v38 }
 0x299   :  { %v15815_v25 = vpop.permute.xlu1 %2182  ;;  %v15817_v21 = vpop.permute.xlu0 %2177  ;;  %6207 = vst.msk [vmem:[#allocation2 + $0x60] sm:$0x1] %vm6200_vm2, %v20715_v38  ;;  %6208 = vst.msk [vmem:[#allocation2 + $0x70] sm:$0x1] %vm6200_vm2, %v20715_v38 }
 0x29a   :  { %21027 = vst [vmem:[#allocation244_spill] sm:$0xff] %v15815_v25  ;;  %21028 = vst [vmem:[#allocation245_spill] sm:$0xff] %v15817_v21  ;;  %2702 = vperm.xlu1 %14015, %v15813_v26   ;;  %4248 = vperm.xlu0 %14014, %v15684_v18   ;;  %v15840_v18 = vld [vmem:[%s20702_s0 + $0x122] sm:$0xff] }
 0x29b   :  { %6209 = vst.msk [vmem:[#allocation2 + $0x80] sm:$0x1] %vm6200_vm2, %v20715_v38  ;;  %6210 = vst.msk [vmem:[#allocation2 + $0x90] sm:$0x1] %vm6200_vm2, %v20715_v38 }
 0x29c   :  { %6211 = vst.msk [vmem:[#allocation2 + $0xa0] sm:$0x1] %vm6200_vm2, %v20715_v38  ;;  %6212 = vst.msk [vmem:[#allocation2 + $0xb0] sm:$0x1] %vm6200_vm2, %v20715_v38 }
 0x29d   :  { %v15831_v5 = vpop.permute.xlu1 %2192  ;;  %v15833_v49 = vpop.permute.xlu0 %2187  ;;  %6213 = vst.msk [vmem:[#allocation2 + $0xc0] sm:$0x1] %vm6200_vm2, %v20715_v38  ;;  %6214 = vst.msk [vmem:[#allocation2 + $0xd0] sm:$0x1] %vm6200_vm2, %v20715_v38 }
 0x29e   :  { %21029 = vst [vmem:[#allocation246_spill] sm:$0xff] %v15831_v5  ;;  %21030 = vst [vmem:[#allocation247_spill] sm:$0xff] %v15833_v49  ;;  %2737 = vperm.xlu1 %14015, %v15824_v14   ;;  %2712 = vperm.xlu0 %14014, %v15829_v41  }
 0x29f   :  { %6215 = vst.msk [vmem:[#allocation2 + $0xe0] sm:$0x1] %vm6200_vm2, %v20715_v38  ;;  %6216 = vst.msk [vmem:[#allocation2 + $0xf0] sm:$0x1] %vm6200_vm2, %v20715_v38 }
 0x2a0   :  { %6217 = vst.msk [vmem:[#allocation2 + $0x100] sm:$0x1] %vm6200_vm2, %v20715_v38  ;;  %6218 = vst.msk [vmem:[#allocation2 + $0x110] sm:$0x1] %vm6200_vm2, %v20715_v38 }
 0x2a1   :  { %v15842_v25 = vpop.permute.xlu1 %2202  ;;  %v15844_v21 = vpop.permute.xlu0 %2197  ;;  %6219 = vst.msk [vmem:[#allocation2 + $0x120] sm:$0x1] %vm6200_vm2, %v20715_v38  ;;  %6220 = vst.msk [vmem:[#allocation2 + $0x130] sm:$0x1] %vm6200_vm2, %v20715_v38 }
 0x2a2   :  { %21031 = vst [vmem:[#allocation248_spill] sm:$0xff] %v15842_v25  ;;  %21032 = vst [vmem:[#allocation249_spill] sm:$0xff] %v15844_v21  ;;  %3703 = vperm.xlu1 %14015, %v15429_v42   ;;  %2747 = vperm.xlu0 %14014, %v15840_v18   ;;  %v15868_v42 = vld [vmem:[%s20702_s0 + $0x13a] sm:$0xff] }
 0x2a3   :  { %21038 = vst [vmem:[#allocation255_spill] sm:$0xff] %v15868_v42  ;;  %6222 = vst.msk [vmem:[#allocation2 + $0x19] sm:$0x1] %vm6200_vm2, %v20715_v38 }
 0x2a4   :  { %6223 = vst.msk [vmem:[#allocation2 + $0x29] sm:$0x1] %vm6200_vm2, %v20715_v38  ;;  %6224 = vst.msk [vmem:[#allocation2 + $0x39] sm:$0x1] %vm6200_vm2, %v20715_v38 }
 0x2a5   :  { %v15848_v5 = vpop.permute.xlu1 %2212  ;;  %v15850_v49 = vpop.permute.xlu0 %2207  ;;  %6225 = vst.msk [vmem:[#allocation2 + $0x49] sm:$0x1] %vm6200_vm2, %v20715_v38  ;;  %6226 = vst.msk [vmem:[#allocation2 + $0x59] sm:$0x1] %vm6200_vm2, %v20715_v38 }
 0x2a6   :  { %21033 = vst [vmem:[#allocation250_spill] sm:$0xff] %v15848_v5  ;;  %21034 = vst [vmem:[#allocation251_spill] sm:$0xff] %v15850_v49  ;;  %3738 = vperm.xlu1 %14015, %v15496_v9   ;;  %3713 = vperm.xlu0 %14014, %v15445_v58   ;;  %v15873_v9 = vld [vmem:[%s20702_s0 + $0xfa] sm:$0xff] }
 0x2a7   :  { %21039 = vst [vmem:[#allocation256_spill] sm:$0xff] %v15873_v9  ;;  %v12526_v49 = vld [vmem:[%s20705_s3 + $0x40] sm:$0xff]  ;;  %6227 = vst.msk [vmem:[#allocation2 + $0x69] sm:$0x1] %vm6200_vm2, %v20715_v38 }
 0x2a8   :  { %6228 = vst.msk [vmem:[#allocation2 + $0x79] sm:$0x1] %vm6200_vm2, %v20715_v38  ;;  %6229 = vst.msk [vmem:[#allocation2 + $0x89] sm:$0x1] %vm6200_vm2, %v20715_v38 }
 0x2a9   :  { %v15859_v25 = vpop.permute.xlu1 %2222  ;;  %v15861_v21 = vpop.permute.xlu0 %2217  ;;  %6230 = vst.msk [vmem:[#allocation2 + $0x99] sm:$0x1] %vm6200_vm2, %v20715_v38  ;;  %6231 = vst.msk [vmem:[#allocation2 + $0xa9] sm:$0x1] %vm6200_vm2, %v20715_v38 }
 0x2aa   :  { %21036 = vst [vmem:[#allocation253_spill] sm:$0xff] %v15859_v25  ;;  %21037 = vst [vmem:[#allocation254_spill] sm:$0xff] %v15861_v21  ;;  %2722 = vperm.xlu1 %14015, %v15857_v1   ;;  %3748 = vperm.xlu0 %14014, %v15509_v63   ;;  %v15884_v63 = vld [vmem:[%s20702_s0 + $0x152] sm:$0xff] }
 0x2ab   :  { %21042 = vst [vmem:[#allocation259_spill] sm:$0xff] %v15884_v63  ;;  %6232 = vst.msk [vmem:[#allocation2 + $0xb9] sm:$0x1] %vm6200_vm2, %v20715_v38 }
 0x2ac   :  { %6233 = vst.msk [vmem:[#allocation2 + $0xc9] sm:$0x1] %vm6200_vm2, %v20715_v38  ;;  %6234 = vst.msk [vmem:[#allocation2 + $0xd9] sm:$0x1] %vm6200_vm2, %v20715_v38 }
 0x2ad   :  { %v15875_v58 = vpop.permute.xlu1 %2232  ;;  %v15877_v5 = vpop.permute.xlu0 %2227  ;;  %6235 = vst.msk [vmem:[#allocation2 + $0xe9] sm:$0x1] %vm6200_vm2, %v20715_v38  ;;  %6236 = vst.msk [vmem:[#allocation2 + $0xf9] sm:$0x1] %vm6200_vm2, %v20715_v38 }
 0x2ae   :  { %21040 = vst [vmem:[#allocation257_spill] sm:$0xff] %v15875_v58  ;;  %21041 = vst [vmem:[#allocation258_spill] sm:$0xff] %v15877_v5  ;;  %2757 = vperm.xlu1 %14015, %v15868_v42   ;;  %2732 = vperm.xlu0 %14014, %v15873_v9   ;;  %v12490_v58 = vld [vmem:[%s20705_s3 + $0x20] sm:$0xff]  ;;  %v12491_v5 = vld [vmem:[%s20705_s3 + $0x28] sm:$0xff] }
 0x2af   :  { %6237 = vst.msk [vmem:[#allocation2 + $0x109] sm:$0x1] %vm6200_vm2, %v20715_v38  ;;  %6238 = vst.msk [vmem:[#allocation2 + $0x119] sm:$0x1] %vm6200_vm2, %v20715_v38  ;;  %v21090_v42 = vld [vmem:[#allocation17_spill] sm:$0xff] }
 0x2b0   :  { %6239 = vst.msk [vmem:[#allocation2 + $0x129] sm:$0x1] %vm6200_vm2, %v20715_v38  ;;  %6240 = vst.msk [vmem:[#allocation2 + $0x139] sm:$0x1] %vm6200_vm2, %v20715_v38 }
 0x2b1   :  { %v15886_v25 = vpop.permute.xlu1 %2242  ;;  %v15888_v21 = vpop.permute.xlu0 %2237  ;;  %9474 = vst.msk [vmem:[#allocation3 + $0x8] sm:$0x1] %vm6200_vm2, %v20715_v38  ;;  %9475 = vst.msk [vmem:[#allocation3 + $0x10] sm:$0x1] %vm6200_vm2, %v20715_v38 }
 0x2b2   :  { %21043 = vst [vmem:[#allocation260_spill] sm:$0xff] %v15886_v25  ;;  %21044 = vst [vmem:[#allocation261_spill] sm:$0xff] %v15888_v21  ;;  %3723 = vperm.xlu1 %14015, %v15461_v45   ;;  %2767 = vperm.xlu0 %14014, %v15884_v63   ;;  %v15901_v25 = vpack.c.bf16 %v12491_v5, %v12490_v58  ;;  %v12527_v21 = vld [vmem:[%s20705_s3 + $0x48] sm:$0xff]  ;;  %v15927_v5 = vld [vmem:[%s20705_s3 + $0x30] sm:$0xff] }
 0x2b3   :  { %v15922_v45 = vpack.c.bf16 %v12527_v21, %v12526_v49  ;;  %v15932_v58 = vld [vmem:[%s20705_s3 + $0x38] sm:$0xff]  ;;  %9476 = vst.msk [vmem:[#allocation3 + $0x18] sm:$0x1] %vm6200_vm2, %v20715_v38  ;;  %9477 = vst.msk [vmem:[#allocation3 + $0x20] sm:$0x1] %vm6200_vm2, %v20715_v38 }
 0x2b4   :  { %9480 = vst.msk [vmem:[#allocation3 + $0x38] sm:$0x1] %vm6200_vm2, %v20715_v38  ;;  %9481 = vst.msk [vmem:[#allocation3 + $0x40] sm:$0x1] %vm6200_vm2, %v20715_v38  ;;  %13629 = vmatprep.subr.bf16.mxu1 %v15901_v25  ;;  %v13632_v21 = vpack.c.bf16 %v15932_v58, %v15927_v5  ;;  %v12529_v49 = vld [vmem:[%s20705_s3 + $0x58] sm:$0xff]  ;;  %v12176_v5 = vld [vmem:[%s20702_s0 + $0xc8] sm:$0xff] }
 0x2b5   :  { %21045 = vst [vmem:[#allocation262_spill] sm:$0xff] %v15922_v45  ;;  %9482 = vst.msk [vmem:[#allocation3 + $0x48] sm:$0x1] %vm6200_vm2, %v20715_v38  ;;  %v16073_v10 = vpop.permute.xlu1 %2252  ;;  %v16075_v63 = vpop.permute.xlu0 %2247  ;;  %13645 = vmatprep.subr.bf16.mxu0 %v15922_v45  ;;  %13631 = vmatpush3.bf16.msra.mxu1 %v15901_v25  ;;  %v16080_v9 = vpack.c.bf16 %v12529_v49, %v15937_v59  ;;  %v7053_v59 = vld [vmem:[#allocation2 + $0x1] sm:$0xff] }
 0x2b6   :  { %9483 = vst.msk [vmem:[#allocation3 + $0x50] sm:$0x1] %vm6200_vm2, %v20715_v38  ;;  %9486 = vst.msk [vmem:[#allocation3 + $0xd] sm:$0x1] %vm6200_vm2, %v20715_v38  ;;  %3758 = vperm.xlu1 %14015, %v15522_v37   ;;  %3733 = vperm.xlu0 %14014, %v15477_v2   ;;  %v7460_v37 = vld [vmem:[#allocation2 + $0x2] sm:$0xff] }
 0x2b7   :  { %9487 = vst.msk [vmem:[#allocation3 + $0x15] sm:$0x1] %vm6200_vm2, %v20715_v38  ;;  %9488 = vst.msk [vmem:[#allocation3 + $0x1d] sm:$0x1] %vm6200_vm2, %v20715_v38  ;;  %13647 = vmatpush3.bf16.msra.mxu0 %v15922_v45  ;;  %13633 = vmatprep.subr.bf16.mxu1 %v13632_v21  ;;  %v12183_v2 = vld [vmem:[%s20702_s0 + $0x120] sm:$0xff] }
 0x2b8   :  { %9489 = vst.msk [vmem:[#allocation3 + $0x25] sm:$0x1] %vm6200_vm2, %v20715_v38  ;;  %9492 = vst.msk [vmem:[#allocation3 + $0x3d] sm:$0x1] %vm6200_vm2, %v20715_v38  ;;  %13649 = vmatprep.subr.bf16.mxu0 %v16080_v9  ;;  %v12178_v25 = vld [vmem:[%s20702_s0 + $0xe0] sm:$0xff]  ;;  %13123 = vmatprep.mubr.msk.f32.mxu1 %vm6189_vm0, %v7053_v59 }
 0x2b9   :  { %9493 = vst.msk [vmem:[#allocation3 + $0x45] sm:$0x1] %vm6200_vm2, %v20715_v38  ;;  %9494 = vst.msk [vmem:[#allocation3 + $0x4d] sm:$0x1] %vm6200_vm2, %v20715_v38  ;;  %v16089_v58 = vpop.permute.xlu1 %2637  ;;  %13635 = vmatpush3.bf16.msra.mxu1 %v13632_v21  ;;  %13187 = vmatprep.mubr.msk.f32.mxu0 %vm6189_vm0, %v7460_v37 }
 0x2ba   :  { %9495 = vst.msk [vmem:[#allocation3 + $0x55] sm:$0x1] %vm6200_vm2, %v20715_v38  ;;  %10919 = vst.msk [vmem:[#allocation4 + $0x4] sm:$0x1] %vm6200_vm2, %v20715_v38  ;;  %3223 = vperm.xlu1 %14015, %v12176_v5   ;;  %3768 = vperm.xlu0 %14014, %v15535_v53   ;;  %v12185_v53 = vld [vmem:[%s20702_s0 + $0x138] sm:$0xff] }
 0x2bb   :  { %10920 = vst.msk [vmem:[#allocation4 + $0x8] sm:$0x1] %vm6200_vm2, %v20715_v38  ;;  %10923 = vst.msk [vmem:[#allocation4 + $0x14] sm:$0x1] %vm6200_vm2, %v20715_v38  ;;  %13651 = vmatpush3.bf16.msra.mxu0 %v16080_v9 }
 0x2bc   :  { %10924 = vst.msk [vmem:[#allocation4 + $0x18] sm:$0x1] %vm6200_vm2, %v20715_v38  ;;  %10927 = vst.msk [vmem:[#allocation4 + $0x7] sm:$0x1] %vm6200_vm2, %v20715_v38 }
 0x2bd   :  { %10928 = vst.msk [vmem:[#allocation4 + $0xb] sm:$0x1] %vm6200_vm2, %v20715_v38  ;;  %10931 = vst.msk [vmem:[#allocation4 + $0x17] sm:$0x1] %vm6200_vm2, %v20715_v38  ;;  %v16103_v21 = vpop.permute.xlu1 %3158 }
 0x2be   :  { %10932 = vst.msk [vmem:[#allocation4 + $0x1b] sm:$0x1] %vm6200_vm2, %v20715_v38  ;;  %21046 = vst [vmem:[#allocation263_spill] sm:$0xff] %v16073_v10  ;;  %v16091_v38 = vpop.permute.xlu0 %2257  ;;  %3258 = vperm.xlu1 %14015, %v12183_v2   ;;  %3233 = vperm.xlu0 %14014, %v12178_v25   ;;  %v12063_v2 = vld [vmem:[%s20702_s0 + $0x1c9] sm:$0xff] }
 0x2bf   :  { %21047 = vst [vmem:[#allocation264_spill] sm:$0xff] %v16075_v63  ;;  %21048 = vst [vmem:[#allocation265_spill] sm:$0xff] %v16080_v9 }
 0x2c0   :  { %21049 = vst [vmem:[#allocation266_spill] sm:$0xff] %v16091_v38 }
 0x2c1   :  { %v16110_v5 = vpop.permute.xlu1 %2657 }
 0x2c2   :  { %v16105_v49 = vpop.permute.xlu0 %2647  ;;  %21050 = vst [vmem:[#allocation267_spill] sm:$0xff] %v16110_v5  ;;  %4223 = vperm.xlu1 %14015, %v15689_v13   ;;  %3268 = vperm.xlu0 %14014, %v12185_v53   ;;  %v12180_v13 = vld [vmem:[%s20702_s0 + $0xf8] sm:$0xff] }
 0x2c5   :  { %v16115_v59 = vpop.permute.xlu1 %2642 }
 0x2c6   :  { %v16112_v45 = vpop.permute.xlu0 %3168  ;;  %21051 = vst [vmem:[#allocation268_spill] sm:$0xff] %v16115_v59  ;;  %4258 = vperm.xlu1 %14015, %v15700_v30   ;;  %4233 = vperm.xlu0 %14014, %v15711_v34   ;;  %v16135_v30 = vld [vmem:[%s20702_s0 + $0x1e1] sm:$0xff] }
 0x2c7   :  { %21055 = vst [vmem:[#allocation272_spill] sm:$0xff] %v16135_v30 }
 0x2c9   :  { %v16124_v25 = vpop.permute.xlu1 %2677 }
 0x2ca   :  { %v16117_v37 = vpop.permute.xlu0 %2667  ;;  %21053 = vst [vmem:[#allocation270_spill] sm:$0xff] %v16124_v25  ;;  %2277 = vperm.xlu1 %14015, %v12063_v2   ;;  %4268 = vperm.xlu0 %14014, %v15722_v61   ;;  %v12187_v61 = vld [vmem:[%s20702_s0 + $0x150] sm:$0xff] }
 0x2cb   :  { %21052 = vst [vmem:[#allocation269_spill] sm:$0xff] %v16117_v37  ;;  %v12182_v2 = vld [vmem:[%s20702_s0 + $0x110] sm:$0xff] }
 0x2cd   :  { %v16137_v34 = vpop.permute.xlu1 %3678 }
 0x2ce   :  { %v16126_v9 = vpop.permute.xlu0 %2652  ;;  %3243 = vperm.xlu1 %14015, %v12180_v13   ;;  %2287 = vperm.xlu0 %14014, %v16135_v30   ;;  %v12189_v13 = vld [vmem:[%s20702_s0 + $0x168] sm:$0xff] }
 0x2cf   :  { %21054 = vst [vmem:[#allocation271_spill] sm:$0xff] %v16126_v9 }
 0x2d1   :  { %v16148_v38 = vpop.permute.xlu1 %3178 }
 0x2d2   :  { %v16139_v53 = vpop.permute.xlu0 %2687  ;;  %21057 = vst [vmem:[#allocation274_spill] sm:$0xff] %v16148_v38  ;;  %3278 = vperm.xlu1 %14015, %v12187_v61   ;;  %3253 = vperm.xlu0 %14014, %v12182_v2   ;;  %v16169_v61 = vld [vmem:[%s20702_s0 + $0x112] sm:$0xff] }
 0x2d3   :  { %21056 = vst [vmem:[#allocation273_spill] sm:$0xff] %v16139_v53  ;;  %21062 = vst [vmem:[#allocation279_spill] sm:$0xff] %v16169_v61 }
 0x2d5   :  { %v16155_v63 = vpop.permute.xlu1 %3163 }
 0x2d6   :  { %v16150_v10 = vpop.permute.xlu0 %3688  ;;  %21058 = vst [vmem:[#allocation275_spill] sm:$0xff] %v16155_v63  ;;  %4243 = vperm.xlu1 %14015, %v15727_v46   ;;  %3288 = vperm.xlu0 %14014, %v12189_v13   ;;  %v16180_v46 = vld [vmem:[%s20703_s1] ss:$0 sm:$0xff] }
 0x2d7   :  { %v16206_v5 = vmul.f32 %v16180_v46, %v14424_v8  ;;  %v16225_v8 = vmul.f32 %v16180_v46, %v14444_v16  ;;  %v16245_v16 = vmul.f32 %v16180_v46, %v14472_v27  ;;  %v16266_v27 = vmul.f32 %v16180_v46, %v14492_v35 }
 0x2d8   :  { %v16285_v35 = vmul.f32 %v16180_v46, %v14512_v43  ;;  %v16306_v43 = vmul.f32 %v16180_v46, %v14532_v51  ;;  %v16326_v51 = vmul.f32 %v16180_v46, %v14554_v60  ;;  %v21075_v60 = vld [vmem:[#allocation11_spill] sm:$0xff] }
 0x2d9   :  { %v16160_v53 = vpop.permute.xlu1 %3198  ;;  %v16346_v37 = vmul.f32 %v16180_v46, %v21075_v60  ;;  %v21082_v60 = vld [vmem:[#allocation14_spill] sm:$0xff] }
 0x2da   :  { %v16157_v25 = vpop.permute.xlu0 %3188  ;;  %21060 = vst [vmem:[#allocation277_spill] sm:$0xff] %v16160_v53  ;;  %4278 = vperm.xlu1 %14015, %v15738_v57   ;;  %4253 = vperm.xlu0 %14014, %v15813_v26   ;;  %v12242_v57 = vld [vmem:[%s20702_s0 + $0xc9] sm:$0xff]  ;;  %21069 = vst [vmem:[#allocation286_spill] sm:$0xff] %v16326_v51  ;;  %v16366_v63 = vmul.f32 %v16180_v46, %v21082_v60  ;;  %v16385_v60 = vmul.f32 %v16180_v46, %v21090_v42 }
 0x2db   :  { %21059 = vst [vmem:[#allocation276_spill] sm:$0xff] %v16157_v25  ;;  %v12120_v26 = vld [vmem:[%s20702_s0 + $0x12a] sm:$0xff]  ;;  %v16202_v25 = vmul.f32 %v16180_v46, %v14422_v7  ;;  %v16221_v7 = vmul.f32 %v16180_v46, %v14442_v15  ;;  %v16241_v15 = vmul.f32 %v16180_v46, %v14464_v24  ;;  %v16261_v24 = vmul.f32 %v16180_v46, %v14484_v32  ;;  %v12122_v32 = vld [vmem:[%s20702_s0 + $0x142] sm:$0xff] }
 0x2dc   :  { %21087 = vst [vmem:[#allocation14_spill] sm:$0xff] %v16377_v33 }
 0x2dd   :  { %v16171_v2 = vpop.permute.xlu1 %4198 }
 0x2de   :  { %v16162_v30 = vpop.permute.xlu0 %3173  ;;  %2742 = vperm.xlu1 %14015, %v16169_v61   ;;  %4288 = vperm.xlu0 %14014, %v15824_v14   ;;  %v16194_v14 = vmul.f32 %v16180_v46, %v14412_v3  ;;  %v12244_v3 = vld [vmem:[%s20702_s0 + $0xe1] sm:$0xff] }
 0x2df   :  { %21061 = vst [vmem:[#allocation278_spill] sm:$0xff] %v16162_v30 }
 0x2e1   :  { %v16188_v13 = vpop.permute.xlu1 %2662 }
 0x2e2   :  { %v16173_v38 = vpop.permute.xlu0 %3208  ;;  %21064 = vst [vmem:[#allocation281_spill] sm:$0xff] %v16188_v13  ;;  %3743 = vperm.xlu1 %14015, %v12242_v57   ;;  %2752 = vperm.xlu0 %14014, %v12120_v26   ;;  %v16210_v13 = vmul.f32 %v16180_v46, %v14432_v11  ;;  %v16229_v11 = vmul.f32 %v16180_v46, %v14452_v19 }
 0x2e3   :  { %21063 = vst [vmem:[#allocation280_spill] sm:$0xff] %v16173_v38  ;;  %v16198_v38 = vmul.f32 %v16180_v46, %v14414_v4  ;;  %v16217_v4 = vmul.f32 %v16180_v46, %v14434_v12  ;;  %v16233_v57 = vmul.f32 %v16180_v46, %v14454_v20  ;;  %v16237_v12 = vmul.f32 %v16180_v46, %v14462_v23 }
 0x2e4   :  { %v16253_v20 = vmul.f32 %v16180_v46, %v14474_v28  ;;  %v16257_v23 = vmul.f32 %v16180_v46, %v14482_v31  ;;  %v16274_v28 = vmul.f32 %v16180_v46, %v14502_v39  ;;  %v16278_v31 = vmul.f32 %v16180_v46, %v14504_v40 }
 0x2e5   :  { %v16247_v26 = vpop.permute.xlu1 %2697  ;;  %v16293_v39 = vmul.f32 %v16180_v46, %v14522_v47  ;;  %v16297_v40 = vmul.f32 %v16180_v46, %v14524_v48  ;;  %v16314_v47 = vmul.f32 %v16180_v46, %v14542_v55  ;;  %v16318_v48 = vmul.f32 %v16180_v46, %v14544_v56  ;;  %v16337_v56 = vld [vmem:[%s20703_s1 + $0x2] ss:$0 sm:$0xff] }
 0x2e6   :  { %v16190_v53 = vpop.permute.xlu0 %4208  ;;  %21065 = vst [vmem:[#allocation282_spill] sm:$0xff] %v16247_v26  ;;  %3778 = vperm.xlu1 %14015, %v15548_v22   ;;  %3753 = vperm.xlu0 %14014, %v12244_v3   ;;  %v16270_v26 = vmul.f32 %v16180_v46, %v14494_v36  ;;  %v16289_v36 = vmul.f32 %v16180_v46, %v14514_v44  ;;  %v16302_v22 = vld [vmem:[%s20703_s1 + $0x1] ss:$0 sm:$0xff]  ;;  %21071 = vst [vmem:[#allocation288_spill] sm:$0xff] %v16337_v56 }
 0x2e7   :  { %v16310_v44 = vmul.f32 %v16180_v46, %v14534_v52  ;;  %v16330_v52 = vmul.f32 %v16180_v46, %v14564_v0  ;;  %v882_v55 = vmul.f32 %v16302_v22, %v14744_v50  ;;  %v21077_v0 = vld [vmem:[#allocation12_spill] sm:$0xff]  ;;  %v21079_v50 = vld [vmem:[#allocation43_spill] sm:$0xff] }
 0x2e8   :  { %v16350_v54 = vmul.f32 %v16180_v46, %v21077_v0  ;;  %v880_v6 = vmul.f32 %v16302_v22, %v21079_v50  ;;  %21083 = vst [vmem:[#allocation43_spill] sm:$0xff] %v16366_v63  ;;  %v21084_v0 = vld [vmem:[#allocation15_spill] sm:$0xff]  ;;  %v21086_v50 = vld [vmem:[#allocation108_spill] sm:$0xff]  ;;  %v21092_v63 = vld [vmem:[#allocation18_spill] sm:$0xff] }
 0x2e9   :  { %v16320_v3 = vpop.permute.xlu1 %3698  ;;  %21070 = vst [vmem:[#allocation287_spill] sm:$0xff] %v16330_v52  ;;  %v16370_v9 = vmul.f32 %v16180_v46, %v21084_v0  ;;  %v1402_v59 = vmul.f32 %v16337_v56, %v21086_v50  ;;  %21091 = vst [vmem:[#allocation108_spill] sm:$0xff] %v16385_v60  ;;  %v16389_v0 = vmul.f32 %v16180_v46, %v21092_v63  ;;  %v21106_v52 = vld [vmem:[#allocation47_spill] sm:$0xff] }
 0x2ea   :  { %v16249_v19 = vpop.permute.xlu0 %2672  ;;  %21067 = vst [vmem:[#allocation284_spill] sm:$0xff] %v16320_v3  ;;  %2762 = vperm.xlu1 %14015, %v12122_v32   ;;  %v21072_v3 = vld [vmem:[#allocation193_spill] sm:$0xff]  ;;  %21078 = vst [vmem:[#allocation11_spill] sm:$0xff] %v16350_v54  ;;  %v944_v63 = vadd.f32 %v880_v6, %v16198_v38  ;;  %v12131_v6 = vld [vmem:[%s20702_s0 + $0x1e2] sm:$0xff]  ;;  %v887_v51 = vmul.f32 %v16302_v22, %v21106_v52 }
 0x2eb   :  { %21066 = vst [vmem:[#allocation283_spill] sm:$0xff] %v16249_v19  ;;  %3788 = vperm.xlu0 %14014, %v21072_v3   ;;  %v12129_v32 = vld [vmem:[%s20702_s0 + $0x1ca] sm:$0xff]  ;;  %21093 = vst [vmem:[#allocation16_spill] sm:$0xff] %v16389_v0  ;;  %v21099_v0 = vld [vmem:[#allocation44_spill] sm:$0xff] }
 0x2ec   :  { %v21080_v3 = vld [vmem:[#allocation13_spill] sm:$0xff]  ;;  %v883_v60 = vmul.f32 %v16302_v22, %v21099_v0  ;;  %v21102_v38 = vld [vmem:[#allocation19_spill] sm:$0xff] }
 0x2ed   :  { %v16362_v30 = vmul.f32 %v16180_v46, %v21080_v3  ;;  %21085 = vst [vmem:[#allocation13_spill] sm:$0xff] %v16370_v9  ;;  %v16381_v3 = vmul.f32 %v16180_v46, %v21088_v62  ;;  %v21094_v9 = vld [vmem:[#allocation106_spill] sm:$0xff]  ;;  %v946_v62 = vadd.f32 %v882_v55, %v16194_v14  ;;  %v16422_v55 = vmul.f32 %v16180_v46, %v21102_v38  ;;  %v21104_v0 = vld [vmem:[#allocation21_spill] sm:$0xff] }
 0x2ee   :  { %v16322_v19 = vpop.permute.xlu0 %2707  ;;  %v1400_v50 = vmul.f32 %v16337_v56, %v21094_v9  ;;  %2797 = vperm.xlu1 %14015, %v12129_v32   ;;  %v21100_v9 = vld [vmem:[#allocation45_spill] sm:$0xff]  ;;  %v21101_v56 = vld [vmem:[#allocation170_spill] sm:$0xff]  ;;  %v21103_v32 = vld [vmem:[#allocation20_spill] sm:$0xff] }
 0x2ef   :  { %21068 = vst [vmem:[#allocation285_spill] sm:$0xff] %v16322_v19  ;;  %v21073_v19 = vld [vmem:[#allocation10_spill] sm:$0xff]  ;;  %21081 = vst [vmem:[#allocation12_spill] sm:$0xff] %v16362_v30  ;;  %v16393_v30 = vpop.permute.xlu1 %2682 }
 0x2f0   :  { %v16342_v61 = vmul.f32 %v16180_v46, %v21073_v19  ;;  %21076 = vst [vmem:[#allocation10_spill] sm:$0xff] %v16346_v37  ;;  %v12124_v19 = vld [vmem:[%s20702_s0 + $0x15a] sm:$0xff]  ;;  %21089 = vst [vmem:[#allocation15_spill] sm:$0xff] %v16381_v3  ;;  %v21097_v37 = vld [vmem:[#allocation42_spill] sm:$0xff]  ;;  %v1464_v38 = vadd.f32 %v1400_v50, %v944_v63  ;;  %v16455_v50 = vadd.f32 %v883_v60, %v16202_v25 }
 0x2f1   :  { %21095 = vst [vmem:[#allocation17_spill] sm:$0xff] %v16393_v30  ;;  %v21098_v3 = vld [vmem:[#allocation172_spill] sm:$0xff]  ;;  %2772 = vperm.xlu0 %14014, %v12124_v19   ;;  %v885_v30 = vmul.f32 %v16302_v22, %v21100_v9  ;;  %v12246_v14 = vld [vmem:[%s20702_s0 + $0xf9] sm:$0xff]  ;;  %v1466_v19 = vadd.f32 %v1402_v59, %v946_v62  ;;  %v16432_v9 = vmul.f32 %v16180_v46, %v21104_v0 }
 0x2f2   :  { %21074 = vst [vmem:[#allocation193_spill] sm:$0xff] %v16342_v61  ;;  %v16395_v54 = vpop.permute.xlu0 %3708  ;;  %v881_v61 = vmul.f32 %v16302_v22, %v21097_v37  ;;  %v1923_v42 = vmul.f32 %v16377_v33, %v21098_v3  ;;  %v16412_v37 = vld [vmem:[%s20703_s1 + $0x4] ss:$0 sm:$0xff]  ;;  %3763 = vperm.xlu1 %14015, %v12246_v14   ;;  %v21111_v14 = vld [vmem:[#allocation49_spill] sm:$0xff] }
 0x2f3   :  { %21096 = vst [vmem:[#allocation18_spill] sm:$0xff] %v16395_v54  ;;  %v1921_v54 = vmul.f32 %v16377_v33, %v21101_v56  ;;  %v16426_v56 = vmul.f32 %v16180_v46, %v21103_v32  ;;  %v2443_v3 = vmul.f32 %v16412_v37, %v15775_v17  ;;  %v21105_v33 = vld [vmem:[#allocation46_spill] sm:$0xff]  ;;  %v16441_v32 = vld [vmem:[%s20703_s1 + $0x5] ss:$0 sm:$0xff]  ;;  %v16443_v59 = vpop.permute.xlu1 %2717  ;;  %v2441_v46 = vmul.f32 %v16412_v37, %v15768_v29 }
 0x2f4   :  { %v884_v1 = vmul.f32 %v16302_v22, %v21105_v33  ;;  %21107 = vst [vmem:[#allocation106_spill] sm:$0xff] %v16443_v59  ;;  %v1987_v17 = vadd.f32 %v1923_v42, %v1466_v19  ;;  %v2963_v33 = vmul.f32 %v16441_v32, %v16105_v49  ;;  %v16452_v52 = vadd.f32 %v881_v61, %v16206_v5  ;;  %v16463_v42 = vld [vmem:[%s20703_s1 + $0x6] ss:$0 sm:$0xff]  ;;  %v12253_v29 = vld [vmem:[%s20702_s0 + $0x151] sm:$0xff] }
 0x2f5   :  { %2807 = vperm.xlu0 %14014, %v12131_v6   ;;  %v16458_v63 = vadd.f32 %v885_v30, %v16210_v13  ;;  %v1985_v0 = vadd.f32 %v1921_v54, %v1464_v38  ;;  %v2961_v5 = vmul.f32 %v16441_v32, %v16089_v58  ;;  %v3484_v25 = vmul.f32 %v16463_v42, %v16112_v45  ;;  %v12248_v54 = vld [vmem:[%s20702_s0 + $0x111] sm:$0xff]  ;;  %v21110_v13 = vld [vmem:[#allocation48_spill] sm:$0xff] }
 0x2f6   :  { %v16445_v62 = vpop.permute.xlu0 %2692  ;;  %v2507_v49 = vadd.f32 %v2443_v3, %v1987_v17  ;;  %v16476_v30 = vadd.f32 %v884_v1, %v16217_v4  ;;  %v16479_v61 = vadd.f32 %v887_v51, %v16221_v7  ;;  %v886_v60 = vmul.f32 %v16302_v22, %v21110_v13  ;;  %v16488_v45 = vld [vmem:[%s20703_s1 + $0x7] ss:$0 sm:$0xff]  ;;  %3798 = vperm.xlu1 %14015, %v12253_v29   ;;  %v21113_v3 = vld [vmem:[#allocation50_spill] sm:$0xff]  ;;  %v21114_v17 = vld [vmem:[#allocation51_spill] sm:$0xff] }
 0x2f7   :  { %21108 = vst [vmem:[#allocation42_spill] sm:$0xff] %v16445_v62  ;;  %v889_v6 = vmul.f32 %v16302_v22, %v21111_v14  ;;  %v16490_v58 = vpop.permute.xlu1 %3683  ;;  %v2505_v1 = vadd.f32 %v2441_v46, %v1985_v0  ;;  %v3482_v4 = vmul.f32 %v16463_v42, %v16103_v21  ;;  %v4004_v51 = vmul.f32 %v16488_v45, %v16150_v10  ;;  %v16505_v14 = vld [vmem:[%s20703_s1 + $0x8] ss:$0 sm:$0xff]  ;;  %v16510_v10 = vld [vmem:[%s20702_s0 + $0x1f9] sm:$0xff] }
 0x2f8   :  { %21109 = vst [vmem:[#allocation172_spill] sm:$0xff] %v16479_v61  ;;  %v3027_v7 = vadd.f32 %v2963_v33, %v2507_v49  ;;  %v888_v38 = vmul.f32 %v16302_v22, %v21113_v3  ;;  %v891_v13 = vmul.f32 %v16302_v22, %v21114_v17  ;;  %v14158_v46 = vmov 1983009808   ;;  %21115 = vst [vmem:[#allocation45_spill] sm:$0xff] %v16510_v10  ;;  %v12255_v3 = vld [vmem:[%s20702_s0 + $0x169] sm:$0xff] }
 0x2f9   :  { %v4716_v0 = vunpack.c.l.s4 %v14158_v46  ;;  %v4718_v59 = vlaneseq  ;;  %3773 = vperm.xlu0 %14014, %v12248_v54   ;;  %v3025_v21 = vadd.f32 %v2961_v5, %v2505_v1  ;;  %v4002_v29 = vmul.f32 %v16488_v45, %v16137_v34  ;;  %v21116_v46 = vld [vmem:[#allocation52_spill] sm:$0xff] }
 0x2fa   :  { %v16492_v19 = vpop.permute.xlu0 %2727  ;;  %v3548_v33 = vadd.f32 %v3484_v25, %v3027_v7  ;;  %v4524_v49 = vmul.f32 %v16505_v14, %v16190_v53  ;;  %v16520_v17 = vadd.f32 %v886_v60, %v16225_v8  ;;  %v16523_v54 = vadd.f32 %v889_v6, %v16229_v11  ;;  %v21117_v25 = vld [vmem:[#allocation53_spill] sm:$0xff]  ;;  %v21119_v53 = vld [vmem:[#allocation54_spill] sm:$0xff]  ;;  %2297 = vperm.xlu1 %14015, %v16510_v10   ;;  %v21120_v6 = vld [vmem:[#allocation55_spill] sm:$0xff] }
 0x2fb   :  { %21112 = vst [vmem:[#allocation44_spill] sm:$0xff] %v16492_v19  ;;  %v890_v5 = vmul.f32 %v16302_v22, %v21116_v46  ;;  %v893_v1 = vmul.f32 %v16302_v22, %v21117_v25  ;;  %v16529_v34 = vpop.permute.xlu1 %3718  ;;  %v892_v19 = vmul.f32 %v16302_v22, %v21119_v53  ;;  %v3546_v62 = vadd.f32 %v3482_v4, %v3025_v21  ;;  %v21121_v25 = vld [vmem:[#allocation56_spill] sm:$0xff]  ;;  %v21123_v53 = vld [vmem:[#allocation58_spill] sm:$0xff] }
 0x2fc   :  { %21118 = vst [vmem:[#allocation170_spill] sm:$0xff] %v16529_v34  ;;  %v4068_v61 = vadd.f32 %v4004_v51, %v3548_v33  ;;  %v4522_v8 = vmul.f32 %v16505_v14, %v16171_v2  ;;  %v16539_v11 = vadd.f32 %v888_v38, %v16233_v57  ;;  %v16542_v60 = vadd.f32 %v891_v13, %v16237_v12  ;;  %v12184_v4 = vld [vmem:[%s20702_s0 + $0x128] sm:$0xff]  ;;  %v12069_v12 = vld [vmem:[%s20702_s0 + $0x211] sm:$0xff] }
 0x2fd   :  { %v895_v46 = vmul.f32 %v16302_v22, %v21120_v6  ;;  %v894_v34 = vmul.f32 %v16302_v22, %v21121_v25  ;;  %3808 = vperm.xlu0 %14014, %v12255_v3   ;;  %v4066_v2 = vadd.f32 %v4002_v29, %v3546_v62  ;;  %v4717_v51 = vunpack.c.0.s8 %v4716_v0  ;;  %v21122_v33 = vld [vmem:[#allocation57_spill] sm:$0xff]  ;;  %v21126_v29 = vld [vmem:[#allocation59_spill] sm:$0xff]  ;;  %v21182_v10 = vld [vmem:[#allocation14_spill] sm:$0xff] }
 0x2fe   :  { %v16531_v7 = vpop.permute.xlu0 %3693  ;;  %v16551_v21 = vshrl.u32 %v4718_v59, 7  ;;  %v4588_v57 = vadd.f32 %v4524_v49, %v4068_v61  ;;  %v16557_v38 = vadd.f32 %v890_v5, %v16241_v15  ;;  %v16560_v13 = vadd.f32 %v893_v1, %v16245_v16  ;;  %v21127_v49 = vld [vmem:[#allocation60_spill] sm:$0xff]  ;;  %3263 = vperm.xlu1 %14015, %v12184_v4   ;;  %v21128_v25 = vld [vmem:[#allocation61_spill] sm:$0xff] }
 0x2ff   :  { %v897_v3 = vmul.f32 %v16302_v22, %v21122_v33  ;;  %v896_v62 = vmul.f32 %v16302_v22, %v21123_v53  ;;  %v16566_v0 = vpop.permute.xlu1 %3183  ;;  %v16571_v61 = vadd.f32 %v892_v19, %v16253_v20  ;;  %v899_v15 = vmul.f32 %v16302_v22, %v21126_v29  ;;  %v21129_v53 = vld [vmem:[#allocation62_spill] sm:$0xff]  ;;  %v21130_v19 = vld [vmem:[#allocation63_spill] sm:$0xff] }
 0x300   :  { %21124 = vst [vmem:[#allocation19_spill] sm:$0xff] %v16566_v0  ;;  %v898_v16 = vmul.f32 %v16302_v22, %v21127_v49  ;;  %v4586_v5 = vadd.f32 %v4522_v8, %v4066_v2  ;;  %v16578_v1 = vadd.f32 %v895_v46, %v16257_v23  ;;  %v16581_v6 = vadd.f32 %v894_v34, %v16261_v24  ;;  %v21131_v0 = vld [vmem:[#allocation64_spill] sm:$0xff]  ;;  %v21133_v2 = vld [vmem:[#allocation65_spill] sm:$0xff]  ;;  %v21134_v49 = vld [vmem:[#allocation66_spill] sm:$0xff] }
 0x301   :  { %v901_v33 = vmul.f32 %v16302_v22, %v21128_v25  ;;  %v900_v20 = vmul.f32 %v16302_v22, %v21129_v53  ;;  %2307 = vperm.xlu0 %14014, %v12069_v12   ;;  %v903_v29 = vmul.f32 %v16302_v22, %v21130_v19  ;;  %v902_v8 = vmul.f32 %v16302_v22, %v21131_v0  ;;  %v12186_v24 = vld [vmem:[%s20702_s0 + $0x140] sm:$0xff] }
 0x302   :  { %v16568_v59 = vpop.permute.xlu0 %3728  ;;  %v16592_v4 = vsub.s32 %v4717_v51, %v16551_v21  ;;  %v16594_v23 = vmax.f32 %v4586_v5, %v4588_v57  ;;  %v16600_v34 = vadd.f32 %v897_v3, %v16266_v27  ;;  %v16603_v46 = vadd.f32 %v896_v62, %v16270_v26  ;;  %v21137_v27 = vld [vmem:[#allocation67_spill] sm:$0xff]  ;;  %v21138_v3 = vld [vmem:[#allocation68_spill] sm:$0xff]  ;;  %4263 = vperm.xlu1 %14015, %v15829_v41   ;;  %v21143_v41 = vld [vmem:[#allocation73_spill] sm:$0xff] }
 0x303   :  { %21125 = vst [vmem:[#allocation20_spill] sm:$0xff] %v16568_v59  ;;  %v905_v12 = vmul.f32 %v16302_v22, %v21133_v2  ;;  %v904_v0 = vmul.f32 %v16302_v22, %v21134_v49  ;;  %v16609_v51 = vpop.permute.xlu1 %3218  ;;  %v16614_v5 = vadd.f32 %v899_v15, %v16274_v28  ;;  %v16617_v25 = vadd.f32 %v898_v16, %v16278_v31  ;;  %v21139_v2 = vld [vmem:[#allocation70_spill] sm:$0xff]  ;;  %v21140_v15 = vld [vmem:[#allocation72_spill] sm:$0xff]  ;;  %v21181_v59 = vld [vmem:[#allocation169_spill] sm:$0xff] }
 0x304   :  { %21132 = vst [vmem:[#allocation21_spill] sm:$0xff] %v16592_v4  ;;  %21135 = vst [vmem:[#allocation46_spill] sm:$0xff] %v16609_v51  ;;  %v907_v26 = vmul.f32 %v16302_v22, %v21137_v27  ;;  %v906_v62 = vmul.f32 %v16302_v22, %v21138_v3  ;;  %v16625_v53 = vadd.f32 %v901_v33, %v16285_v35  ;;  %v21157_v51 = vld [vmem:[#allocation78_spill] sm:$0xff] }
 0x305   :  { %v16628_v19 = vadd.f32 %v900_v20, %v16289_v36  ;;  %v908_v28 = vmul.f32 %v16302_v22, %v21139_v2  ;;  %v910_v31 = vmul.f32 %v16302_v22, %v21140_v15  ;;  %3273 = vperm.xlu0 %14014, %v12186_v24   ;;  %v16635_v16 = vadd.f32 %v903_v29, %v16293_v39  ;;  %v21146_v24 = vld [vmem:[#allocation74_spill] sm:$0xff]  ;;  %v21147_v29 = vld [vmem:[#allocation75_spill] sm:$0xff] }
 0x306   :  { %v16611_v57 = vpop.permute.xlu0 %3193  ;;  %v16638_v49 = vadd.f32 %v902_v8, %v16297_v40  ;;  %v913_v35 = vmul.f32 %v16302_v22, %v21143_v41  ;;  %v16644_v36 = vrot.slane %v16594_v23, %v16592_v4  ;;  %v16647_v33 = vadd.f32 %v905_v12, %v16306_v43  ;;  %v21151_v43 = vld [vmem:[#allocation76_spill] sm:$0xff]  ;;  %v21152_v12 = vld [vmem:[#allocation77_spill] sm:$0xff]  ;;  %4298 = vperm.xlu1 %14015, %v15840_v18   ;;  %v21153_v15 = vld [vmem:[#allocation286_spill] sm:$0xff] }
 0x307   :  { %21136 = vst [vmem:[#allocation47_spill] sm:$0xff] %v16611_v57  ;;  %21141 = vst [vmem:[#allocation48_spill] sm:$0xff] %v16635_v16  ;;  %v16650_v20 = vadd.f32 %v904_v0, %v16310_v44  ;;  %v912_v39 = vmul.f32 %v16302_v22, %v21146_v24  ;;  %v915_v40 = vmul.f32 %v16302_v22, %v21147_v29  ;;  %v16656_v8 = vpop.permute.xlu1 %4218  ;;  %v21155_v24 = vld [vmem:[#allocation287_spill] sm:$0xff]  ;;  %v21205_v16 = vld [vmem:[#allocation110_spill] sm:$0xff] }
 0x308   :  { %21142 = vst [vmem:[#allocation49_spill] sm:$0xff] %v16638_v49  ;;  %21144 = vst [vmem:[#allocation50_spill] sm:$0xff] %v16647_v33  ;;  %v16661_v3 = vadd.f32 %v907_v26, %v16314_v47  ;;  %v16664_v2 = vadd.f32 %v906_v62, %v16318_v48  ;;  %v914_v44 = vmul.f32 %v16302_v22, %v21151_v43  ;;  %v21158_v26 = vld [vmem:[#allocation79_spill] sm:$0xff]  ;;  %v21159_v62 = vld [vmem:[#allocation252_spill] sm:$0xff] }
 0x309   :  { %21145 = vst [vmem:[#allocation51_spill] sm:$0xff] %v16650_v20  ;;  %v917_v0 = vmul.f32 %v16302_v22, %v21152_v12  ;;  %v16672_v41 = vadd.f32 %v908_v28, %v21153_v15  ;;  %v16675_v29 = vadd.f32 %v910_v31, %v21155_v24  ;;  %v916_v47 = vmul.f32 %v16302_v22, %v21157_v51  ;;  %v12064_v43 = vld [vmem:[%s20702_s0 + $0x1d1] sm:$0xff]  ;;  %v21162_v28 = vld [vmem:[#allocation80_spill] sm:$0xff]  ;;  %v21179_v57 = vld [vmem:[#allocation15_spill] sm:$0xff] }
 0x30a   :  { %v16658_v27 = vpop.permute.xlu0 %3228  ;;  %21149 = vst [vmem:[#allocation53_spill] sm:$0xff] %v16661_v3  ;;  %21150 = vst [vmem:[#allocation54_spill] sm:$0xff] %v16664_v2  ;;  %v919_v48 = vmul.f32 %v16302_v22, %v21158_v26  ;;  %4273 = vperm.xlu0 %14014, %v21159_v62   ;;  %v21160_v12 = vld [vmem:[#allocation193_spill] sm:$0xff]  ;;  %v918_v15 = vmul.f32 %v16302_v22, %v21162_v28  ;;  %v4714_v31 = vcombine.high %v16594_v23, %v16594_v23  ;;  %v21163_v24 = vld [vmem:[#allocation10_spill] sm:$0xff] }
 0x30b   :  { %21148 = vst [vmem:[#allocation52_spill] sm:$0xff] %v16658_v27  ;;  %21154 = vst [vmem:[#allocation55_spill] sm:$0xff] %v16672_v41  ;;  %v16686_v18 = vadd.f32 %v913_v35, %v21160_v12  ;;  %v4729_v51 = vcombine.high %v16644_v36, %v16644_v36  ;;  %v16695_v26 = vadd.f32 %v912_v39, %v21163_v24  ;;  %v21165_v62 = vld [vmem:[#allocation11_spill] sm:$0xff]  ;;  %v21167_v27 = vld [vmem:[#allocation105_spill] sm:$0xff]  ;;  %v16709_v23 = vpop.permute.xlu1 %3203  ;;  %2282 = vperm.xlu1 %14015, %v12064_v43  }
 0x30c   :  { %21156 = vst [vmem:[#allocation56_spill] sm:$0xff] %v16675_v29  ;;  %v16698_v29 = vadd.f32 %v915_v40, %v21165_v62  ;;  %v21168_v41 = vld [vmem:[#allocation288_spill] sm:$0xff]  ;;  %v21169_v35 = vld [vmem:[#allocation107_spill] sm:$0xff]  ;;  %21170 = vst [vmem:[#allocation60_spill] sm:$0xff] %v16709_v23  ;;  %v16727_v23 = vadd.f32 %v919_v48, %v21179_v57 }
 0x30d   :  { %21161 = vst [vmem:[#allocation57_spill] sm:$0xff] %v16686_v18  ;;  %21164 = vst [vmem:[#allocation58_spill] sm:$0xff] %v16695_v26  ;;  %v1401_v2 = vmul.f32 %v21168_v41, %v21167_v27  ;;  %v1403_v12 = vmul.f32 %v21168_v41, %v21169_v35  ;;  %v16707_v28 = vld [vmem:[%s20704_s2] ss:$0 sm:$0xff]  ;;  %v21171_v39 = vld [vmem:[#allocation12_spill] sm:$0xff] }
 0x30e   :  { %21166 = vst [vmem:[#allocation59_spill] sm:$0xff] %v16698_v29  ;;  %v16711_v18 = vpop.permute.xlu0 %4228  ;;  %v16714_v24 = vadd.f32 %v914_v44, %v21171_v39  ;;  %v21173_v40 = vld [vmem:[#allocation43_spill] sm:$0xff]  ;;  %v21175_v29 = vld [vmem:[#allocation81_spill] sm:$0xff]  ;;  %v21176_v26 = vld [vmem:[#allocation82_spill] sm:$0xff]  ;;  %v1922_v44 = vmul.f32 %v21182_v10, %v21181_v59  ;;  %v16744_v57 = vrot.slane %v16707_v28, %v16592_v4  ;;  %v12362_v59 = vrot.slane %v4729_v51, 9 }
 0x30f   :  { %v16717_v62 = vadd.f32 %v917_v0, %v21173_v40  ;;  %v921_v27 = vmul.f32 %v16302_v22, %v21175_v29  ;;  %v920_v35 = vmul.f32 %v16302_v22, %v21176_v26  ;;  %v21177_v3 = vld [vmem:[#allocation13_spill] sm:$0xff]  ;;  %21180 = vst [vmem:[#allocation64_spill] sm:$0xff] %v16727_v23  ;;  %v21183_v39 = vld [vmem:[#allocation171_spill] sm:$0xff]  ;;  %v21186_v43 = vld [vmem:[#allocation108_spill] sm:$0xff]  ;;  %v1465_v48 = vadd.f32 %v1401_v2, %v16452_v52 }
 0x310   :  { %21172 = vst [vmem:[#allocation61_spill] sm:$0xff] %v16714_v24  ;;  %v16724_v20 = vadd.f32 %v916_v47, %v21177_v3  ;;  %v1924_v0 = vmul.f32 %v21182_v10, %v21183_v39  ;;  %v21184_v40 = vld [vmem:[#allocation255_spill] sm:$0xff]  ;;  %v16737_v29 = vld [vmem:[%s20702_s0 + $0x229] sm:$0xff]  ;;  %v16740_v26 = vadd.f32 %v918_v15, %v21186_v43  ;;  %21188 = vst [vmem:[#allocation67_spill] sm:$0xff] %v16744_v57 }
 0x311   :  { %21174 = vst [vmem:[#allocation62_spill] sm:$0xff] %v16717_v62  ;;  %4308 = vperm.xlu0 %14014, %v21184_v40   ;;  %21185 = vst [vmem:[#allocation65_spill] sm:$0xff] %v16737_v29  ;;  %v4728_v3 = vrot.slane %v4714_v31, %v16592_v4  ;;  %v12066_v47 = vld [vmem:[%s20702_s0 + $0x1e9] sm:$0xff]  ;;  %v1467_v39 = vadd.f32 %v1403_v12, %v16455_v50  ;;  %v21189_v40 = vld [vmem:[#allocation234_spill] sm:$0xff]  ;;  %v16764_v24 = vadd.f32 %v920_v35, %v16422_v55 }
 0x312   :  { %21178 = vst [vmem:[#allocation63_spill] sm:$0xff] %v16724_v20  ;;  %21187 = vst [vmem:[#allocation66_spill] sm:$0xff] %v16740_v26  ;;  %v2442_v23 = vmul.f32 %v16412_v37, %v21189_v40  ;;  %v21190_v15 = vld [vmem:[#allocation235_spill] sm:$0xff]  ;;  %v16756_v26 = vpop.permute.xlu1 %3238  ;;  %v16758_v20 = vpop.permute.xlu0 %3213  ;;  %v21193_v31 = vld [vmem:[#allocation16_spill] sm:$0xff]  ;;  %v12361_v50 = vrot.slane %v16644_v36, 9  ;;  %2317 = vperm.xlu1 %14015, %v16737_v29   ;;  %v1986_v2 = vadd.f32 %v1922_v44, %v1465_v48 }
 0x313   :  { %v2444_v43 = vmul.f32 %v16412_v37, %v21190_v15  ;;  %21191 = vst [vmem:[#allocation68_spill] sm:$0xff] %v16756_v26  ;;  %21192 = vst [vmem:[#allocation70_spill] sm:$0xff] %v16758_v20  ;;  %v16761_v62 = vadd.f32 %v921_v27, %v21193_v31  ;;  %v21196_v33 = vld [vmem:[#allocation83_spill] sm:$0xff]  ;;  %v1988_v12 = vadd.f32 %v1924_v0, %v1467_v39  ;;  %v21197_v40 = vld [vmem:[#allocation268_spill] sm:$0xff]  ;;  %v12363_v31 = vrot.slane %v4728_v3, 9 }
 0x314   :  { %21195 = vst [vmem:[#allocation73_spill] sm:$0xff] %v16764_v24  ;;  %v16768_v52 = vmul.f32 %v16302_v22, %v21196_v33  ;;  %v2962_v15 = vmul.f32 %v16441_v32, %v21197_v40  ;;  %v21198_v26 = vld [vmem:[#allocation271_spill] sm:$0xff]  ;;  %v16780_v33 = vrot.slane %v16744_v57, 1  ;;  %v4730_v35 = vcombine.high %v4728_v3, %v4728_v3  ;;  %v21203_v20 = vld [vmem:[#allocation84_spill] sm:$0xff] }
 0x315   :  { %21194 = vst [vmem:[#allocation72_spill] sm:$0xff] %v16761_v62  ;;  %v2964_v27 = vmul.f32 %v16441_v32, %v21198_v26  ;;  %2292 = vperm.xlu0 %14014, %v12066_v47   ;;  %v12188_v55 = vld [vmem:[%s20702_s0 + $0x158] sm:$0xff]  ;;  %v5771_v24 = vmax.f32 %v4729_v51, %v12362_v59  ;;  %v12073_v44 = vld [vmem:[%s20702_s0 + $0x241] sm:$0xff]  ;;  %v2506_v0 = vadd.f32 %v2442_v23, %v1986_v2  ;;  %v21204_v51 = vld [vmem:[#allocation109_spill] sm:$0xff] }
 0x316   :  { %21199 = vst [vmem:[#allocation74_spill] sm:$0xff] %v16780_v33  ;;  %v2508_v48 = vadd.f32 %v2444_v43, %v1988_v12  ;;  %v21200_v39 = vld [vmem:[#allocation275_spill] sm:$0xff]  ;;  %v21201_v47 = vld [vmem:[#allocation278_spill] sm:$0xff]  ;;  %v4204_v62 = vpop.permute.xlu1 %4203  ;;  %v16789_v29 = vpop.permute.xlu0 %3248  ;;  %v16793_v49 = vmul.f32 %v16302_v22, %v21203_v20  ;;  %v16797_v59 = vmul.f32 %v21168_v41, %v21204_v51  ;;  %v1404_v23 = vmul.f32 %v21168_v41, %v21205_v16 }
 0x317   :  { %v3483_v26 = vmul.f32 %v16463_v42, %v21200_v39  ;;  %v3485_v40 = vmul.f32 %v16463_v42, %v21201_v47  ;;  %21202 = vst [vmem:[#allocation75_spill] sm:$0xff] %v16789_v29  ;;  %v5770_v43 = vmax.f32 %v16644_v36, %v12361_v50  ;;  %3283 = vperm.xlu1 %14015, %v12188_v55   ;;  %v12195_v22 = vld [vmem:[%s20702_s0 + $0x1e0] sm:$0xff]  ;;  %v12364_v16 = vrot.slane %v4730_v35, 9  ;;  %v21208_v29 = vld [vmem:[#allocation174_spill] sm:$0xff] }
 0x318   :  { %v3026_v2 = vadd.f32 %v2962_v15, %v2506_v0  ;;  %v3028_v12 = vadd.f32 %v2964_v27, %v2508_v48  ;;  %v4003_v39 = vmul.f32 %v16488_v45, %v16490_v58  ;;  %v4005_v47 = vmul.f32 %v16488_v45, %v16531_v7  ;;  %v12190_v58 = vld [vmem:[%s20702_s0 + $0x170] sm:$0xff]  ;;  %v21207_v15 = vld [vmem:[#allocation112_spill] sm:$0xff] }
 0x319   :  { %2327 = vperm.xlu0 %14014, %v12073_v44   ;;  %v16811_v20 = vcombine.high %v16744_v57, %v16744_v57  ;;  %v5772_v36 = vmax.f32 %v4728_v3, %v12363_v31  ;;  %v5934_v50 = vadd.f32 %v16780_v33, %v5771_v24  ;;  %v1406_v7 = vmul.f32 %v21168_v41, %v21207_v15  ;;  %v21209_v33 = vld [vmem:[#allocation176_spill] sm:$0xff] }
 0x31a   :  { %v3547_v27 = vadd.f32 %v3483_v26, %v3026_v2  ;;  %v3549_v55 = vadd.f32 %v3485_v40, %v3028_v12  ;;  %v4523_v44 = vmul.f32 %v16505_v14, %v4204_v62  ;;  %v16820_v0 = vpop.permute.xlu1 %4238  ;;  %v4214_v48 = vpop.permute.xlu0 %4213  ;;  %v1468_v51 = vadd.f32 %v1404_v23, %v16476_v30 }
 0x31b   :  { %21206 = vst [vmem:[#allocation76_spill] sm:$0xff] %v16811_v20  ;;  %v1925_v3 = vmul.f32 %v21182_v10, %v21208_v29  ;;  %v5933_v24 = vadd.f32 %v16744_v57, %v5770_v43  ;;  %v5904_v31 = vcombine.high %v16707_v28, %v16707_v28  ;;  %3318 = vperm.xlu1 %14015, %v12195_v22   ;;  %v16832_v12 = vrot.slane %v16811_v20, 1  ;;  %v12197_v28 = vld [vmem:[%s20702_s0 + $0x1f8] sm:$0xff]  ;;  %v21211_v22 = vld [vmem:[#allocation237_spill] sm:$0xff] }
 0x31c   :  { %v1927_v26 = vmul.f32 %v21182_v10, %v21209_v33  ;;  %v4067_v40 = vadd.f32 %v4003_v39, %v3547_v27  ;;  %v4069_v2 = vadd.f32 %v4005_v47, %v3549_v55  ;;  %v4525_v62 = vmul.f32 %v16505_v14, %v4214_v48  ;;  %v21213_v27 = vld [vmem:[#allocation239_spill] sm:$0xff] }
 0x31d   :  { %3293 = vperm.xlu0 %14014, %v12190_v58   ;;  %21210 = vst [vmem:[#allocation77_spill] sm:$0xff] %v16832_v12  ;;  %v5773_v30 = vmax.f32 %v4730_v35, %v12364_v16  ;;  %v5935_v29 = vadd.f32 %v16811_v20, %v5772_v36  ;;  %v6062_v23 = vmax.f32 %v5934_v50, 0.0  ;;  %v1470_v43 = vadd.f32 %v1406_v7, %v16520_v17  ;;  %v21215_v17 = vld [vmem:[#allocation256_spill] sm:$0xff] }
 0x31e   :  { %v2445_v33 = vmul.f32 %v16412_v37, %v21211_v22  ;;  %v4587_v39 = vadd.f32 %v4523_v44, %v4067_v40  ;;  %v4589_v47 = vadd.f32 %v4525_v62, %v4069_v2  ;;  %v16841_v15 = vpop.permute.xlu1 %2702  ;;  %v16843_v58 = vpop.permute.xlu0 %4248  ;;  %v2447_v35 = vmul.f32 %v16412_v37, %v21213_v27 }
 0x31f   :  { %21212 = vst [vmem:[#allocation286_spill] sm:$0xff] %v16841_v15  ;;  %v16848_v16 = vsub.s32 0, %v16551_v21  ;;  %v6061_v36 = vmax.f32 %v5933_v24, 0.0  ;;  %v16851_v50 = vrot.slane %v5904_v31, %v16592_v4  ;;  %4283 = vperm.xlu1 %14015, %v21215_v17   ;;  %v1989_v7 = vadd.f32 %v1925_v3, %v1468_v51  ;;  %v21218_v3 = vld [vmem:[#allocation269_spill] sm:$0xff] }
 0x320   :  { %v1991_v55 = vadd.f32 %v1927_v26, %v1470_v43  ;;  %v4651_v44 = vmax.f32 %v4587_v39, %v4589_v47  ;;  %v5936_v48 = vadd.f32 %v16832_v12, %v5773_v30  ;;  %v6063_v40 = vmax.f32 %v5935_v29, 0.0  ;;  %v21220_v29 = vld [vmem:[#allocation259_spill] sm:$0xff] }
 0x321   :  { %21214 = vst [vmem:[#allocation287_spill] sm:$0xff] %v16851_v50  ;;  %3328 = vperm.xlu0 %14014, %v12197_v28   ;;  %v6376_v2 = vrot.slane %v6062_v23, %v16848_v16  ;;  %v2509_v62 = vadd.f32 %v2445_v33, %v1989_v7  ;;  %v2967_v26 = vmul.f32 %v16441_v32, %v21218_v3  ;;  %v21221_v39 = vld [vmem:[#allocation279_spill] sm:$0xff]  ;;  %v16879_v17 = vrot.slane %v16851_v50, 1  ;;  %v12321_v7 = vld [vmem:[%s20702_s0 + $0x16a] sm:$0xff] }
 0x322   :  { %v4731_v21 = vcombine.high %v4651_v44, %v4651_v44  ;;  %v4738_v24 = vrot.slane %v4651_v44, %v16592_v4  ;;  %v16857_v31 = vpop.permute.xlu1 %2737  ;;  %v16859_v22 = vpop.permute.xlu0 %2712  ;;  %v2511_v51 = vadd.f32 %v2447_v35, %v1991_v55  ;;  %v6372_v28 = vrot.slane %v6061_v36, %v16848_v16  ;;  %v16874_v47 = vld [vmem:[%s20702_s0 + $0x1fa] sm:$0xff] }
 0x323   :  { %21216 = vst [vmem:[#allocation78_spill] sm:$0xff] %v16857_v31  ;;  %21217 = vst [vmem:[#allocation79_spill] sm:$0xff] %v16859_v22  ;;  %v16866_v30 = vcombine.high %v16851_v50, %v16851_v50  ;;  %4318 = vperm.xlu1 %14015, %v21220_v29   ;;  %v6064_v27 = vmax.f32 %v5936_v48, 0.0  ;;  %v6380_v35 = vrot.slane %v6063_v40, %v16848_v16  ;;  %v21225_v40 = vld [vmem:[#allocation267_spill] sm:$0xff] }
 0x324   :  { %v4745_v23 = vrot.slane %v4731_v21, %v16592_v4  ;;  %v4746_v43 = vcombine.high %v4738_v24, %v4738_v24  ;;  %v12365_v33 = vrot.slane %v4738_v24, 9  ;;  %21222 = vst [vmem:[#allocation193_spill] sm:$0xff] %v16874_v47  ;;  %v6882_v36 = vsel %vm6881_vm3, %v6376_v2, %v6372_v28  ;;  %21223 = vst [vmem:[#allocation80_spill] sm:$0xff] %v16879_v17 }
 0x325   :  { %21219 = vst [vmem:[#allocation252_spill] sm:$0xff] %v16866_v30  ;;  %4293 = vperm.xlu0 %14014, %v21221_v39   ;;  %v2965_v2 = vmul.f32 %v16441_v32, %v21225_v40  ;;  %v3031_v28 = vadd.f32 %v2967_v26, %v2511_v51  ;;  %v21226_v39 = vld [vmem:[#allocation276_spill] sm:$0xff]  ;;  %v16893_v22 = vrot.slane %v16866_v30, 1  ;;  %v21228_v40 = vld [vmem:[#allocation274_spill] sm:$0xff]  ;;  %v6384_v26 = vrot.slane %v6064_v27, %v16848_v16 }
 0x326   :  { %v4747_v55 = vcombine.high %v4745_v23, %v4745_v23  ;;  %v12366_v44 = vrot.slane %v4746_v43, 9  ;;  %v12367_v21 = vrot.slane %v4745_v23, 9  ;;  %v5774_v3 = vmax.f32 %v4738_v24, %v12365_v33  ;;  %v16884_v29 = vpop.permute.xlu1 %3703  ;;  %v16886_v48 = vpop.permute.xlu0 %2747  ;;  %v12250_v33 = vld [vmem:[%s20702_s0 + $0x129] sm:$0xff] }
 0x327   :  { %21224 = vst [vmem:[#allocation10_spill] sm:$0xff] %v16886_v48  ;;  %v3488_v31 = vmul.f32 %v16463_v42, %v21226_v39  ;;  %21227 = vst [vmem:[#allocation11_spill] sm:$0xff] %v16893_v22  ;;  %2817 = vperm.xlu1 %14015, %v16874_v47   ;;  %v3486_v51 = vmul.f32 %v16463_v42, %v21228_v40  ;;  %v6884_v39 = vsel %vm6883_vm4, %v6380_v35, %v6882_v36  ;;  %v21229_v48 = vld [vmem:[#allocation18_spill] sm:$0xff]  ;;  %v21230_v36 = vld [vmem:[#allocation284_spill] sm:$0xff] }
 0x328   :  { %v12368_v15 = vrot.slane %v4747_v55, 9  ;;  %v5775_v12 = vmax.f32 %v4746_v43, %v12366_v44  ;;  %v5776_v20 = vmax.f32 %v4745_v23, %v12367_v21  ;;  %v5937_v24 = vadd.f32 %v16851_v50, %v5774_v3  ;;  %v16909_v23 = vld [vmem:[%s20702_s0 + $0x212] sm:$0xff] }
 0x329   :  { %4328 = vperm.xlu0 %14014, %v12321_v7   ;;  %v4008_v47 = vmul.f32 %v16488_v45, %v21229_v48  ;;  %v3029_v27 = vadd.f32 %v2965_v2, %v2509_v62  ;;  %v3552_v35 = vadd.f32 %v3488_v31, %v3031_v28  ;;  %v4006_v48 = vmul.f32 %v16488_v45, %v21230_v36  ;;  %v12130_v62 = vld [vmem:[%s20702_s0 + $0x1d2] sm:$0xff] }
 0x32a   :  { %v5777_v43 = vmax.f32 %v4747_v55, %v12368_v15  ;;  %v5938_v7 = vadd.f32 %v16879_v17, %v5775_v12  ;;  %v5939_v44 = vadd.f32 %v16866_v30, %v5776_v20  ;;  %v6065_v21 = vmax.f32 %v5937_v24, 0.0  ;;  %v16913_v3 = vpop.permute.xlu1 %3738  ;;  %v16915_v40 = vpop.permute.xlu0 %3713  ;;  %v12252_v24 = vld [vmem:[%s20702_s0 + $0x141] sm:$0xff] }
 0x32b   :  { %v4528_v50 = vmul.f32 %v16505_v14, %v16711_v18  ;;  %3783 = vperm.xlu1 %14015, %v12250_v33   ;;  %v3550_v31 = vadd.f32 %v3486_v51, %v3029_v27  ;;  %v4072_v2 = vadd.f32 %v4008_v47, %v3552_v35  ;;  %v4526_v28 = vmul.f32 %v16505_v14, %v16656_v8 }
 0x32c   :  { %v5940_v15 = vadd.f32 %v16893_v22, %v5777_v43  ;;  %v6066_v55 = vmax.f32 %v5938_v7, 0.0  ;;  %v6067_v12 = vmax.f32 %v5939_v44, 0.0  ;;  %v6388_v20 = vrot.slane %v6065_v21, %v16848_v16 }
 0x32d   :  { %2827 = vperm.xlu0 %14014, %v16909_v23   ;;  %v6886_v18 = vsel %vm6885_vm5, %v6384_v26, %v6884_v39  ;;  %v16942_v8 = vadd.f32 %v16768_v52, %v16426_v56  ;;  %v16946_v47 = vadd.f32 %v16793_v49, %v16432_v9  ;;  %v16950_v26 = vadd.f32 %v16797_v59, %v16458_v63  ;;  %v16957_v56 = vld [vmem:[%s20702_s0 + $0x22a] sm:$0xff]  ;;  %v21232_v9 = vld [vmem:[#allocation111_spill] sm:$0xff]  ;;  %v21234_v59 = vld [vmem:[#allocation114_spill] sm:$0xff] }
 0x32e   :  { %v6068_v33 = vmax.f32 %v5940_v15, 0.0  ;;  %v6392_v43 = vrot.slane %v6066_v55, %v16848_v16  ;;  %v6396_v7 = vrot.slane %v6067_v12, %v16848_v16  ;;  %v6888_v44 = vsel %vm6887_vm6, %v6388_v20, %v6886_v18  ;;  %v16936_v21 = vpop.permute.xlu1 %2722  ;;  %v16938_v51 = vpop.permute.xlu0 %3748  ;;  %v21233_v52 = vld [vmem:[#allocation113_spill] sm:$0xff]  ;;  %v21236_v55 = vld [vmem:[#allocation115_spill] sm:$0xff]  ;;  %v21237_v20 = vld [vmem:[#allocation116_spill] sm:$0xff] }
 0x32f   :  { %21231 = vst [vmem:[#allocation105_spill] sm:$0xff] %v16936_v21  ;;  %2802 = vperm.xlu1 %14015, %v12130_v62   ;;  %v4070_v39 = vadd.f32 %v4006_v48, %v3550_v31  ;;  %v4592_v27 = vadd.f32 %v4528_v50, %v4072_v2  ;;  %v1407_v49 = vmul.f32 %v21168_v41, %v21232_v9  ;;  %v16969_v15 = vld [vmem:[%s20702_s0 + $0x1ea] sm:$0xff] }
 0x330   :  { %v6400_v35 = vrot.slane %v6068_v33, %v16848_v16  ;;  %v6890_v36 = vsel %vm6889_vm7, %v6392_v43, %v6888_v44  ;;  %v1409_v63 = vmul.f32 %v21168_v41, %v21233_v52  ;;  %v1408_v48 = vmul.f32 %v21168_v41, %v21234_v59  ;;  %21235 = vst [vmem:[#allocation288_spill] sm:$0xff] %v16969_v15  ;;  %v21240_v33 = vld [vmem:[#allocation117_spill] sm:$0xff]  ;;  %v21243_v52 = vld [vmem:[#allocation120_spill] sm:$0xff] }
 0x331   :  { %3793 = vperm.xlu0 %14014, %v12252_v24   ;;  %v6892_v50 = vsel %vm6891_vm8, %v6396_v7, %v6890_v36  ;;  %v1411_v12 = vmul.f32 %v21168_v41, %v21236_v55  ;;  %v1410_v62 = vmul.f32 %v21168_v41, %v21237_v20  ;;  %v4590_v31 = vadd.f32 %v4526_v28, %v4070_v39  ;;  %v21241_v7 = vld [vmem:[#allocation118_spill] sm:$0xff]  ;;  %v21242_v36 = vld [vmem:[#allocation119_spill] sm:$0xff]  ;;  %v21244_v28 = vld [vmem:[#allocation121_spill] sm:$0xff] }
 0x332   :  { %v6894_v2 = vsel %vm6893_vm9, %v6400_v35, %v6892_v50  ;;  %v16976_v18 = vpop.permute.xlu1 %2757  ;;  %v16978_v24 = vpop.permute.xlu0 %2732  ;;  %v1413_v43 = vmul.f32 %v21168_v41, %v21240_v33  ;;  %v1412_v44 = vmul.f32 %v21168_v41, %v21241_v7  ;;  %v1415_v9 = vmul.f32 %v21168_v41, %v21242_v36  ;;  %v21245_v35 = vld [vmem:[#allocation122_spill] sm:$0xff]  ;;  %v21246_v55 = vld [vmem:[#allocation123_spill] sm:$0xff]  ;;  %v21247_v36 = vld [vmem:[#allocation172_spill] sm:$0xff] }
 0x333   :  { %21238 = vst [vmem:[#allocation107_spill] sm:$0xff] %v16976_v18  ;;  %21239 = vst [vmem:[#allocation12_spill] sm:$0xff] %v16978_v24  ;;  %v1414_v59 = vmul.f32 %v21168_v41, %v21243_v52  ;;  %2837 = vperm.xlu1 %14015, %v16957_v56   ;;  %v1417_v39 = vmul.f32 %v21168_v41, %v21244_v28  ;;  %v1416_v50 = vmul.f32 %v21168_v41, %v21245_v35  ;;  %v12254_v7 = vld [vmem:[%s20702_s0 + $0x159] sm:$0xff]  ;;  %v21248_v18 = vld [vmem:[#allocation124_spill] sm:$0xff] }
 0x334   :  { %7017 = vst.msk [vmem:[#allocation2 + $0x11] sm:$0xff] %vm6189_vm0, %v6894_v2  ;;  %v1419_v20 = vmul.f32 %v21168_v41, %v21246_v55  ;;  %v4652_v33 = vmax.f32 %v4590_v31, %v4592_v27  ;;  %v1471_v2 = vadd.f32 %v1407_v49, %v21247_v36  ;;  %v17002_v52 = vadd.f32 %v1409_v63, %v16523_v54  ;;  %v21249_v24 = vld [vmem:[#allocation125_spill] sm:$0xff]  ;;  %v17011_v27 = vld [vmem:[%s20702_s0 + $0x242] sm:$0xff]  ;;  %v21251_v54 = vld [vmem:[#allocation126_spill] sm:$0xff] }
 0x335   :  { %2812 = vperm.xlu0 %14014, %v16969_v15   ;;  %v1418_v28 = vmul.f32 %v21168_v41, %v21248_v18  ;;  %v1421_v35 = vmul.f32 %v21168_v41, %v21249_v24  ;;  %21250 = vst [vmem:[#allocation43_spill] sm:$0xff] %v17011_v27  ;;  %v1472_v31 = vadd.f32 %v1408_v48, %v16539_v11 }
 0x336   :  { %v17015_v55 = vadd.f32 %v1411_v12, %v16542_v60  ;;  %v1474_v49 = vadd.f32 %v1410_v62, %v16557_v38  ;;  %v1420_v63 = vmul.f32 %v21168_v41, %v21251_v54  ;;  %v17020_v36 = vpop.permute.xlu1 %3723  ;;  %v17022_v18 = vpop.permute.xlu0 %2767  ;;  %v17025_v24 = vadd.f32 %v1413_v43, %v16560_v13  ;;  %v21257_v62 = vld [vmem:[#allocation180_spill] sm:$0xff] }
 0x337   :  { %21252 = vst [vmem:[#allocation81_spill] sm:$0xff] %v17022_v18  ;;  %v17028_v21 = vadd.f32 %v1412_v44, %v16571_v61  ;;  %v17031_v11 = vadd.f32 %v1415_v9, %v16578_v1  ;;  %v17034_v60 = vadd.f32 %v1414_v59, %v16581_v6  ;;  %3803 = vperm.xlu1 %14015, %v12254_v7   ;;  %v21256_v6 = vld [vmem:[#allocation127_spill] sm:$0xff]  ;;  %v21259_v44 = vld [vmem:[#allocation128_spill] sm:$0xff]  ;;  %v21260_v9 = vld [vmem:[#allocation129_spill] sm:$0xff] }
 0x338   :  { %v17037_v38 = vadd.f32 %v1417_v39, %v16600_v34  ;;  %v17040_v48 = vadd.f32 %v1416_v50, %v16603_v46  ;;  %v17043_v12 = vadd.f32 %v1419_v20, %v16614_v5  ;;  %v17046_v13 = vrot.slane %v4652_v33, %v16592_v4  ;;  %v12256_v5 = vld [vmem:[%s20702_s0 + $0x171] sm:$0xff] }
 0x339   :  { %2847 = vperm.xlu0 %14014, %v17011_v27   ;;  %v17050_v61 = vadd.f32 %v1418_v28, %v16617_v25  ;;  %v17053_v1 = vadd.f32 %v1421_v35, %v16625_v53  ;;  %v1423_v34 = vmul.f32 %v21168_v41, %v21256_v6  ;;  %v1931_v46 = vmul.f32 %v21182_v10, %v21257_v62  ;;  %v21261_v59 = vld [vmem:[#allocation178_spill] sm:$0xff]  ;;  %v21263_v35 = vld [vmem:[#allocation173_spill] sm:$0xff]  ;;  %v21265_v62 = vld [vmem:[#allocation175_spill] sm:$0xff] }
 0x33a   :  { %21253 = vst [vmem:[#allocation82_spill] sm:$0xff] %v17043_v12  ;;  %v17063_v43 = vadd.f32 %v1420_v63, %v16628_v19  ;;  %v1422_v25 = vmul.f32 %v21168_v41, %v21259_v44  ;;  %v1425_v53 = vmul.f32 %v21168_v41, %v21260_v9  ;;  %v1929_v39 = vmul.f32 %v21182_v10, %v21261_v59  ;;  %v17071_v50 = vpop.permute.xlu1 %3758  ;;  %v17073_v28 = vpop.permute.xlu0 %3733  ;;  %v21264_v19 = vld [vmem:[#allocation243_spill] sm:$0xff]  ;;  %v21266_v9 = vld [vmem:[#allocation241_spill] sm:$0xff] }
 0x33b   :  { %21254 = vst [vmem:[#allocation13_spill] sm:$0xff] %v17050_v61  ;;  %21255 = vst [vmem:[#allocation15_spill] sm:$0xff] %v17053_v1  ;;  %v7054_v20 = vld [vmem:[#allocation2 + $0x11] sm:$0xff]  ;;  %v1926_v54 = vmul.f32 %v21182_v10, %v21263_v35  ;;  %v2451_v63 = vmul.f32 %v16412_v37, %v21264_v19  ;;  %v4748_v6 = vcombine.high %v4652_v33, %v4652_v33  ;;  %v21268_v35 = vld [vmem:[#allocation48_spill] sm:$0xff] }
 0x33c   :  { %21258 = vst [vmem:[#allocation169_spill] sm:$0xff] %v17063_v43  ;;  %21262 = vst [vmem:[#allocation14_spill] sm:$0xff] %v17071_v50  ;;  %v7461_v7 = vld [vmem:[#allocation2 + $0x12] sm:$0xff]  ;;  %13124 = vmatmul.mubr.msk.f32.vlgmr.msra.gmra.mrb[0].mxu1 %vm6189_vm0, %v7054_v20  ;;  %v1928_v44 = vmul.f32 %v21182_v10, %v21265_v62  ;;  %v2449_v59 = vmul.f32 %v16412_v37, %v21266_v9  ;;  %v4763_v18 = vcombine.high %v17046_v13, %v17046_v13  ;;  %v21267_v50 = vld [vmem:[#allocation272_spill] sm:$0xff] }
 0x33d   :  { %13188 = vmatmul.mubr.msk.f32.vlgmr.msra.gmra.mrb[0].mxu0 %vm6189_vm0, %v7461_v7  ;;  %3838 = vperm.xlu1 %14015, %v21267_v50   ;;  %v17089_v27 = vadd.f32 %v1423_v34, %v21268_v35  ;;  %v1995_v33 = vadd.f32 %v1931_v46, %v1474_v49  ;;  %v21270_v19 = vld [vmem:[#allocation236_spill] sm:$0xff]  ;;  %v21271_v7 = vld [vmem:[#allocation273_spill] sm:$0xff]  ;;  %v21274_v50 = vld [vmem:[#allocation130_spill] sm:$0xff]  ;;  %v1993_v34 = vadd.f32 %v1929_v39, %v1472_v31 }
 0x33e   :  { %3813 = vperm.xlu0 %14014, %v12256_v5   ;;  %v2446_v20 = vmul.f32 %v16412_v37, %v21270_v19  ;;  %v2971_v15 = vmul.f32 %v16441_v32, %v21271_v7  ;;  %v17098_v62 = vld [vmem:[%s20702_s0 + $0x201] sm:$0xff]  ;;  %v21272_v9 = vld [vmem:[#allocation49_spill] sm:$0xff]  ;;  %v17105_v5 = vmul.f32 %v21168_v41, %v21274_v50  ;;  %v21275_v49 = vld [vmem:[#allocation270_spill] sm:$0xff]  ;;  %v17109_v35 = vpop.permute.xlu1 %3223  ;;  %v17111_v19 = vpop.permute.xlu0 %3768  ;;  %v1990_v7 = vadd.f32 %v1926_v54, %v16950_v26 }
 0x33f   :  { %21269 = vst [vmem:[#allocation171_spill] sm:$0xff] %v17089_v27  ;;  %v17101_v43 = vadd.f32 %v1422_v25, %v21272_v9  ;;  %v2969_v46 = vmul.f32 %v16441_v32, %v21275_v49  ;;  %21276 = vst [vmem:[#allocation108_spill] sm:$0xff] %v17109_v35  ;;  %v2515_v27 = vadd.f32 %v2451_v63, %v1995_v33  ;;  %v21278_v1 = vld [vmem:[#allocation280_spill] sm:$0xff]  ;;  %v21279_v9 = vld [vmem:[#allocation50_spill] sm:$0xff]  ;;  %v12370_v39 = vrot.slane %v4763_v18, 9 }
 0x340   :  { %21277 = vst [vmem:[#allocation234_spill] sm:$0xff] %v17111_v19  ;;  %v3492_v61 = vmul.f32 %v16463_v42, %v21278_v1  ;;  %v4762_v25 = vrot.slane %v4748_v6, %v16592_v4  ;;  %v1992_v50 = vadd.f32 %v1928_v44, %v1471_v2  ;;  %v2513_v31 = vadd.f32 %v2449_v59, %v1993_v34  ;;  %v21281_v49 = vld [vmem:[#allocation45_spill] sm:$0xff]  ;;  %v21282_v19 = vld [vmem:[#allocation238_spill] sm:$0xff]  ;;  %v21286_v33 = vld [vmem:[#allocation20_spill] sm:$0xff] }
 0x341   :  { %21273 = vst [vmem:[#allocation255_spill] sm:$0xff] %v17101_v43  ;;  %v17118_v43 = vadd.f32 %v1425_v53, %v21279_v9  ;;  %2302 = vperm.xlu1 %14015, %v17098_v62   ;;  %v2510_v35 = vadd.f32 %v2446_v20, %v1990_v7  ;;  %v2448_v26 = vmul.f32 %v16412_v37, %v21282_v19  ;;  %v21283_v63 = vld [vmem:[#allocation277_spill] sm:$0xff]  ;;  %v17132_v2 = vld [vmem:[%s20702_s0 + $0x219] sm:$0xff] }
 0x342   :  { %3848 = vperm.xlu0 %14014, %v21281_v49   ;;  %v3035_v54 = vadd.f32 %v2971_v15, %v2515_v27  ;;  %v3490_v1 = vmul.f32 %v16463_v42, %v21283_v63  ;;  %v12199_v53 = vld [vmem:[%s20702_s0 + $0x210] sm:$0xff]  ;;  %21284 = vst [vmem:[#allocation16_spill] sm:$0xff] %v17132_v2  ;;  %v3033_v6 = vadd.f32 %v2969_v46, %v2513_v31  ;;  %v12369_v15 = vrot.slane %v17046_v13, 9  ;;  %v17139_v27 = vpop.permute.xlu1 %3258  ;;  %v17141_v34 = vpop.permute.xlu0 %3233  ;;  %v21289_v7 = vld [vmem:[#allocation283_spill] sm:$0xff] }
 0x343   :  { %21280 = vst [vmem:[#allocation235_spill] sm:$0xff] %v17118_v43  ;;  %v21285_v44 = vld [vmem:[#allocation281_spill] sm:$0xff]  ;;  %v4012_v20 = vmul.f32 %v16488_v45, %v21286_v33  ;;  %21287 = vst [vmem:[#allocation83_spill] sm:$0xff] %v17139_v27  ;;  %v2968_v9 = vmul.f32 %v16441_v32, %v21289_v7  ;;  %v21290_v49 = vld [vmem:[#allocation170_spill] sm:$0xff]  ;;  %v12371_v46 = vrot.slane %v4762_v25, 9  ;;  %v4764_v31 = vcombine.high %v4762_v25, %v4762_v25 }
 0x344   :  { %v2966_v59 = vmul.f32 %v16441_v32, %v21285_v44  ;;  %21288 = vst [vmem:[#allocation268_spill] sm:$0xff] %v17141_v34  ;;  %v3556_v19 = vadd.f32 %v3492_v61, %v3035_v54  ;;  %v4010_v63 = vmul.f32 %v16488_v45, %v21290_v49  ;;  %v5779_v43 = vmax.f32 %v4763_v18, %v12370_v39  ;;  %v21291_v12 = vld [vmem:[#allocation19_spill] sm:$0xff]  ;;  %v12201_v7 = vld [vmem:[%s20702_s0 + $0x228] sm:$0xff] }
 0x345   :  { %v4532_v44 = vmul.f32 %v16505_v14, %v16843_v58  ;;  %3338 = vperm.xlu1 %14015, %v12199_v53   ;;  %v2512_v33 = vadd.f32 %v2448_v26, %v1992_v50  ;;  %v3554_v27 = vadd.f32 %v3490_v1, %v3033_v6  ;;  %v3487_v61 = vmul.f32 %v16463_v42, %v21291_v12  ;;  %v21292_v54 = vld [vmem:[#allocation47_spill] sm:$0xff] }
 0x346   :  { %2312 = vperm.xlu0 %14014, %v17132_v2   ;;  %v3489_v32 = vmul.f32 %v16463_v42, %v21292_v54  ;;  %v3030_v49 = vadd.f32 %v2966_v59, %v2510_v35  ;;  %v4076_v18 = vadd.f32 %v4012_v20, %v3556_v19  ;;  %v5778_v39 = vmax.f32 %v17046_v13, %v12369_v15  ;;  %v4224_v53 = vpop.permute.xlu1 %4223  ;;  %v17160_v50 = vpop.permute.xlu0 %3268  ;;  %v21294_v35 = vld [vmem:[#allocation74_spill] sm:$0xff]  ;;  %v21295_v13 = vld [vmem:[#allocation131_spill] sm:$0xff] }
 0x347   :  { %v4530_v58 = vmul.f32 %v16505_v14, %v16820_v0  ;;  %21293 = vst [vmem:[#allocation271_spill] sm:$0xff] %v17160_v50  ;;  %v3032_v26 = vadd.f32 %v2968_v9, %v2512_v33  ;;  %v5780_v1 = vmax.f32 %v4762_v25, %v12371_v46  ;;  %v4007_v12 = vmul.f32 %v16488_v45, %v16884_v29  ;;  %v14070_v0 = vld [vmem:[%s20702_s0 + $0x12a] sm:$0xff] }
 0x348   :  { %v4009_v42 = vmul.f32 %v16488_v45, %v16915_v40  ;;  %v4074_v6 = vadd.f32 %v4010_v63, %v3554_v27  ;;  %v12372_v54 = vrot.slane %v4764_v31, 9  ;;  %v5942_v59 = vadd.f32 %v21294_v35, %v5779_v43  ;;  %v17176_v45 = vld [vmem:[%s20702_s0 + $0x231] sm:$0xff]  ;;  %v21297_v40 = vld [vmem:[#allocation132_spill] sm:$0xff] }
 0x349   :  { %v4596_v20 = vadd.f32 %v4532_v44, %v4076_v18  ;;  %4303 = vperm.xlu1 %14015, %v14070_v0   ;;  %v1427_v25 = vmul.f32 %v21168_v41, %v21295_v13  ;;  %v3551_v15 = vadd.f32 %v3487_v61, %v3030_v49  ;;  %v3553_v19 = vadd.f32 %v3489_v32, %v3032_v26  ;;  %v21298_v27 = vld [vmem:[#allocation134_spill] sm:$0xff]  ;;  %v21299_v61 = vld [vmem:[#allocation76_spill] sm:$0xff] }
 0x34a   :  { %3348 = vperm.xlu0 %14014, %v12201_v7   ;;  %v4527_v29 = vmul.f32 %v16505_v14, %v4224_v53  ;;  %21296 = vst [vmem:[#allocation275_spill] sm:$0xff] %v17176_v45  ;;  %v1426_v43 = vmul.f32 %v21168_v41, %v21297_v40  ;;  %v1428_v9 = vmul.f32 %v21168_v41, %v21298_v27  ;;  %v17183_v44 = vpop.permute.xlu1 %4258  ;;  %v4234_v33 = vpop.permute.xlu0 %4233  ;;  %v21300_v53 = vld [vmem:[#allocation51_spill] sm:$0xff]  ;;  %v6070_v13 = vmax.f32 %v5942_v59, 0.0  ;;  %v14071_v41 = vld [vmem:[%s20702_s0 + $0x142] sm:$0xff] }
 0x34b   :  { %v5941_v63 = vadd.f32 %v16744_v57, %v5778_v39  ;;  %v4594_v46 = vadd.f32 %v4530_v58, %v4074_v6  ;;  %v5943_v32 = vadd.f32 %v21299_v61, %v5780_v1  ;;  %v4071_v7 = vadd.f32 %v4007_v12, %v3551_v15  ;;  %v21302_v39 = vld [vmem:[#allocation53_spill] sm:$0xff]  ;;  %v21306_v6 = vld [vmem:[#allocation54_spill] sm:$0xff]  ;;  %v21308_v59 = vld [vmem:[#allocation55_spill] sm:$0xff] }
 0x34c   :  { %v4073_v49 = vadd.f32 %v4009_v42, %v3553_v19  ;;  %v4529_v18 = vmul.f32 %v16505_v14, %v4234_v33  ;;  %v17189_v26 = vadd.f32 %v17105_v5, %v21300_v53  ;;  %v5781_v0 = vmax.f32 %v4764_v31, %v12372_v54  ;;  %v21304_v1 = vld [vmem:[#allocation177_spill] sm:$0xff]  ;;  %v21312_v33 = vld [vmem:[#allocation136_spill] sm:$0xff] }
 0x34d   :  { %v17191_v40 = vmax.f32 %v4594_v46, %v4596_v20  ;;  %2322 = vperm.xlu1 %14015, %v17176_v45   ;;  %v17198_v58 = vadd.f32 %v1427_v25, %v21302_v39  ;;  %v1930_v14 = vmul.f32 %v21182_v10, %v21304_v1  ;;  %v4591_v12 = vadd.f32 %v4527_v29, %v4071_v7  ;;  %v12196_v31 = vld [vmem:[%s20702_s0 + $0x1e8] sm:$0xff]  ;;  %v21310_v25 = vld [vmem:[#allocation179_spill] sm:$0xff]  ;;  %v17225_v46 = vld [vmem:[%s20703_s1 + $0x2] ss:$0 sm:$0xff] }
 0x34e   :  { %21301 = vst [vmem:[#allocation278_spill] sm:$0xff] %v17189_v26  ;;  %4313 = vperm.xlu0 %14014, %v14071_v41   ;;  %v4593_v5 = vadd.f32 %v4529_v18, %v4073_v49  ;;  %v17208_v42 = vld [vmem:[%s20702_s0 + $0x249] sm:$0xff]  ;;  %v17211_v54 = vadd.f32 %v1426_v43, %v21306_v6  ;;  %v17214_v20 = vadd.f32 %v1428_v9, %v21308_v59  ;;  %v6069_v19 = vmax.f32 %v5941_v63, 0.0  ;;  %v17218_v29 = vpop.permute.xlu1 %2277  ;;  %v17220_v27 = vpop.permute.xlu0 %4268  ;;  %v21316_v39 = vld [vmem:[#allocation138_spill] sm:$0xff]  ;;  %v21325_v26 = vld [vmem:[#allocation287_spill] sm:$0xff] }
 0x34f   :  { %21303 = vst [vmem:[#allocation84_spill] sm:$0xff] %v17198_v58  ;;  %21305 = vst [vmem:[#allocation109_spill] sm:$0xff] %v17208_v42  ;;  %v1932_v15 = vmul.f32 %v21182_v10, %v21310_v25  ;;  %v17229_v43 = vmul.f32 %v17225_v46, %v21312_v33  ;;  %v21314_v7 = vld [vmem:[#allocation137_spill] sm:$0xff]  ;;  %v6071_v49 = vmax.f32 %v5943_v32, 0.0  ;;  %v6408_v53 = vrot.slane %v6070_v13, %v16848_v16  ;;  %v12198_v13 = vld [vmem:[%s20702_s0 + $0x200] sm:$0xff] }
 0x350   :  { %21307 = vst [vmem:[#allocation110_spill] sm:$0xff] %v17211_v54  ;;  %21309 = vst [vmem:[#allocation112_spill] sm:$0xff] %v17214_v20  ;;  %v17233_v9 = vmul.f32 %v17225_v46, %v21314_v7  ;;  %v4653_v10 = vmax.f32 %v4591_v12, %v4593_v5  ;;  %v21315_v63 = vld [vmem:[#allocation77_spill] sm:$0xff]  ;;  %v17239_v41 = vrot.slane %v17191_v40, %v16592_v4  ;;  %v21317_v5 = vld [vmem:[#allocation240_spill] sm:$0xff] }
 0x351   :  { %21311 = vst [vmem:[#allocation174_spill] sm:$0xff] %v17218_v29  ;;  %21313 = vst [vmem:[#allocation176_spill] sm:$0xff] %v17229_v43  ;;  %v5944_v18 = vadd.f32 %v21315_v63, %v5781_v0  ;;  %3323 = vperm.xlu1 %14015, %v12196_v31   ;;  %v17244_v1 = vmul.f32 %v17225_v46, %v21316_v39  ;;  %v1994_v6 = vadd.f32 %v1930_v14, %v17002_v52  ;;  %v12203_v0 = vld [vmem:[%s20702_s0 + $0x240] sm:$0xff]  ;;  %v21318_v25 = vld [vmem:[#allocation242_spill] sm:$0xff] }
 0x352   :  { %2332 = vperm.xlu0 %14014, %v17208_v42   ;;  %v4765_v59 = vcombine.high %v4653_v10, %v4653_v10  ;;  %v4772_v32 = vrot.slane %v4653_v10, %v16592_v4  ;;  %v1996_v12 = vadd.f32 %v1932_v15, %v17015_v55  ;;  %v2450_v31 = vmul.f32 %v16412_v37, %v21317_v5  ;;  %v17260_v14 = vpop.permute.xlu1 %3243  ;;  %v17262_v7 = vpop.permute.xlu0 %2287 }
 0x353   :  { %v2452_v33 = vmul.f32 %v16412_v37, %v21318_v25  ;;  %v6404_v52 = vrot.slane %v6069_v19, %v16848_v16  ;;  %21319 = vst [vmem:[#allocation237_spill] sm:$0xff] %v17260_v14  ;;  %21320 = vst [vmem:[#allocation239_spill] sm:$0xff] %v17262_v7  ;;  %v6412_v10 = vrot.slane %v6071_v49, %v16848_v16  ;;  %v6072_v29 = vmax.f32 %v5944_v18, 0.0  ;;  %v12205_v49 = vld [vmem:[%s20702_s0 + $0x258] sm:$0xff]  ;;  %v17277_v18 = vld [vmem:[%s20703_s1 + $0x3] ss:$0 sm:$0xff] }
 0x354   :  { %v4779_v39 = vrot.slane %v4765_v59, %v16592_v4  ;;  %v4780_v20 = vcombine.high %v4772_v32, %v4772_v32  ;;  %v12373_v43 = vrot.slane %v4772_v32, 9  ;;  %v4782_v15 = vcombine.high %v17191_v40, %v17191_v40 }
 0x355   :  { %v6895_v55 = vsel %vm6881_vm3, %v6408_v53, %v6404_v52  ;;  %v4797_v37 = vcombine.high %v17239_v41, %v17239_v41  ;;  %3358 = vperm.xlu1 %14015, %v12203_v0   ;;  %v21321_v53 = vld [vmem:[#allocation182_spill] sm:$0xff]  ;;  %v2514_v59 = vadd.f32 %v2450_v31, %v1994_v6  ;;  %v2516_v0 = vadd.f32 %v2452_v33, %v1996_v12 }
 0x356   :  { %3333 = vperm.xlu0 %14014, %v12198_v13   ;;  %v4781_v19 = vcombine.high %v4779_v39, %v4779_v39  ;;  %v12374_v5 = vrot.slane %v4780_v20, 9  ;;  %v12375_v25 = vrot.slane %v4779_v39, 9  ;;  %v5782_v7 = vmax.f32 %v4772_v32, %v12373_v43  ;;  %v17286_v13 = vld [vmem:[%s20703_s1 + $0x5] ss:$0 sm:$0xff]  ;;  %v21322_v43 = vld [vmem:[#allocation17_spill] sm:$0xff]  ;;  %v17290_v52 = vpop.permute.xlu1 %3278  ;;  %v17292_v50 = vpop.permute.xlu0 %3253 }
 0x357   :  { %v17281_v40 = vmul.f32 %v17277_v18, %v21321_v53  ;;  %v2970_v32 = vmul.f32 %v17286_v13, %v21322_v43  ;;  %21323 = vst [vmem:[#allocation256_spill] sm:$0xff] %v17290_v52  ;;  %21324 = vst [vmem:[#allocation269_spill] sm:$0xff] %v17292_v50  ;;  %v6416_v6 = vrot.slane %v6072_v29, %v16848_v16  ;;  %v12378_v33 = vrot.slane %v4797_v37, 9  ;;  %v14075_v43 = vld [vmem:[%s20702_s0 + $0x15a] sm:$0xff]  ;;  %v17306_v29 = vld [vmem:[%s20702_s0 + $0x172] sm:$0xff] }
 0x358   :  { %v12376_v14 = vrot.slane %v4781_v19, 9  ;;  %v5783_v54 = vmax.f32 %v4780_v20, %v12374_v5  ;;  %v5784_v58 = vmax.f32 %v4779_v39, %v12375_v25  ;;  %v5945_v53 = vadd.f32 %v21325_v26, %v5782_v7  ;;  %21326 = vst [vmem:[#allocation259_spill] sm:$0xff] %v17306_v29  ;;  %v21327_v7 = vld [vmem:[#allocation42_spill] sm:$0xff] }
 0x359   :  { %v6896_v12 = vsel %vm6883_vm4, %v6412_v10, %v6895_v55  ;;  %v4796_v31 = vrot.slane %v4782_v15, %v16592_v4  ;;  %4323 = vperm.xlu1 %14015, %v14075_v43   ;;  %v2972_v10 = vmul.f32 %v17286_v13, %v21327_v7  ;;  %v17313_v55 = vld [vmem:[%s20703_s1 + $0x6] ss:$0 sm:$0xff]  ;;  %v5787_v2 = vmax.f32 %v4797_v37, %v12378_v33 }
 0x35a   :  { %3368 = vperm.xlu0 %14014, %v12205_v49   ;;  %v5785_v52 = vmax.f32 %v4781_v19, %v12376_v14  ;;  %v5946_v50 = vadd.f32 %v16879_v17, %v5783_v54  ;;  %v5947_v20 = vadd.f32 %v16866_v30, %v5784_v58  ;;  %v6073_v39 = vmax.f32 %v5945_v53, 0.0  ;;  %v21328_v15 = vld [vmem:[#allocation60_spill] sm:$0xff]  ;;  %v21329_v54 = vld [vmem:[#allocation70_spill] sm:$0xff]  ;;  %v4244_v5 = vpop.permute.xlu1 %4243  ;;  %v17320_v25 = vpop.permute.xlu0 %3288 }
 0x35b   :  { %v3491_v14 = vmul.f32 %v17313_v55, %v21328_v15  ;;  %v3493_v58 = vmul.f32 %v17313_v55, %v21329_v54  ;;  %v12377_v19 = vrot.slane %v17239_v41, 9  ;;  %21330 = vst [vmem:[#allocation279_spill] sm:$0xff] %v17320_v25  ;;  %v4798_v45 = vcombine.high %v4796_v31, %v4796_v31  ;;  %v14077_v15 = vld [vmem:[%s20702_s0 + $0x1e2] sm:$0xff] }
 0x35c   :  { %v5948_v49 = vadd.f32 %v16893_v22, %v5785_v52  ;;  %v6074_v53 = vmax.f32 %v5946_v50, 0.0  ;;  %v6075_v43 = vmax.f32 %v5947_v20, 0.0  ;;  %v6420_v7 = vrot.slane %v6073_v39, %v16848_v16  ;;  %v17335_v37 = vld [vmem:[%s20702_s0 + $0x202] sm:$0xff] }
 0x35d   :  { %v12379_v42 = vrot.slane %v4796_v31, 9  ;;  %v6897_v34 = vsel %vm6885_vm5, %v6416_v6, %v6896_v12  ;;  %4358 = vperm.xlu1 %14015, %v14077_v15   ;;  %v21331_v6 = vld [vmem:[#allocation184_spill] sm:$0xff]  ;;  %v3034_v33 = vadd.f32 %v2970_v32, %v2514_v59  ;;  %v3036_v20 = vadd.f32 %v2972_v10, %v2516_v0 }
 0x35e   :  { %4333 = vperm.xlu0 %14014, %v17306_v29   ;;  %v6076_v54 = vmax.f32 %v5948_v49, 0.0  ;;  %v6424_v25 = vrot.slane %v6074_v53, %v16848_v16  ;;  %v6428_v50 = vrot.slane %v6075_v43, %v16848_v16  ;;  %v6898_v52 = vsel %vm6887_vm6, %v6420_v7, %v6897_v34  ;;  %v17340_v15 = vpop.permute.xlu1 %4278  ;;  %v4254_v49 = vpop.permute.xlu0 %4253  ;;  %v17345_v53 = vld [vmem:[%s20703_s1 + $0x7] ss:$0 sm:$0xff] }
 0x35f   :  { %v1935_v12 = vmul.f32 %v17277_v18, %v21331_v6  ;;  %v5786_v39 = vmax.f32 %v17239_v41, %v12377_v19  ;;  %v4011_v34 = vmul.f32 %v17345_v53, %v17020_v36  ;;  %v4013_v43 = vmul.f32 %v17345_v53, %v17073_v28  ;;  %v21332_v19 = vld [vmem:[#allocation193_spill] sm:$0xff]  ;;  %v17361_v28 = vld [vmem:[%s20703_s1 + $0x8] ss:$0 sm:$0xff] }
 0x360   :  { %v6432_v7 = vrot.slane %v6076_v54, %v16848_v16  ;;  %v6899_v59 = vsel %vm6889_vm7, %v6424_v25, %v6898_v52  ;;  %v12380_v0 = vrot.slane %v4798_v45, 9  ;;  %v5788_v41 = vmax.f32 %v4796_v31, %v12379_v42  ;;  %v21333_v42 = vld [vmem:[#allocation57_spill] sm:$0xff]  ;;  %v21335_v54 = vld [vmem:[#allocation247_spill] sm:$0xff] }
 0x361   :  { %v5950_v32 = vadd.f32 %v21294_v35, %v5787_v2  ;;  %v6900_v10 = vsel %vm6891_vm8, %v6428_v50, %v6899_v59  ;;  %2822 = vperm.xlu1 %14015, %v17335_v37   ;;  %v3555_v6 = vadd.f32 %v3491_v14, %v3034_v33  ;;  %v3557_v29 = vadd.f32 %v3493_v58, %v3036_v20  ;;  %v12265_v2 = vld [vmem:[%s20702_s0 + $0x211] sm:$0xff]  ;;  %v17375_v58 = vld [vmem:[%s20703_s1 + $0x4] ss:$0 sm:$0xff] }
 0x362   :  { %4368 = vperm.xlu0 %14014, %v21332_v19   ;;  %v6901_v36 = vsel %vm6893_vm9, %v6432_v7, %v6900_v10  ;;  %v4531_v25 = vmul.f32 %v17361_v28, %v4244_v5  ;;  %v17369_v31 = vadd.f32 %v17233_v9, %v21333_v42  ;;  %v1999_v14 = vadd.f32 %v1935_v12, %v17034_v60  ;;  %v17381_v52 = vpop.permute.xlu1 %2742  ;;  %v17383_v33 = vpop.permute.xlu0 %4288  ;;  %v17388_v60 = vld [vmem:[%s20702_s0 + $0x21a] sm:$0xff]  ;;  %v21337_v9 = vld [vmem:[#allocation245_spill] sm:$0xff] }
 0x363   :  { %v2455_v50 = vmul.f32 %v17375_v58, %v21335_v54  ;;  %v5949_v5 = vadd.f32 %v16744_v57, %v5786_v39  ;;  %7018 = vst.msk [vmem:[#allocation2 + $0x21] sm:$0xff] %vm6189_vm0, %v6901_v36  ;;  %21336 = vst [vmem:[#allocation276_spill] sm:$0xff] %v17381_v52  ;;  %v2453_v12 = vmul.f32 %v17375_v58, %v21337_v9  ;;  %v21338_v10 = vld [vmem:[#allocation285_spill] sm:$0xff]  ;;  %v6078_v42 = vmax.f32 %v5950_v32, 0.0  ;;  %v21339_v52 = vld [vmem:[#allocation282_spill] sm:$0xff] }
 0x364   :  { %21334 = vst [vmem:[#allocation267_spill] sm:$0xff] %v17369_v31  ;;  %v4075_v20 = vadd.f32 %v4011_v34, %v3555_v6  ;;  %v4077_v7 = vadd.f32 %v4013_v43, %v3557_v29  ;;  %v4533_v59 = vmul.f32 %v17361_v28, %v4254_v49  ;;  %v2975_v39 = vmul.f32 %v17286_v13, %v21338_v10  ;;  %v17404_v29 = vld [vmem:[%s20702_s0 + $0x232] sm:$0xff]  ;;  %v21343_v43 = vld [vmem:[#allocation52_spill] sm:$0xff]  ;;  %v21345_v32 = vld [vmem:[#allocation139_spill] sm:$0xff] }
 0x365   :  { %v5789_v19 = vmax.f32 %v4798_v45, %v12380_v0  ;;  %v5951_v36 = vadd.f32 %v21299_v61, %v5788_v41  ;;  %3858 = vperm.xlu1 %14015, %v12265_v2   ;;  %v1997_v54 = vadd.f32 %v17281_v40, %v17028_v21  ;;  %v2973_v31 = vmul.f32 %v17286_v13, %v21339_v52  ;;  %v21341_v45 = vld [vmem:[#allocation58_spill] sm:$0xff] }
 0x366   :  { %v4595_v57 = vadd.f32 %v4531_v25, %v4075_v20  ;;  %v4597_v9 = vadd.f32 %v4533_v59, %v4077_v7  ;;  %2832 = vperm.xlu0 %14014, %v17388_v60   ;;  %21340 = vst [vmem:[#allocation274_spill] sm:$0xff] %v17404_v29  ;;  %v17408_v49 = vadd.f32 %v17244_v1, %v21341_v45  ;;  %v6077_v40 = vmax.f32 %v5949_v5, 0.0  ;;  %v17412_v0 = vpop.permute.xlu1 %3743  ;;  %v17414_v41 = vpop.permute.xlu0 %2752  ;;  %v21346_v25 = vld [vmem:[#allocation140_spill] sm:$0xff]  ;;  %v21347_v59 = vld [vmem:[#allocation46_spill] sm:$0xff] }
 0x367   :  { %v2519_v34 = vadd.f32 %v2455_v50, %v1999_v14  ;;  %v3496_v21 = vmul.f32 %v17313_v55, %v21343_v43  ;;  %21344 = vst [vmem:[#allocation284_spill] sm:$0xff] %v17414_v41  ;;  %v1435_v6 = vmul.f32 %v17225_v46, %v21345_v32  ;;  %v17420_v2 = vmul.f32 %v17225_v46, %v21346_v25  ;;  %v21348_v32 = vld [vmem:[#allocation65_spill] sm:$0xff] }
 0x368   :  { %21342 = vst [vmem:[#allocation18_spill] sm:$0xff] %v17408_v49  ;;  %v2517_v52 = vadd.f32 %v2453_v12, %v1997_v54  ;;  %v4655_v20 = vmax.f32 %v4595_v57, %v4597_v9  ;;  %v5952_v14 = vadd.f32 %v21315_v63, %v5789_v19  ;;  %v6079_v50 = vmax.f32 %v5951_v36, 0.0  ;;  %v12262_v57 = vld [vmem:[%s20702_s0 + $0x1e9] sm:$0xff] }
 0x369   :  { %v3039_v1 = vadd.f32 %v2975_v39, %v2519_v34  ;;  %v6440_v7 = vrot.slane %v6078_v42, %v16848_v16  ;;  %2842 = vperm.xlu1 %14015, %v17404_v29   ;;  %v3494_v10 = vmul.f32 %v17313_v55, %v21347_v59  ;;  %v6436_v19 = vrot.slane %v6077_v40, %v16848_v16  ;;  %v17444_v54 = vld [vmem:[%s20702_s0 + $0x24a] sm:$0xff] }
 0x36a   :  { %v3037_v5 = vadd.f32 %v2973_v31, %v2517_v52  ;;  %v4799_v45 = vcombine.high %v4655_v20, %v4655_v20  ;;  %v4806_v43 = vrot.slane %v4655_v20, %v16592_v4  ;;  %3868 = vperm.xlu0 %14014, %v21348_v32   ;;  %v7055_v25 = vld [vmem:[#allocation2 + $0x21] sm:$0xff]  ;;  %v4016_v31 = vmul.f32 %v17345_v53, %v16938_v51  ;;  %v17435_v36 = vpop.permute.xlu1 %3778  ;;  %v17439_v42 = vpop.permute.xlu0 %3753 }
 0x36b   :  { %v7462_v12 = vld [vmem:[#allocation2 + $0x22] sm:$0xff]  ;;  %v3560_v39 = vadd.f32 %v3496_v21, %v3039_v1  ;;  %21349 = vst [vmem:[#allocation111_spill] sm:$0xff] %v17435_v36  ;;  %13126 = vmatprep.mubr.msk.f32.mxu1 %vm6189_vm0, %v7055_v25  ;;  %21350 = vst [vmem:[#allocation113_spill] sm:$0xff] %v17444_v54  ;;  %v4014_v9 = vmul.f32 %v17345_v53, %v16913_v3  ;;  %v6080_v40 = vmax.f32 %v5952_v14, 0.0 }
 0x36c   :  { %13190 = vmatprep.mubr.msk.f32.mxu0 %vm6189_vm0, %v7462_v12  ;;  %v4813_v34 = vrot.slane %v4799_v45, %v16592_v4  ;;  %v4814_v21 = vcombine.high %v4806_v43, %v4806_v43  ;;  %v12381_v51 = vrot.slane %v4806_v43, 9  ;;  %v6444_v52 = vrot.slane %v6079_v50, %v16848_v16  ;;  %v12269_v3 = vld [vmem:[%s20702_s0 + $0x241] sm:$0xff]  ;;  %v21351_v45 = vld [vmem:[#allocation141_spill] sm:$0xff] }
 0x36d   :  { %v6902_v20 = vsel %vm6881_vm3, %v6440_v7, %v6436_v19  ;;  %v4536_v1 = vmul.f32 %v17361_v28, %v17220_v27  ;;  %3843 = vperm.xlu1 %14015, %v12262_v57   ;;  %v1437_v14 = vmul.f32 %v17225_v46, %v21351_v45  ;;  %v3558_v50 = vadd.f32 %v3494_v10, %v3037_v5 }
 0x36e   :  { %v4815_v59 = vcombine.high %v4813_v34, %v4813_v34  ;;  %v12382_v32 = vrot.slane %v4814_v21, 9  ;;  %v12383_v25 = vrot.slane %v4813_v34, 9  ;;  %v5790_v12 = vmax.f32 %v4806_v43, %v12381_v51  ;;  %2852 = vperm.xlu0 %14014, %v17444_v54   ;;  %v17461_v27 = vpop.permute.xlu1 %2762  ;;  %v17463_v57 = vpop.permute.xlu0 %3788 }
 0x36f   :  { %v4080_v41 = vadd.f32 %v4016_v31, %v3560_v39  ;;  %v4534_v7 = vmul.f32 %v17361_v28, %v17183_v44  ;;  %21352 = vst [vmem:[#allocation114_spill] sm:$0xff] %v17461_v27  ;;  %v6448_v29 = vrot.slane %v6080_v40, %v16848_v16  ;;  %v6903_v54 = vsel %vm6883_vm4, %v6444_v52, %v6902_v20  ;;  %v12200_v31 = vld [vmem:[%s20702_s0 + $0x218] sm:$0xff] }
 0x370   :  { %v12384_v19 = vrot.slane %v4815_v59, 9  ;;  %v5791_v43 = vmax.f32 %v4814_v21, %v12382_v32  ;;  %v5792_v51 = vmax.f32 %v4813_v34, %v12383_v25  ;;  %v5953_v36 = vadd.f32 %v21325_v26, %v5790_v12  ;;  %v21353_v34 = vld [vmem:[#allocation59_spill] sm:$0xff]  ;;  %v21354_v40 = vld [vmem:[#allocation142_spill] sm:$0xff]  ;;  %v21358_v12 = vld [vmem:[#allocation61_spill] sm:$0xff] }
 0x371   :  { %v4078_v49 = vadd.f32 %v4014_v9, %v3558_v50  ;;  %v4600_v45 = vadd.f32 %v4536_v1, %v4080_v41  ;;  %3878 = vperm.xlu1 %14015, %v12269_v3   ;;  %v17475_v21 = vadd.f32 %v1435_v6, %v21353_v34  ;;  %v1436_v9 = vmul.f32 %v17225_v46, %v21354_v40  ;;  %v21355_v41 = vld [vmem:[#allocation143_spill] sm:$0xff]  ;;  %v21402_v27 = vld [vmem:[#allocation246_spill] sm:$0xff] }
 0x372   :  { %v5793_v5 = vmax.f32 %v4815_v59, %v12384_v19  ;;  %v5954_v10 = vadd.f32 %v16879_v17, %v5791_v43  ;;  %v5955_v44 = vadd.f32 %v16866_v30, %v5792_v51  ;;  %v6081_v39 = vmax.f32 %v5953_v36, 0.0  ;;  %3853 = vperm.xlu0 %14014, %v17098_v62   ;;  %v17481_v1 = vpop.permute.xlu1 %2797  ;;  %v17483_v59 = vpop.permute.xlu0 %2772  ;;  %v17488_v62 = vld [vmem:[%s20702_s0 + $0x259] sm:$0xff] }
 0x373   :  { %v1439_v52 = vmul.f32 %v17225_v46, %v21355_v41  ;;  %v4598_v20 = vadd.f32 %v4534_v7, %v4078_v49  ;;  %21356 = vst [vmem:[#allocation115_spill] sm:$0xff] %v17481_v1  ;;  %21357 = vst [vmem:[#allocation116_spill] sm:$0xff] %v17483_v59  ;;  %v17494_v3 = vadd.f32 %v17420_v2, %v21358_v12  ;;  %v21359_v49 = vld [vmem:[#allocation62_spill] sm:$0xff]  ;;  %v21386_v59 = vld [vmem:[#allocation251_spill] sm:$0xff] }
 0x374   :  { %v5956_v36 = vadd.f32 %v16893_v22, %v5793_v5  ;;  %v6082_v6 = vmax.f32 %v5954_v10, 0.0  ;;  %v6083_v32 = vmax.f32 %v5955_v44, 0.0  ;;  %v6452_v25 = vrot.slane %v6081_v39, %v16848_v16  ;;  %v21360_v44 = vld [vmem:[#allocation63_spill] sm:$0xff]  ;;  %v21361_v39 = vld [vmem:[#allocation64_spill] sm:$0xff]  ;;  %v12202_v41 = vld [vmem:[%s20702_s0 + $0x230] sm:$0xff] }
 0x375   :  { %v17497_v50 = vadd.f32 %v1437_v14, %v21359_v49  ;;  %v17499_v7 = vmax.f32 %v4598_v20, %v4600_v45  ;;  %v6904_v19 = vsel %vm6885_vm5, %v6448_v29, %v6903_v54  ;;  %3343 = vperm.xlu1 %14015, %v12200_v31   ;;  %v17507_v2 = vadd.f32 %v1436_v9, %v21360_v44  ;;  %v21363_v45 = vld [vmem:[#allocation144_spill] sm:$0xff]  ;;  %v21364_v29 = vld [vmem:[#allocation145_spill] sm:$0xff]  ;;  %v21366_v20 = vld [vmem:[#allocation146_spill] sm:$0xff] }
 0x376   :  { %v6084_v43 = vmax.f32 %v5956_v36, 0.0  ;;  %v6456_v51 = vrot.slane %v6082_v6, %v16848_v16  ;;  %v6460_v5 = vrot.slane %v6083_v32, %v16848_v16  ;;  %v6905_v10 = vsel %vm6887_vm6, %v6452_v25, %v6904_v19  ;;  %3888 = vperm.xlu0 %14014, %v17488_v62   ;;  %v17516_v31 = vpop.permute.xlu1 %3763  ;;  %v17518_v40 = vpop.permute.xlu0 %2807  ;;  %v21367_v36 = vld [vmem:[#allocation147_spill] sm:$0xff]  ;;  %v21368_v25 = vld [vmem:[#allocation148_spill] sm:$0xff]  ;;  %v21369_v49 = vld [vmem:[#allocation181_spill] sm:$0xff] }
 0x377   :  { %v17510_v14 = vadd.f32 %v1439_v52, %v21361_v39  ;;  %v1438_v34 = vmul.f32 %v17225_v46, %v21363_v45  ;;  %v1441_v54 = vmul.f32 %v17225_v46, %v21364_v29  ;;  %21365 = vst [vmem:[#allocation118_spill] sm:$0xff] %v17518_v40  ;;  %v1440_v9 = vmul.f32 %v17225_v46, %v21366_v20  ;;  %v21370_v44 = vld [vmem:[#allocation183_spill] sm:$0xff]  ;;  %v21371_v29 = vld [vmem:[#allocation185_spill] sm:$0xff]  ;;  %v21401_v1 = vld [vmem:[#allocation194_spill] sm:$0xff] }
 0x378   :  { %v1443_v52 = vmul.f32 %v17225_v46, %v21367_v36  ;;  %v6464_v6 = vrot.slane %v6084_v43, %v16848_v16  ;;  %v6906_v32 = vsel %vm6889_vm7, %v6456_v51, %v6905_v10  ;;  %v1442_v12 = vmul.f32 %v17225_v46, %v21368_v25  ;;  %v21372_v36 = vld [vmem:[#allocation186_spill] sm:$0xff]  ;;  %v12204_v10 = vld [vmem:[%s20702_s0 + $0x248] sm:$0xff] }
 0x379   :  { %21362 = vst [vmem:[#allocation117_spill] sm:$0xff] %v17510_v14  ;;  %v1934_v19 = vmul.f32 %v17277_v18, %v21369_v49  ;;  %v1936_v39 = vmul.f32 %v17277_v18, %v21370_v44  ;;  %v6907_v45 = vsel %vm6891_vm8, %v6460_v5, %v6906_v32  ;;  %4378 = vperm.xlu1 %14015, %v16909_v23   ;;  %v21373_v5 = vld [vmem:[#allocation66_spill] sm:$0xff]  ;;  %v21375_v23 = vld [vmem:[#allocation72_spill] sm:$0xff]  ;;  %v21377_v49 = vld [vmem:[#allocation187_spill] sm:$0xff] }
 0x37a   :  { %v1938_v20 = vmul.f32 %v17277_v18, %v21371_v29  ;;  %v1937_v43 = vmul.f32 %v17277_v18, %v21372_v36  ;;  %v17543_v51 = vrot.slane %v17499_v7, %v16592_v4  ;;  %v6908_v46 = vsel %vm6893_vm9, %v6464_v6, %v6907_v45  ;;  %3353 = vperm.xlu0 %14014, %v12202_v41   ;;  %v21378_v29 = vld [vmem:[#allocation188_spill] sm:$0xff]  ;;  %v17560_v6 = vpop.permute.xlu1 %3798  ;;  %v21380_v41 = vld [vmem:[#allocation73_spill] sm:$0xff] }
 0x37b   :  { %v17550_v32 = vadd.f32 %v1438_v34, %v21373_v5  ;;  %v17553_v25 = vadd.f32 %v1441_v54, %v21375_v23  ;;  %v1940_v44 = vmul.f32 %v17277_v18, %v21377_v49  ;;  %v1939_v36 = vmul.f32 %v17277_v18, %v21378_v29  ;;  %7019 = vst.msk [vmem:[#allocation2 + $0x31] sm:$0xff] %vm6189_vm0, %v6908_v46  ;;  %v21383_v34 = vld [vmem:[#allocation189_spill] sm:$0xff]  ;;  %v21384_v5 = vld [vmem:[#allocation190_spill] sm:$0xff]  ;;  %v17572_v49 = vpop.permute.xlu0 %3773 }
 0x37c   :  { %21379 = vst [vmem:[#allocation121_spill] sm:$0xff] %v17560_v6  ;;  %v17563_v45 = vadd.f32 %v1440_v9, %v21380_v41  ;;  %v17566_v40 = vadd.f32 %v1443_v52, %v16942_v8  ;;  %v1942_v54 = vmul.f32 %v17277_v18, %v21383_v34  ;;  %v1941_v23 = vmul.f32 %v17277_v18, %v21384_v5  ;;  %v21389_v5 = vld [vmem:[#allocation249_spill] sm:$0xff] }
 0x37d   :  { %21374 = vst [vmem:[#allocation119_spill] sm:$0xff] %v17550_v32  ;;  %21376 = vst [vmem:[#allocation120_spill] sm:$0xff] %v17553_v25  ;;  %v17575_v29 = vadd.f32 %v1442_v12, %v16946_v47  ;;  %v1998_v46 = vadd.f32 %v1934_v19, %v17025_v24  ;;  %v2459_v9 = vmul.f32 %v17375_v58, %v21386_v59  ;;  %3363 = vperm.xlu1 %14015, %v12204_v10   ;;  %v21387_v24 = vld [vmem:[#allocation82_spill] sm:$0xff]  ;;  %v21388_v59 = vld [vmem:[#allocation13_spill] sm:$0xff] }
 0x37e   :  { %21381 = vst [vmem:[#allocation122_spill] sm:$0xff] %v17563_v45  ;;  %21382 = vst [vmem:[#allocation123_spill] sm:$0xff] %v17566_v40  ;;  %v4816_v8 = vcombine.high %v17499_v7, %v17499_v7  ;;  %v2000_v52 = vadd.f32 %v1936_v39, %v17031_v11  ;;  %v17584_v41 = vadd.f32 %v1938_v20, %v17037_v38  ;;  %4388 = vperm.xlu0 %14014, %v16957_v56   ;;  %v21390_v10 = vld [vmem:[#allocation44_spill] sm:$0xff]  ;;  %v17598_v38 = vpop.permute.xlu1 %2297  ;;  %v21392_v39 = vld [vmem:[#allocation15_spill] sm:$0xff] }
 0x37f   :  { %21385 = vst [vmem:[#allocation172_spill] sm:$0xff] %v17575_v29  ;;  %v2001_v34 = vadd.f32 %v1937_v43, %v17040_v48  ;;  %v4831_v47 = vcombine.high %v17543_v51, %v17543_v51  ;;  %v17591_v12 = vadd.f32 %v1940_v44, %v21387_v24  ;;  %v2003_v19 = vadd.f32 %v1939_v36, %v21388_v59  ;;  %v12206_v48 = vld [vmem:[%s20702_s0 + $0x260] sm:$0xff]  ;;  %v21394_v56 = vld [vmem:[#allocation169_spill] sm:$0xff]  ;;  %v21405_v25 = vld [vmem:[#allocation286_spill] sm:$0xff] }
 0x380   :  { %v2457_v7 = vmul.f32 %v17375_v58, %v21389_v5  ;;  %v2979_v11 = vmul.f32 %v17286_v13, %v21390_v10  ;;  %21391 = vst [vmem:[#allocation124_spill] sm:$0xff] %v17598_v38  ;;  %v17604_v20 = vadd.f32 %v1942_v54, %v21392_v39  ;;  %v17607_v43 = vadd.f32 %v1941_v23, %v21394_v56  ;;  %v21395_v44 = vld [vmem:[#allocation191_spill] sm:$0xff]  ;;  %v21396_v24 = vld [vmem:[#allocation244_spill] sm:$0xff]  ;;  %v17615_v5 = vpop.permute.xlu0 %3808  ;;  %v21397_v38 = vld [vmem:[#allocation106_spill] sm:$0xff] }
 0x381   :  { %v17611_v36 = vmul.f32 %v17277_v18, %v21395_v44  ;;  %v2454_v59 = vmul.f32 %v17375_v58, %v21396_v24  ;;  %v2523_v10 = vadd.f32 %v2459_v9, %v2003_v19  ;;  %v2977_v29 = vmul.f32 %v17286_v13, %v21397_v38  ;;  %v21398_v40 = vld [vmem:[#allocation75_spill] sm:$0xff]  ;;  %v21399_v23 = vld [vmem:[#allocation288_spill] sm:$0xff] }
 0x382   :  { %21393 = vst [vmem:[#allocation125_spill] sm:$0xff] %v17604_v20  ;;  %v3500_v54 = vmul.f32 %v17313_v55, %v21398_v40  ;;  %v4830_v39 = vrot.slane %v4816_v8, %v16592_v4  ;;  %4363 = vperm.xlu1 %14015, %v21399_v23   ;;  %v21400_v56 = vld [vmem:[#allocation192_spill] sm:$0xff]  ;;  %v17629_v24 = vmul.f32 %v17277_v18, %v21401_v1  ;;  %v12386_v19 = vrot.slane %v4831_v47, 9  ;;  %v7056_v38 = vld [vmem:[#allocation2 + $0x31] sm:$0xff] }
 0x383   :  { %v17625_v44 = vmul.f32 %v17277_v18, %v21400_v56  ;;  %v2456_v9 = vmul.f32 %v17375_v58, %v21402_v27  ;;  %v7463_v20 = vld [vmem:[#allocation2 + $0x32] sm:$0xff]  ;;  %3373 = vperm.xlu0 %14014, %v12206_v48   ;;  %v2521_v40 = vadd.f32 %v2457_v7, %v2001_v34  ;;  %v3043_v45 = vadd.f32 %v2979_v11, %v2523_v10  ;;  %v21403_v8 = vld [vmem:[#allocation68_spill] sm:$0xff]  ;;  %v17637_v56 = vpop.permute.xlu1 %3263  ;;  %v21408_v10 = vld [vmem:[#allocation79_spill] sm:$0xff] }
 0x384   :  { %v3498_v23 = vmul.f32 %v17313_v55, %v21403_v8  ;;  %13127 = vmatmul.mubr.msk.f32.gmra.mrb[2].mxu1 %vm6189_vm0, %v7056_v38  ;;  %13191 = vmatmul.mubr.msk.f32.gmra.mrb[2].mxu0 %vm6189_vm0, %v7463_v20  ;;  %21404 = vst [vmem:[#allocation126_spill] sm:$0xff] %v17637_v56  ;;  %v2518_v1 = vadd.f32 %v2454_v59, %v1998_v46  ;;  %v21406_v27 = vld [vmem:[#allocation234_spill] sm:$0xff]  ;;  %v12385_v48 = vrot.slane %v17543_v51, 9  ;;  %v17644_v34 = vpop.permute.xlu0 %2307  ;;  %v21409_v20 = vld [vmem:[#allocation43_spill] sm:$0xff]  ;;  %v12387_v59 = vrot.slane %v4830_v39, 9 }
 0x385   :  { %v2974_v32 = vmul.f32 %v17286_v13, %v21405_v25  ;;  %v4020_v6 = vmul.f32 %v17345_v53, %v21406_v27  ;;  %21407 = vst [vmem:[#allocation127_spill] sm:$0xff] %v17644_v34  ;;  %v3041_v7 = vadd.f32 %v2977_v29, %v2521_v40  ;;  %v3564_v11 = vadd.f32 %v3500_v54, %v3043_v45  ;;  %v21410_v56 = vld [vmem:[#allocation14_spill] sm:$0xff]  ;;  %v21411_v29 = vld [vmem:[#allocation108_spill] sm:$0xff] }
 0x386   :  { %v2976_v38 = vmul.f32 %v17286_v13, %v21408_v10  ;;  %v4832_v8 = vcombine.high %v4830_v39, %v4830_v39  ;;  %4398 = vperm.xlu1 %14015, %v21409_v20   ;;  %v4018_v46 = vmul.f32 %v17345_v53, %v21410_v56  ;;  %v5795_v25 = vmax.f32 %v4831_v47, %v12386_v19  ;;  %v21412_v54 = vld [vmem:[#allocation268_spill] sm:$0xff]  ;;  %v17661_v56 = vld [vmem:[%s20702_s0 + $0x25a] sm:$0xff] }
 0x387   :  { %v4540_v27 = vmul.f32 %v17361_v28, %v17383_v33  ;;  %4373 = vperm.xlu0 %14014, %v17335_v37   ;;  %v2520_v14 = vadd.f32 %v2456_v9, %v2000_v52  ;;  %v3562_v34 = vadd.f32 %v3498_v23, %v3041_v7  ;;  %v3495_v45 = vmul.f32 %v17313_v55, %v21411_v29  ;;  %v4264_v10 = vpop.permute.xlu1 %4263  ;;  %v21415_v29 = vld [vmem:[#allocation16_spill] sm:$0xff] }
 0x388   :  { %v3497_v40 = vmul.f32 %v17313_v55, %v21412_v54  ;;  %21413 = vst [vmem:[#allocation180_spill] sm:$0xff] %v17661_v56  ;;  %v3038_v47 = vadd.f32 %v2974_v32, %v2518_v1  ;;  %v4084_v19 = vadd.f32 %v4020_v6, %v3564_v11  ;;  %v5794_v33 = vmax.f32 %v17543_v51, %v12385_v48  ;;  %v17666_v52 = vpop.permute.xlu0 %3273 }
 0x389   :  { %v4538_v37 = vmul.f32 %v17361_v28, %v17340_v15  ;;  %21414 = vst [vmem:[#allocation128_spill] sm:$0xff] %v17666_v52  ;;  %v3040_v9 = vadd.f32 %v2976_v38, %v2520_v14  ;;  %v12388_v23 = vrot.slane %v4832_v8, 9  ;;  %v4015_v7 = vmul.f32 %v17345_v53, %v17412_v0  ;;  %v21416_v15 = vld [vmem:[#allocation195_spill] sm:$0xff]  ;;  %v21417_v38 = vld [vmem:[#allocation196_spill] sm:$0xff] }
 0x38a   :  { %v4017_v20 = vmul.f32 %v17345_v53, %v17439_v42  ;;  %3863 = vperm.xlu1 %14015, %v21415_v29   ;;  %v4082_v54 = vadd.f32 %v4018_v46, %v3562_v34  ;;  %v5796_v32 = vmax.f32 %v4830_v39, %v12387_v59  ;;  %v5958_v6 = vadd.f32 %v21294_v35, %v5795_v25  ;;  %v21418_v29 = vld [vmem:[#allocation197_spill] sm:$0xff]  ;;  %v21419_v34 = vld [vmem:[#allocation67_spill] sm:$0xff] }
 0x38b   :  { %v4604_v51 = vadd.f32 %v4540_v27, %v4084_v19  ;;  %4408 = vperm.xlu0 %14014, %v17661_v56   ;;  %v1945_v1 = vmul.f32 %v17277_v18, %v21416_v15  ;;  %v3559_v14 = vadd.f32 %v3495_v45, %v3038_v47  ;;  %v3561_v48 = vadd.f32 %v3497_v40, %v3040_v9  ;;  %v17678_v0 = vpop.permute.xlu1 %4298  ;;  %v21420_v40 = vld [vmem:[#allocation109_spill] sm:$0xff] }
 0x38c   :  { %v4535_v11 = vmul.f32 %v17361_v28, %v4264_v10  ;;  %v1948_v42 = vmul.f32 %v17277_v18, %v21417_v38  ;;  %v1947_v39 = vmul.f32 %v17277_v18, %v21418_v29  ;;  %v5957_v46 = vadd.f32 %v21419_v34, %v5794_v33  ;;  %v4274_v25 = vpop.permute.xlu0 %4273  ;;  %v21421_v10 = vld [vmem:[#allocation171_spill] sm:$0xff]  ;;  %v21424_v33 = vld [vmem:[#allocation202_spill] sm:$0xff] }
 0x38d   :  { %v4602_v59 = vadd.f32 %v4538_v37, %v4082_v54  ;;  %v5797_v27 = vmax.f32 %v4832_v8, %v12388_v23  ;;  %v4079_v19 = vadd.f32 %v4015_v7, %v3559_v14  ;;  %v4081_v52 = vadd.f32 %v4017_v20, %v3561_v48  ;;  %v21423_v29 = vld [vmem:[#allocation275_spill] sm:$0xff]  ;;  %v21431_v48 = vld [vmem:[#allocation278_spill] sm:$0xff] }
 0x38e   :  { %v4537_v45 = vmul.f32 %v17361_v28, %v4274_v25  ;;  %3883 = vperm.xlu1 %14015, %v21420_v40   ;;  %v17689_v47 = vadd.f32 %v17611_v36, %v21421_v10  ;;  %v5959_v9 = vadd.f32 %v21299_v61, %v5796_v32  ;;  %v6086_v15 = vmax.f32 %v5958_v6, 0.0  ;;  %v21425_v37 = vld [vmem:[#allocation203_spill] sm:$0xff]  ;;  %v21432_v25 = vld [vmem:[#allocation84_spill] sm:$0xff] }
 0x38f   :  { %v17692_v38 = vmax.f32 %v4602_v59, %v4604_v51  ;;  %3873 = vperm.xlu0 %14014, %v21423_v29   ;;  %v1954_v8 = vmul.f32 %v17277_v18, %v21424_v33  ;;  %v1953_v23 = vmul.f32 %v17277_v18, %v21425_v37  ;;  %v4599_v7 = vadd.f32 %v4535_v11, %v4079_v19  ;;  %v17699_v54 = vpop.permute.xlu1 %2282  ;;  %v17704_v36 = vld [vmem:[%s20702_s0 + $0x261] sm:$0xff] }
 0x390   :  { %21422 = vst [vmem:[#allocation129_spill] sm:$0xff] %v17689_v47  ;;  %v4601_v20 = vadd.f32 %v4537_v45, %v4081_v52  ;;  %21426 = vst [vmem:[#allocation178_spill] sm:$0xff] %v17699_v54  ;;  %v21428_v32 = vld [vmem:[#allocation255_spill] sm:$0xff]  ;;  %v17715_v59 = vadd.f32 %v1945_v1, %v21431_v48  ;;  %v6085_v11 = vmax.f32 %v5957_v46, 0.0  ;;  %v17717_v52 = vpop.permute.xlu0 %4308  ;;  %v17720_v19 = vadd.f32 %v1948_v42, %v21432_v25  ;;  %v21434_v45 = vld [vmem:[#allocation110_spill] sm:$0xff] }
 0x391   :  { %21427 = vst [vmem:[#allocation173_spill] sm:$0xff] %v17704_v36  ;;  %v17708_v6 = vadd.f32 %v17625_v44, %v21428_v32  ;;  %v21429_v51 = vld [vmem:[#allocation235_spill] sm:$0xff]  ;;  %v17723_v40 = vadd.f32 %v1947_v39, %v21434_v45  ;;  %v5960_v10 = vadd.f32 %v21315_v63, %v5797_v27  ;;  %v6087_v1 = vmax.f32 %v5959_v9, 0.0  ;;  %v21439_v27 = vld [vmem:[#allocation18_spill] sm:$0xff]  ;;  %v21442_v9 = vld [vmem:[#allocation204_spill] sm:$0xff] }
 0x392   :  { %v17712_v14 = vadd.f32 %v17629_v24, %v21429_v51  ;;  %21433 = vst [vmem:[#allocation175_spill] sm:$0xff] %v17720_v19  ;;  %v4657_v44 = vmax.f32 %v4599_v7, %v4601_v20  ;;  %4383 = vperm.xlu1 %14015, %v17388_v60   ;;  %v21435_v29 = vld [vmem:[#allocation199_spill] sm:$0xff]  ;;  %v6472_v46 = vrot.slane %v6086_v15, %v16848_v16  ;;  %v21443_v32 = vld [vmem:[#allocation248_spill] sm:$0xff]  ;;  %v21444_v48 = vld [vmem:[#allocation250_spill] sm:$0xff] }
 0x393   :  { %v17729_v24 = vmul.f32 %v17277_v18, %v21435_v29  ;;  %v17734_v33 = vrot.slane %v17692_v38, %v16592_v4  ;;  %3893 = vperm.xlu0 %14014, %v17704_v36   ;;  %v21437_v42 = vld [vmem:[#allocation267_spill] sm:$0xff]  ;;  %v17741_v37 = vadd.f32 %v1953_v23, %v21439_v27  ;;  %v17744_v20 = vpop.permute.xlu1 %2317  ;;  %v17748_v15 = vmul.f32 %v17277_v18, %v21442_v9  ;;  %v21446_v27 = vld [vmem:[#allocation113_spill] sm:$0xff]  ;;  %v21451_v54 = vld [vmem:[#allocation254_spill] sm:$0xff] }
 0x394   :  { %21430 = vst [vmem:[#allocation243_spill] sm:$0xff] %v17712_v14  ;;  %v17738_v39 = vadd.f32 %v1954_v8, %v21437_v42  ;;  %v4833_v60 = vcombine.high %v4657_v44, %v4657_v44  ;;  %v4840_v7 = vrot.slane %v4657_v44, %v16592_v4  ;;  %21441 = vst [vmem:[#allocation236_spill] sm:$0xff] %v17744_v20  ;;  %v17755_v45 = vpop.permute.xlu0 %2292  ;;  %v6088_v23 = vmax.f32 %v5960_v10, 0.0  ;;  %v17769_v10 = vld [vmem:[%s20702_s0 + $0x181] sm:$0xff] }
 0x395   :  { %21436 = vst [vmem:[#allocation241_spill] sm:$0xff] %v17729_v24  ;;  %21440 = vst [vmem:[#allocation48_spill] sm:$0xff] %v17741_v37  ;;  %v2458_v51 = vmul.f32 %v17375_v58, %v21443_v32  ;;  %v2460_v25 = vmul.f32 %v17375_v58, %v21444_v48  ;;  %v6468_v8 = vrot.slane %v6085_v11, %v16848_v16  ;;  %v21447_v11 = vld [vmem:[#allocation274_spill] sm:$0xff] }
 0x396   :  { %21438 = vst [vmem:[#allocation272_spill] sm:$0xff] %v17738_v39  ;;  %21445 = vst [vmem:[#allocation273_spill] sm:$0xff] %v17755_v45  ;;  %v4847_v29 = vrot.slane %v4833_v60, %v16592_v4  ;;  %v4848_v44 = vcombine.high %v4840_v7, %v4840_v7  ;;  %v12389_v42 = vrot.slane %v4840_v7, 9  ;;  %4403 = vperm.xlu1 %14015, %v21446_v27  }
 0x397   :  { %v6476_v9 = vrot.slane %v6087_v1, %v16848_v16  ;;  %v6909_v24 = vsel %vm6881_vm3, %v6472_v46, %v6468_v8  ;;  %v4850_v32 = vcombine.high %v17692_v38, %v17692_v38  ;;  %v4865_v48 = vcombine.high %v17734_v33, %v17734_v33  ;;  %4393 = vperm.xlu0 %14014, %v21447_v11   ;;  %v17771_v1 = vpop.permute.xlu1 %3283  ;;  %v17776_v38 = vld [vmem:[%s20702_s0 + $0x262] sm:$0xff]  ;;  %v21450_v46 = vld [vmem:[#allocation205_spill] sm:$0xff] }
 0x398   :  { %v4849_v60 = vcombine.high %v4847_v29, %v4847_v29  ;;  %v12390_v45 = vrot.slane %v4848_v44, 9  ;;  %v12391_v27 = vrot.slane %v4847_v29, 9  ;;  %v5798_v39 = vmax.f32 %v4840_v7, %v12389_v42  ;;  %21448 = vst [vmem:[#allocation49_spill] sm:$0xff] %v17771_v1  ;;  %21449 = vst [vmem:[#allocation130_spill] sm:$0xff] %v17776_v38  ;;  %v17786_v37 = vpop.permute.xlu0 %2327 }
 0x399   :  { %v17780_v8 = vmul.f32 %v17277_v18, %v21450_v46  ;;  %v2522_v11 = vadd.f32 %v2458_v51, %v17584_v41  ;;  %v2524_v20 = vadd.f32 %v2460_v25, %v17591_v12  ;;  %v2461_v36 = vmul.f32 %v17375_v58, %v21451_v54  ;;  %21452 = vst [vmem:[#allocation270_spill] sm:$0xff] %v17786_v37  ;;  %v17797_v12 = vld [vmem:[%s20702_s0 + $0x182] sm:$0xff] }
 0x39a   :  { %v12392_v7 = vrot.slane %v4849_v60, 9  ;;  %v5799_v42 = vmax.f32 %v4848_v44, %v12390_v45  ;;  %v5800_v1 = vmax.f32 %v4847_v29, %v12391_v27  ;;  %v5961_v19 = vadd.f32 %v21325_v26, %v5798_v39  ;;  %2267 = vperm.xlu1 %14015, %v17769_v10   ;;  %v21454_v44 = vld [vmem:[#allocation105_spill] sm:$0xff] }
 0x39b   :  { %v6480_v14 = vrot.slane %v6088_v23, %v16848_v16  ;;  %v6910_v46 = vsel %vm6883_vm4, %v6476_v9, %v6909_v24  ;;  %v4864_v41 = vrot.slane %v4850_v32, %v16592_v4  ;;  %v12394_v51 = vrot.slane %v4865_v48, 9  ;;  %4413 = vperm.xlu0 %14014, %v17776_v38   ;;  %v17801_v29 = vpop.permute.xlu1 %3318  ;;  %v12125_v24 = vld [vmem:[%s20702_s0 + $0x16a] sm:$0xff]  ;;  %v21455_v32 = vld [vmem:[#allocation12_spill] sm:$0xff] }
 0x39c   :  { %v5801_v54 = vmax.f32 %v4849_v60, %v12392_v7  ;;  %v5962_v25 = vadd.f32 %v16879_v17, %v5799_v42  ;;  %v5963_v39 = vadd.f32 %v16866_v30, %v5800_v1  ;;  %v6089_v45 = vmax.f32 %v5961_v19, 0.0  ;;  %21453 = vst [vmem:[#allocation280_spill] sm:$0xff] %v17801_v29  ;;  %v17814_v7 = vpop.permute.xlu0 %3293  ;;  %v21457_v29 = vld [vmem:[#allocation258_spill] sm:$0xff] }
 0x39d   :  { %v17807_v23 = vadd.f32 %v2461_v36, %v17607_v43  ;;  %v2978_v9 = vmul.f32 %v17286_v13, %v21454_v44  ;;  %v2980_v60 = vmul.f32 %v17286_v13, %v21455_v32  ;;  %v12393_v27 = vrot.slane %v17734_v33, 9  ;;  %21456 = vst [vmem:[#allocation50_spill] sm:$0xff] %v17814_v7  ;;  %v17823_v32 = vld [vmem:[%s20702_s0 + $0x189] sm:$0xff] }
 0x39e   :  { %v5964_v19 = vadd.f32 %v16893_v22, %v5801_v54  ;;  %v6090_v1 = vmax.f32 %v5962_v25, 0.0  ;;  %v6091_v42 = vmax.f32 %v5963_v39, 0.0  ;;  %v6484_v37 = vrot.slane %v6089_v45, %v16848_v16  ;;  %2787 = vperm.xlu1 %14015, %v17797_v12  }
 0x39f   :  { %v4866_v43 = vcombine.high %v4864_v41, %v4864_v41  ;;  %v12395_v36 = vrot.slane %v4864_v41, 9  ;;  %v5803_v38 = vmax.f32 %v4865_v48, %v12394_v51  ;;  %v6911_v44 = vsel %vm6885_vm5, %v6480_v14, %v6910_v46  ;;  %2777 = vperm.xlu0 %14014, %v12125_v24   ;;  %v4284_v45 = vpop.permute.xlu1 %4283  ;;  %v21458_v51 = vld [vmem:[#allocation237_spill] sm:$0xff] }
 0x3a0   :  { %v6092_v7 = vmax.f32 %v5964_v19, 0.0  ;;  %v6488_v54 = vrot.slane %v6090_v1, %v16848_v16  ;;  %v6492_v25 = vrot.slane %v6091_v42, %v16848_v16  ;;  %v6912_v39 = vsel %vm6887_vm6, %v6484_v37, %v6911_v44  ;;  %v21459_v46 = vld [vmem:[#allocation269_spill] sm:$0xff]  ;;  %v17834_v56 = vpop.permute.xlu0 %3328 }
 0x3a1   :  { %v2463_v47 = vmul.f32 %v17375_v58, %v21457_v29  ;;  %v3042_v48 = vadd.f32 %v2978_v9, %v2522_v11  ;;  %v3499_v14 = vmul.f32 %v17313_v55, %v21458_v51  ;;  %v3501_v24 = vmul.f32 %v17313_v55, %v21459_v46  ;;  %21460 = vst [vmem:[#allocation45_spill] sm:$0xff] %v17834_v56  ;;  %v21462_v51 = vld [vmem:[#allocation78_spill] sm:$0xff]  ;;  %v21464_v56 = vld [vmem:[#allocation83_spill] sm:$0xff] }
 0x3a2   :  { %v3044_v19 = vadd.f32 %v2980_v60, %v2524_v20  ;;  %v5802_v1 = vmax.f32 %v17734_v33, %v12393_v27  ;;  %v6496_v42 = vrot.slane %v6092_v7, %v16848_v16  ;;  %v6913_v37 = vsel %vm6889_vm7, %v6488_v54, %v6912_v39  ;;  %2272 = vperm.xlu1 %14015, %v17823_v32   ;;  %v14081_v20 = vld [vmem:[%s20702_s0 + $0x171] sm:$0xff] }
 0x3a3   :  { %v12396_v44 = vrot.slane %v4866_v43, 9  ;;  %v4019_v11 = vmul.f32 %v17345_v53, %v17516_v31  ;;  %v4021_v29 = vmul.f32 %v17345_v53, %v17572_v49  ;;  %v6914_v9 = vsel %vm6891_vm8, %v6492_v25, %v6913_v37  ;;  %2262 = vperm.xlu0 %14014, %v14081_v20   ;;  %v12193_v33 = vld [vmem:[%s20702_s0 + $0x198] sm:$0xff]  ;;  %v17855_v49 = vpop.permute.xlu1 %4318  ;;  %v12191_v25 = vld [vmem:[%s20702_s0 + $0x180] sm:$0xff] }
 0x3a4   :  { %v21461_v60 = vld [vmem:[#allocation10_spill] sm:$0xff]  ;;  %v5804_v7 = vmax.f32 %v4864_v41, %v12395_v36  ;;  %v5966_v31 = vadd.f32 %v21294_v35, %v5803_v38  ;;  %v6915_v54 = vsel %vm6893_vm9, %v6496_v42, %v6914_v9  ;;  %v2527_v39 = vadd.f32 %v2463_v47, %v17708_v6  ;;  %v4294_v41 = vpop.permute.xlu0 %4293  ;;  %v21463_v36 = vld [vmem:[#allocation271_spill] sm:$0xff] }
 0x3a5   :  { %v2983_v27 = vmul.f32 %v17286_v13, %v21461_v60  ;;  %v2981_v46 = vmul.f32 %v17286_v13, %v21462_v51  ;;  %v3563_v37 = vadd.f32 %v3499_v14, %v3042_v48  ;;  %v3565_v20 = vadd.f32 %v3501_v24, %v3044_v19  ;;  %7020 = vst.msk [vmem:[#allocation2 + $0x41] sm:$0xff] %vm6189_vm0, %v6915_v54  ;;  %v17874_v14 = vld [vmem:[%s20702_s0 + $0x18a] sm:$0xff] }
 0x3a6   :  { %v3504_v38 = vmul.f32 %v17313_v55, %v21463_v36  ;;  %v5965_v42 = vadd.f32 %v21419_v34, %v5802_v1  ;;  %v4539_v9 = vmul.f32 %v17361_v28, %v4284_v45  ;;  %v4541_v60 = vmul.f32 %v17361_v28, %v4294_v41  ;;  %3308 = vperm.xlu1 %14015, %v12193_v33  }
 0x3a7   :  { %v3502_v47 = vmul.f32 %v17313_v55, %v21464_v56  ;;  %v5805_v6 = vmax.f32 %v4866_v43, %v12396_v44  ;;  %v4083_v51 = vadd.f32 %v4019_v11, %v3563_v37  ;;  %v4085_v48 = vadd.f32 %v4021_v29, %v3565_v20  ;;  %3298 = vperm.xlu0 %14014, %v12191_v25   ;;  %v17879_v33 = vpop.permute.xlu1 %2817  ;;  %v21465_v25 = vld [vmem:[#allocation111_spill] sm:$0xff] }
 0x3a8   :  { %v3047_v24 = vadd.f32 %v2983_v27, %v2527_v39  ;;  %v5967_v19 = vadd.f32 %v21299_v61, %v5804_v7  ;;  %v6094_v1 = vmax.f32 %v5966_v31, 0.0  ;;  %v4024_v45 = vmul.f32 %v17345_v53, %v17463_v57  ;;  %v17886_v29 = vpop.permute.xlu0 %4328  ;;  %v21466_v31 = vld [vmem:[#allocation206_spill] sm:$0xff] }
 0x3a9   :  { %v17883_v56 = vadd.f32 %v17748_v15, %v17475_v21  ;;  %v3045_v43 = vadd.f32 %v2981_v46, %v17807_v23  ;;  %v4603_v44 = vadd.f32 %v4539_v9, %v4083_v51  ;;  %v4605_v11 = vadd.f32 %v4541_v60, %v4085_v48  ;;  %v21467_v46 = vld [vmem:[#allocation259_spill] sm:$0xff] }
 0x3aa   :  { %v3568_v54 = vadd.f32 %v3504_v38, %v3047_v24  ;;  %v6093_v27 = vmax.f32 %v5965_v42, 0.0  ;;  %v4022_v7 = vmul.f32 %v17345_v53, %v21465_v25  ;;  %v4544_v57 = vmul.f32 %v17361_v28, %v17717_v52  ;;  %2792 = vperm.xlu1 %14015, %v17874_v14   ;;  %v12259_v37 = vld [vmem:[%s20702_s0 + $0x199] sm:$0xff] }
 0x3ab   :  { %v1958_v21 = vmul.f32 %v17277_v18, %v21466_v31  ;;  %v3566_v15 = vadd.f32 %v3502_v47, %v3045_v43  ;;  %v5968_v23 = vadd.f32 %v21315_v63, %v5805_v6  ;;  %v4659_v39 = vmax.f32 %v4603_v44, %v4605_v11  ;;  %2782 = vperm.xlu0 %14014, %v21467_v46   ;;  %v17903_v38 = vpop.permute.xlu1 %3783  ;;  %v21469_v48 = vld [vmem:[#allocation207_spill] sm:$0xff]  ;;  %v17925_v44 = vld [vmem:[%s20702_s0 + $0x271] sm:$0xff] }
 0x3ac   :  { %v6095_v20 = vmax.f32 %v5967_v19, 0.0  ;;  %v6504_v41 = vrot.slane %v6094_v1, %v16848_v16  ;;  %v4088_v36 = vadd.f32 %v4024_v45, %v3568_v54  ;;  %v4542_v52 = vmul.f32 %v17361_v28, %v17678_v0  ;;  %v7057_v42 = vld [vmem:[#allocation2 + $0x41] sm:$0xff]  ;;  %v17912_v51 = vpop.permute.xlu0 %2827 }
 0x3ad   :  { %v7464_v9 = vld [vmem:[#allocation2 + $0x42] sm:$0xff]  ;;  %v17907_v60 = vadd.f32 %v17780_v8, %v17494_v3  ;;  %v4867_v47 = vcombine.high %v4659_v39, %v4659_v39  ;;  %v4874_v6 = vrot.slane %v4659_v39, %v16592_v4  ;;  %13129 = vmatprep.mubr.msk.f32.mxu1 %vm6189_vm0, %v7057_v42  ;;  %21468 = vst [vmem:[#allocation238_spill] sm:$0xff] %v17912_v51  ;;  %v6096_v11 = vmax.f32 %v5968_v23, 0.0 }
 0x3ae   :  { %13193 = vmatprep.mubr.msk.f32.mxu0 %vm6189_vm0, %v7464_v9  ;;  %v1957_v0 = vmul.f32 %v17277_v18, %v21469_v48  ;;  %v6500_v24 = vrot.slane %v6093_v27, %v16848_v16  ;;  %v4086_v19 = vadd.f32 %v4022_v7, %v3566_v15  ;;  %v4608_v1 = vadd.f32 %v4544_v57, %v4088_v36  ;;  %v21472_v39 = vld [vmem:[#allocation208_spill] sm:$0xff]  ;;  %v21474_v9 = vld [vmem:[#allocation209_spill] sm:$0xff] }
 0x3af   :  { %3828 = vperm.xlu1 %14015, %v12259_v37   ;;  %v17918_v3 = vadd.f32 %v1958_v21, %v17497_v50  ;;  %v4881_v8 = vrot.slane %v4867_v47, %v16592_v4  ;;  %v4882_v45 = vcombine.high %v4874_v6, %v4874_v6  ;;  %v12397_v43 = vrot.slane %v4874_v6, 9  ;;  %3818 = vperm.xlu0 %14014, %v17769_v10   ;;  %v17929_v7 = vpop.permute.xlu1 %2802  ;;  %v21473_v23 = vld [vmem:[#allocation264_spill] sm:$0xff] }
 0x3b0   :  { %v6508_v54 = vrot.slane %v6095_v20, %v16848_v16  ;;  %v6916_v27 = vsel %vm6881_vm3, %v6504_v41, %v6500_v24  ;;  %v4606_v25 = vadd.f32 %v4542_v52, %v4086_v19  ;;  %21471 = vst [vmem:[#allocation281_spill] sm:$0xff] %v17929_v7  ;;  %v17931_v15 = vpop.permute.xlu0 %3793  ;;  %v17934_v10 = vadd.f32 %v1957_v0, %v17507_v2  ;;  %v12194_v2 = vld [vmem:[%s20702_s0 + $0x1a0] sm:$0xff] }
 0x3b1   :  { %21470 = vst [vmem:[#allocation277_spill] sm:$0xff] %v17918_v3  ;;  %v4883_v50 = vcombine.high %v4881_v8, %v4881_v8  ;;  %v12398_v57 = vrot.slane %v4882_v45, 9  ;;  %v12399_v31 = vrot.slane %v4881_v8, 9  ;;  %v5806_v21 = vmax.f32 %v4874_v6, %v12397_v43  ;;  %v21475_v6 = vld [vmem:[#allocation210_spill] sm:$0xff]  ;;  %v18088_v3 = vld [vmem:[%s20702_s0 + $0x2a1] sm:$0xff] }
 0x3b2   :  { %v1960_v46 = vmul.f32 %v17277_v18, %v21472_v39  ;;  %v2467_v37 = vmul.f32 %v17375_v58, %v21473_v23  ;;  %v4660_v20 = vmax.f32 %v4606_v25, %v4608_v1  ;;  %v1959_v47 = vmul.f32 %v17277_v18, %v21474_v9  ;;  %21505 = vst [vmem:[#allocation132_spill] sm:$0xff] %v18088_v3 }
 0x3b3   :  { %2347 = vperm.xlu1 %14015, %v17925_v44   ;;  %v12400_v41 = vrot.slane %v4883_v50, 9  ;;  %v5807_v36 = vmax.f32 %v4882_v45, %v12398_v57  ;;  %v5808_v52 = vmax.f32 %v4881_v8, %v12399_v31  ;;  %v5969_v42 = vadd.f32 %v21325_v26, %v5806_v21  ;;  %2337 = vperm.xlu0 %14014, %v17488_v62   ;;  %v17952_v19 = vpop.permute.xlu1 %2837  ;;  %v12192_v62 = vld [vmem:[%s20702_s0 + $0x188] sm:$0xff] }
 0x3b4   :  { %v1962_v48 = vmul.f32 %v17277_v18, %v21475_v6  ;;  %v6512_v0 = vrot.slane %v6096_v11, %v16848_v16  ;;  %v6917_v24 = vsel %vm6883_vm4, %v6508_v54, %v6916_v27  ;;  %21476 = vst [vmem:[#allocation20_spill] sm:$0xff] %v17952_v19  ;;  %v17959_v25 = vpop.permute.xlu0 %2812  ;;  %v21478_v57 = vld [vmem:[#allocation261_spill] sm:$0xff]  ;;  %v2531_v11 = vadd.f32 %v2467_v37, %v17723_v40  ;;  %v17977_v40 = vld [vmem:[%s20703_s1 + $0x5] ss:$0 sm:$0xff] }
 0x3b5   :  { %v5809_v1 = vmax.f32 %v4883_v50, %v12400_v41  ;;  %v5970_v8 = vadd.f32 %v16879_v17, %v5807_v36  ;;  %v5971_v45 = vadd.f32 %v16866_v30, %v5808_v52  ;;  %v6097_v43 = vmax.f32 %v5969_v42, 0.0  ;;  %21477 = vst [vmem:[#allocation283_spill] sm:$0xff] %v17959_v25  ;;  %v21479_v54 = vld [vmem:[#allocation81_spill] sm:$0xff]  ;;  %v12325_v41 = vld [vmem:[%s20702_s0 + $0x19a] sm:$0xff] }
 0x3b6   :  { %v2465_v18 = vmul.f32 %v17375_v58, %v21478_v57  ;;  %v2987_v27 = vmul.f32 %v17286_v13, %v21479_v54  ;;  %v17967_v31 = vrot.slane %v4660_v20, %v16592_v4  ;;  %v21480_v13 = vld [vmem:[#allocation107_spill] sm:$0xff]  ;;  %v4884_v42 = vcombine.high %v4660_v20, %v4660_v20  ;;  %v21525_v25 = vld [vmem:[#allocation49_spill] sm:$0xff] }
 0x3b7   :  { %3313 = vperm.xlu1 %14015, %v12194_v2   ;;  %v5972_v50 = vadd.f32 %v16893_v22, %v5809_v1  ;;  %v6098_v21 = vmax.f32 %v5970_v8, 0.0  ;;  %v6099_v39 = vmax.f32 %v5971_v45, 0.0  ;;  %v6516_v23 = vrot.slane %v6097_v43, %v16848_v16  ;;  %3303 = vperm.xlu0 %14014, %v12192_v62   ;;  %v21481_v36 = vld [vmem:[#allocation279_spill] sm:$0xff]  ;;  %v17984_v9 = vpop.permute.xlu1 %3803  ;;  %v14083_v43 = vld [vmem:[%s20703_s1 + $0x3] ss:$0 sm:$0xff] }
 0x3b8   :  { %v2985_v37 = vmul.f32 %v17977_v40, %v21480_v13  ;;  %v3508_v52 = vmul.f32 %v17313_v55, %v21481_v36  ;;  %v6918_v2 = vsel %vm6885_vm5, %v6512_v0, %v6917_v24  ;;  %v17989_v45 = vpop.permute.xlu0 %2847  ;;  %v21483_v57 = vld [vmem:[#allocation211_spill] sm:$0xff]  ;;  %v2529_v20 = vadd.f32 %v2465_v18, %v17715_v59  ;;  %v21484_v24 = vld [vmem:[#allocation256_spill] sm:$0xff]  ;;  %v18008_v59 = vld [vmem:[%s20702_s0 + $0x272] sm:$0xff] }
 0x3b9   :  { %v6100_v6 = vmax.f32 %v5972_v50, 0.0  ;;  %v6520_v62 = vrot.slane %v6098_v21, %v16848_v16  ;;  %v6524_v1 = vrot.slane %v6099_v39, %v16848_v16  ;;  %v6919_v8 = vsel %vm6887_vm6, %v6516_v23, %v6918_v2  ;;  %21482 = vst [vmem:[#allocation170_spill] sm:$0xff] %v17989_v45  ;;  %21485 = vst [vmem:[#allocation19_spill] sm:$0xff] %v18008_v59  ;;  %v21486_v18 = vld [vmem:[#allocation117_spill] sm:$0xff] }
 0x3ba   :  { %v1961_v54 = vmul.f32 %v14083_v43, %v21483_v57  ;;  %v3051_v0 = vadd.f32 %v2987_v27, %v2531_v11  ;;  %v3506_v50 = vmul.f32 %v17313_v55, %v21484_v24  ;;  %v4028_v21 = vmul.f32 %v17345_v53, %v17615_v5 }
 0x3bb   :  { %4348 = vperm.xlu1 %14015, %v12325_v41   ;;  %v4899_v39 = vcombine.high %v17967_v31, %v17967_v31  ;;  %v6528_v23 = vrot.slane %v6100_v6, %v16848_v16  ;;  %v6920_v13 = vsel %vm6889_vm7, %v6520_v62, %v6919_v8  ;;  %4338 = vperm.xlu0 %14014, %v17797_v12   ;;  %v21488_v41 = vld [vmem:[#allocation121_spill] sm:$0xff] }
 0x3bc   :  { %v18011_v55 = vadd.f32 %v1960_v46, %v21486_v18  ;;  %v3049_v11 = vadd.f32 %v2985_v37, %v2529_v20  ;;  %v3572_v27 = vadd.f32 %v3508_v52, %v3051_v0  ;;  %v6921_v5 = vsel %vm6891_vm8, %v6524_v1, %v6920_v13  ;;  %v18020_v62 = vpop.permute.xlu1 %3838  ;;  %v21489_v46 = vld [vmem:[#allocation119_spill] sm:$0xff]  ;;  %v21490_v37 = vld [vmem:[#allocation120_spill] sm:$0xff]  ;;  %v21492_v1 = vld [vmem:[#allocation122_spill] sm:$0xff] }
 0x3bd   :  { %v4026_v36 = vmul.f32 %v17345_v53, %v21488_v41  ;;  %v4898_v2 = vrot.slane %v4884_v42, %v16592_v4  ;;  %v6922_v6 = vsel %vm6893_vm9, %v6528_v23, %v6921_v5  ;;  %v4548_v12 = vmul.f32 %v17361_v28, %v17886_v29  ;;  %v18022_v8 = vpop.permute.xlu0 %3813  ;;  %v21493_v53 = vld [vmem:[#allocation212_spill] sm:$0xff]  ;;  %v21495_v18 = vld [vmem:[#allocation253_spill] sm:$0xff] }
 0x3be   :  { %21487 = vst [vmem:[#allocation47_spill] sm:$0xff] %v18011_v55  ;;  %v18025_v57 = vadd.f32 %v1959_v47, %v21489_v46  ;;  %v18028_v52 = vadd.f32 %v1962_v48, %v21490_v37  ;;  %v18031_v20 = vadd.f32 %v1961_v54, %v21492_v1  ;;  %v18034_v42 = vmul.f32 %v14083_v43, %v21493_v53  ;;  %v12546_v29 = vld [vmem:[%s20705_s3 + $0x60] sm:$0xff]  ;;  %v12547_v47 = vld [vmem:[%s20705_s3 + $0x68] sm:$0xff] }
 0x3bf   :  { %7021 = vst.msk [vmem:[#allocation2 + $0x51] sm:$0xff] %vm6189_vm0, %v6922_v6  ;;  %2867 = vperm.xlu1 %14015, %v18008_v59   ;;  %v3570_v48 = vadd.f32 %v3506_v50, %v3049_v11  ;;  %v4092_v0 = vadd.f32 %v4028_v21, %v3572_v27  ;;  %v12402_v24 = vrot.slane %v4899_v39, 9  ;;  %v4546_v54 = vmul.f32 %v17361_v28, %v17855_v49  ;;  %v21494_v23 = vld [vmem:[#allocation180_spill] sm:$0xff]  ;;  %v21496_v41 = vld [vmem:[#allocation257_spill] sm:$0xff] }
 0x3c0   :  { %21491 = vst [vmem:[#allocation74_spill] sm:$0xff] %v18028_v52  ;;  %2857 = vperm.xlu0 %14014, %v21494_v23   ;;  %v12260_v13 = vld [vmem:[%s20702_s0 + $0x1a1] sm:$0xff]  ;;  %v2462_v5 = vmul.f32 %v17375_v58, %v21495_v18  ;;  %v2464_v6 = vmul.f32 %v17375_v58, %v21496_v41  ;;  %v12401_v21 = vrot.slane %v17967_v31, 9  ;;  %v4900_v27 = vcombine.high %v4898_v2, %v4898_v2  ;;  %v18057_v49 = vpop.permute.xlu1 %2302  ;;  %v21499_v53 = vld [vmem:[#allocation213_spill] sm:$0xff] }
 0x3c1   :  { %v21497_v46 = vld [vmem:[#allocation260_spill] sm:$0xff]  ;;  %v4090_v11 = vadd.f32 %v4026_v36, %v3570_v48  ;;  %v4612_v28 = vadd.f32 %v4548_v12, %v4092_v0  ;;  %21498 = vst [vmem:[#allocation131_spill] sm:$0xff] %v18057_v49  ;;  %v18059_v37 = vpop.permute.xlu0 %3848  ;;  %v13652_v1 = vpack.c.bf16 %v12547_v47, %v12546_v29  ;;  %v18062_v23 = vmul.f32 %v14083_v43, %v21499_v53  ;;  %v21500_v18 = vld [vmem:[#allocation263_spill] sm:$0xff]  ;;  %v12548_v29 = vld [vmem:[%s20705_s3 + $0x70] sm:$0xff] }
 0x3c2   :  { %v2466_v50 = vmul.f32 %v17375_v58, %v21497_v46  ;;  %v2468_v59 = vmul.f32 %v17375_v58, %v21500_v18  ;;  %v18069_v41 = vld [vmem:[%s20703_s1 + $0x4] ss:$0 sm:$0xff]  ;;  %v21501_v46 = vld [vmem:[#allocation174_spill] sm:$0xff]  ;;  %v12403_v12 = vrot.slane %v4898_v2, 9  ;;  %v5811_v47 = vmax.f32 %v4899_v39, %v12402_v24  ;;  %v21502_v0 = vld [vmem:[#allocation125_spill] sm:$0xff] }
 0x3c3   :  { %v2473_v36 = vmul.f32 %v18069_v41, %v21501_v46  ;;  %3833 = vperm.xlu1 %14015, %v12260_v13   ;;  %v12549_v43 = vld [vmem:[%s20705_s3 + $0x78] sm:$0xff]  ;;  %v4610_v58 = vadd.f32 %v4546_v54, %v4090_v11  ;;  %13653 = vmatprep.subr.bf16.mxu0 %v13652_v1  ;;  %v2526_v53 = vadd.f32 %v2462_v5, %v21502_v0  ;;  %v21503_v18 = vld [vmem:[#allocation129_spill] sm:$0xff]  ;;  %v21507_v54 = vld [vmem:[#allocation276_spill] sm:$0xff] }
 0x3c4   :  { %3823 = vperm.xlu0 %14014, %v17823_v32   ;;  %v13656_v48 = vpack.c.bf16 %v12549_v43, %v12548_v29  ;;  %v2528_v46 = vadd.f32 %v2464_v6, %v21503_v18  ;;  %v21504_v52 = vld [vmem:[#allocation239_spill] sm:$0xff]  ;;  %v5810_v55 = vmax.f32 %v17967_v31, %v12401_v21  ;;  %v18093_v32 = vld [vmem:[%s20702_s0 + $0x289] sm:$0xff]  ;;  %13655 = vmatpush3.bf16.msra.mxu0 %v13652_v1  ;;  %v12404_v6 = vrot.slane %v4900_v27, 9  ;;  %v18098_v11 = vpop.permute.xlu1 %3338 }
 0x3c5   :  { %v2475_v13 = vmul.f32 %v18069_v41, %v21504_v52  ;;  %v21506_v39 = vld [vmem:[#allocation243_spill] sm:$0xff]  ;;  %v2982_v5 = vmul.f32 %v17977_v40, %v21507_v54  ;;  %v4662_v52 = vmax.f32 %v4610_v58, %v4612_v28  ;;  %21508 = vst [vmem:[#allocation134_spill] sm:$0xff] %v18098_v11  ;;  %v18100_v29 = vpop.permute.xlu0 %2312  ;;  %v21511_v18 = vld [vmem:[#allocation284_spill] sm:$0xff]  ;;  %v5812_v49 = vmax.f32 %v4898_v2, %v12403_v12  ;;  %v21513_v58 = vld [vmem:[#allocation114_spill] sm:$0xff] }
 0x3c6   :  { %v2530_v24 = vadd.f32 %v2466_v50, %v21506_v39  ;;  %v7058_v31 = vld [vmem:[#allocation2 + $0x51] sm:$0xff]  ;;  %21509 = vst [vmem:[#allocation76_spill] sm:$0xff] %v18100_v29  ;;  %13657 = vmatprep.subr.bf16.mxu0 %v13656_v48  ;;  %v21510_v43 = vld [vmem:[#allocation175_spill] sm:$0xff]  ;;  %v2984_v1 = vmul.f32 %v17977_v40, %v21511_v18  ;;  %v21512_v50 = vld [vmem:[#allocation48_spill] sm:$0xff]  ;;  %v2986_v39 = vmul.f32 %v17977_v40, %v21513_v58 }
 0x3c7   :  { %v7465_v21 = vld [vmem:[#allocation2 + $0x52] sm:$0xff]  ;;  %v18103_v0 = vadd.f32 %v2468_v59, %v21510_v43  ;;  %13130 = vmatmul.mubr.msk.f32.gmra.mrb[4].mxu1 %vm6189_vm0, %v7058_v31  ;;  %v2537_v28 = vadd.f32 %v2473_v36, %v21512_v50  ;;  %v5974_v54 = vadd.f32 %v21294_v35, %v5811_v47  ;;  %2367 = vperm.xlu1 %14015, %v18088_v3   ;;  %v18119_v2 = vld [vmem:[%s20703_s1 + $0x6] ss:$0 sm:$0xff] }
 0x3c8   :  { %13194 = vmatmul.mubr.msk.f32.gmra.mrb[4].mxu0 %vm6189_vm0, %v7465_v21  ;;  %2357 = vperm.xlu0 %14014, %v18093_v32   ;;  %v2539_v59 = vadd.f32 %v2475_v13, %v17907_v60  ;;  %v21514_v12 = vld [vmem:[#allocation126_spill] sm:$0xff]  ;;  %v21515_v36 = vld [vmem:[#allocation128_spill] sm:$0xff]  ;;  %v5973_v43 = vadd.f32 %v21419_v34, %v5810_v55  ;;  %v3046_v60 = vadd.f32 %v2982_v5, %v2526_v53  ;;  %v21517_v13 = vld [vmem:[#allocation115_spill] sm:$0xff]  ;;  %v4304_v3 = vpop.permute.xlu1 %4303 }
 0x3c9   :  { %v3503_v31 = vmul.f32 %v18119_v2, %v21514_v12  ;;  %v3505_v21 = vmul.f32 %v18119_v2, %v21515_v36  ;;  %v18129_v47 = vld [vmem:[%s20702_s0 + $0x279] sm:$0xff]  ;;  %13659 = vmatpush3.bf16.msra.mxu0 %v13656_v48  ;;  %v2993_v18 = vmul.f32 %v17977_v40, %v21517_v13  ;;  %v5813_v50 = vmax.f32 %v4900_v27, %v12404_v6  ;;  %v18133_v29 = vpop.permute.xlu0 %3348  ;;  %v18139_v55 = vld [vmem:[%s20703_s1 + $0x7] ss:$0 sm:$0xff] }
 0x3ca   :  { %21516 = vst [vmem:[#allocation51_spill] sm:$0xff] %v18129_v47  ;;  %v4918_v58 = vcombine.high %v4662_v52, %v4662_v52  ;;  %21518 = vst [vmem:[#allocation53_spill] sm:$0xff] %v18133_v29  ;;  %v3048_v12 = vadd.f32 %v2984_v1, %v2528_v46  ;;  %v5975_v36 = vadd.f32 %v21299_v61, %v5812_v49  ;;  %v21519_v27 = vld [vmem:[#allocation116_spill] sm:$0xff]  ;;  %v6102_v13 = vmax.f32 %v5974_v54, 0.0  ;;  %v21520_v49 = vld [vmem:[#allocation173_spill] sm:$0xff] }
 0x3cb   :  { %v4023_v48 = vmul.f32 %v18139_v55, %v17903_v38  ;;  %v4025_v53 = vmul.f32 %v18139_v55, %v17931_v15  ;;  %v3050_v5 = vadd.f32 %v2986_v39, %v2530_v24  ;;  %v2988_v6 = vmul.f32 %v17977_v40, %v21519_v27  ;;  %2352 = vperm.xlu1 %14015, %v18129_v47   ;;  %v18153_v38 = vld [vmem:[%s20703_s1 + $0x8] ss:$0 sm:$0xff]  ;;  %v18159_v24 = vld [vmem:[%s20702_s0 + $0x2d1] sm:$0xff] }
 0x3cc   :  { %v4925_v46 = vrot.slane %v4662_v52, %v16592_v4  ;;  %2342 = vperm.xlu0 %14014, %v21520_v49   ;;  %v3567_v1 = vadd.f32 %v3503_v31, %v3046_v60  ;;  %v3569_v29 = vadd.f32 %v3505_v21, %v3048_v12  ;;  %v6101_v11 = vmax.f32 %v5973_v43, 0.0  ;;  %21521 = vst [vmem:[#allocation177_spill] sm:$0xff] %v18159_v24  ;;  %v18164_v52 = vld [vmem:[%s20702_s0 + $0x2b9] sm:$0xff]  ;;  %v18170_v60 = vpop.permute.xlu1 %2322 }
 0x3cd   :  { %v4543_v15 = vmul.f32 %v18153_v38, %v4304_v3  ;;  %21522 = vst [vmem:[#allocation54_spill] sm:$0xff] %v18164_v52  ;;  %v3057_v39 = vadd.f32 %v2993_v18, %v2537_v28  ;;  %v21523_v54 = vld [vmem:[#allocation118_spill] sm:$0xff]  ;;  %v5976_v21 = vadd.f32 %v21315_v63, %v5813_v50  ;;  %v4932_v43 = vrot.slane %v4918_v58, %v16592_v4  ;;  %v4314_v3 = vpop.permute.xlu0 %4313  ;;  %v21526_v58 = vld [vmem:[#allocation280_spill] sm:$0xff] }
 0x3ce   :  { %v2995_v31 = vmul.f32 %v17977_v40, %v21523_v54  ;;  %21524 = vst [vmem:[#allocation55_spill] sm:$0xff] %v18170_v60  ;;  %v6103_v12 = vmax.f32 %v5975_v36, 0.0  ;;  %v4087_v27 = vadd.f32 %v4023_v48, %v3567_v1  ;;  %v4089_v49 = vadd.f32 %v4025_v53, %v3569_v29  ;;  %v12209_v29 = vld [vmem:[%s20702_s0 + $0x288] sm:$0xff] }
 0x3cf   :  { %v4545_v47 = vmul.f32 %v18153_v38, %v4314_v3  ;;  %v6536_v45 = vrot.slane %v6102_v13, %v16848_v16  ;;  %v3507_v28 = vmul.f32 %v18119_v2, %v21525_v25  ;;  %v4933_v18 = vcombine.high %v4925_v46, %v4925_v46  ;;  %2387 = vperm.xlu1 %14015, %v18159_v24   ;;  %v12207_v25 = vld [vmem:[%s20702_s0 + $0x270] sm:$0xff] }
 0x3d0   :  { %2377 = vperm.xlu0 %14014, %v18164_v52   ;;  %v6532_v50 = vrot.slane %v6101_v11, %v16848_v16  ;;  %v3514_v54 = vmul.f32 %v18119_v2, %v21526_v58  ;;  %v4607_v36 = vadd.f32 %v4543_v15, %v4087_v27  ;;  %v6104_v53 = vmax.f32 %v5976_v21, 0.0  ;;  %v21527_v13 = vld [vmem:[#allocation50_spill] sm:$0xff]  ;;  %v18189_v11 = vpop.permute.xlu1 %3323  ;;  %v21530_v60 = vld [vmem:[#allocation45_spill] sm:$0xff] }
 0x3d1   :  { %v4609_v48 = vadd.f32 %v4545_v47, %v4089_v49  ;;  %v3509_v1 = vmul.f32 %v18119_v2, %v21527_v13  ;;  %v4934_v3 = vcombine.high %v4932_v43, %v4932_v43  ;;  %v12409_v24 = vrot.slane %v4925_v46, 9  ;;  %21528 = vst [vmem:[#allocation179_spill] sm:$0xff] %v18189_v11  ;;  %v18191_v52 = vpop.permute.xlu0 %2332 }
 0x3d2   :  { %21529 = vst [vmem:[#allocation136_spill] sm:$0xff] %v18191_v52  ;;  %v3052_v47 = vadd.f32 %v2988_v6, %v18103_v0  ;;  %v3059_v15 = vadd.f32 %v2995_v31, %v2539_v59  ;;  %v6540_v27 = vrot.slane %v6103_v12, %v16848_v16  ;;  %v6923_v58 = vsel %vm6881_vm3, %v6536_v45, %v6532_v50  ;;  %v12326_v0 = vld [vmem:[%s20702_s0 + $0x1a2] sm:$0xff] }
 0x3d3   :  { %v4661_v49 = vmax.f32 %v4607_v36, %v4609_v48  ;;  %v3516_v21 = vmul.f32 %v18119_v2, %v21530_v60  ;;  %v12410_v19 = vrot.slane %v4933_v18, 9  ;;  %v12411_v7 = vrot.slane %v4932_v43, 9  ;;  %3388 = vperm.xlu1 %14015, %v12209_v29  }
 0x3d4   :  { %3378 = vperm.xlu0 %14014, %v12207_v25   ;;  %v3571_v13 = vadd.f32 %v3507_v28, %v3050_v5  ;;  %v18198_v51 = vadd.f32 %v3514_v54, %v3057_v39  ;;  %v6544_v59 = vrot.slane %v6104_v53, %v16848_v16  ;;  %v3573_v45 = vadd.f32 %v3509_v1, %v3052_v47  ;;  %v18205_v60 = vpop.permute.xlu1 %3358  ;;  %v18220_v1 = vld [vmem:[%s20702_s0 + $0x28a] sm:$0xff] }
 0x3d5   :  { %v4901_v11 = vcombine.high %v4661_v49, %v4661_v49  ;;  %v4908_v52 = vrot.slane %v4661_v49, %v16592_v4  ;;  %v12412_v6 = vrot.slane %v4934_v3, 9  ;;  %v5818_v31 = vmax.f32 %v4925_v46, %v12409_v24  ;;  %v18207_v12 = vpop.permute.xlu0 %3333  ;;  %v18215_v24 = vld [vmem:[%s20702_s0 + $0x2a2] sm:$0xff] }
 0x3d6   :  { %v6924_v5 = vsel %vm6883_vm4, %v6540_v27, %v6923_v58  ;;  %v3580_v54 = vadd.f32 %v3516_v21, %v3059_v15  ;;  %v5819_v36 = vmax.f32 %v4933_v18, %v12410_v19  ;;  %v5820_v48 = vmax.f32 %v4932_v43, %v12411_v7  ;;  %21531 = vst [vmem:[#allocation137_spill] sm:$0xff] %v18215_v24 }
 0x3d7   :  { %v4915_v39 = vrot.slane %v4901_v11, %v16592_v4  ;;  %v4916_v28 = vcombine.high %v4908_v52, %v4908_v52  ;;  %v12405_v50 = vrot.slane %v4908_v52, 9  ;;  %4353 = vperm.xlu1 %14015, %v12326_v0   ;;  %v5821_v11 = vmax.f32 %v4934_v3, %v12412_v6  ;;  %v12144_v6 = vld [vmem:[%s20702_s0 + $0x27a] sm:$0xff] }
 0x3d8   :  { %4343 = vperm.xlu0 %14014, %v17874_v14   ;;  %v18223_v7 = vadd.f32 %v21419_v34, %v5818_v31  ;;  %v4027_v14 = vmul.f32 %v18139_v55, %v17984_v9  ;;  %v6925_v19 = vsel %vm6885_vm5, %v6544_v59, %v6924_v5  ;;  %v5982_v49 = vadd.f32 %v21294_v35, %v5819_v36 }
 0x3d9   :  { %v4917_v29 = vcombine.high %v4915_v39, %v4915_v39  ;;  %v12406_v25 = vrot.slane %v4916_v28, 9  ;;  %v12407_v53 = vrot.slane %v4915_v39, 9  ;;  %v5814_v46 = vmax.f32 %v4908_v52, %v12405_v50  ;;  %v4324_v52 = vpop.permute.xlu1 %4323  ;;  %v18228_v43 = vpop.permute.xlu0 %3368 }
 0x3da   :  { %v18233_v3 = vadd.f32 %v21299_v61, %v5820_v48  ;;  %v4029_v58 = vmul.f32 %v18139_v55, %v18022_v8  ;;  %v4091_v31 = vadd.f32 %v4027_v14, %v3571_v13  ;;  %v4034_v5 = vmul.f32 %v18139_v55, %v18020_v62  ;;  %v21532_v62 = vld [vmem:[#allocation130_spill] sm:$0xff] }
 0x3db   :  { %v12408_v18 = vrot.slane %v4917_v29, 9  ;;  %v5815_v47 = vmax.f32 %v4916_v28, %v12406_v25  ;;  %v5816_v15 = vmax.f32 %v4915_v39, %v12407_v53  ;;  %v5977_v27 = vadd.f32 %v21325_v26, %v5814_v46  ;;  %2887 = vperm.xlu1 %14015, %v18215_v24  }
 0x3dc   :  { %2877 = vperm.xlu0 %14014, %v18220_v1   ;;  %v4036_v8 = vmul.f32 %v18139_v55, %v18059_v37  ;;  %v4547_v39 = vmul.f32 %v18153_v38, %v4324_v52  ;;  %v6110_v53 = vmax.f32 %v5982_v49, 0.0  ;;  %v4093_v46 = vadd.f32 %v4029_v58, %v3573_v45  ;;  %v18263_v45 = vld [vmem:[%s20702_s0 + $0x2ba] sm:$0xff] }
 0x3dd   :  { %v5817_v9 = vmax.f32 %v4917_v29, %v12408_v18  ;;  %v5978_v21 = vadd.f32 %v16879_v17, %v5815_v47  ;;  %v5979_v0 = vadd.f32 %v16866_v30, %v5816_v15  ;;  %v6105_v59 = vmax.f32 %v5977_v27, 0.0  ;;  %v4359_v28 = vpop.permute.xlu1 %4358  ;;  %v4334_v50 = vpop.permute.xlu0 %4333  ;;  %v12151_v15 = vld [vmem:[%s20702_s0 + $0x2d2] sm:$0xff]  ;;  %21533 = vst [vmem:[#allocation77_spill] sm:$0xff] %v18263_v45 }
 0x3de   :  { %v4554_v13 = vmul.f32 %v18153_v38, %v4359_v28  ;;  %v4549_v14 = vmul.f32 %v18153_v38, %v4334_v50  ;;  %v6109_v27 = vmax.f32 %v18223_v7, 0.0  ;;  %v4098_v49 = vadd.f32 %v4034_v5, %v18198_v51 }
 0x3df   :  { %v5980_v36 = vadd.f32 %v16893_v22, %v5817_v9  ;;  %v6106_v48 = vmax.f32 %v5978_v21, 0.0  ;;  %v6107_v29 = vmax.f32 %v5979_v0, 0.0  ;;  %v6548_v25 = vrot.slane %v6105_v59, %v16848_v16  ;;  %2872 = vperm.xlu1 %14015, %v12144_v6  }
 0x3e0   :  { %2862 = vperm.xlu0 %14014, %v21532_v62   ;;  %v4611_v58 = vadd.f32 %v4547_v39, %v4091_v31  ;;  %v4613_v9 = vadd.f32 %v4549_v14, %v4093_v46  ;;  %v4100_v59 = vadd.f32 %v4036_v8, %v3580_v54  ;;  %v5984_v50 = vadd.f32 %v21315_v63, %v5821_v11  ;;  %v21534_v8 = vld [vmem:[#allocation123_spill] sm:$0xff] }
 0x3e1   :  { %v6108_v37 = vmax.f32 %v5980_v36, 0.0  ;;  %v6552_v52 = vrot.slane %v6106_v48, %v16848_v16  ;;  %v6556_v18 = vrot.slane %v6107_v29, %v16848_v16  ;;  %v6926_v47 = vsel %vm6887_vm6, %v6548_v25, %v6925_v19  ;;  %v18267_v21 = vpop.permute.xlu1 %2822  ;;  %v4369_v0 = vpop.permute.xlu0 %4368  ;;  %v21535_v29 = vld [vmem:[#allocation172_spill] sm:$0xff] }
 0x3e2   :  { %v4556_v28 = vmul.f32 %v18153_v38, %v4369_v0  ;;  %v6111_v36 = vmax.f32 %v18233_v3, 0.0  ;;  %v4663_v48 = vmax.f32 %v4611_v58, %v4613_v9  ;;  %v6568_v51 = vrot.slane %v6110_v53, %v16848_v16  ;;  %v21536_v53 = vld [vmem:[#allocation124_spill] sm:$0xff] }
 0x3e3   :  { %v6560_v19 = vrot.slane %v6108_v37, %v16848_v16  ;;  %v6927_v6 = vsel %vm6889_vm7, %v6552_v52, %v6926_v47  ;;  %2907 = vperm.xlu1 %14015, %v12151_v15   ;;  %v4618_v31 = vadd.f32 %v4554_v13, %v4098_v49  ;;  %v18280_v39 = vadd.f32 %v18034_v42, %v21534_v8  ;;  %v21537_v13 = vld [vmem:[#allocation127_spill] sm:$0xff] }
 0x3e4   :  { %v6928_v7 = vsel %vm6891_vm8, %v6556_v18, %v6927_v6  ;;  %2897 = vperm.xlu0 %14014, %v18263_v45   ;;  %v4620_v5 = vadd.f32 %v4556_v28, %v4100_v59  ;;  %v18284_v11 = vadd.f32 %v18062_v23, %v21535_v29  ;;  %v4935_v3 = vcombine.high %v4663_v48, %v4663_v48  ;;  %v18311_v59 = vld [vmem:[%s20702_s0 + $0x291] sm:$0xff] }
 0x3e5   :  { %v6929_v54 = vsel %vm6893_vm9, %v6560_v19, %v6928_v7  ;;  %v4942_v25 = vrot.slane %v4663_v48, %v16592_v4  ;;  %v18288_v46 = vpop.permute.xlu1 %3858  ;;  %v2477_v14 = vmul.f32 %v18069_v41, %v21536_v53  ;;  %v2479_v62 = vmul.f32 %v18069_v41, %v21537_v13  ;;  %v18295_v52 = vpop.permute.xlu0 %2832  ;;  %21538 = vst [vmem:[#allocation138_spill] sm:$0xff] %v18311_v59  ;;  %v21539_v7 = vld [vmem:[#allocation178_spill] sm:$0xff]  ;;  %v21554_v45 = vld [vmem:[#allocation53_spill] sm:$0xff] }
 0x3e6   :  { %7022 = vst.msk [vmem:[#allocation2 + $0x61] sm:$0xff] %vm6189_vm0, %v6929_v54  ;;  %v6564_v42 = vrot.slane %v6109_v27, %v16848_v16  ;;  %v4666_v37 = vmax.f32 %v4618_v31, %v4620_v5  ;;  %v6112_v23 = vmax.f32 %v5984_v50, 0.0  ;;  %v4949_v18 = vrot.slane %v4935_v3, %v16592_v4  ;;  %v12082_v27 = vld [vmem:[%s20702_s0 + $0x2a9] sm:$0xff] }
 0x3e7   :  { %v4950_v47 = vcombine.high %v4942_v25, %v4942_v25  ;;  %v12413_v15 = vrot.slane %v4942_v25, 9  ;;  %3908 = vperm.xlu1 %14015, %v18093_v32   ;;  %v6572_v49 = vrot.slane %v6111_v36, %v16848_v16  ;;  %v18316_v50 = vadd.f32 %v2477_v14, %v17934_v10  ;;  %v12089_v10 = vld [vmem:[%s20702_s0 + $0x301] sm:$0xff] }
 0x3e8   :  { %3898 = vperm.xlu0 %14014, %v17925_v44   ;;  %v6930_v58 = vsel %vm6881_vm3, %v6568_v51, %v6564_v42  ;;  %v4986_v9 = vcombine.high %v4666_v37, %v4666_v37  ;;  %v18303_v0 = vrot.slane %v4666_v37, %v16592_v4  ;;  %v4951_v32 = vcombine.high %v4949_v18, %v4949_v18  ;;  %v18340_v42 = vld [vmem:[%s20702_s0 + $0x2e9] sm:$0xff] }
 0x3e9   :  { %v12414_v19 = vrot.slane %v4950_v47, 9  ;;  %v12415_v44 = vrot.slane %v4949_v18, 9  ;;  %v5822_v6 = vmax.f32 %v4942_v25, %v12413_v15  ;;  %v18313_v28 = vpop.permute.xlu1 %2842  ;;  %v18319_v36 = vadd.f32 %v2479_v62, %v18025_v57  ;;  %v18325_v54 = vpop.permute.xlu0 %3868  ;;  %v21540_v57 = vld [vmem:[#allocation236_spill] sm:$0xff]  ;;  %21541 = vst [vmem:[#allocation240_spill] sm:$0xff] %v18340_v42 }
 0x3ea   :  { %v2474_v48 = vmul.f32 %v18069_v41, %v21539_v7  ;;  %v5001_v51 = vcombine.high %v18303_v0, %v18303_v0  ;;  %v12416_v31 = vrot.slane %v4951_v32, 9  ;;  %v2481_v3 = vmul.f32 %v18069_v41, %v21540_v57 }
 0x3eb   :  { %v5823_v5 = vmax.f32 %v4950_v47, %v12414_v19  ;;  %v5824_v8 = vmax.f32 %v4949_v18, %v12415_v44  ;;  %v5985_v29 = vadd.f32 %v21325_v26, %v5822_v6  ;;  %2372 = vperm.xlu1 %14015, %v12082_v27   ;;  %v6576_v25 = vrot.slane %v6112_v23, %v16848_v16  ;;  %v21542_v23 = vld [vmem:[#allocation272_spill] sm:$0xff]  ;;  %v21544_v19 = vld [vmem:[#allocation270_spill] sm:$0xff] }
 0x3ec   :  { %2362 = vperm.xlu0 %14014, %v18311_v59   ;;  %v6931_v53 = vsel %vm6883_vm4, %v6572_v49, %v6930_v58  ;;  %v5000_v14 = vrot.slane %v4986_v9, %v16592_v4  ;;  %v5825_v37 = vmax.f32 %v4951_v32, %v12416_v31  ;;  %v2538_v49 = vadd.f32 %v2474_v48, %v21542_v23  ;;  %v21543_v58 = vld [vmem:[#allocation273_spill] sm:$0xff]  ;;  %v21556_v59 = vld [vmem:[#allocation179_spill] sm:$0xff] }
 0x3ed   :  { %v7059_v13 = vld [vmem:[#allocation2 + $0x61] sm:$0xff]  ;;  %v5986_v18 = vadd.f32 %v16879_v17, %v5823_v5  ;;  %v5987_v47 = vadd.f32 %v16866_v30, %v5824_v8  ;;  %v6113_v15 = vmax.f32 %v5985_v29, 0.0  ;;  %v18344_v27 = vpop.permute.xlu1 %3843  ;;  %v2476_v9 = vmul.f32 %v18069_v41, %v21543_v58  ;;  %v18353_v6 = vpop.permute.xlu0 %2852 }
 0x3ee   :  { %v7466_v62 = vld [vmem:[#allocation2 + $0x62] sm:$0xff]  ;;  %13132 = vmatprep.mubr.msk.f32.mxu1 %vm6189_vm0, %v7059_v13  ;;  %v2483_v44 = vmul.f32 %v18069_v41, %v21544_v19  ;;  %v12426_v32 = vrot.slane %v5001_v51, 9  ;;  %v5988_v7 = vadd.f32 %v16893_v22, %v5825_v37  ;;  %v2545_v48 = vadd.f32 %v2481_v3, %v18031_v20  ;;  %v21545_v19 = vld [vmem:[#allocation238_spill] sm:$0xff] }
 0x3ef   :  { %13196 = vmatprep.mubr.msk.f32.mxu0 %vm6189_vm0, %v7466_v62  ;;  %v6114_v31 = vmax.f32 %v5986_v18, 0.0  ;;  %v6115_v5 = vmax.f32 %v5987_v47, 0.0  ;;  %v6580_v8 = vrot.slane %v6113_v15, %v16848_v16  ;;  %2407 = vperm.xlu1 %14015, %v12089_v10   ;;  %v6932_v29 = vsel %vm6885_vm5, %v6576_v25, %v6931_v53  ;;  %v12213_v62 = vld [vmem:[%s20702_s0 + $0x2b8] sm:$0xff]  ;;  %v12211_v20 = vld [vmem:[%s20702_s0 + $0x2a0] sm:$0xff] }
 0x3f0   :  { %2397 = vperm.xlu0 %14014, %v18340_v42   ;;  %v5002_v57 = vcombine.high %v5000_v14, %v5000_v14  ;;  %v12425_v13 = vrot.slane %v18303_v0, 9  ;;  %v6116_v23 = vmax.f32 %v5988_v7, 0.0  ;;  %v2540_v3 = vadd.f32 %v2476_v9, %v17883_v56  ;;  %v21547_v9 = vld [vmem:[#allocation20_spill] sm:$0xff] }
 0x3f1   :  { %v6584_v37 = vrot.slane %v6114_v31, %v16848_v16  ;;  %v6588_v18 = vrot.slane %v6115_v5, %v16848_v16  ;;  %v6933_v10 = vsel %vm6887_vm6, %v6580_v8, %v6932_v29  ;;  %v18367_v47 = vpop.permute.xlu1 %3878  ;;  %v2547_v25 = vadd.f32 %v2483_v44, %v18284_v11  ;;  %v18376_v58 = vpop.permute.xlu0 %3853  ;;  %v21546_v29 = vld [vmem:[#allocation281_spill] sm:$0xff] }
 0x3f2   :  { %v2997_v53 = vmul.f32 %v17977_v40, %v17879_v33  ;;  %v12427_v15 = vrot.slane %v5000_v14, 9  ;;  %v2999_v7 = vmul.f32 %v17977_v40, %v21545_v19  ;;  %v6592_v31 = vrot.slane %v6116_v23, %v16848_v16  ;;  %v12086_v19 = vld [vmem:[%s20702_s0 + $0x2d9] sm:$0xff] }
 0x3f3   :  { %v6934_v5 = vsel %vm6889_vm7, %v6584_v37, %v6933_v10  ;;  %v5835_v8 = vmax.f32 %v5001_v51, %v12426_v32  ;;  %3408 = vperm.xlu1 %14015, %v12213_v62   ;;  %v2994_v56 = vmul.f32 %v17977_v40, %v21546_v29  ;;  %v3001_v11 = vmul.f32 %v17977_v40, %v21547_v9  ;;  %v21548_v23 = vld [vmem:[#allocation283_spill] sm:$0xff]  ;;  %v21549_v51 = vld [vmem:[#allocation170_spill] sm:$0xff] }
 0x3f4   :  { %v6935_v33 = vsel %vm6891_vm8, %v6588_v18, %v6934_v5  ;;  %v5834_v44 = vmax.f32 %v18303_v0, %v12425_v13  ;;  %3398 = vperm.xlu0 %14014, %v12211_v20   ;;  %v2996_v37 = vmul.f32 %v17977_v40, %v21548_v23  ;;  %v3003_v32 = vmul.f32 %v17977_v40, %v21549_v51  ;;  %v18401_v0 = vld [vmem:[%s20702_s0 + $0x2c1] sm:$0xff]  ;;  %v21552_v5 = vld [vmem:[#allocation134_spill] sm:$0xff] }
 0x3f5   :  { %v6936_v62 = vsel %vm6893_vm9, %v6592_v31, %v6935_v33  ;;  %v12428_v10 = vrot.slane %v5002_v57, 9  ;;  %v18396_v29 = vpop.permute.xlu1 %3343  ;;  %21550 = vst [vmem:[#allocation242_spill] sm:$0xff] %v18401_v0  ;;  %v3061_v13 = vadd.f32 %v2997_v53, %v18316_v50  ;;  %v21551_v18 = vld [vmem:[#allocation131_spill] sm:$0xff]  ;;  %v3518_v9 = vmul.f32 %v18119_v2, %v21552_v5  ;;  %v18409_v31 = vpop.permute.xlu0 %3888  ;;  %v21553_v51 = vld [vmem:[#allocation76_spill] sm:$0xff] }
 0x3f6   :  { %v2478_v20 = vmul.f32 %v18069_v41, %v21551_v18  ;;  %7023 = vst.msk [vmem:[#allocation2 + $0x71] sm:$0xff] %vm6189_vm0, %v6936_v62  ;;  %v5836_v23 = vmax.f32 %v5000_v14, %v12427_v15  ;;  %v3063_v33 = vadd.f32 %v2999_v7, %v18319_v36  ;;  %v2480_v24 = vmul.f32 %v18069_v41, %v21553_v51  ;;  %v21555_v18 = vld [vmem:[#allocation55_spill] sm:$0xff]  ;;  %v12093_v36 = vld [vmem:[%s20702_s0 + $0x331] sm:$0xff] }
 0x3f7   :  { %v3520_v42 = vmul.f32 %v18119_v2, %v21554_v45  ;;  %v5998_v50 = vadd.f32 %v21294_v35, %v5835_v8  ;;  %2392 = vperm.xlu1 %14015, %v12086_v19   ;;  %v3058_v53 = vadd.f32 %v2994_v56, %v2538_v49  ;;  %v2482_v5 = vmul.f32 %v18069_v41, %v21555_v18  ;;  %v18429_v49 = vld [vmem:[%s20702_s0 + $0x319] sm:$0xff]  ;;  %v21557_v56 = vld [vmem:[#allocation277_spill] sm:$0xff] }
 0x3f8   :  { %v3515_v14 = vmul.f32 %v18119_v2, %v21556_v59  ;;  %v5997_v15 = vadd.f32 %v21419_v34, %v5834_v44  ;;  %2382 = vperm.xlu0 %14014, %v18401_v0   ;;  %v3065_v7 = vadd.f32 %v3001_v11, %v2545_v48  ;;  %v3060_v45 = vadd.f32 %v2996_v37, %v2540_v3  ;;  %v21558_v48 = vld [vmem:[#allocation47_spill] sm:$0xff]  ;;  %v21559_v37 = vld [vmem:[#allocation74_spill] sm:$0xff] }
 0x3f9   :  { %v3067_v62 = vadd.f32 %v3003_v32, %v2547_v25  ;;  %v5837_v8 = vmax.f32 %v5002_v57, %v12428_v10  ;;  %v4379_v19 = vpop.permute.xlu1 %4378  ;;  %v2542_v59 = vadd.f32 %v2478_v20, %v21557_v56  ;;  %v3582_v51 = vadd.f32 %v3518_v9, %v3061_v13  ;;  %v18435_v0 = vpop.permute.xlu0 %3353  ;;  %v21560_v20 = vld [vmem:[#allocation136_spill] sm:$0xff] }
 0x3fa   :  { %v5999_v44 = vadd.f32 %v21299_v61, %v5836_v23  ;;  %v4038_v18 = vmul.f32 %v18139_v55, %v18288_v46  ;;  %v2544_v3 = vadd.f32 %v2480_v24, %v21558_v48  ;;  %v3584_v25 = vadd.f32 %v3520_v42, %v3063_v33  ;;  %v12210_v46 = vld [vmem:[%s20702_s0 + $0x290] sm:$0xff]  ;;  %v12208_v24 = vld [vmem:[%s20702_s0 + $0x278] sm:$0xff]  ;;  %v7061_v42 = vld [vmem:[#allocation2 + $0xa1] sm:$0xff] }
 0x3fb   :  { %v6126_v57 = vmax.f32 %v5998_v50, 0.0  ;;  %v4040_v11 = vmul.f32 %v18139_v55, %v18325_v54  ;;  %2427 = vperm.xlu1 %14015, %v12093_v36   ;;  %v2546_v32 = vadd.f32 %v2482_v5, %v21559_v37  ;;  %v3579_v10 = vadd.f32 %v3515_v14, %v3058_v53  ;;  %v7468_v14 = vld [vmem:[#allocation2 + $0xa2] sm:$0xff] }
 0x3fc   :  { %v2484_v13 = vmul.f32 %v18069_v41, %v21560_v20  ;;  %v6125_v9 = vmax.f32 %v5997_v15, 0.0  ;;  %2417 = vperm.xlu0 %14014, %v18429_v49   ;;  %v3522_v54 = vmul.f32 %v18119_v2, %v18205_v60  ;;  %v3517_v23 = vmul.f32 %v18119_v2, %v18207_v12 }
 0x3fd   :  { %v6000_v41 = vadd.f32 %v21315_v63, %v5837_v8  ;;  %v4558_v33 = vmul.f32 %v18153_v38, %v4379_v19  ;;  %v18456_v50 = vpop.permute.xlu1 %3363  ;;  %v7060_v53 = vld [vmem:[#allocation2 + $0x71] sm:$0xff]  ;;  %v3524_v15 = vmul.f32 %v18119_v2, %v18228_v43  ;;  %v2998_v36 = vmul.f32 %v17977_v40, %v18267_v21  ;;  %v4389_v12 = vpop.permute.xlu0 %4388 }
 0x3fe   :  { %v7467_v5 = vld [vmem:[#allocation2 + $0x72] sm:$0xff]  ;;  %v6127_v56 = vmax.f32 %v5999_v44, 0.0  ;;  %v4102_v60 = vadd.f32 %v4038_v18, %v3582_v51  ;;  %13133 = vmatmul.mubr.msk.f32.gmra.mrb[6].mxu1 %vm6189_vm0, %v7060_v53  ;;  %v6632_v8 = vrot.slane %v6126_v57, %v16848_v16  ;;  %v4104_v19 = vadd.f32 %v4040_v11, %v3584_v25  ;;  %v12217_v51 = vld [vmem:[%s20702_s0 + $0x2e8] sm:$0xff] }
 0x3ff   :  { %13197 = vmatmul.mubr.msk.f32.gmra.mrb[6].mxu0 %vm6189_vm0, %v7467_v5  ;;  %v4560_v48 = vmul.f32 %v18153_v38, %v4389_v12  ;;  %3393 = vperm.xlu1 %14015, %v12210_v46   ;;  %v2548_v43 = vadd.f32 %v2484_v13, %v18280_v39  ;;  %v6628_v37 = vrot.slane %v6125_v9, %v16848_v16  ;;  %v6128_v44 = vmax.f32 %v6000_v41, 0.0  ;;  %v12215_v39 = vld [vmem:[%s20702_s0 + $0x2d0] sm:$0xff]  ;;  %v21561_v12 = vld [vmem:[#allocation19_spill] sm:$0xff] }
 0x400   :  { %13135 = vmatprep.mubr.msk.f32.mxu1 %vm6189_vm0, %v7061_v42  ;;  %v3000_v21 = vmul.f32 %v17977_v40, %v18295_v52  ;;  %3383 = vperm.xlu0 %14014, %v12208_v24   ;;  %v3002_v18 = vmul.f32 %v17977_v40, %v18313_v28  ;;  %v4622_v25 = vadd.f32 %v4558_v33, %v4102_v60 }
 0x401   :  { %13199 = vmatprep.mubr.msk.f32.mxu0 %vm6189_vm0, %v7468_v14  ;;  %v4624_v57 = vadd.f32 %v4560_v48, %v4104_v19  ;;  %v4364_v11 = vpop.permute.xlu1 %4363  ;;  %v3586_v20 = vadd.f32 %v3522_v54, %v3065_v7  ;;  %v3581_v52 = vadd.f32 %v3517_v23, %v3060_v45  ;;  %v6636_v13 = vrot.slane %v6127_v56, %v16848_v16 }
 0x402   :  { %v4035_v9 = vmul.f32 %v18139_v55, %v18344_v27  ;;  %v3374_v46 = vpop.permute.xlu0 %3373  ;;  %v3588_v24 = vadd.f32 %v3524_v15, %v3067_v62  ;;  %v3062_v42 = vadd.f32 %v2998_v36, %v2542_v59  ;;  %v6944_v41 = vsel %vm6881_vm3, %v6632_v8, %v6628_v37 }
 0x403   :  { %v4668_v28 = vmax.f32 %v4622_v25, %v4624_v57  ;;  %3428 = vperm.xlu1 %14015, %v12217_v51   ;;  %v3064_v33 = vadd.f32 %v3000_v21, %v2544_v3  ;;  %v3004_v53 = vmul.f32 %v17977_v40, %v18353_v6  ;;  %v4042_v7 = vmul.f32 %v18139_v55, %v18367_v47 }
 0x404   :  { %v4037_v45 = vmul.f32 %v18139_v55, %v18376_v58  ;;  %3418 = vperm.xlu0 %14014, %v12215_v39   ;;  %v6640_v27 = vrot.slane %v6128_v44, %v16848_v16  ;;  %v3066_v54 = vadd.f32 %v3002_v18, %v2546_v32  ;;  %v6945_v5 = vsel %vm6883_vm4, %v6636_v13, %v6944_v41 }
 0x405   :  { %v5020_v62 = vcombine.high %v4668_v28, %v4668_v28  ;;  %v5027_v59 = vrot.slane %v4668_v28, %v16592_v4  ;;  %v4399_v23 = vpop.permute.xlu1 %4398  ;;  %v4099_v3 = vadd.f32 %v4035_v9, %v3579_v10  ;;  %v3519_v40 = vmul.f32 %v18119_v2, %v18396_v29  ;;  %v12148_v29 = vld [vmem:[%s20702_s0 + $0x2aa] sm:$0xff] }
 0x406   :  { %v4555_v6 = vmul.f32 %v18153_v38, %v4364_v11  ;;  %v4374_v47 = vpop.permute.xlu0 %4373  ;;  %v3068_v32 = vadd.f32 %v3004_v53, %v2548_v43  ;;  %v4106_v56 = vadd.f32 %v4042_v7, %v3586_v20  ;;  %v4101_v60 = vadd.f32 %v4037_v45, %v3581_v52  ;;  %v18533_v7 = vld [vmem:[%s20702_s0 + $0x2ea] sm:$0xff] }
 0x407   :  { %v5034_v14 = vrot.slane %v5020_v62, %v16592_v4  ;;  %v5035_v58 = vcombine.high %v5027_v59, %v5027_v59  ;;  %v12433_v15 = vrot.slane %v5027_v59, 9  ;;  %v4557_v36 = vmul.f32 %v18153_v38, %v4374_v47  ;;  %4428 = vperm.xlu1 %14015, %v18220_v1   ;;  %v18508_v1 = vld [vmem:[%s20702_s0 + $0x292] sm:$0xff] }
 0x408   :  { %v4044_v10 = vmul.f32 %v18139_v55, %v18409_v31  ;;  %4418 = vperm.xlu0 %14014, %v21561_v12   ;;  %v3521_v43 = vmul.f32 %v18119_v2, %v18435_v0  ;;  %v4619_v31 = vadd.f32 %v4555_v6, %v4099_v3  ;;  %v4562_v51 = vmul.f32 %v18153_v38, %v4399_v23  ;;  %v12155_v0 = vld [vmem:[%s20702_s0 + $0x302] sm:$0xff] }
 0x409   :  { %v5036_v8 = vcombine.high %v5034_v14, %v5034_v14  ;;  %v12434_v19 = vrot.slane %v5035_v58, 9  ;;  %v12435_v48 = vrot.slane %v5034_v14, 9  ;;  %v5842_v37 = vmax.f32 %v5027_v59, %v12433_v15  ;;  %v3864_v21 = vpop.permute.xlu1 %3863 }
 0x40a   :  { %v4621_v44 = vadd.f32 %v4557_v36, %v4101_v60  ;;  %v4409_v18 = vpop.permute.xlu0 %4408  ;;  %v3523_v25 = vmul.f32 %v18119_v2, %v18456_v50  ;;  %v4108_v20 = vadd.f32 %v4044_v10, %v3588_v24  ;;  %v18516_v52 = vsel %vm6885_vm5, %v6640_v27, %v6945_v5 }
 0x40b   :  { %v12436_v57 = vrot.slane %v5036_v8, 9  ;;  %v5843_v11 = vmax.f32 %v5035_v58, %v12434_v19  ;;  %v5844_v39 = vmax.f32 %v5034_v14, %v12435_v48  ;;  %2892 = vperm.xlu1 %14015, %v12148_v29   ;;  %v4564_v9 = vmul.f32 %v18153_v38, %v4409_v18  ;;  %v21562_v48 = vld [vmem:[#allocation54_spill] sm:$0xff] }
 0x40c   :  { %v4667_v13 = vmax.f32 %v4619_v31, %v4621_v44  ;;  %2882 = vperm.xlu0 %14014, %v18508_v1   ;;  %v18523_v41 = vadd.f32 %v3519_v40, %v3062_v42  ;;  %v18526_v50 = vadd.f32 %v21419_v34, %v5842_v37  ;;  %v3525_v24 = vmul.f32 %v18119_v2, %v3374_v46  ;;  %v18570_v44 = vld [vmem:[%s20702_s0 + $0x2da] sm:$0xff] }
 0x40d   :  { %v6006_v28 = vadd.f32 %v21294_v35, %v5843_v11  ;;  %v3884_v53 = vpop.permute.xlu1 %3883  ;;  %v4626_v45 = vadd.f32 %v4562_v51, %v4106_v56  ;;  %v4628_v59 = vadd.f32 %v4564_v9, %v4108_v20  ;;  %v18538_v23 = vadd.f32 %v3521_v43, %v3064_v33  ;;  %v21563_v51 = vld [vmem:[#allocation132_spill] sm:$0xff]  ;;  %21564 = vst [vmem:[#allocation182_spill] sm:$0xff] %v18570_v44 }
 0x40e   :  { %v5003_v27 = vcombine.high %v4667_v13, %v4667_v13  ;;  %v5010_v62 = vrot.slane %v4667_v13, %v16592_v4  ;;  %v18536_v42 = vpop.permute.xlu0 %3873  ;;  %v18540_v5 = vadd.f32 %v3523_v25, %v3066_v54  ;;  %v5845_v3 = vmax.f32 %v5036_v8, %v12436_v57  ;;  %v18577_v20 = vld [vmem:[%s20702_s0 + $0x2c2] sm:$0xff] }
 0x40f   :  { %v18543_v2 = vadd.f32 %v21299_v61, %v5844_v39  ;;  %2927 = vperm.xlu1 %14015, %v12155_v0   ;;  %v4670_v47 = vmax.f32 %v4626_v45, %v4628_v59  ;;  %v6133_v14 = vmax.f32 %v18526_v50, 0.0  ;;  %v6134_v58 = vmax.f32 %v6006_v28, 0.0  ;;  %21565 = vst [vmem:[#allocation17_spill] sm:$0xff] %v18577_v20 }
 0x410   :  { %v5017_v46 = vrot.slane %v5003_v27, %v16592_v4  ;;  %v5018_v40 = vcombine.high %v5010_v62, %v5010_v62  ;;  %v12429_v6 = vrot.slane %v5010_v62, 9  ;;  %2917 = vperm.xlu0 %14014, %v18533_v7   ;;  %v18548_v15 = vadd.f32 %v3525_v24, %v3068_v32 }
 0x411   :  { %v18551_v33 = vmul.f32 %v18139_v55, %v3864_v21  ;;  %v18553_v54 = vpop.permute.xlu1 %4383  ;;  %v18558_v29 = vadd.f32 %v21315_v63, %v5845_v3  ;;  %v5054_v8 = vcombine.high %v4670_v47, %v4670_v47  ;;  %v5061_v19 = vrot.slane %v4670_v47, %v16592_v4 }
 0x412   :  { %v5019_v36 = vcombine.high %v5017_v46, %v5017_v46  ;;  %v12430_v56 = vrot.slane %v5018_v40, 9  ;;  %v12431_v60 = vrot.slane %v5017_v46, 9  ;;  %v5838_v10 = vmax.f32 %v5010_v62, %v12429_v6  ;;  %v18555_v12 = vpop.permute.xlu0 %3893 }
 0x413   :  { %v18562_v32 = vmul.f32 %v18139_v55, %v3884_v53  ;;  %3928 = vperm.xlu1 %14015, %v21562_v48   ;;  %v6135_v37 = vmax.f32 %v18543_v2, 0.0  ;;  %v5068_v25 = vrot.slane %v5054_v8, %v16592_v4  ;;  %v5069_v57 = vcombine.high %v5061_v19, %v5061_v19 }
 0x414   :  { %v12432_v21 = vrot.slane %v5019_v36, 9  ;;  %v5839_v43 = vmax.f32 %v5018_v40, %v12430_v56  ;;  %v5840_v31 = vmax.f32 %v5017_v46, %v12431_v60  ;;  %3918 = vperm.xlu0 %14014, %v21563_v51   ;;  %v6001_v18 = vadd.f32 %v21325_v26, %v5838_v10  ;;  %v18588_v40 = vld [vmem:[%s20702_s0 + $0x332] sm:$0xff]  ;;  %v18596_v60 = vld [vmem:[%s20702_s0 + $0x31a] sm:$0xff] }
 0x415   :  { %v12441_v11 = vrot.slane %v5061_v19, 9  ;;  %v4404_v39 = vpop.permute.xlu1 %4403  ;;  %v6664_v13 = vrot.slane %v6134_v58, %v16848_v16  ;;  %v5070_v45 = vcombine.high %v5068_v25, %v5068_v25  ;;  %v12442_v27 = vrot.slane %v5069_v57, 9  ;;  %21566 = vst [vmem:[#allocation42_spill] sm:$0xff] %v18588_v40  ;;  %21567 = vst [vmem:[#allocation60_spill] sm:$0xff] %v18596_v60 }
 0x416   :  { %v5841_v9 = vmax.f32 %v5019_v36, %v12432_v21  ;;  %v6002_v0 = vadd.f32 %v16879_v17, %v5839_v43  ;;  %v6003_v28 = vadd.f32 %v16866_v30, %v5840_v31  ;;  %v4394_v24 = vpop.permute.xlu0 %4393  ;;  %v6129_v53 = vmax.f32 %v6001_v18, 0.0 }
 0x417   :  { %v12443_v62 = vrot.slane %v5068_v25, 9  ;;  %2912 = vperm.xlu1 %14015, %v18570_v44   ;;  %v5850_v46 = vmax.f32 %v5061_v19, %v12441_v11  ;;  %v12444_v47 = vrot.slane %v5070_v45, 9  ;;  %v5851_v58 = vmax.f32 %v5069_v57, %v12442_v27 }
 0x418   :  { %v6004_v59 = vadd.f32 %v16893_v22, %v5841_v9  ;;  %v6130_v3 = vmax.f32 %v6002_v0, 0.0  ;;  %v6131_v2 = vmax.f32 %v6003_v28, 0.0  ;;  %2902 = vperm.xlu0 %14014, %v18577_v20   ;;  %v6644_v6 = vrot.slane %v6129_v53, %v16848_v16  ;;  %v21604_v20 = vld [vmem:[#allocation94_spill] sm:$0xff] }
 0x419   :  { %v5852_v36 = vmax.f32 %v5068_v25, %v12443_v62  ;;  %v18591_v56 = vpop.permute.xlu1 %2267  ;;  %v6013_v48 = vadd.f32 %v21419_v34, %v5850_v46  ;;  %v5853_v31 = vmax.f32 %v5070_v45, %v12444_v47  ;;  %v6014_v51 = vadd.f32 %v21294_v35, %v5851_v58  ;;  %v21569_v47 = vld [vmem:[#allocation51_spill] sm:$0xff] }
 0x41a   :  { %v6132_v10 = vmax.f32 %v6004_v59, 0.0  ;;  %v6648_v8 = vrot.slane %v6130_v3, %v16848_v16  ;;  %v6652_v19 = vrot.slane %v6131_v2, %v16848_v16  ;;  %v4414_v21 = vpop.permute.xlu0 %4413  ;;  %v6947_v43 = vsel %vm6887_vm6, %v6644_v6, %v18516_v52 }
 0x41b   :  { %v6015_v18 = vadd.f32 %v21299_v61, %v5852_v36  ;;  %2947 = vperm.xlu1 %14015, %v18588_v40   ;;  %v6141_v11 = vmax.f32 %v6013_v48, 0.0  ;;  %v4041_v9 = vmul.f32 %v18139_v55, %v18536_v42  ;;  %v6016_v52 = vadd.f32 %v21315_v63, %v5853_v31  ;;  %v21571_v48 = vld [vmem:[#allocation266_spill] sm:$0xff] }
 0x41c   :  { %v6656_v25 = vrot.slane %v6132_v10, %v16848_v16  ;;  %v6948_v57 = vsel %vm6889_vm7, %v6648_v8, %v6947_v43  ;;  %2937 = vperm.xlu0 %14014, %v18596_v60   ;;  %v6142_v28 = vmax.f32 %v6014_v51, 0.0  ;;  %v4103_v62 = vadd.f32 %v18551_v33, %v18523_v41  ;;  %v21568_v33 = vld [vmem:[#allocation138_spill] sm:$0xff]  ;;  %v21572_v43 = vld [vmem:[#allocation240_spill] sm:$0xff] }
 0x41d   :  { %v6949_v0 = vsel %vm6891_vm8, %v6652_v19, %v6948_v57  ;;  %v6143_v53 = vmax.f32 %v6015_v18, 0.0  ;;  %v18613_v45 = vpop.permute.xlu1 %2787  ;;  %v4559_v59 = vmul.f32 %v18153_v38, %v18553_v54  ;;  %v4045_v42 = vmul.f32 %v18139_v55, %v18555_v12  ;;  %v18657_v19 = vld [vmem:[%s20703_s1 + $0x4] ss:$0 sm:$0xff]  ;;  %v21573_v57 = vld [vmem:[#allocation177_spill] sm:$0xff]  ;;  %v21602_v40 = vld [vmem:[#allocation90_spill] sm:$0xff] }
 0x41e   :  { %v6950_v27 = vsel %vm6893_vm9, %v6656_v25, %v6949_v0  ;;  %v18622_v3 = vpop.permute.xlu0 %2777  ;;  %v6136_v2 = vmax.f32 %v18558_v29, 0.0  ;;  %v6660_v46 = vrot.slane %v6133_v14, %v16848_v16  ;;  %v6668_v6 = vrot.slane %v6135_v37, %v16848_v16  ;;  %v21603_v60 = vld [vmem:[#allocation92_spill] sm:$0xff] }
 0x41f   :  { %7025 = vst.msk [vmem:[#allocation2 + $0xb1] sm:$0xff] %vm6189_vm0, %v6950_v27  ;;  %v6696_v41 = vrot.slane %v6142_v28, %v16848_v16  ;;  %3913 = vperm.xlu1 %14015, %v21568_v33   ;;  %v4107_v54 = vadd.f32 %v18562_v32, %v18540_v5  ;;  %v4105_v55 = vadd.f32 %v4041_v9, %v18538_v23  ;;  %v6144_v14 = vmax.f32 %v6016_v52, 0.0  ;;  %v21575_v9 = vld [vmem:[#allocation176_spill] sm:$0xff]  ;;  %v21577_v28 = vld [vmem:[#allocation241_spill] sm:$0xff] }
 0x420   :  { %v4563_v12 = vmul.f32 %v18153_v38, %v4404_v39  ;;  %v4561_v29 = vmul.f32 %v18153_v38, %v4394_v24  ;;  %3903 = vperm.xlu0 %14014, %v21569_v47   ;;  %v6951_v50 = vsel %vm6881_vm3, %v6664_v13, %v6660_v46  ;;  %v6692_v37 = vrot.slane %v6141_v11, %v16848_v16  ;;  %v18650_v24 = vld [vmem:[%s20703_s1 + $0x3] ss:$0 sm:$0xff]  ;;  %v21570_v13 = vld [vmem:[#allocation201_spill] sm:$0xff] }
 0x421   :  { %v6700_v58 = vrot.slane %v6143_v53, %v16848_v16  ;;  %v18641_v36 = vpop.permute.xlu1 %2272  ;;  %v4623_v10 = vadd.f32 %v4559_v59, %v4103_v62  ;;  %v4109_v5 = vadd.f32 %v4045_v42, %v18548_v15  ;;  %v4565_v23 = vmul.f32 %v18153_v38, %v4414_v21  ;;  %v21574_v11 = vld [vmem:[#allocation56_spill] sm:$0xff] }
 0x422   :  { %v4625_v32 = vadd.f32 %v4561_v29, %v4105_v55  ;;  %v18645_v39 = vpop.permute.xlu0 %2262  ;;  %v1951_v8 = vmul.f32 %v18650_v24, %v21570_v13  ;;  %v2469_v15 = vmul.f32 %v18657_v19, %v21571_v48  ;;  %v6672_v38 = vrot.slane %v6136_v2, %v16848_v16  ;;  %v21576_v52 = vld [vmem:[#allocation112_spill] sm:$0xff]  ;;  %v18683_v2 = vld [vmem:[%s20702_s0 + $0x2f1] sm:$0xff] }
 0x423   :  { %v6958_v21 = vsel %vm6881_vm3, %v6696_v41, %v6692_v37  ;;  %3948 = vperm.xlu1 %14015, %v21572_v43   ;;  %v6952_v31 = vsel %vm6883_vm4, %v6668_v6, %v6951_v50  ;;  %v4627_v51 = vadd.f32 %v4563_v12, %v4107_v54  ;;  %v4629_v25 = vadd.f32 %v4565_v23, %v4109_v5  ;;  %v18678_v42 = vld [vmem:[%s20702_s0 + $0x309] sm:$0xff]  ;;  %v18708_v23 = vld [vmem:[%s20703_s1 + $0x5] ss:$0 sm:$0xff] }
 0x424   :  { %v4669_v18 = vmax.f32 %v4623_v10, %v4625_v32  ;;  %3938 = vperm.xlu0 %14014, %v21573_v57   ;;  %v1494_v0 = vadd.f32 %v21575_v9, %v21574_v11  ;;  %v2013_v53 = vadd.f32 %v21577_v28, %v21576_v52  ;;  %v6704_v27 = vrot.slane %v6144_v14, %v16848_v16  ;;  %v12214_v48 = vld [vmem:[%s20702_s0 + $0x2c0] sm:$0xff] }
 0x425   :  { %v2471_v62 = vmul.f32 %v18657_v19, %v18591_v56  ;;  %v18673_v59 = vpop.permute.xlu1 %3308  ;;  %21578 = vst [vmem:[#allocation70_spill] sm:$0xff] %v18678_v42  ;;  %21579 = vst [vmem:[#allocation184_spill] sm:$0xff] %v18683_v2  ;;  %v6959_v46 = vsel %vm6883_vm4, %v6700_v58, %v6958_v21  ;;  %v4671_v33 = vmax.f32 %v4627_v51, %v4629_v25 }
 0x426   :  { %v5037_v6 = vcombine.high %v4669_v18, %v4669_v18  ;;  %v5044_v41 = vrot.slane %v4669_v18, %v16592_v4  ;;  %v7062_v54 = vld [vmem:[#allocation2 + $0xb1] sm:$0xff]  ;;  %v18687_v55 = vpop.permute.xlu0 %3298  ;;  %v2015_v12 = vadd.f32 %v1951_v8, %v1494_v0  ;;  %v18689_v29 = vadd.f32 %v2469_v15, %v2013_v53  ;;  %v12212_v15 = vld [vmem:[%s20702_s0 + $0x2a8] sm:$0xff] }
 0x427   :  { %v7469_v56 = vld [vmem:[#allocation2 + $0xb2] sm:$0xff]  ;;  %v18692_v47 = vsel %vm6885_vm5, %v6672_v38, %v6952_v31  ;;  %13136 = vmatmul.mubr.msk.f32.gmra.mrb[8].mxu1 %vm6189_vm0, %v7062_v54  ;;  %v5071_v58 = vcombine.high %v4671_v33, %v4671_v33  ;;  %2412 = vperm.xlu1 %14015, %v18678_v42   ;;  %v18702_v5 = vsel %vm6885_vm5, %v6704_v27, %v6959_v46  ;;  %v21601_v42 = vld [vmem:[#allocation88_spill] sm:$0xff] }
 0x428   :  { %13200 = vmatmul.mubr.msk.f32.gmra.mrb[8].mxu0 %vm6189_vm0, %v7469_v56  ;;  %v5051_v50 = vrot.slane %v5037_v6, %v16592_v4  ;;  %v5052_v14 = vcombine.high %v5044_v41, %v5044_v41  ;;  %v12437_v37 = vrot.slane %v5044_v41, 9  ;;  %2402 = vperm.xlu0 %14014, %v18683_v2   ;;  %v18699_v10 = vadd.f32 %v2471_v62, %v2015_v12  ;;  %v12221_v6 = vld [vmem:[%s20702_s0 + $0x318] sm:$0xff] }
 0x429   :  { %v5078_v32 = vrot.slane %v4671_v33, %v16592_v4  ;;  %v18712_v13 = vmul.f32 %v18708_v23, %v18613_v45  ;;  %v18714_v8 = vpop.permute.xlu1 %2792  ;;  %v5085_v18 = vrot.slane %v5071_v58, %v16592_v4  ;;  %v18727_v57 = vmul.f32 %v18708_v23, %v18622_v3  ;;  %v12219_v3 = vld [vmem:[%s20702_s0 + $0x300] sm:$0xff] }
 0x42a   :  { %v5053_v38 = vcombine.high %v5051_v50, %v5051_v50  ;;  %v12438_v21 = vrot.slane %v5052_v14, 9  ;;  %v12439_v43 = vrot.slane %v5051_v50, 9  ;;  %v5846_v31 = vmax.f32 %v5044_v41, %v12437_v37  ;;  %v18722_v51 = vpop.permute.xlu0 %2782 }
 0x42b   :  { %v5086_v45 = vcombine.high %v5078_v32, %v5078_v32  ;;  %v12445_v25 = vrot.slane %v5078_v32, 9  ;;  %3413 = vperm.xlu1 %14015, %v12214_v48   ;;  %v5087_v28 = vcombine.high %v5085_v18, %v5085_v18  ;;  %v12447_v27 = vrot.slane %v5085_v18, 9 }
 0x42c   :  { %v12440_v11 = vrot.slane %v5053_v38, 9  ;;  %v5847_v9 = vmax.f32 %v5052_v14, %v12438_v21  ;;  %v5848_v0 = vmax.f32 %v5051_v50, %v12439_v43  ;;  %v6009_v52 = vadd.f32 %v21325_v26, %v5846_v31  ;;  %3403 = vperm.xlu0 %14014, %v12212_v15  }
 0x42d   :  { %v12446_v53 = vrot.slane %v5086_v45, 9  ;;  %v5854_v62 = vmax.f32 %v5078_v32, %v12445_v25  ;;  %v12448_v50 = vrot.slane %v5087_v28, 9  ;;  %v5856_v37 = vmax.f32 %v5085_v18, %v12447_v27 }
 0x42e   :  { %v3829_v46 = vpop.permute.xlu1 %3828  ;;  %v5849_v41 = vmax.f32 %v5053_v38, %v12440_v11  ;;  %v6010_v33 = vadd.f32 %v16879_v17, %v5847_v9  ;;  %v6011_v54 = vadd.f32 %v16866_v30, %v5848_v0  ;;  %v6137_v56 = vmax.f32 %v6009_v52, 0.0  ;;  %v3819_v12 = vpop.permute.xlu0 %3818 }
 0x42f   :  { %v5855_v14 = vmax.f32 %v5086_v45, %v12446_v53  ;;  %v6017_v58 = vadd.f32 %v21325_v26, %v5854_v62  ;;  %3448 = vperm.xlu1 %14015, %v12221_v6   ;;  %v5857_v38 = vmax.f32 %v5087_v28, %v12448_v50  ;;  %v6019_v31 = vadd.f32 %v16866_v30, %v5856_v37  ;;  %v21611_v30 = vld [vmem:[#allocation151_spill] sm:$0xff] }
 0x430   :  { %v6012_v32 = vadd.f32 %v16893_v22, %v5849_v41  ;;  %v6138_v48 = vmax.f32 %v6010_v33, 0.0  ;;  %v6139_v15 = vmax.f32 %v6011_v54, 0.0  ;;  %v6676_v21 = vrot.slane %v6137_v56, %v16848_v16  ;;  %3438 = vperm.xlu0 %14014, %v12219_v3   ;;  %v18758_v41 = vld [vmem:[%s20703_s1 + $0x6] ss:$0 sm:$0xff]  ;;  %v21580_v54 = vld [vmem:[#allocation77_spill] sm:$0xff] }
 0x431   :  { %v6018_v43 = vadd.f32 %v16879_v17, %v5855_v14  ;;  %v6145_v25 = vmax.f32 %v6017_v58, 0.0  ;;  %v6020_v53 = vadd.f32 %v16893_v22, %v5857_v38  ;;  %v6147_v27 = vmax.f32 %v6019_v31, 0.0  ;;  %v21581_v58 = vld [vmem:[#allocation137_spill] sm:$0xff]  ;;  %v18792_v31 = vld [vmem:[%s20702_s0 + $0x321] sm:$0xff] }
 0x432   :  { %v18743_v11 = vpop.permute.xlu1 %2347  ;;  %v6140_v45 = vmax.f32 %v6012_v32, 0.0  ;;  %v6680_v18 = vrot.slane %v6138_v48, %v16848_v16  ;;  %v6684_v9 = vrot.slane %v6139_v15, %v16848_v16  ;;  %v6954_v0 = vsel %vm6887_vm6, %v6676_v21, %v18692_v47  ;;  %v18749_v52 = vpop.permute.xlu0 %2337  ;;  %v18784_v21 = vld [vmem:[%s20703_s1 + $0x7] ss:$0 sm:$0xff]  ;;  %21583 = vst [vmem:[#allocation57_spill] sm:$0xff] %v18792_v31 }
 0x433   :  { %v6146_v28 = vmax.f32 %v6018_v43, 0.0  ;;  %v6708_v62 = vrot.slane %v6145_v25, %v16848_v16  ;;  %v3512_v47 = vmul.f32 %v18758_v41, %v18673_v59  ;;  %v3510_v33 = vmul.f32 %v18758_v41, %v18687_v55  ;;  %4448 = vperm.xlu1 %14015, %v21580_v54   ;;  %v18774_v59 = vld [vmem:[%s20702_s0 + $0x339] sm:$0xff] }
 0x434   :  { %v6688_v6 = vrot.slane %v6140_v45, %v16848_v16  ;;  %v6955_v3 = vsel %vm6889_vm7, %v6680_v18, %v6954_v0  ;;  %v6148_v50 = vmax.f32 %v6020_v53, 0.0  ;;  %v6716_v37 = vrot.slane %v6147_v27, %v16848_v16  ;;  %4438 = vperm.xlu0 %14014, %v21581_v58   ;;  %21582 = vst [vmem:[#allocation193_spill] sm:$0xff] %v18774_v59  ;;  %v12218_v53 = vld [vmem:[%s20702_s0 + $0x2f0] sm:$0xff]  ;;  %v18818_v27 = vld [vmem:[%s20703_s1 + $0x8] ss:$0 sm:$0xff]  ;;  %v7691_v17 = vld [vmem:[#allocation2 + $0x20] sm:$0xff] }
 0x435   :  { %v6956_v56 = vsel %vm6891_vm8, %v6684_v9, %v6955_v3  ;;  %v6712_v14 = vrot.slane %v6146_v28, %v16848_v16  ;;  %v6961_v48 = vsel %vm6887_vm6, %v6708_v62, %v18702_v5  ;;  %v3055_v15 = vadd.f32 %v18712_v13, %v18699_v10  ;;  %v12216_v3 = vld [vmem:[%s20702_s0 + $0x2d8] sm:$0xff]  ;;  %v21589_v58 = vld [vmem:[#allocation69_spill] sm:$0xff] }
 0x436   :  { %v18769_v32 = vpop.permute.xlu1 %3313  ;;  %v6957_v55 = vsel %vm6893_vm9, %v6688_v6, %v6956_v56  ;;  %v4032_v38 = vmul.f32 %v18784_v21, %v3829_v46  ;;  %v18787_v43 = vpop.permute.xlu0 %3303  ;;  %v6720_v5 = vrot.slane %v6148_v50, %v16848_v16  ;;  %v3053_v13 = vadd.f32 %v18727_v57, %v18689_v29  ;;  %v18810_v29 = vld [vmem:[%s20703_s1] ss:$0 sm:$0xff]  ;;  %v21585_v57 = vld [vmem:[#allocation8_spill] sm:$0xff]  ;;  %v21587_v54 = vld [vmem:[#allocation22_spill] sm:$0xff] }
 0x437   :  { %7026 = vst.msk [vmem:[#allocation2 + $0xc1] sm:$0xff] %vm6189_vm0, %v6957_v55  ;;  %v6962_v10 = vsel %vm6889_vm7, %v6712_v14, %v6961_v48  ;;  %v4030_v25 = vmul.f32 %v18784_v21, %v3819_v12  ;;  %v3576_v45 = vadd.f32 %v3512_v47, %v3055_v15  ;;  %2432 = vperm.xlu1 %14015, %v18774_v59   ;;  %21584 = vst [vmem:[#allocation247_spill] sm:$0xff] %v18810_v29  ;;  %v21586_v47 = vld [vmem:[#allocation9_spill] sm:$0xff]  ;;  %v21590_v48 = vld [vmem:[#allocation71_spill] sm:$0xff] }
 0x438   :  { %v6963_v46 = vsel %vm6891_vm8, %v6716_v37, %v6962_v10  ;;  %v3574_v9 = vadd.f32 %v3510_v33, %v3053_v13  ;;  %2422 = vperm.xlu0 %14014, %v18792_v31   ;;  %v453_v12 = vmul.f32 %v18810_v29, %v21585_v57  ;;  %v455_v33 = vmul.f32 %v18810_v29, %v21586_v47  ;;  %v18832_v37 = vld [vmem:[%s20703_s1 + $0x1] ss:$0 sm:$0xff] }
 0x439   :  { %v6964_v18 = vsel %vm6893_vm9, %v6720_v5, %v6963_v46  ;;  %v4096_v28 = vadd.f32 %v4032_v38, %v3576_v45  ;;  %v469_v56 = vmul.f32 %v18810_v29, %v21587_v54  ;;  %21588 = vst [vmem:[#allocation245_spill] sm:$0xff] %v18832_v37  ;;  %v909_v55 = vmul.f32 %v18832_v37, %v21589_v58  ;;  %v21591_v38 = vld [vmem:[#allocation85_spill] sm:$0xff]  ;;  %v21592_v13 = vld [vmem:[#allocation23_spill] sm:$0xff]  ;;  %v21593_v46 = vld [vmem:[#allocation24_spill] sm:$0xff] }
 0x43a   :  { %v4349_v0 = vpop.permute.xlu1 %4348  ;;  %7027 = vst.msk [vmem:[#allocation2 + $0xd1] sm:$0xff] %vm6189_vm0, %v6964_v18  ;;  %v4339_v6 = vpop.permute.xlu0 %4338  ;;  %v4094_v50 = vadd.f32 %v4030_v25, %v3574_v9  ;;  %v911_v15 = vmul.f32 %v18832_v37, %v21590_v48  ;;  %v925_v5 = vmul.f32 %v18832_v37, %v21591_v38  ;;  %v468_v25 = vmul.f32 %v18810_v29, %v21592_v13  ;;  %v21594_v18 = vld [vmem:[#allocation25_spill] sm:$0xff]  ;;  %v21595_v47 = vld [vmem:[#allocation27_spill] sm:$0xff] }
 0x43b   :  { %v4552_v62 = vmul.f32 %v18818_v27, %v4349_v0  ;;  %v4550_v14 = vmul.f32 %v18818_v27, %v4339_v6  ;;  %3433 = vperm.xlu1 %14015, %v12218_v53   ;;  %v471_v45 = vmul.f32 %v18810_v29, %v21593_v46  ;;  %v470_v9 = vmul.f32 %v18810_v29, %v21594_v18  ;;  %v12225_v6 = vld [vmem:[%s20702_s0 + $0x348] sm:$0xff]  ;;  %v21597_v54 = vld [vmem:[#allocation31_spill] sm:$0xff]  ;;  %v12223_v13 = vld [vmem:[%s20702_s0 + $0x330] sm:$0xff] }
 0x43c   :  { %3423 = vperm.xlu0 %14014, %v12216_v3   ;;  %v472_v53 = vmul.f32 %v18810_v29, %v21595_v47  ;;  %v476_v58 = vmul.f32 %v18810_v29, %v21597_v54  ;;  %v21598_v48 = vld [vmem:[#allocation33_spill] sm:$0xff]  ;;  %v21599_v46 = vld [vmem:[#allocation86_spill] sm:$0xff]  ;;  %v21600_v47 = vld [vmem:[#allocation87_spill] sm:$0xff]  ;;  %v989_v59 = vadd.f32 %v925_v5, %v469_v56  ;;  %v926_v31 = vmul.f32 %v18832_v37, %v21601_v42 }
 0x43d   :  { %v4616_v10 = vadd.f32 %v4552_v62, %v4096_v28  ;;  %v4614_v0 = vadd.f32 %v4550_v14, %v4094_v50  ;;  %v21596_v28 = vld [vmem:[#allocation29_spill] sm:$0xff]  ;;  %v478_v38 = vmul.f32 %v18810_v29, %v21598_v48  ;;  %v924_v18 = vmul.f32 %v18832_v37, %v21599_v46 }
 0x43e   :  { %v18846_v57 = vpop.permute.xlu1 %2867  ;;  %v474_v62 = vmul.f32 %v18810_v29, %v21596_v28  ;;  %v7063_v50 = vld [vmem:[#allocation2 + $0xc1] sm:$0xff]  ;;  %v927_v28 = vmul.f32 %v18832_v37, %v21600_v47  ;;  %v973_v48 = vadd.f32 %v909_v55, %v453_v12  ;;  %v975_v29 = vadd.f32 %v911_v15, %v455_v33  ;;  %v7690_v15 = vld [vmem:[#allocation2 + $0x10] sm:$0xff] }
 0x43f   :  { %v7470_v3 = vld [vmem:[#allocation2 + $0xc2] sm:$0xff]  ;;  %v18859_v14 = vpop.permute.xlu0 %2857  ;;  %13138 = vmatprep.mubr.msk.f32.mxu1 %vm6189_vm0, %v7063_v50  ;;  %v4664_v54 = vmax.f32 %v4614_v0, %v4616_v10  ;;  %3468 = vperm.xlu1 %14015, %v12225_v6   ;;  %v928_v44 = vmul.f32 %v18832_v37, %v21602_v40  ;;  %v930_v46 = vmul.f32 %v18832_v37, %v21603_v60  ;;  %v21607_v60 = vld [vmem:[#allocation133_spill] sm:$0xff] }
 0x440   :  { %13202 = vmatprep.mubr.msk.f32.mxu0 %vm6189_vm0, %v7470_v3  ;;  %v932_v47 = vmul.f32 %v18832_v37, %v21604_v20  ;;  %3458 = vperm.xlu0 %14014, %v12223_v13   ;;  %v21605_v33 = vld [vmem:[#allocation96_spill] sm:$0xff]  ;;  %v21608_v20 = vld [vmem:[#allocation135_spill] sm:$0xff]  ;;  %v988_v0 = vadd.f32 %v924_v18, %v468_v25  ;;  %v991_v6 = vadd.f32 %v927_v28, %v471_v45  ;;  %v21609_v3 = vld [vmem:[#allocation149_spill] sm:$0xff] }
 0x441   :  { %v7064_v50 = vld [vmem:[#allocation2 + $0xd1] sm:$0xff]  ;;  %v18879_v10 = vrot.slane %v4664_v54, %v16592_v4  ;;  %v934_v42 = vmul.f32 %v18832_v37, %v21605_v33  ;;  %v18888_v40 = vld [vmem:[%s20703_s1 + $0x2] ss:$0 sm:$0xff]  ;;  %v992_v25 = vadd.f32 %v928_v44, %v472_v53  ;;  %v994_v45 = vadd.f32 %v930_v46, %v474_v62 }
 0x442   :  { %v7471_v22 = vld [vmem:[#allocation2 + $0xd2] sm:$0xff]  ;;  %v18881_v12 = vpop.permute.xlu1 %3833  ;;  %21606 = vst [vmem:[#allocation285_spill] sm:$0xff] %v18888_v40  ;;  %v1429_v56 = vmul.f32 %v18888_v40, %v21607_v60  ;;  %v1431_v55 = vmul.f32 %v18888_v40, %v21608_v20  ;;  %13139 = vmatmul.mubr.msk.f32.gmra.mrb[10].mxu1 %vm6189_vm0, %v7064_v50  ;;  %v1445_v13 = vmul.f32 %v18888_v40, %v21609_v3  ;;  %v21612_v28 = vld [vmem:[#allocation152_spill] sm:$0xff] }
 0x443   :  { %13203 = vmatmul.mubr.msk.f32.gmra.mrb[10].mxu0 %vm6189_vm0, %v7471_v22  ;;  %v18896_v5 = vpop.permute.xlu0 %3823  ;;  %v21610_v33 = vld [vmem:[#allocation150_spill] sm:$0xff]  ;;  %v990_v60 = vadd.f32 %v926_v31, %v470_v9  ;;  %v1447_v20 = vmul.f32 %v18888_v40, %v21611_v30  ;;  %v4952_v50 = vcombine.high %v4664_v54, %v4664_v54  ;;  %v4967_v22 = vcombine.high %v18879_v10, %v18879_v10  ;;  %v14097_v31 = vld [vmem:[%s20702_s0 + $0x27a] sm:$0xff]  ;;  %v21614_v46 = vld [vmem:[#allocation156_spill] sm:$0xff] }
 0x444   :  { %v1444_v37 = vmul.f32 %v18888_v40, %v21610_v33  ;;  %13219 = vmatprep.mubr.msk.f32.mxu0 %vm6189_vm0, %v7690_v15  ;;  %4433 = vperm.xlu1 %14015, %v18508_v1   ;;  %v996_v18 = vadd.f32 %v932_v47, %v476_v58  ;;  %v1446_v3 = vmul.f32 %v18888_v40, %v21612_v28  ;;  %v21613_v15 = vld [vmem:[#allocation154_spill] sm:$0xff] }
 0x445   :  { %4423 = vperm.xlu0 %14014, %v14097_v31   ;;  %v998_v9 = vadd.f32 %v934_v42, %v478_v38  ;;  %v1493_v30 = vadd.f32 %v1429_v56, %v973_v48  ;;  %v1495_v54 = vadd.f32 %v1431_v55, %v975_v29  ;;  %v1448_v33 = vmul.f32 %v18888_v40, %v21613_v15  ;;  %v7692_v1 = vld [vmem:[#allocation2 + $0x30] sm:$0xff]  ;;  %v21616_v48 = vld [vmem:[#allocation160_spill] sm:$0xff] }
 0x446   :  { %v18916_v44 = vpop.permute.xlu1 %2367  ;;  %v1509_v62 = vadd.f32 %v1445_v13, %v989_v59  ;;  %v1508_v58 = vadd.f32 %v1444_v37, %v988_v0  ;;  %v1450_v47 = vmul.f32 %v18888_v40, %v21614_v46  ;;  %v21615_v28 = vld [vmem:[#allocation158_spill] sm:$0xff]  ;;  %v1511_v29 = vadd.f32 %v1447_v20, %v991_v6  ;;  %v21618_v0 = vld [vmem:[#allocation200_spill] sm:$0xff]  ;;  %v21620_v20 = vld [vmem:[#allocation215_spill] sm:$0xff] }
 0x447   :  { %13220 = vmatmul.mubr.msk.f32.vlgmr.msra.gmra.mrb[0].mxu0 %vm6189_vm0, %v7691_v17  ;;  %v18918_v53 = vpop.permute.xlu0 %2357  ;;  %v1452_v38 = vmul.f32 %v18888_v40, %v21615_v28  ;;  %v1454_v42 = vmul.f32 %v18888_v40, %v21616_v48  ;;  %v4966_v17 = vrot.slane %v4952_v50, %v16592_v4  ;;  %v12418_v56 = vrot.slane %v4967_v22, 9  ;;  %v21617_v59 = vld [vmem:[#allocation198_spill] sm:$0xff] }
 0x448   :  { %13222 = vmatprep.mubr.msk.f32.mxu0 %vm6189_vm0, %v7692_v1  ;;  %4468 = vperm.xlu1 %14015, %v18533_v7   ;;  %v1510_v55 = vadd.f32 %v1446_v3, %v990_v60  ;;  %v1950_v37 = vmul.f32 %v18650_v24, %v21617_v59  ;;  %v1952_v13 = vmul.f32 %v18650_v24, %v21618_v0  ;;  %v21619_v31 = vld [vmem:[#allocation214_spill] sm:$0xff]  ;;  %v7693_v1 = vld [vmem:[#allocation2 + $0x40] sm:$0xff]  ;;  %v18941_v7 = vld [vmem:[%s20702_s0 + $0x30a] sm:$0xff]  ;;  %v12417_v28 = vrot.slane %v18879_v10, 9 }
 0x449   :  { %v1966_v15 = vmul.f32 %v18650_v24, %v21619_v31  ;;  %v14098_v6 = vld [vmem:[%s20702_s0 + $0x2d2] sm:$0xff]  ;;  %v1512_v60 = vadd.f32 %v1448_v33, %v992_v25  ;;  %v1965_v50 = vmul.f32 %v18650_v24, %v21620_v20  ;;  %v21621_v3 = vld [vmem:[#allocation216_spill] sm:$0xff]  ;;  %v1514_v25 = vadd.f32 %v1450_v47, %v994_v45 }
 0x44a   :  { %4458 = vperm.xlu0 %14014, %v14098_v6   ;;  %v1968_v46 = vmul.f32 %v18650_v24, %v21621_v3  ;;  %v7694_v48 = vld [vmem:[#allocation2 + $0x50] sm:$0xff]  ;;  %v18949_v59 = vpop.permute.xlu1 %2352  ;;  %v1516_v33 = vadd.f32 %v1452_v38, %v996_v18  ;;  %v2472_v3 = vmul.f32 %v18657_v19, %v18641_v36  ;;  %v4968_v40 = vcombine.high %v4966_v17, %v4966_v17  ;;  %v7695_v18 = vld [vmem:[#allocation2 + $0x60] sm:$0xff] }
 0x44b   :  { %13223 = vmatmul.mubr.msk.f32.gmra.mrb[2].mxu0 %vm6189_vm0, %v7693_v1  ;;  %21622 = vst [vmem:[#allocation282_spill] sm:$0xff] %v18949_v59  ;;  %v18951_v0 = vpop.permute.xlu0 %2342  ;;  %v18956_v31 = vld [vmem:[%s20702_s0 + $0x2f2] sm:$0xff]  ;;  %v21624_v6 = vld [vmem:[#allocation217_spill] sm:$0xff]  ;;  %v1518_v1 = vadd.f32 %v1454_v42, %v998_v9  ;;  %v12419_v26 = vrot.slane %v4966_v17, 9  ;;  %v5827_v4 = vmax.f32 %v4967_v22, %v12418_v56  ;;  %v2014_v2 = vadd.f32 %v1950_v37, %v1493_v30 }
 0x44c   :  { %21623 = vst [vmem:[#allocation58_spill] sm:$0xff] %v18951_v0  ;;  %v1967_v20 = vmul.f32 %v18650_v24, %v21624_v6  ;;  %13225 = vmatprep.mubr.msk.f32.mxu0 %vm6189_vm0, %v7694_v48  ;;  %2932 = vperm.xlu1 %14015, %v18941_v7   ;;  %v2016_v0 = vadd.f32 %v1952_v13, %v1495_v54  ;;  %v7696_v30 = vld [vmem:[#allocation2 + $0x70] sm:$0xff] }
 0x44d   :  { %v18964_v59 = vadd.f32 %v1966_v15, %v1509_v62  ;;  %v2470_v45 = vmul.f32 %v18657_v19, %v18645_v39  ;;  %v2029_v47 = vadd.f32 %v1965_v50, %v1508_v58  ;;  %v18969_v36 = vadd.f32 %v1968_v46, %v1511_v29  ;;  %v21625_v39 = vld [vmem:[#allocation219_spill] sm:$0xff]  ;;  %v21626_v13 = vld [vmem:[#allocation242_spill] sm:$0xff]  ;;  %v21627_v15 = vld [vmem:[#allocation221_spill] sm:$0xff] }
 0x44e   :  { %2922 = vperm.xlu0 %14014, %v18956_v31   ;;  %v2992_v9 = vmul.f32 %v18708_v23, %v18714_v8  ;;  %v5826_v22 = vmax.f32 %v18879_v10, %v12417_v28  ;;  %v18975_v54 = vpop.permute.xlu1 %2387  ;;  %v2031_v38 = vadd.f32 %v1967_v20, %v1510_v55  ;;  %v1969_v42 = vmul.f32 %v18650_v24, %v21625_v39  ;;  %v21628_v50 = vld [vmem:[#allocation223_spill] sm:$0xff] }
 0x44f   :  { %13226 = vmatmul.mubr.msk.f32.gmra.mrb[4].mxu0 %vm6189_vm0, %v7695_v18  ;;  %v18977_v62 = vpop.permute.xlu0 %2377  ;;  %v2536_v56 = vadd.f32 %v2472_v3, %v2016_v0  ;;  %v2990_v58 = vmul.f32 %v18708_v23, %v18722_v51  ;;  %v3513_v8 = vmul.f32 %v18758_v41, %v18769_v32  ;;  %v12420_v10 = vrot.slane %v4968_v40, 9  ;;  %v14099_v32 = vld [vmem:[%s20702_s0 + $0x2a9] sm:$0xff] }
 0x450   :  { %13228 = vmatprep.mubr.msk.f32.mxu0 %vm6189_vm0, %v7696_v30  ;;  %v5828_v29 = vmax.f32 %v4966_v17, %v12419_v26  ;;  %v5990_v37 = vadd.f32 %v21294_v35, %v5827_v4  ;;  %3933 = vperm.xlu1 %14015, %v21626_v13   ;;  %v1971_v55 = vmul.f32 %v18650_v24, %v21627_v15  ;;  %v21629_v26 = vld [vmem:[#allocation225_spill] sm:$0xff] }
 0x451   :  { %v1973_v46 = vmul.f32 %v18650_v24, %v21628_v50  ;;  %v2534_v28 = vadd.f32 %v2470_v45, %v2014_v2  ;;  %v3511_v51 = vmul.f32 %v18758_v41, %v18787_v43  ;;  %v1975_v4 = vmul.f32 %v18650_v24, %v21629_v26 }
 0x452   :  { %3923 = vperm.xlu0 %14014, %v14099_v32   ;;  %v3056_v17 = vadd.f32 %v2992_v9, %v2536_v56  ;;  %v5989_v48 = vadd.f32 %v21419_v34, %v5826_v22  ;;  %v4033_v0 = vmul.f32 %v18784_v21, %v18881_v12  ;;  %v19002_v6 = vpop.permute.xlu1 %3388  ;;  %v2033_v20 = vadd.f32 %v1969_v42, %v1512_v60  ;;  %v21630_v32 = vld [vmem:[#allocation282_spill] sm:$0xff] }
 0x453   :  { %v19004_v2 = vpop.permute.xlu0 %3378  ;;  %v3054_v43 = vadd.f32 %v2990_v58, %v2534_v28  ;;  %v2487_v3 = vmul.f32 %v18657_v19, %v18743_v11  ;;  %v4031_v45 = vmul.f32 %v18784_v21, %v18896_v5  ;;  %v5829_v30 = vmax.f32 %v4968_v40, %v12420_v10  ;;  %v14100_v11 = vld [vmem:[%s20702_s0 + $0x301] sm:$0xff] }
 0x454   :  { %v3577_v18 = vadd.f32 %v3513_v8, %v3056_v17  ;;  %v5991_v9 = vadd.f32 %v21299_v61, %v5828_v29  ;;  %v6118_v22 = vmax.f32 %v5990_v37, 0.0  ;;  %3968 = vperm.xlu1 %14015, %v18429_v49   ;;  %v2035_v12 = vadd.f32 %v1971_v55, %v1514_v25  ;;  %v19022_v40 = vld [vmem:[%s20702_s0 + $0x33a] sm:$0xff]  ;;  %v19031_v58 = vld [vmem:[%s20702_s0 + $0x322] sm:$0xff] }
 0x455   :  { %v19012_v39 = vadd.f32 %v1973_v46, %v1516_v33  ;;  %v2485_v60 = vmul.f32 %v18657_v19, %v18749_v52  ;;  %v3575_v42 = vadd.f32 %v3511_v51, %v3054_v43  ;;  %v19024_v5 = vadd.f32 %v1975_v4, %v1518_v1 }
 0x456   :  { %3958 = vperm.xlu0 %14014, %v14100_v11   ;;  %v6117_v49 = vmax.f32 %v5989_v48, 0.0  ;;  %v4097_v25 = vadd.f32 %v4033_v0, %v3577_v18  ;;  %v2491_v33 = vmul.f32 %v18657_v19, %v18916_v44  ;;  %v4354_v56 = vpop.permute.xlu1 %4353  ;;  %v2489_v10 = vmul.f32 %v18657_v19, %v18918_v53  ;;  %v21631_v18 = vld [vmem:[#allocation58_spill] sm:$0xff]  ;;  %v12291_v11 = vld [vmem:[%s20702_s0 + $0x349] sm:$0xff] }
 0x457   :  { %v4344_v52 = vpop.permute.xlu0 %4343  ;;  %v4095_v8 = vadd.f32 %v4031_v45, %v3575_v42  ;;  %v4553_v29 = vmul.f32 %v18818_v27, %v4354_v56  ;;  %v2551_v37 = vadd.f32 %v2487_v3, %v2031_v38  ;;  %v5992_v13 = vadd.f32 %v21315_v63, %v5829_v30  ;;  %v21632_v30 = vld [vmem:[#allocation184_spill] sm:$0xff]  ;;  %v14101_v42 = vld [vmem:[%s20702_s0 + $0x2d9] sm:$0xff] }
 0x458   :  { %v4551_v1 = vmul.f32 %v18818_v27, %v4344_v52  ;;  %v6119_v15 = vmax.f32 %v5991_v9, 0.0  ;;  %v6600_v44 = vrot.slane %v6118_v22, %v16848_v16  ;;  %2952 = vperm.xlu1 %14015, %v19022_v40   ;;  %v19040_v55 = vadd.f32 %v2485_v60, %v2029_v47  ;;  %v21633_v22 = vld [vmem:[#allocation21_spill] sm:$0xff] }
 0x459   :  { %v3007_v50 = vmul.f32 %v18708_v23, %v18846_v57  ;;  %v4617_v46 = vadd.f32 %v4553_v29, %v4097_v25  ;;  %v6596_v53 = vrot.slane %v6117_v49, %v16848_v16  ;;  %v19048_v38 = vmul.f32 %v18708_v23, %v18859_v14 }
 0x45a   :  { %v4615_v28 = vadd.f32 %v4551_v1, %v4095_v8  ;;  %2942 = vperm.xlu0 %14014, %v19031_v58   ;;  %v2555_v51 = vadd.f32 %v2491_v33, %v2035_v12  ;;  %v2488_v26 = vmul.f32 %v18657_v19, %v21630_v32  ;;  %v2888_v4 = vpop.permute.xlu1 %2887  ;;  %v2553_v17 = vadd.f32 %v2489_v10, %v2033_v20 }
 0x45b   :  { %v2878_v47 = vpop.permute.xlu0 %2877  ;;  %v3011_v57 = vmul.f32 %v18708_v23, %v2888_v4  ;;  %v6120_v43 = vmax.f32 %v5992_v13, 0.0  ;;  %v6604_v3 = vrot.slane %v6119_v15, %v16848_v16  ;;  %v6937_v45 = vsel %vm6881_vm3, %v6600_v44, %v6596_v53  ;;  %v12222_v53 = vld [vmem:[%s20702_s0 + $0x320] sm:$0xff] }
 0x45c   :  { %v4665_v48 = vmax.f32 %v4615_v28, %v4617_v46  ;;  %v3009_v0 = vmul.f32 %v18708_v23, %v2878_v47  ;;  %v2486_v14 = vmul.f32 %v18657_v19, %v21631_v18  ;;  %3953 = vperm.xlu1 %14015, %v21632_v30   ;;  %v3071_v49 = vadd.f32 %v3007_v50, %v2551_v37  ;;  %v14102_v28 = vld [vmem:[%s20702_s0 + $0x331] sm:$0xff]  ;;  %v21635_v30 = vld [vmem:[#allocation80_spill] sm:$0xff] }
 0x45d   :  { %v19060_v60 = vadd.f32 %v3011_v57, %v2555_v51  ;;  %v2552_v25 = vadd.f32 %v2488_v26, %v18969_v36  ;;  %v2495_v33 = vmul.f32 %v18657_v19, %v18975_v54  ;;  %v2493_v56 = vmul.f32 %v18657_v19, %v18977_v62 }
 0x45e   :  { %v4969_v9 = vcombine.high %v4665_v48, %v4665_v48  ;;  %v4976_v12 = vrot.slane %v4665_v48, %v21633_v22  ;;  %v19062_v20 = vadd.f32 %v3009_v0, %v2553_v17  ;;  %3943 = vperm.xlu0 %14014, %v14101_v42   ;;  %v2873_v52 = vpop.permute.xlu1 %2872  ;;  %v6608_v15 = vrot.slane %v6120_v43, %v16848_v16  ;;  %v12220_v17 = vld [vmem:[%s20702_s0 + $0x308] sm:$0xff]  ;;  %v21634_v43 = vld [vmem:[#allocation287_spill] sm:$0xff] }
 0x45f   :  { %v2863_v8 = vpop.permute.xlu0 %2862  ;;  %v3008_v13 = vmul.f32 %v18708_v23, %v2873_v52  ;;  %v6938_v37 = vsel %vm6883_vm4, %v6604_v3, %v6937_v45  ;;  %v2550_v36 = vadd.f32 %v2486_v14, %v18964_v59  ;;  %v2559_v51 = vadd.f32 %v2495_v33, %v19024_v5 }
 0x460   :  { %v4983_v10 = vrot.slane %v4969_v9, %v21633_v22  ;;  %v4984_v29 = vcombine.high %v4976_v12, %v4976_v12  ;;  %v12421_v1 = vrot.slane %v4976_v12, 9  ;;  %v3006_v44 = vmul.f32 %v18708_v23, %v2863_v8  ;;  %3988 = vperm.xlu1 %14015, %v12291_v11   ;;  %v21637_v8 = vld [vmem:[#allocation11_spill] sm:$0xff] }
 0x461   :  { %v2557_v59 = vadd.f32 %v2493_v56, %v19012_v39  ;;  %v19089_v32 = vadd.f32 %v3008_v13, %v2552_v25  ;;  %v3528_v5 = vmul.f32 %v18758_v41, %v19002_v6  ;;  %v3526_v39 = vmul.f32 %v18758_v41, %v19004_v2 }
 0x462   :  { %v4985_v54 = vcombine.high %v4983_v10, %v4983_v10  ;;  %v12422_v50 = vrot.slane %v4984_v29, 9  ;;  %v12423_v62 = vrot.slane %v4983_v10, 9  ;;  %v5830_v46 = vmax.f32 %v4976_v12, %v12421_v1  ;;  %3978 = vperm.xlu0 %14014, %v14102_v28   ;;  %v2908_v4 = vpop.permute.xlu1 %2907  ;;  %v21636_v12 = vld [vmem:[#allocation252_spill] sm:$0xff] }
 0x463   :  { %v19091_v26 = vadd.f32 %v3006_v44, %v2550_v36  ;;  %v2898_v47 = vpop.permute.xlu0 %2897  ;;  %v3015_v45 = vmul.f32 %v18708_v23, %v2908_v4  ;;  %v3069_v25 = vadd.f32 %v19048_v38, %v19040_v55  ;;  %v6939_v6 = vsel %vm6885_vm5, %v6608_v15, %v6938_v37  ;;  %v21638_v38 = vld [vmem:[#allocation17_spill] sm:$0xff] }
 0x464   :  { %v12424_v48 = vrot.slane %v4985_v54, 9  ;;  %v5831_v57 = vmax.f32 %v4984_v29, %v12422_v50  ;;  %v5832_v0 = vmax.f32 %v4983_v10, %v12423_v62  ;;  %v5993_v3 = vadd.f32 %v21634_v43, %v5830_v46  ;;  %3453 = vperm.xlu1 %14015, %v12222_v53   ;;  %v14103_v46 = vld [vmem:[%s20702_s0 + $0x2aa] sm:$0xff] }
 0x465   :  { %v3013_v18 = vmul.f32 %v18708_v23, %v2898_v47  ;;  %v19108_v33 = vadd.f32 %v3015_v45, %v2559_v51  ;;  %v3592_v36 = vadd.f32 %v3528_v5, %v3071_v49  ;;  %v3590_v44 = vadd.f32 %v3526_v39, %v3069_v25  ;;  %v12224_v39 = vld [vmem:[%s20702_s0 + $0x338] sm:$0xff] }
 0x466   :  { %v5833_v14 = vmax.f32 %v4985_v54, %v12424_v48  ;;  %v5994_v9 = vadd.f32 %v21635_v30, %v5831_v57  ;;  %v5995_v42 = vadd.f32 %v21636_v12, %v5832_v0  ;;  %v6121_v11 = vmax.f32 %v5993_v3, 0.0  ;;  %3443 = vperm.xlu0 %14014, %v12220_v17   ;;  %v3909_v56 = vpop.permute.xlu1 %3908  ;;  %v21639_v17 = vld [vmem:[#allocation60_spill] sm:$0xff]  ;;  %v12226_v0 = vld [vmem:[%s20702_s0 + $0x350] sm:$0xff] }
 0x467   :  { %v19110_v2 = vadd.f32 %v3013_v18, %v2557_v59  ;;  %v3899_v52 = vpop.permute.xlu0 %3898  ;;  %v4048_v54 = vmul.f32 %v18784_v21, %v3909_v56  ;;  %v14104_v57 = vld [vmem:[%s20702_s0 + $0x302] sm:$0xff] }
 0x468   :  { %v5996_v10 = vadd.f32 %v21637_v8, %v5833_v14  ;;  %v6122_v29 = vmax.f32 %v5994_v9, 0.0  ;;  %v6123_v1 = vmax.f32 %v5995_v42, 0.0  ;;  %v6612_v13 = vrot.slane %v6121_v11, %v16848_v16  ;;  %4453 = vperm.xlu1 %14015, %v21638_v38   ;;  %v21640_v11 = vld [vmem:[#allocation182_spill] sm:$0xff] }
 0x469   :  { %v4046_v55 = vmul.f32 %v18784_v21, %v3899_v52  ;;  %v19123_v49 = vadd.f32 %v4048_v54, %v3592_v36  ;;  %v21642_v36 = vld [vmem:[#allocation57_spill] sm:$0xff] }
 0x46a   :  { %v6124_v15 = vmax.f32 %v5996_v10, 0.0  ;;  %v6616_v37 = vrot.slane %v6122_v29, %v16848_v16  ;;  %v6620_v50 = vrot.slane %v6123_v1, %v16848_v16  ;;  %v6940_v62 = vsel %vm6887_vm6, %v6612_v13, %v6939_v6  ;;  %4443 = vperm.xlu0 %14014, %v14103_v46   ;;  %v19127_v53 = vpop.permute.xlu1 %2372  ;;  %v12357_v6 = vld [vmem:[%s20702_s0 + $0x34a] sm:$0xff] }
 0x46b   :  { %v19125_v28 = vadd.f32 %v4046_v55, %v3590_v44  ;;  %v19129_v51 = vpop.permute.xlu0 %2362  ;;  %v7698_v10 = vld [vmem:[#allocation2 + $0xb0] sm:$0xff] }
 0x46c   :  { %v6624_v59 = vrot.slane %v6124_v15, %v16848_v16  ;;  %v6941_v4 = vsel %vm6889_vm7, %v6616_v37, %v6940_v62  ;;  %4488 = vperm.xlu1 %14015, %v21639_v17   ;;  %v7700_v13 = vld [vmem:[#allocation2 + $0xd0] sm:$0xff] }
 0x46d   :  { %v6942_v47 = vsel %vm6891_vm8, %v6620_v50, %v6941_v4  ;;  %v21643_v44 = vld [vmem:[#allocation70_spill] sm:$0xff]  ;;  %v21644_v50 = vld [vmem:[#allocation89_spill] sm:$0xff] }
 0x46e   :  { %v6943_v48 = vsel %vm6893_vm9, %v6624_v59, %v6942_v47  ;;  %4478 = vperm.xlu0 %14014, %v14104_v57   ;;  %v19143_v3 = vpop.permute.xlu1 %2407  ;;  %v12292_v54 = vld [vmem:[%s20702_s0 + $0x351] sm:$0xff]  ;;  %v21646_v59 = vld [vmem:[#allocation91_spill] sm:$0xff] }
 0x46f   :  { %7024 = vst.msk [vmem:[#allocation2 + $0x81] sm:$0xff] %vm6189_vm0, %v6943_v48  ;;  %v19145_v5 = vpop.permute.xlu0 %2397  ;;  %v21645_v62 = vld [vmem:[#allocation245_spill] sm:$0xff]  ;;  %v21648_v48 = vld [vmem:[#allocation26_spill] sm:$0xff]  ;;  %v21649_v57 = vld [vmem:[#allocation247_spill] sm:$0xff] }
 0x470   :  { %3473 = vperm.xlu1 %14015, %v12226_v0   ;;  %v929_v46 = vmul.f32 %v21645_v62, %v21644_v50  ;;  %v931_v4 = vmul.f32 %v21645_v62, %v21646_v59  ;;  %v21647_v17 = vld [vmem:[#allocation193_spill] sm:$0xff]  ;;  %v473_v0 = vmul.f32 %v21649_v57, %v21648_v48  ;;  %v21658_v59 = vld [vmem:[#allocation220_spill] sm:$0xff] }
 0x472   :  { %3463 = vperm.xlu0 %14014, %v12224_v39   ;;  %v3409_v45 = vpop.permute.xlu1 %3408  ;;  %v21650_v39 = vld [vmem:[#allocation28_spill] sm:$0xff] }
 0x473   :  { %v3532_v18 = vmul.f32 %v18758_v41, %v3409_v45  ;;  %v3399_v14 = vpop.permute.xlu0 %3398  ;;  %v475_v45 = vmul.f32 %v21649_v57, %v21650_v39  ;;  %v12358_v39 = vld [vmem:[%s20702_s0 + $0x352] sm:$0xff] }
 0x474   :  { %v3530_v9 = vmul.f32 %v18758_v41, %v3399_v14  ;;  %4473 = vperm.xlu1 %14015, %v18956_v31   ;;  %v21641_v31 = vld [vmem:[#allocation42_spill] sm:$0xff] }
 0x475   :  { %v19154_v42 = vadd.f32 %v3532_v18, %v19060_v60  ;;  %v7699_v60 = vld [vmem:[#allocation2 + $0xc0] sm:$0xff]  ;;  %v995_v50 = vadd.f32 %v931_v4, %v475_v45 }
 0x476   :  { %4463 = vperm.xlu0 %14014, %v21640_v11   ;;  %v7697_v25 = vld [vmem:[#allocation2 + $0x80] sm:$0xff]  ;;  %v19161_v56 = vadd.f32 %v3530_v9, %v19062_v20  ;;  %v19163_v52 = vpop.permute.xlu1 %2392 }
 0x477   :  { %13229 = vmatmul.mubr.msk.f32.gmra.mrb[6].mxu0 %vm6189_vm0, %v7697_v25  ;;  %v19166_v29 = vpop.permute.xlu0 %2382  ;;  %v21651_v9 = vld [vmem:[#allocation32_spill] sm:$0xff]  ;;  %v21652_v25 = vld [vmem:[#allocation35_spill] sm:$0xff] }
 0x478   :  { %13231 = vmatprep.mubr.msk.f32.mxu0 %vm6189_vm0, %v7698_v10  ;;  %4508 = vperm.xlu1 %14015, %v12357_v6   ;;  %v479_v11 = vmul.f32 %v21649_v57, %v21651_v9  ;;  %v480_v6 = vmul.f32 %v21649_v57, %v21652_v25  ;;  %v21654_v10 = vld [vmem:[#allocation285_spill] sm:$0xff]  ;;  %v21660_v25 = vld [vmem:[#allocation164_spill] sm:$0xff]  ;;  %v21662_v45 = vld [vmem:[#allocation95_spill] sm:$0xff] }
 0x47a   :  { %4498 = vperm.xlu0 %14014, %v21641_v31   ;;  %v19170_v1 = vpop.permute.xlu1 %2427 }
 0x47b   :  { %13232 = vmatmul.mubr.msk.f32.gmra.mrb[8].mxu0 %vm6189_vm0, %v7699_v60  ;;  %v19173_v20 = vpop.permute.xlu0 %2417 }
 0x47c   :  { %13234 = vmatprep.mubr.msk.f32.mxu0 %vm6189_vm0, %v7700_v13  ;;  %3973 = vperm.xlu1 %14015, %v21642_v36   ;;  %v21655_v36 = vld [vmem:[#allocation37_spill] sm:$0xff] }
 0x47e   :  { %3963 = vperm.xlu0 %14014, %v21643_v44   ;;  %v3394_v55 = vpop.permute.xlu1 %3393  ;;  %v482_v44 = vmul.f32 %v21649_v57, %v21655_v36 }
 0x47f   :  { %v3529_v38 = vmul.f32 %v18758_v41, %v3394_v55  ;;  %v3384_v15 = vpop.permute.xlu0 %3383  ;;  %v21657_v55 = vld [vmem:[#allocation153_spill] sm:$0xff] }
 0x480   :  { %v3527_v37 = vmul.f32 %v18758_v41, %v3384_v15  ;;  %3993 = vperm.xlu1 %14015, %v12292_v54   ;;  %v21656_v54 = vld [vmem:[#allocation100_spill] sm:$0xff] }
 0x481   :  { %v19188_v47 = vadd.f32 %v3529_v38, %v19089_v32  ;;  %v21653_v32 = vld [vmem:[#allocation155_spill] sm:$0xff]  ;;  %v1449_v38 = vmul.f32 %v21654_v10, %v21657_v55 }
 0x482   :  { %3983 = vperm.xlu0 %14014, %v21647_v17   ;;  %v19196_v18 = vadd.f32 %v3527_v37, %v19091_v26  ;;  %v3429_v14 = vpop.permute.xlu1 %3428  ;;  %v1451_v31 = vmul.f32 %v21654_v10, %v21653_v32  ;;  %v938_v26 = vmul.f32 %v21645_v62, %v21656_v54  ;;  %v993_v37 = vadd.f32 %v929_v46, %v473_v0  ;;  %v21661_v46 = vld [vmem:[#allocation218_spill] sm:$0xff] }
 0x483   :  { %v3536_v60 = vmul.f32 %v18758_v41, %v3429_v14  ;;  %v3419_v13 = vpop.permute.xlu0 %3418  ;;  %v1972_v17 = vmul.f32 %v18650_v24, %v21658_v59  ;;  %v21659_v14 = vld [vmem:[#allocation98_spill] sm:$0xff]  ;;  %v1970_v4 = vmul.f32 %v18650_v24, %v21661_v46  ;;  %v2490_v59 = vmul.f32 %v18657_v19, %v19129_v51  ;;  %v21664_v46 = vld [vmem:[#allocation229_spill] sm:$0xff] }
 0x484   :  { %v3534_v15 = vmul.f32 %v18758_v41, %v3419_v13  ;;  %4493 = vperm.xlu1 %14015, %v19031_v58   ;;  %v936_v9 = vmul.f32 %v21645_v62, %v21659_v14  ;;  %v1458_v58 = vmul.f32 %v21654_v10, %v21660_v25  ;;  %v1515_v32 = vadd.f32 %v1451_v31, %v995_v50 }
 0x485   :  { %v19216_v48 = vadd.f32 %v3536_v60, %v19108_v33  ;;  %v2492_v60 = vmul.f32 %v18657_v19, %v19127_v53  ;;  %v1002_v54 = vadd.f32 %v938_v26, %v482_v44  ;;  %v1513_v55 = vadd.f32 %v1449_v38, %v993_v37  ;;  %v21665_v37 = vld [vmem:[#allocation227_spill] sm:$0xff] }
 0x486   :  { %4483 = vperm.xlu0 %14014, %v18941_v7   ;;  %v19229_v0 = vadd.f32 %v3534_v15, %v19110_v2  ;;  %v4429_v33 = vpop.permute.xlu1 %4428  ;;  %v935_v7 = vmul.f32 %v21645_v62, %v21662_v45  ;;  %v21663_v2 = vld [vmem:[#allocation162_spill] sm:$0xff]  ;;  %v2036_v25 = vadd.f32 %v1972_v17, %v1515_v32  ;;  %v1979_v31 = vmul.f32 %v18650_v24, %v21664_v46 }
 0x487   :  { %v4568_v13 = vmul.f32 %v18818_v27, %v4429_v33  ;;  %v4419_v36 = vpop.permute.xlu0 %4418  ;;  %v1456_v15 = vmul.f32 %v21654_v10, %v21663_v2  ;;  %v1000_v50 = vadd.f32 %v936_v9, %v480_v6  ;;  %v1522_v44 = vadd.f32 %v1458_v58, %v1002_v54 }
 0x488   :  { %v4566_v14 = vmul.f32 %v18818_v27, %v4419_v36  ;;  %4513 = vperm.xlu1 %14015, %v12358_v39   ;;  %v2034_v26 = vadd.f32 %v1970_v4, %v1513_v55  ;;  %v1977_v39 = vmul.f32 %v18650_v24, %v21665_v37  ;;  %v2556_v33 = vadd.f32 %v2492_v60, %v2036_v25  ;;  %v21666_v36 = vld [vmem:[#allocation93_spill] sm:$0xff]  ;;  %v21667_v60 = vld [vmem:[#allocation30_spill] sm:$0xff] }
 0x489   :  { %v4632_v53 = vadd.f32 %v4568_v13, %v19123_v49  ;;  %v2499_v17 = vmul.f32 %v18657_v19, %v19143_v3  ;;  %v933_v49 = vmul.f32 %v21645_v62, %v21666_v36  ;;  %v2043_v58 = vadd.f32 %v1979_v31, %v1522_v44  ;;  %v21668_v13 = vld [vmem:[#allocation159_spill] sm:$0xff]  ;;  %v21669_v31 = vld [vmem:[#allocation104_spill] sm:$0xff] }
 0x48a   :  { %4503 = vperm.xlu0 %14014, %v19022_v40   ;;  %v4630_v38 = vadd.f32 %v4566_v14, %v19125_v28  ;;  %v2893_v51 = vpop.permute.xlu1 %2892  ;;  %v2554_v40 = vadd.f32 %v2490_v59, %v2034_v26  ;;  %v1520_v28 = vadd.f32 %v1456_v15, %v1000_v50  ;;  %v2497_v24 = vmul.f32 %v18657_v19, %v19145_v5  ;;  %v21670_v5 = vld [vmem:[#allocation157_spill] sm:$0xff]  ;;  %v19274_v50 = vld [vmem:[%s20703_s1 + $0x3] ss:$0 sm:$0xff] }
 0x48b   :  { %v3012_v45 = vmul.f32 %v18708_v23, %v2893_v51  ;;  %v2883_v32 = vpop.permute.xlu0 %2882  ;;  %v477_v3 = vmul.f32 %v21649_v57, %v21667_v60  ;;  %v1455_v54 = vmul.f32 %v21654_v10, %v21668_v13  ;;  %v999_v14 = vadd.f32 %v935_v7, %v479_v11  ;;  %v21671_v44 = vld [vmem:[#allocation224_spill] sm:$0xff]  ;;  %v21672_v7 = vld [vmem:[#allocation41_spill] sm:$0xff] }
 0x48c   :  { %v19253_v6 = vmax.f32 %v4630_v38, %v4632_v53  ;;  %v3010_v9 = vmul.f32 %v18708_v23, %v2883_v32  ;;  %v2041_v2 = vadd.f32 %v1977_v39, %v1520_v28  ;;  %v2563_v25 = vadd.f32 %v2499_v17, %v2043_v58  ;;  %v21674_v32 = vld [vmem:[#allocation168_spill] sm:$0xff]  ;;  %v21676_v58 = vld [vmem:[#allocation39_spill] sm:$0xff] }
 0x48d   :  { %v19258_v4 = vadd.f32 %v3012_v45, %v2556_v33  ;;  %v942_v19 = vmul.f32 %v21645_v62, %v21669_v31  ;;  %v1453_v53 = vmul.f32 %v21654_v10, %v21670_v5  ;;  %v1976_v26 = vmul.f32 %v19274_v50, %v21671_v44  ;;  %v21673_v33 = vld [vmem:[#allocation102_spill] sm:$0xff] }
 0x48e   :  { %v19264_v55 = vadd.f32 %v3010_v9, %v2554_v40  ;;  %v2928_v59 = vpop.permute.xlu1 %2927  ;;  %v486_v38 = vmul.f32 %v21649_v57, %v21672_v7  ;;  %v997_v51 = vadd.f32 %v933_v49, %v477_v3  ;;  %v2561_v37 = vadd.f32 %v2497_v24, %v2041_v2  ;;  %v21675_v40 = vld [vmem:[#allocation222_spill] sm:$0xff]  ;;  %v19294_v49 = vld [vmem:[%s20703_s1 + $0x4] ss:$0 sm:$0xff] }
 0x48f   :  { %v3019_v15 = vmul.f32 %v18708_v23, %v2928_v59  ;;  %v2918_v46 = vpop.permute.xlu0 %2917  ;;  %v940_v17 = vmul.f32 %v21645_v62, %v21673_v33  ;;  %v1519_v45 = vadd.f32 %v1455_v54, %v999_v14  ;;  %v1462_v36 = vmul.f32 %v21654_v10, %v21674_v32  ;;  %v21677_v2 = vld [vmem:[#allocation166_spill] sm:$0xff] }
 0x490   :  { %v3017_v11 = vmul.f32 %v18708_v23, %v2918_v46  ;;  %v1974_v9 = vmul.f32 %v19274_v50, %v21675_v40  ;;  %v484_v60 = vmul.f32 %v21649_v57, %v21676_v58  ;;  %v2496_v24 = vmul.f32 %v19294_v49, %v19163_v52  ;;  %v21678_v46 = vld [vmem:[#allocation233_spill] sm:$0xff] }
 0x491   :  { %v19281_v39 = vadd.f32 %v3019_v15, %v2563_v25  ;;  %v1006_v59 = vadd.f32 %v942_v19, %v486_v38  ;;  %v1517_v14 = vadd.f32 %v1453_v53, %v997_v51  ;;  %v1460_v25 = vmul.f32 %v21654_v10, %v21677_v2  ;;  %v21679_v19 = vld [vmem:[#allocation231_spill] sm:$0xff] }
 0x492   :  { %v3929_v28 = vpop.permute.xlu1 %3928  ;;  %v19298_v3 = vadd.f32 %v3017_v11, %v2561_v37  ;;  %v2040_v15 = vadd.f32 %v1976_v26, %v1519_v45  ;;  %v1983_v31 = vmul.f32 %v19274_v50, %v21678_v46  ;;  %v2494_v5 = vmul.f32 %v19294_v49, %v19166_v29 }
 0x493   :  { %v4052_v13 = vmul.f32 %v18784_v21, %v3929_v28  ;;  %v3919_v54 = vpop.permute.xlu0 %3918  ;;  %v1004_v11 = vadd.f32 %v940_v17, %v484_v60  ;;  %v1526_v7 = vadd.f32 %v1462_v36, %v1006_v59  ;;  %v2038_v37 = vadd.f32 %v1974_v9, %v1517_v14  ;;  %v19326_v9 = vld [vmem:[%s20703_s1 + $0x5] ss:$0 sm:$0xff] }
 0x494   :  { %v4050_v52 = vmul.f32 %v18784_v21, %v3919_v54  ;;  %v1981_v53 = vmul.f32 %v19274_v50, %v21679_v19  ;;  %v2560_v51 = vadd.f32 %v2496_v24, %v2040_v15  ;;  %v2503_v26 = vmul.f32 %v19294_v49, %v19170_v1  ;;  %v7050_v19 = vld [vmem:[%s20705_s3 + $0x8] sm:$0xff] }
 0x495   :  { %v19308_v44 = vadd.f32 %v4052_v13, %v19154_v42  ;;  %v1524_v45 = vadd.f32 %v1460_v25, %v1004_v11  ;;  %v2501_v17 = vmul.f32 %v19294_v49, %v19173_v20  ;;  %v2047_v32 = vadd.f32 %v1983_v31, %v1526_v7 }
 0x496   :  { %v2913_v38 = vpop.permute.xlu1 %2912  ;;  %v19316_v33 = vadd.f32 %v4050_v52, %v19161_v56  ;;  %v2558_v36 = vadd.f32 %v2494_v5, %v2038_v37  ;;  %v7049_v37 = vld [vmem:[%s20705_s3] sm:$0xff] }
 0x497   :  { %v3016_v29 = vmul.f32 %v18708_v23, %v2913_v38  ;;  %v2903_v42 = vpop.permute.xlu0 %2902  ;;  %v2045_v56 = vadd.f32 %v1981_v53, %v1524_v45  ;;  %v2567_v58 = vadd.f32 %v2503_v26, %v2047_v32  ;;  %v13636_v53 = vpack.c.bf16 %v7050_v19, %v7049_v37  ;;  %v12567_v38 = vld [vmem:[%s20705_s3 + $0x88] sm:$0xff]  ;;  %v7051_v45 = vld [vmem:[%s20705_s3 + $0x10] sm:$0xff] }
 0x498   :  { %v3014_v1 = vmul.f32 %v19326_v9, %v2903_v42 }
 0x499   :  { %v19321_v40 = vadd.f32 %v3016_v29, %v2560_v51  ;;  %v2565_v20 = vadd.f32 %v2501_v17, %v2045_v56  ;;  %v12568_v51 = vld [vmem:[%s20705_s3 + $0x90] sm:$0xff]  ;;  %v12569_v29 = vld [vmem:[%s20705_s3 + $0x98] sm:$0xff]  ;;  %13637 = vmatprep.subr.bf16.mxu1 %v13636_v53 }
 0x49a   :  { %v2948_v28 = vpop.permute.xlu1 %2947  ;;  %v19329_v23 = vadd.f32 %v3014_v1, %v2558_v36  ;;  %v13664_v42 = vpack.c.bf16 %v12569_v29, %v12568_v51  ;;  %13639 = vmatpush3.bf16.msra.mxu1 %v13636_v53  ;;  %v7052_v17 = vld [vmem:[%s20705_s3 + $0x18] sm:$0xff] }
 0x49b   :  { %v3023_v60 = vmul.f32 %v19326_v9, %v2948_v28  ;;  %v2938_v24 = vpop.permute.xlu0 %2937  ;;  %v13640_v32 = vpack.c.bf16 %v7052_v17, %v7051_v45 }
 0x49c   :  { %21680 = vst [vmem:[#allocation52_spill] sm:$0xff] %v19329_v23  ;;  %v3021_v13 = vmul.f32 %v19326_v9, %v2938_v24 }
 0x49d   :  { %v19333_v54 = vadd.f32 %v3023_v60, %v2567_v58  ;;  %13641 = vmatprep.subr.bf16.mxu1 %v13640_v32  ;;  %v5095_v58 = vrot.slane %v19253_v6, %v21633_v22 }
 0x49e   :  { %v19335_v59 = vadd.f32 %v3021_v13, %v2565_v20  ;;  %v19337_v14 = vpop.permute.xlu1 %3913  ;;  %13643 = vmatpush3.bf16.msra.mxu1 %v13640_v32  ;;  %v21683_v20 = vld [vmem:[#allocation262_spill] sm:$0xff] }
 0x49f   :  { %v19339_v2 = vpop.permute.xlu0 %3903  ;;  %13826 = vmatprep.subr.bf16.mxu1 %v21683_v20  ;;  %v5103_v37 = vcombine.high %v5095_v58, %v5095_v58  ;;  %v21685_v32 = vld [vmem:[#allocation34_spill] sm:$0xff] }
 0x4a2   :  { %v3949_v25 = vpop.permute.xlu1 %3948 }
 0x4a3   :  { %v4056_v15 = vmul.f32 %v18784_v21, %v3949_v25  ;;  %v3939_v46 = vpop.permute.xlu0 %3938 }
 0x4a4   :  { %v4054_v31 = vmul.f32 %v18784_v21, %v3939_v46  ;;  %v12587_v46 = vld [vmem:[%s20705_s3 + $0xa8] sm:$0xff] }
 0x4a5   :  { %v19344_v5 = vadd.f32 %v4056_v15, %v19216_v48 }
 0x4a6   :  { %v19347_v52 = vadd.f32 %v4054_v31, %v19229_v0  ;;  %v19349_v11 = vpop.permute.xlu1 %2412  ;;  %v12566_v0 = vld [vmem:[%s20705_s3 + $0x80] sm:$0xff] }
 0x4a7   :  { %v19351_v7 = vpop.permute.xlu0 %2402  ;;  %v13660_v26 = vpack.c.bf16 %v12567_v38, %v12566_v0 }
 0x4a9   :  { %13661 = vmatprep.subr.bf16.mxu0 %v13660_v26 }
 0x4aa   :  { %v19359_v21 = vpop.permute.xlu1 %3413  ;;  %13663 = vmatpush3.bf16.msra.mxu0 %v13660_v26 }
 0x4ab   :  { %v19361_v48 = vpop.permute.xlu0 %3403  ;;  %13665 = vmatprep.subr.bf16.mxu0 %v13664_v42 }
 0x4ae   :  { %v3449_v36 = vpop.permute.xlu1 %3448  ;;  %13667 = vmatpush3.bf16.msra.mxu0 %v13664_v42 }
 0x4af   :  { %v3439_v1 = vpop.permute.xlu0 %3438  ;;  %v3540_v56 = vmul.f32 %v18758_v41, %v3449_v36  ;;  %v481_v36 = vmul.f32 %v21649_v57, %v21685_v32  ;;  %v21690_v32 = vld [vmem:[#allocation40_spill] sm:$0xff] }
 0x4b0   :  { %v3538_v28 = vmul.f32 %v18758_v41, %v3439_v1  ;;  %v12586_v41 = vld [vmem:[%s20705_s3 + $0xa0] sm:$0xff] }
 0x4b1   :  { %v19386_v60 = vadd.f32 %v3540_v56, %v19281_v39  ;;  %v5088_v39 = vcombine.high %v19253_v6, %v19253_v6  ;;  %v19402_v31 = vpack.c.bf16 %v12587_v46, %v12586_v41  ;;  %v12450_v6 = vrot.slane %v5103_v37, 9  ;;  %v19423_v56 = vld [vmem:[%s20703_s1 + $0x7] ss:$0 sm:$0xff] }
 0x4b2   :  { %v19389_v24 = vadd.f32 %v3538_v28, %v19298_v3  ;;  %v4449_v13 = vpop.permute.xlu1 %4448  ;;  %v4049_v28 = vmul.f32 %v19423_v56, %v19337_v14  ;;  %v21686_v41 = vld [vmem:[#allocation36_spill] sm:$0xff]  ;;  %v4047_v14 = vmul.f32 %v19423_v56, %v19339_v2 }
 0x4b3   :  { %21681 = vst [vmem:[#allocation139_spill] sm:$0xff] %v19386_v60  ;;  %v4572_v25 = vmul.f32 %v18818_v27, %v4449_v13  ;;  %v4439_v15 = vpop.permute.xlu0 %4438  ;;  %21684 = vst [vmem:[#allocation46_spill] sm:$0xff] %v19402_v31  ;;  %13669 = vmatprep.subr.bf16.mxu0 %v19402_v31  ;;  %v5102_v51 = vrot.slane %v5088_v39, %v21633_v22  ;;  %v5859_v17 = vmax.f32 %v5103_v37, %v12450_v6  ;;  %v19430_v13 = vld [vmem:[%s20703_s1 + $0x6] ss:$0 sm:$0xff] }
 0x4b4   :  { %21682 = vst [vmem:[#allocation140_spill] sm:$0xff] %v19389_v24  ;;  %v4570_v3 = vmul.f32 %v18818_v27, %v4439_v15  ;;  %v12449_v27 = vrot.slane %v5095_v58, 9  ;;  %v483_v46 = vmul.f32 %v21649_v57, %v21686_v41  ;;  %v21689_v57 = vld [vmem:[#allocation38_spill] sm:$0xff] }
 0x4b5   :  { %v4636_v19 = vadd.f32 %v4572_v25, %v19308_v44  ;;  %v5104_v45 = vcombine.high %v5102_v51, %v5102_v51  ;;  %v12451_v44 = vrot.slane %v5102_v51, 9 }
 0x4b6   :  { %v4634_v53 = vadd.f32 %v4570_v3, %v19316_v33  ;;  %v19406_v0 = vpop.permute.xlu1 %2432  ;;  %v5858_v1 = vmax.f32 %v5095_v58, %v12449_v27  ;;  %v21687_v58 = vld [vmem:[#allocation97_spill] sm:$0xff]  ;;  %v14110_v27 = vld [vmem:[%s20703_s1] ss:$0 sm:$0xff] }
 0x4b7   :  { %v19409_v38 = vpop.permute.xlu0 %2422  ;;  %v937_v39 = vmul.f32 %v21645_v62, %v21687_v58  ;;  %v12452_v3 = vrot.slane %v5104_v45, 9  ;;  %v5860_v37 = vmax.f32 %v5102_v51, %v12451_v44  ;;  %v487_v41 = vmul.f32 %v14110_v27, %v21690_v32  ;;  %v21691_v58 = vld [vmem:[#allocation99_spill] sm:$0xff]  ;;  %v21692_v44 = vld [vmem:[#allocation101_spill] sm:$0xff] }
 0x4b8   :  { %v19412_v26 = vmax.f32 %v4634_v53, %v4636_v19  ;;  %v6022_v19 = vadd.f32 %v21294_v35, %v5859_v17  ;;  %v939_v51 = vmul.f32 %v21645_v62, %v21691_v58  ;;  %v941_v17 = vmul.f32 %v21645_v62, %v21692_v44  ;;  %v14112_v62 = vld [vmem:[%s20703_s1 + $0x1] ss:$0 sm:$0xff] }
 0x4b9   :  { %v1001_v58 = vadd.f32 %v937_v39, %v481_v36  ;;  %v21695_v44 = vld [vmem:[#allocation103_spill] sm:$0xff]  ;;  %v5861_v31 = vmax.f32 %v5104_v45, %v12452_v3 }
 0x4ba   :  { %v19414_v29 = vpop.permute.xlu1 %3433  ;;  %v19475_v39 = vrot.slane %v19412_v26, %v21633_v22 }
 0x4bb   :  { %v19416_v42 = vpop.permute.xlu0 %3423 }
 0x4be   :  { %v3469_v33 = vpop.permute.xlu1 %3468 }
 0x4bf   :  { %v3544_v25 = vmul.f32 %v19430_v13, %v3469_v33  ;;  %v3459_v15 = vpop.permute.xlu0 %3458  ;;  %v485_v33 = vmul.f32 %v14110_v27, %v21689_v57  ;;  %v19461_v57 = vld [vmem:[%s20703_s1 + $0x8] ss:$0 sm:$0xff] }
 0x4c0   :  { %v3542_v6 = vmul.f32 %v19430_v13, %v3459_v15  ;;  %21694 = vst [vmem:[#allocation59_spill] sm:$0xff] %v19461_v57 }
 0x4c1   :  { %v19441_v53 = vadd.f32 %v3544_v25, %v19333_v54  ;;  %v6021_v54 = vadd.f32 %v21419_v34, %v5858_v1  ;;  %v4113_v25 = vadd.f32 %v4049_v28, %v19188_v47  ;;  %v943_v1 = vmul.f32 %v14112_v62, %v21695_v44  ;;  %v21697_v62 = vld [vmem:[#allocation163_spill] sm:$0xff] }
 0x4c2   :  { %v19456_v15 = vadd.f32 %v3542_v6, %v19335_v59  ;;  %v6023_v47 = vadd.f32 %v21299_v61, %v5860_v37  ;;  %v6150_v59 = vmax.f32 %v6022_v19, 0.0  ;;  %v4111_v28 = vadd.f32 %v4047_v14, %v19196_v18 }
 0x4c3   :  { %21688 = vst [vmem:[#allocation65_spill] sm:$0xff] %v19441_v53  ;;  %v4434_v2 = vpop.permute.xlu1 %4433  ;;  %v1005_v53 = vadd.f32 %v941_v17, %v485_v33  ;;  %v1459_v45 = vmul.f32 %v21654_v10, %v21697_v62  ;;  %v6149_v3 = vmax.f32 %v6021_v54, 0.0  ;;  %v6024_v14 = vadd.f32 %v21315_v63, %v5861_v31 }
 0x4c4   :  { %21693 = vst [vmem:[#allocation141_spill] sm:$0xff] %v19456_v15  ;;  %v4569_v27 = vmul.f32 %v19461_v57, %v4434_v2  ;;  %v4424_v32 = vpop.permute.xlu0 %4423  ;;  %v1003_v15 = vadd.f32 %v939_v51, %v483_v46  ;;  %v21696_v2 = vld [vmem:[#allocation161_spill] sm:$0xff]  ;;  %v6151_v46 = vmax.f32 %v6023_v47, 0.0  ;;  %v5122_v33 = vcombine.high %v19412_v26, %v19412_v26 }
 0x4c5   :  { %v4567_v20 = vmul.f32 %v19461_v57, %v4424_v32  ;;  %v1457_v36 = vmul.f32 %v21654_v10, %v21696_v2  ;;  %v1007_v17 = vadd.f32 %v943_v1, %v487_v41  ;;  %v5137_v31 = vcombine.high %v19475_v39, %v19475_v39 }
 0x4c6   :  { %v4633_v6 = vadd.f32 %v4569_v27, %v4113_v25  ;;  %v6728_v25 = vrot.slane %v6150_v59, %v16848_v16  ;;  %v19495_v26 = vadd.f32 %v1459_v45, %v1003_v15  ;;  %v6724_v41 = vrot.slane %v6149_v3, %v16848_v16  ;;  %v14113_v45 = vld [vmem:[%s20703_s1 + $0x2] ss:$0 sm:$0xff]  ;;  %v21700_v3 = vld [vmem:[#allocation167_spill] sm:$0xff] }
 0x4c7   :  { %v4469_v24 = vpop.permute.xlu1 %4468  ;;  %v4631_v37 = vadd.f32 %v4567_v20, %v4111_v28  ;;  %v19486_v44 = vadd.f32 %v1457_v36, %v1001_v58  ;;  %v21698_v20 = vld [vmem:[#allocation165_spill] sm:$0xff]  ;;  %v6152_v58 = vmax.f32 %v6024_v14, 0.0  ;;  %v6732_v28 = vrot.slane %v6151_v46, %v16848_v16 }
 0x4c8   :  { %v4576_v18 = vmul.f32 %v19461_v57, %v4469_v24  ;;  %v1461_v24 = vmul.f32 %v21654_v10, %v21698_v20  ;;  %v5136_v10 = vrot.slane %v5122_v33, %v21633_v22  ;;  %v6965_v2 = vsel %vm6881_vm3, %v6728_v25, %v6724_v41 }
 0x4c9   :  { %v4459_v19 = vpop.permute.xlu0 %4458  ;;  %v4673_v27 = vmax.f32 %v4631_v37, %v4633_v6  ;;  %v1463_v37 = vmul.f32 %v14113_v45, %v21700_v3 }
 0x4ca   :  { %v4574_v51 = vmul.f32 %v19461_v57, %v4459_v19  ;;  %v4640_v32 = vadd.f32 %v4576_v18, %v19344_v5  ;;  %v19505_v62 = vadd.f32 %v1461_v24, %v1005_v53  ;;  %v12458_v18 = vrot.slane %v5137_v31, 9 }
 0x4cb   :  { %v19493_v47 = vpop.permute.xlu1 %2932  ;;  %v5105_v1 = vcombine.high %v4673_v27, %v4673_v27  ;;  %v5112_v59 = vrot.slane %v4673_v27, %v21633_v22  ;;  %v6736_v53 = vrot.slane %v6152_v58, %v16848_v16  ;;  %v5138_v20 = vcombine.high %v5136_v10, %v5136_v10 }
 0x4cc   :  { %v4638_v54 = vadd.f32 %v4574_v51, %v19347_v52  ;;  %v12457_v24 = vrot.slane %v19475_v39, 9  ;;  %v12459_v3 = vrot.slane %v5136_v10, 9  ;;  %v5867_v60 = vmax.f32 %v5137_v31, %v12458_v18 }
 0x4cd   :  { %v19499_v5 = vpop.permute.xlu0 %2922  ;;  %v5119_v52 = vrot.slane %v5105_v1, %v21633_v22  ;;  %v5120_v36 = vcombine.high %v5112_v59, %v5112_v59  ;;  %v12453_v15 = vrot.slane %v5112_v59, 9 }
 0x4ce   :  { %21699 = vst [vmem:[#allocation142_spill] sm:$0xff] %v19499_v5  ;;  %v4676_v6 = vmax.f32 %v4638_v54, %v4640_v32  ;;  %v6966_v32 = vsel %vm6883_vm4, %v6732_v28, %v6965_v2 }
 0x4cf   :  { %v19514_v14 = vpop.permute.xlu1 %3933  ;;  %v5121_v46 = vcombine.high %v5119_v52, %v5119_v52  ;;  %v12454_v33 = vrot.slane %v5120_v36, 9  ;;  %v12455_v51 = vrot.slane %v5119_v52, 9  ;;  %v5862_v25 = vmax.f32 %v5112_v59, %v12453_v15 }
 0x4d0   :  { %v19512_v19 = vrot.slane %v4676_v6, %v21633_v22  ;;  %v5156_v5 = vcombine.high %v4676_v6, %v4676_v6  ;;  %v6967_v31 = vsel %vm6885_vm5, %v6736_v53, %v6966_v32  ;;  %v21701_v32 = vld [vmem:[#allocation226_spill] sm:$0xff] }
 0x4d1   :  { %v19516_v27 = vpop.permute.xlu0 %3923  ;;  %v12456_v54 = vrot.slane %v5121_v46, 9  ;;  %v5863_v41 = vmax.f32 %v5120_v36, %v12454_v33  ;;  %v5864_v1 = vmax.f32 %v5119_v52, %v12455_v51  ;;  %v6025_v45 = vadd.f32 %v21634_v43, %v5862_v25 }
 0x4d2   :  { %v5171_v59 = vcombine.high %v19512_v19, %v19512_v19  ;;  %v1527_v36 = vadd.f32 %v1463_v37, %v1007_v17  ;;  %v12460_v52 = vrot.slane %v5138_v20, 9  ;;  %v5866_v33 = vmax.f32 %v19475_v39, %v12457_v24 }
 0x4d3   :  { %v19524_v15 = vpop.permute.xlu1 %3968  ;;  %v5865_v23 = vmax.f32 %v5121_v46, %v12456_v54  ;;  %v6026_v58 = vadd.f32 %v21635_v30, %v5863_v41  ;;  %v6027_v28 = vadd.f32 %v21636_v12, %v5864_v1  ;;  %v6153_v2 = vmax.f32 %v6025_v45, 0.0 }
 0x4d4   :  { %v5868_v46 = vmax.f32 %v5136_v10, %v12459_v3  ;;  %v6030_v54 = vadd.f32 %v21294_v35, %v5867_v60  ;;  %v5170_v41 = vrot.slane %v5156_v5, %v21633_v22  ;;  %v12466_v1 = vrot.slane %v5171_v59, 9  ;;  %v21702_v10 = vld [vmem:[#allocation228_spill] sm:$0xff]  ;;  %v21703_v3 = vld [vmem:[#allocation230_spill] sm:$0xff] }
 0x4d5   :  { %v19528_v57 = vpop.permute.xlu0 %3958  ;;  %v6028_v6 = vadd.f32 %v21637_v8, %v5865_v23  ;;  %v6154_v18 = vmax.f32 %v6026_v58, 0.0  ;;  %v6155_v51 = vmax.f32 %v6027_v28, 0.0  ;;  %v6740_v25 = vrot.slane %v6153_v2, %v16848_v16 }
 0x4d6   :  { %v1978_v24 = vmul.f32 %v19274_v50, %v21701_v32  ;;  %v1980_v60 = vmul.f32 %v19274_v50, %v21702_v10  ;;  %v1982_v5 = vmul.f32 %v19274_v50, %v21703_v3  ;;  %v6029_v58 = vadd.f32 %v21419_v34, %v5866_v33  ;;  %v21704_v10 = vld [vmem:[#allocation232_spill] sm:$0xff] }
 0x4d7   :  { %v19536_v45 = vpop.permute.xlu1 %2952  ;;  %v6156_v17 = vmax.f32 %v6028_v6, 0.0  ;;  %v6744_v37 = vrot.slane %v6154_v18, %v16848_v16  ;;  %v6748_v39 = vrot.slane %v6155_v51, %v16848_v16  ;;  %v6968_v53 = vsel %vm6887_vm6, %v6740_v25, %v6967_v31 }
 0x4d8   :  { %v5869_v28 = vmax.f32 %v5138_v20, %v12460_v52  ;;  %v12465_v31 = vrot.slane %v19512_v19, 9  ;;  %v6031_v18 = vadd.f32 %v21299_v61, %v5868_v46  ;;  %v5172_v25 = vcombine.high %v5170_v41, %v5170_v41 }
 0x4d9   :  { %v19541_v23 = vpop.permute.xlu0 %2942  ;;  %v6752_v2 = vrot.slane %v6156_v17, %v16848_v16  ;;  %v6969_v6 = vsel %vm6889_vm7, %v6744_v37, %v6968_v53  ;;  %v12467_v32 = vrot.slane %v5170_v41, 9  ;;  %v1984_v3 = vmul.f32 %v19274_v50, %v21704_v10 }
 0x4da   :  { %v6970_v51 = vsel %vm6891_vm8, %v6748_v39, %v6969_v6  ;;  %v6158_v12 = vmax.f32 %v6030_v54, 0.0  ;;  %v5875_v52 = vmax.f32 %v5171_v59, %v12466_v1  ;;  %v2042_v17 = vadd.f32 %v1978_v24, %v19486_v44 }
 0x4db   :  { %v19555_v8 = vpop.permute.xlu1 %3953  ;;  %v6971_v20 = vsel %vm6893_vm9, %v6752_v2, %v6970_v51  ;;  %v2044_v37 = vadd.f32 %v1980_v60, %v19495_v26  ;;  %v2500_v46 = vmul.f32 %v19294_v49, %v19349_v11  ;;  %v2498_v39 = vmul.f32 %v19294_v49, %v19351_v7 }
 0x4dc   :  { %7028 = vst.msk [vmem:[#allocation2 + $0xe1] sm:$0xff] %vm6189_vm0, %v6971_v20  ;;  %v2046_v50 = vadd.f32 %v1982_v5, %v19505_v62  ;;  %v6032_v54 = vadd.f32 %v21315_v63, %v5869_v28  ;;  %v6157_v53 = vmax.f32 %v6029_v58, 0.0  ;;  %v5874_v59 = vmax.f32 %v19512_v19, %v12465_v31 }
 0x4dd   :  { %v19560_v33 = vpop.permute.xlu0 %3943  ;;  %v3533_v44 = vmul.f32 %v19430_v13, %v19359_v21  ;;  %v6159_v1 = vmax.f32 %v6031_v18, 0.0  ;;  %v12468_v26 = vrot.slane %v5172_v25, 9  ;;  %v5876_v24 = vmax.f32 %v5170_v41, %v12467_v32 }
 0x4de   :  { %v2048_v11 = vadd.f32 %v1984_v3, %v1527_v36  ;;  %v3531_v7 = vmul.f32 %v19430_v13, %v19361_v48  ;;  %v6760_v2 = vrot.slane %v6158_v12, %v16848_v16  ;;  %v6038_v62 = vadd.f32 %v21294_v35, %v5875_v52 }
 0x4df   :  { %v19574_v60 = vpop.permute.xlu1 %3988  ;;  %v2564_v58 = vadd.f32 %v2500_v46, %v2044_v37  ;;  %v19582_v19 = vadd.f32 %v2498_v39, %v2042_v17  ;;  %v2504_v21 = vmul.f32 %v19294_v49, %v19406_v0  ;;  %v2502_v41 = vmul.f32 %v19294_v49, %v19409_v38 }
 0x4e0   :  { %v6160_v28 = vmax.f32 %v6032_v54, 0.0  ;;  %v6756_v36 = vrot.slane %v6157_v53, %v16848_v16  ;;  %v3537_v48 = vmul.f32 %v19430_v13, %v19414_v29  ;;  %v6037_v12 = vadd.f32 %v21419_v34, %v5874_v59 }
 0x4e1   :  { %v19580_v5 = vpop.permute.xlu0 %3978  ;;  %v3597_v6 = vadd.f32 %v3533_v44, %v19258_v4  ;;  %v6764_v31 = vrot.slane %v6159_v1, %v16848_v16  ;;  %v5877_v18 = vmax.f32 %v5172_v25, %v12468_v26  ;;  %v6039_v51 = vadd.f32 %v21299_v61, %v5876_v24  ;;  %v21705_v1 = vld [vmem:[#allocation59_spill] sm:$0xff] }
 0x4e2   :  { %v3595_v0 = vadd.f32 %v3531_v7, %v19264_v55  ;;  %v6972_v49 = vsel %vm6881_vm3, %v6760_v2, %v6756_v36  ;;  %v6166_v38 = vmax.f32 %v6038_v62, 0.0  ;;  %v4053_v10 = vmul.f32 %v19423_v56, %v19514_v14  ;;  %v21707_v62 = vld [vmem:[#allocation142_spill] sm:$0xff] }
 0x4e3   :  { %v19595_v32 = vpop.permute.xlu1 %3453  ;;  %v19601_v29 = vld [vmem:[#allocation2 + $0xe1] sm:$0xff]  ;;  %v2568_v20 = vadd.f32 %v2504_v21, %v2048_v11  ;;  %v3535_v25 = vmul.f32 %v19430_v13, %v19416_v42  ;;  %v4051_v52 = vmul.f32 %v19423_v56, %v19516_v27  ;;  %v6768_v55 = vrot.slane %v6160_v28, %v16848_v16 }
 0x4e4   :  { %v19603_v3 = vld [vmem:[#allocation2 + $0xe0] sm:$0xff]  ;;  %13141 = vmatprep.mubr.msk.f32.mxu1 %vm6189_vm0, %v19601_v29  ;;  %v2566_v14 = vadd.f32 %v2502_v41, %v2046_v50  ;;  %v3601_v17 = vadd.f32 %v3537_v48, %v19321_v40  ;;  %v6165_v37 = vmax.f32 %v6037_v12, 0.0  ;;  %v6973_v46 = vsel %vm6883_vm4, %v6764_v31, %v6972_v49 }
 0x4e5   :  { %v19605_v4 = vpop.permute.xlu0 %3443  ;;  %13235 = vmatmul.mubr.msk.f32.gmra.mrb[10].mxu0 %vm6189_vm0, %v19603_v3  ;;  %v6040_v39 = vadd.f32 %v21315_v63, %v5877_v18  ;;  %v6167_v42 = vmax.f32 %v6039_v51, 0.0  ;;  %v3020_v27 = vmul.f32 %v19326_v9, %v19493_v47  ;;  %v6792_v53 = vrot.slane %v6166_v38, %v16848_v16  ;;  %v21706_v40 = vld [vmem:[#allocation52_spill] sm:$0xff]  ;;  %v21708_v31 = vld [vmem:[#allocation139_spill] sm:$0xff] }
 0x4e6   :  { %v4117_v59 = vadd.f32 %v4053_v10, %v3597_v6  ;;  %v4060_v44 = vmul.f32 %v19423_v56, %v19524_v15  ;;  %v3599_v24 = vadd.f32 %v3535_v25, %v21706_v40  ;;  %v4115_v11 = vadd.f32 %v4051_v52, %v3595_v0  ;;  %v21709_v38 = vld [vmem:[#allocation140_spill] sm:$0xff] }
 0x4e7   :  { %v4454_v54 = vpop.permute.xlu1 %4453  ;;  %v4058_v7 = vmul.f32 %v19423_v56, %v19528_v57  ;;  %v6788_v47 = vrot.slane %v6165_v37, %v16848_v16  ;;  %v3018_v21 = vmul.f32 %v19326_v9, %v21707_v62  ;;  %v19633_v28 = vsel %vm6885_vm5, %v6768_v55, %v6973_v46 }
 0x4e8   :  { %v4573_v50 = vmul.f32 %v21705_v1, %v4454_v54  ;;  %v6168_v15 = vmax.f32 %v6040_v39, 0.0  ;;  %v6796_v36 = vrot.slane %v6167_v42, %v16848_v16  ;;  %v19636_v48 = vadd.f32 %v3020_v27, %v2564_v58 }
 0x4e9   :  { %v4444_v26 = vpop.permute.xlu0 %4443  ;;  %v6979_v57 = vsel %vm6881_vm3, %v6792_v53, %v6788_v47  ;;  %v4124_v18 = vadd.f32 %v4060_v44, %v21708_v31  ;;  %v3024_v51 = vmul.f32 %v19326_v9, %v19536_v45  ;;  %v4122_v10 = vadd.f32 %v4058_v7, %v21709_v38  ;;  %v21710_v7 = vld [vmem:[#allocation65_spill] sm:$0xff] }
 0x4ea   :  { %v4571_v2 = vmul.f32 %v21705_v1, %v4444_v26  ;;  %v4637_v41 = vadd.f32 %v4573_v50, %v4117_v59  ;;  %v3022_v25 = vmul.f32 %v19326_v9, %v19541_v23  ;;  %v4057_v55 = vmul.f32 %v19423_v56, %v19555_v8 }
 0x4eb   :  { %v4489_v6 = vpop.permute.xlu1 %4488  ;;  %v4055_v37 = vmul.f32 %v19423_v56, %v19560_v33  ;;  %v4064_v45 = vmul.f32 %v19423_v56, %v19574_v60  ;;  %v19654_v39 = vadd.f32 %v3018_v21, %v19582_v19  ;;  %v19660_v54 = vrot.slane %v6168_v15, %v16848_v16  ;;  %v21711_v15 = vld [vmem:[#allocation141_spill] sm:$0xff] }
 0x4ec   :  { %v4635_v12 = vadd.f32 %v4571_v2, %v4115_v11  ;;  %v4580_v0 = vmul.f32 %v21705_v1, %v4489_v6  ;;  %v19663_v8 = vsel %vm6883_vm4, %v6796_v36, %v6979_v57  ;;  %v19665_v33 = vadd.f32 %v3024_v51, %v2568_v20 }
 0x4ed   :  { %v4479_v49 = vpop.permute.xlu0 %4478  ;;  %v4062_v60 = vmul.f32 %v19423_v56, %v19580_v5  ;;  %v19670_v26 = vadd.f32 %v3022_v25, %v2566_v14  ;;  %v4121_v40 = vadd.f32 %v4057_v55, %v3601_v17  ;;  %v4119_v11 = vadd.f32 %v4055_v37, %v3599_v24  ;;  %v21712_v25 = vld [vmem:[#allocation252_spill] sm:$0xff] }
 0x4ee   :  { %v4675_v52 = vmax.f32 %v4635_v12, %v4637_v41  ;;  %v4578_v58 = vmul.f32 %v21705_v1, %v4479_v49  ;;  %v4644_v46 = vadd.f32 %v4580_v0, %v4124_v18  ;;  %v4128_v2 = vadd.f32 %v4064_v45, %v21710_v7 }
 0x4ef   :  { %v19657_v23 = vpop.permute.xlu1 %3473  ;;  %v19674_v36 = vadd.f32 %v4062_v60, %v21711_v15  ;;  %v3541_v5 = vmul.f32 %v19430_v13, %v19595_v32 }
 0x4f0   :  { %v5139_v42 = vcombine.high %v4675_v52, %v4675_v52  ;;  %v5146_v27 = vrot.slane %v4675_v52, %v21633_v22  ;;  %v4642_v9 = vadd.f32 %v4578_v58, %v4122_v10 }
 0x4f1   :  { %v3464_v53 = vpop.permute.xlu0 %3463 }
 0x4f2   :  { %v5153_v19 = vrot.slane %v5139_v42, %v21633_v22  ;;  %v5154_v59 = vcombine.high %v5146_v27, %v5146_v27  ;;  %v12461_v44 = vrot.slane %v5146_v27, 9  ;;  %v4678_v50 = vmax.f32 %v4642_v9, %v4644_v46 }
 0x4f3   :  { %v4474_v41 = vpop.permute.xlu1 %4473 }
 0x4f4   :  { %v5155_v47 = vcombine.high %v5153_v19, %v5153_v19  ;;  %v12462_v62 = vrot.slane %v5154_v59, 9  ;;  %v12463_v21 = vrot.slane %v5153_v19, 9  ;;  %v5870_v20 = vmax.f32 %v5146_v27, %v12461_v44  ;;  %v21713_v27 = vld [vmem:[#allocation11_spill] sm:$0xff] }
 0x4f5   :  { %v5190_v12 = vcombine.high %v4678_v50, %v4678_v50  ;;  %v5197_v6 = vrot.slane %v4678_v50, %v21633_v22  ;;  %v4464_v14 = vpop.permute.xlu0 %4463  ;;  %v4577_v49 = vmul.f32 %v21705_v1, %v4474_v41 }
 0x4f6   :  { %v12464_v57 = vrot.slane %v5155_v47, 9  ;;  %v5871_v17 = vmax.f32 %v5154_v59, %v12462_v62  ;;  %v5872_v24 = vmax.f32 %v5153_v19, %v12463_v21  ;;  %v6033_v31 = vadd.f32 %v21634_v43, %v5870_v20 }
 0x4f7   :  { %v5204_v18 = vrot.slane %v5190_v12, %v21633_v22  ;;  %v5205_v51 = vcombine.high %v5197_v6, %v5197_v6  ;;  %v12473_v0 = vrot.slane %v5197_v6, 9  ;;  %v4509_v58 = vpop.permute.xlu1 %4508 }
 0x4f8   :  { %v5873_v38 = vmax.f32 %v5155_v47, %v12464_v57  ;;  %v6034_v10 = vadd.f32 %v21635_v30, %v5871_v17  ;;  %v6035_v32 = vadd.f32 %v21712_v25, %v5872_v24  ;;  %v6161_v52 = vmax.f32 %v6033_v31, 0.0 }
 0x4f9   :  { %v5206_v55 = vcombine.high %v5204_v18, %v5204_v18  ;;  %v12474_v37 = vrot.slane %v5205_v51, 9  ;;  %v12475_v45 = vrot.slane %v5204_v18, 9  ;;  %v5882_v46 = vmax.f32 %v5197_v6, %v12473_v0  ;;  %v4499_v42 = vpop.permute.xlu0 %4498 }
 0x4fa   :  { %v6036_v9 = vadd.f32 %v21713_v27, %v5873_v38  ;;  %v6162_v60 = vmax.f32 %v6034_v10, 0.0  ;;  %v6163_v19 = vmax.f32 %v6035_v32, 0.0  ;;  %v6772_v59 = vrot.slane %v6161_v52, %v16848_v16 }
 0x4fb   :  { %v12476_v44 = vrot.slane %v5206_v55, 9  ;;  %v5883_v50 = vmax.f32 %v5205_v51, %v12474_v37  ;;  %v5884_v7 = vmax.f32 %v5204_v18, %v12475_v45  ;;  %v6045_v47 = vadd.f32 %v21419_v34, %v5882_v46  ;;  %v3974_v15 = vpop.permute.xlu1 %3973 }
 0x4fc   :  { %v6164_v62 = vmax.f32 %v6036_v9, 0.0  ;;  %v6776_v21 = vrot.slane %v6162_v60, %v16848_v16  ;;  %v6780_v20 = vrot.slane %v6163_v19, %v16848_v16  ;;  %v6975_v41 = vsel %vm6887_vm6, %v6772_v59, %v19633_v28 }
 0x4fd   :  { %v5885_v12 = vmax.f32 %v5206_v55, %v12476_v44  ;;  %v6046_v6 = vadd.f32 %v21294_v35, %v5883_v50  ;;  %v6047_v57 = vadd.f32 %v21299_v61, %v5884_v7  ;;  %v4641_v17 = vadd.f32 %v4577_v49, %v4121_v40  ;;  %v3964_v0 = vpop.permute.xlu0 %3963 }
 0x4fe   :  { %v6784_v24 = vrot.slane %v6164_v62, %v16848_v16  ;;  %v6976_v31 = vsel %vm6889_vm7, %v6776_v21, %v6975_v41  ;;  %v4575_v18 = vmul.f32 %v21705_v1, %v4464_v14  ;;  %v4584_v51 = vmul.f32 %v21705_v1, %v4509_v58 }
 0x4ff   :  { %v3539_v38 = vmul.f32 %v19430_v13, %v19605_v4  ;;  %v6977_v28 = vsel %vm6891_vm8, %v6780_v20, %v6976_v31  ;;  %v3545_v10 = vmul.f32 %v19430_v13, %v19657_v23  ;;  %v3543_v32 = vmul.f32 %v19430_v13, %v3464_v53  ;;  %v3994_v53 = vpop.permute.xlu1 %3993 }
 0x500   :  { %v6978_v40 = vsel %vm6893_vm9, %v6784_v24, %v6977_v28  ;;  %v19705_v49 = vadd.f32 %v21315_v63, %v5885_v12  ;;  %v6173_v52 = vmax.f32 %v6045_v47, 0.0  ;;  %v4639_v14 = vadd.f32 %v4575_v18, %v4119_v11 }
 0x501   :  { %7029 = vst.msk [vmem:[#allocation2 + $0xf1] sm:$0xff] %vm6189_vm0, %v6978_v40  ;;  %v6174_v58 = vmax.f32 %v6046_v6, 0.0  ;;  %v6175_v55 = vmax.f32 %v6047_v57, 0.0  ;;  %v4648_v37 = vadd.f32 %v4584_v51, %v4128_v2  ;;  %v4582_v4 = vmul.f32 %v21705_v1, %v4499_v42 }
 0x502   :  { %v3605_v45 = vadd.f32 %v3541_v5, %v19636_v48  ;;  %v19713_v13 = vsel %vm6885_vm5, %v19660_v54, %v19663_v8  ;;  %v4677_v23 = vmax.f32 %v4639_v14, %v4641_v17  ;;  %v3603_v46 = vadd.f32 %v3539_v38, %v19654_v39  ;;  %v3984_v8 = vpop.permute.xlu0 %3983 }
 0x503   :  { %v19717_v11 = vadd.f32 %v3545_v10, %v19665_v33  ;;  %v19720_v9 = vadd.f32 %v3543_v32, %v19670_v26  ;;  %v4646_v2 = vadd.f32 %v4582_v4, %v19674_v36  ;;  %v6176_v42 = vmax.f32 %v19705_v49, 0.0  ;;  %v4494_v6 = vpop.permute.xlu1 %4493 }
 0x504   :  { %v6820_v48 = vrot.slane %v6173_v52, %v16848_v16  ;;  %v5173_v5 = vcombine.high %v4677_v23, %v4677_v23  ;;  %v5180_v54 = vrot.slane %v4677_v23, %v21633_v22  ;;  %v6824_v60 = vrot.slane %v6174_v58, %v16848_v16 }
 0x505   :  { %v19728_v39 = vrot.slane %v6175_v55, %v16848_v16  ;;  %v4680_v33 = vmax.f32 %v4646_v2, %v4648_v37  ;;  %v4061_v19 = vmul.f32 %v19423_v56, %v3974_v15  ;;  %v4059_v44 = vmul.f32 %v19423_v56, %v3964_v0 }
 0x506   :  { %v5187_v26 = vrot.slane %v5173_v5, %v21633_v22  ;;  %v5188_v59 = vcombine.high %v5180_v54, %v5180_v54  ;;  %v12469_v36 = vrot.slane %v5180_v54, 9  ;;  %v4065_v47 = vmul.f32 %v19423_v56, %v3994_v53  ;;  %v4484_v28 = vpop.permute.xlu0 %4483 }
 0x507   :  { %v5224_v50 = vcombine.high %v4680_v33, %v4680_v33  ;;  %v5231_v7 = vrot.slane %v4680_v33, %v21633_v22  ;;  %v4063_v62 = vmul.f32 %v19423_v56, %v3984_v8  ;;  %v4125_v18 = vadd.f32 %v4061_v19, %v3605_v45 }
 0x508   :  { %v5189_v21 = vcombine.high %v5187_v26, %v5187_v26  ;;  %v12470_v20 = vrot.slane %v5188_v59, 9  ;;  %v12471_v41 = vrot.slane %v5187_v26, 9  ;;  %v5878_v12 = vmax.f32 %v5180_v54, %v12469_v36  ;;  %v19736_v57 = vld [vmem:[#allocation2 + $0xf1] sm:$0xff]  ;;  %v4514_v36 = vpop.permute.xlu1 %4513 }
 0x509   :  { %v19738_v15 = vld [vmem:[#allocation2 + $0xf0] sm:$0xff]  ;;  %v5238_v17 = vrot.slane %v5224_v50, %v21633_v22  ;;  %v5239_v24 = vcombine.high %v5231_v7, %v5231_v7  ;;  %v12481_v31 = vrot.slane %v5231_v7, 9  ;;  %13142 = vmatmul.mubr.msk.f32.gmra.mrb[12].mxu1 %vm6189_vm0, %v19736_v57  ;;  %v4581_v52 = vmul.f32 %v21705_v1, %v4494_v6 }
 0x50a   :  { %13237 = vmatprep.mubr.msk.f32.mxu0 %vm6189_vm0, %v19738_v15  ;;  %v12472_v56 = vrot.slane %v5189_v21, 9  ;;  %v5879_v51 = vmax.f32 %v5188_v59, %v12470_v20  ;;  %v5880_v0 = vmax.f32 %v5187_v26, %v12471_v41  ;;  %v6041_v38 = vadd.f32 %v21634_v43, %v5878_v12 }
 0x50b   :  { %v5240_v10 = vcombine.high %v5238_v17, %v5238_v17  ;;  %v12482_v32 = vrot.slane %v5239_v24, 9  ;;  %v12483_v40 = vrot.slane %v5238_v17, 9  ;;  %v5890_v45 = vmax.f32 %v5231_v7, %v12481_v31 }
 0x50c   :  { %v5881_v14 = vmax.f32 %v5189_v21, %v12472_v56  ;;  %v6042_v58 = vadd.f32 %v21635_v30, %v5879_v51  ;;  %v6043_v55 = vadd.f32 %v21712_v25, %v5880_v0  ;;  %v6169_v37 = vmax.f32 %v6041_v38, 0.0 }
 0x50d   :  { %v12484_v4 = vrot.slane %v5240_v10, 9  ;;  %v5891_v23 = vmax.f32 %v5239_v24, %v12482_v32  ;;  %v4579_v53 = vmul.f32 %v21705_v1, %v4484_v28  ;;  %v5892_v33 = vmax.f32 %v5238_v17, %v12483_v40  ;;  %v4504_v24 = vpop.permute.xlu0 %4503 }
 0x50e   :  { %v6044_v2 = vadd.f32 %v21713_v27, %v5881_v14  ;;  %v6170_v5 = vmax.f32 %v6042_v58, 0.0  ;;  %v6171_v54 = vmax.f32 %v6043_v55, 0.0  ;;  %v6804_v8 = vrot.slane %v6169_v37, %v16848_v16 }
 0x50f   :  { %v5893_v19 = vmax.f32 %v5240_v10, %v12484_v4  ;;  %v4123_v26 = vadd.f32 %v4059_v44, %v3603_v46  ;;  %v4645_v59 = vadd.f32 %v4581_v52, %v4125_v18  ;;  %v6986_v41 = vsel %vm6881_vm3, %v6824_v60, %v6820_v48 }
 0x510   :  { %v6172_v50 = vmax.f32 %v6044_v2, 0.0  ;;  %v6808_v21 = vrot.slane %v6170_v5, %v16848_v16  ;;  %v6812_v20 = vrot.slane %v6171_v54, %v16848_v16  ;;  %v6982_v7 = vsel %vm6887_vm6, %v6804_v8, %v19713_v13 }
 0x511   :  { %v6053_v12 = vadd.f32 %v21419_v34, %v5890_v45  ;;  %v6054_v6 = vadd.f32 %v21294_v35, %v5891_v23  ;;  %v4129_v17 = vadd.f32 %v4065_v47, %v19717_v11  ;;  %v4643_v31 = vadd.f32 %v4579_v53, %v4123_v26 }
 0x512   :  { %v6816_v46 = vrot.slane %v6172_v50, %v16848_v16  ;;  %v6983_v44 = vsel %vm6889_vm7, %v6808_v21, %v6982_v7  ;;  %v4585_v18 = vmul.f32 %v21705_v1, %v4514_v36  ;;  %v6055_v13 = vadd.f32 %v21299_v61, %v5892_v33 }
 0x513   :  { %v6984_v56 = vsel %vm6891_vm8, %v6812_v20, %v6983_v44  ;;  %v6056_v48 = vadd.f32 %v21315_v63, %v5893_v19  ;;  %v4127_v34 = vadd.f32 %v4063_v62, %v19720_v9  ;;  %v4679_v60 = vmax.f32 %v4643_v31, %v4645_v59 }
 0x514   :  { %v6985_v35 = vsel %vm6893_vm9, %v6816_v46, %v6984_v56  ;;  %v4649_v11 = vadd.f32 %v4585_v18, %v4129_v17  ;;  %v4583_v47 = vmul.f32 %v21705_v1, %v4504_v24  ;;  %v6832_v51 = vrot.slane %v6176_v42, %v16848_v16 }
 0x515   :  { %7030 = vst.msk [vmem:[#allocation2 + $0x101] sm:$0xff] %vm6189_vm0, %v6985_v35  ;;  %v6181_v0 = vmax.f32 %v6053_v12, 0.0  ;;  %v6182_v38 = vmax.f32 %v6054_v6, 0.0  ;;  %v6987_v61 = vsel %vm6883_vm4, %v19728_v39, %v6986_v41  ;;  %v5207_v63 = vcombine.high %v4679_v60, %v4679_v60 }
 0x516   :  { %v5214_v9 = vrot.slane %v4679_v60, %v21633_v22  ;;  %v4647_v62 = vadd.f32 %v4583_v47, %v4127_v34  ;;  %v6183_v28 = vmax.f32 %v6055_v13, 0.0  ;;  %v6184_v10 = vmax.f32 %v6056_v48, 0.0 }
 0x517   :  { %v5221_v32 = vrot.slane %v5207_v63, %v21633_v22  ;;  %v6852_v49 = vrot.slane %v6181_v0, %v16848_v16  ;;  %v6856_v42 = vrot.slane %v6182_v38, %v16848_v16  ;;  %v6988_v14 = vsel %vm6885_vm5, %v6832_v51, %v6987_v61 }
 0x518   :  { %v5222_v1 = vcombine.high %v5214_v9, %v5214_v9  ;;  %v12477_v40 = vrot.slane %v5214_v9, 9  ;;  %v4681_v52 = vmax.f32 %v4647_v62, %v4649_v11  ;;  %v6860_v4 = vrot.slane %v6183_v28, %v16848_v16 }
 0x519   :  { %v5223_v58 = vcombine.high %v5221_v32, %v5221_v32  ;;  %v12479_v39 = vrot.slane %v5221_v32, 9  ;;  %v6864_v45 = vrot.slane %v6184_v10, %v16848_v16  ;;  %v6993_v26 = vsel %vm6881_vm3, %v6856_v42, %v6852_v49 }
 0x51a   :  { %v12478_v55 = vrot.slane %v5222_v1, 9  ;;  %v5886_v37 = vmax.f32 %v5214_v9, %v12477_v40  ;;  %v5241_v23 = vcombine.high %v4681_v52, %v4681_v52  ;;  %v5248_v53 = vrot.slane %v4681_v52, %v21633_v22 }
 0x51b   :  { %v12480_v2 = vrot.slane %v5223_v58, 9  ;;  %v5888_v54 = vmax.f32 %v5221_v32, %v12479_v39  ;;  %v6994_v63 = vsel %vm6883_vm4, %v6860_v4, %v6993_v26  ;;  %v7033_v39 = vld [vmem:[#allocation2] sm:$0xff]  ;;  %v19847_v26 = vld [vmem:[#allocation2 + $0x30] sm:$0xff] }
 0x51c   :  { %v5887_v5 = vmax.f32 %v5222_v1, %v12478_v55  ;;  %v6049_v8 = vadd.f32 %v21634_v43, %v5886_v37  ;;  %v19784_v33 = vld [vmem:[#allocation2 + $0x101] sm:$0xff]  ;;  %v5255_v59 = vrot.slane %v5241_v23, %v21633_v22  ;;  %v5256_v36 = vcombine.high %v5248_v53, %v5248_v53 }
 0x51d   :  { %v19786_v19 = vld [vmem:[#allocation2 + $0x100] sm:$0xff]  ;;  %v12485_v50 = vrot.slane %v5248_v53, 9  ;;  %13144 = vmatprep.mubr.msk.f32.mxu1 %vm6189_vm0, %v19784_v33  ;;  %v5889_v21 = vmax.f32 %v5223_v58, %v12480_v2  ;;  %v6051_v7 = vadd.f32 %v21712_v25, %v5888_v54  ;;  %v12588_v2 = vld [vmem:[%s20705_s3 + $0xb0] sm:$0xff] }
 0x51e   :  { %13238 = vmatmul.mubr.msk.f32.gmra.mrb[12].mxu0 %vm6189_vm0, %v19786_v19  ;;  %v6050_v20 = vadd.f32 %v21635_v30, %v5887_v5  ;;  %v6177_v41 = vmax.f32 %v6049_v8, 0.0  ;;  %v5257_v12 = vcombine.high %v5255_v59, %v5255_v59  ;;  %v12486_v6 = vrot.slane %v5256_v36, 9  ;;  %v19830_v23 = vld [vmem:[#allocation2 + $0x20] sm:$0xff]  ;;  %v12589_v5 = vld [vmem:[%s20705_s3 + $0xb8] sm:$0xff] }
 0x51f   :  { %v12487_v17 = vrot.slane %v5255_v59, 9  ;;  %v5894_v24 = vmax.f32 %v5248_v53, %v12485_v50  ;;  %v6052_v46 = vadd.f32 %v21713_v27, %v5889_v21  ;;  %v6179_v31 = vmax.f32 %v6051_v7, 0.0  ;;  %v7920_v54 = vld [vmem:[#allocation2 + $0x11] sm:$0xff]  ;;  %v19854_v21 = vld [vmem:[#allocation2 + $0x40] sm:$0xff]  ;;  %v12607_v7 = vld [vmem:[%s20705_s3 + $0xc8] sm:$0xff] }
 0x520   :  { %v6178_v44 = vmax.f32 %v6050_v20, 0.0  ;;  %v6836_v18 = vrot.slane %v6177_v41, %v16848_v16  ;;  %v12488_v56 = vrot.slane %v5257_v12, 9  ;;  %v5895_v13 = vmax.f32 %v5256_v36, %v12486_v6  ;;  %v21714_v8 = vld [vmem:[#allocation262_spill] sm:$0xff]  ;;  %v21715_v50 = vld [vmem:[#allocation265_spill] sm:$0xff]  ;;  %v12606_v20 = vld [vmem:[%s20705_s3 + $0xc0] sm:$0xff] }
 0x521   :  { %v5896_v48 = vmax.f32 %v5255_v59, %v12487_v17  ;;  %v6057_v34 = vadd.f32 %v21634_v43, %v5894_v24  ;;  %v6180_v35 = vmax.f32 %v6052_v46, 0.0  ;;  %v6844_v11 = vrot.slane %v6179_v31, %v16848_v16  ;;  %v19849_v59 = vld [vmem:[#allocation2 + $0x21] sm:$0xff]  ;;  %v19866_v41 = vld [vmem:[#allocation2 + $0x31] sm:$0xff] }
 0x522   :  { %v6840_v60 = vrot.slane %v6178_v44, %v16848_v16  ;;  %v6989_v47 = vsel %vm6887_vm6, %v6836_v18, %v6988_v14  ;;  %v5897_v51 = vmax.f32 %v5257_v12, %v12488_v56  ;;  %v6058_v0 = vadd.f32 %v21635_v30, %v5895_v13  ;;  %v21716_v12 = vld [vmem:[#allocation46_spill] sm:$0xff]  ;;  %v19876_v24 = vld [vmem:[#allocation2 + $0x41] sm:$0xff] }
 0x523   :  { %v6059_v38 = vadd.f32 %v21712_v25, %v5896_v48  ;;  %v6185_v61 = vmax.f32 %v6057_v34, 0.0  ;;  %v6848_v9 = vrot.slane %v6180_v35, %v16848_v16  ;;  %v6995_v30 = vsel %vm6885_vm5, %v6864_v45, %v6994_v63  ;;  %v7034_v45 = vld [vmem:[#allocation2 + $0x10] sm:$0xff]  ;;  %v19878_v46 = vld [vmem:[#allocation2 + $0x60] sm:$0xff] }
 0x524   :  { %v6990_v62 = vsel %vm6889_vm7, %v6840_v60, %v6989_v47  ;;  %v6060_v28 = vadd.f32 %v21713_v27, %v5897_v51  ;;  %v6186_v10 = vmax.f32 %v6058_v0, 0.0  ;;  %v13672_v36 = vpack.c.bf16 %v12589_v5, %v12588_v2  ;;  %v19871_v6 = vld [vmem:[#allocation2 + $0x50] sm:$0xff]  ;;  %v7041_v31 = vld [vmem:[#allocation2 + $0xa0] sm:$0xff]  ;;  %v12629_v5 = vld [vmem:[%s20705_s3 + $0xf8] sm:$0xff] }
 0x525   :  { %v6991_v43 = vsel %vm6891_vm8, %v6844_v11, %v6990_v62  ;;  %v6187_v32 = vmax.f32 %v6059_v38, 0.0  ;;  %v6868_v40 = vrot.slane %v6185_v61, %v16848_v16  ;;  %v13676_v17 = vpack.c.bf16 %v12607_v7, %v12606_v20  ;;  %v19884_v44 = vld [vmem:[#allocation2 + $0x51] sm:$0xff]  ;;  %v19892_v56 = vld [vmem:[#allocation2 + $0x61] sm:$0xff] }
 0x526   :  { %v6992_v1 = vsel %vm6893_vm9, %v6848_v9, %v6991_v43  ;;  %v6188_v25 = vmax.f32 %v6060_v28, 0.0  ;;  %v6872_v52 = vrot.slane %v6186_v10, %v16848_v16  ;;  %v19888_v18 = vld [vmem:[#allocation2 + $0x70] sm:$0xff]  ;;  %v19902_v34 = vld [vmem:[#allocation2 + $0x81] sm:$0xff]  ;;  %v12609_v62 = vld [vmem:[%s20705_s3 + $0xd8] sm:$0xff] }
 0x527   :  { %7031 = vst.msk [vmem:[#allocation2 + $0x111] sm:$0xff] %vm6189_vm0, %v6992_v1  ;;  %v6876_v49 = vrot.slane %v6187_v32, %v16848_v16  ;;  %v6996_v42 = vsel %vm6887_vm6, %v6868_v40, %v6995_v30  ;;  %v19896_v13 = vld [vmem:[#allocation2 + $0x71] sm:$0xff]  ;;  %v19904_v35 = vld [vmem:[#allocation2 + $0xc0] sm:$0xff]  ;;  %v12627_v40 = vld [vmem:[%s20705_s3 + $0xe8] sm:$0xff] }
 0x528   :  { %v6880_v14 = vrot.slane %v6188_v25, %v16848_v16  ;;  %v6997_v27 = vsel %vm6889_vm7, %v6872_v52, %v6996_v42  ;;  %v7042_v48 = vld [vmem:[#allocation2 + $0xb0] sm:$0xff]  ;;  %v19915_v47 = vld [vmem:[#allocation2 + $0xc1] sm:$0xff] }
 0x529   :  { %v6998_v58 = vsel %vm6891_vm8, %v6876_v49, %v6997_v27  ;;  %v7928_v60 = vld [vmem:[#allocation2 + $0xb1] sm:$0xff]  ;;  %v19935_v0 = vld [vmem:[#allocation2 + $0xe2] sm:$0xff] }
 0x52a   :  { %v6999_v55 = vsel %vm6893_vm9, %v6880_v14, %v6998_v58  ;;  %v19911_v11 = vld [vmem:[#allocation2 + $0xd0] sm:$0xff]  ;;  %v19952_v9 = vld [vmem:[#allocation2 + $0x102] sm:$0xff] }
 0x52b   :  { %7032 = vst.msk [vmem:[#allocation2 + $0x121] sm:$0xff] %vm6189_vm0, %v6999_v55  ;;  %v19921_v51 = vld [vmem:[#allocation2 + $0xd1] sm:$0xff]  ;;  %v19966_v32 = vld [vmem:[#allocation2 + $0x22] sm:$0xff] }
 0x52c   :  { %v19943_v38 = vld [vmem:[#allocation2 + $0xf2] sm:$0xff]  ;;  %v12626_v1 = vld [vmem:[%s20705_s3 + $0xe0] sm:$0xff] }
 0x52d   :  { %v12608_v61 = vld [vmem:[%s20705_s3 + $0xd0] sm:$0xff]  ;;  %v13684_v25 = vpack.c.bf16 %v12627_v40, %v12626_v1  ;;  %v19980_v52 = vld [vmem:[#allocation2 + $0x42] sm:$0xff] }
 0x52e   :  { %v19821_v37 = vld [vmem:[#allocation2 + $0x111] sm:$0xff]  ;;  %v13680_v10 = vpack.c.bf16 %v12609_v62, %v12608_v61  ;;  %v19988_v42 = vld [vmem:[#allocation2 + $0x62] sm:$0xff] }
 0x52f   :  { %v19823_v4 = vld [vmem:[#allocation2 + $0x110] sm:$0xff]  ;;  %13145 = vmatmul.mubr.msk.f32.gmra.mrb[14].mxu1 %vm6189_vm0, %v19821_v37  ;;  %v19996_v27 = vld [vmem:[#allocation2 + $0x82] sm:$0xff] }
 0x530   :  { %13240 = vmatprep.mubr.msk.f32.mxu0 %vm6189_vm0, %v19823_v4  ;;  %13155 = vmatprep.mubr.msk.f32.mxu1 %vm6189_vm0, %v7033_v39  ;;  %v8150_v43 = vld [vmem:[#allocation2 + $0x12] sm:$0xff]  ;;  %v20001_v55 = vld [vmem:[#allocation2 + $0xc2] sm:$0xff] }
 0x531   :  { %v19962_v28 = vld [vmem:[#allocation2 + $0x112] sm:$0xff] }
 0x532   :  { %v19833_v53 = vld [vmem:[#allocation2 + $0x120] sm:$0xff]  ;;  %v19976_v30 = vld [vmem:[#allocation2 + $0x32] sm:$0xff] }
 0x533   :  { %13156 = vmatmul.mubr.msk.f32.vlgmr.msra.gmra.mrb[0].mxu1 %vm6189_vm0, %v7034_v45  ;;  %13241 = vmatmul.mubr.msk.f32.gmra.mrb[14].mxu0 %vm6189_vm0, %v19833_v53  ;;  %v19950_v63 = vld [vmem:[#allocation2 + $0x121] sm:$0xff]  ;;  %v19984_v49 = vld [vmem:[#allocation2 + $0x52] sm:$0xff] }
 0x534   :  { %13158 = vmatprep.mubr.msk.f32.mxu1 %vm6189_vm0, %v19830_v23  ;;  %13251 = vmatprep.mubr.msk.f32.mxu0 %vm6189_vm0, %v7920_v54  ;;  %v19992_v14 = vld [vmem:[#allocation2 + $0x72] sm:$0xff]  ;;  %v20017_v45 = vld [vmem:[#allocation2 + $0x122] sm:$0xff] }
 0x535   :  { %13828 = vmatpush3.bf16.msra.mxu1 %v21714_v8  ;;  %v8158_v58 = vld [vmem:[#allocation2 + $0xb2] sm:$0xff]  ;;  %v12646_v8 = vld [vmem:[%s20705_s3 + $0x100] sm:$0xff] }
 0x536   :  { %13827 = vmatprep.subr.bf16.mxu1 %v21715_v50  ;;  %v20005_v39 = vld [vmem:[#allocation2 + $0xd2] sm:$0xff] }
 0x537   :  { %13159 = vmatmul.mubr.msk.f32.gmra.mrb[2].mxu1 %vm6189_vm0, %v19847_v26  ;;  %13252 = vmatmul.mubr.msk.f32.vlgmr.msra.gmra.mrb[0].mxu0 %vm6189_vm0, %v19849_v59  ;;  %v12628_v2 = vld [vmem:[%s20705_s3 + $0xf0] sm:$0xff] }
 0x538   :  { %13161 = vmatprep.mubr.msk.f32.mxu1 %vm6189_vm0, %v19854_v21  ;;  %13671 = vmatpush3.bf16.msra.mxu0 %v21716_v12  ;;  %v13688_v54 = vpack.c.bf16 %v12629_v5, %v12628_v2  ;;  %v12648_v20 = vld [vmem:[%s20705_s3 + $0x110] sm:$0xff]  ;;  %v9710_v2 = vld [vmem:[%s20707_s5 + $0x18] sm:$0xff] }
 0x539   :  { %13254 = vmatprep.mubr.msk.f32.mxu0 %vm6189_vm0, %v19866_v41  ;;  %13673 = vmatprep.subr.bf16.mxu0 %v13672_v36 }
 0x53a   :  { %13829 = vmatpush3.bf16.msra.mxu1 %v21715_v50 }
 0x53b   :  { %13162 = vmatmul.mubr.msk.f32.gmra.mrb[4].mxu1 %vm6189_vm0, %v19871_v6  ;;  %13255 = vmatmul.mubr.msk.f32.gmra.mrb[2].mxu0 %vm6189_vm0, %v19876_v24 }
 0x53c   :  { %13164 = vmatprep.mubr.msk.f32.mxu1 %vm6189_vm0, %v19878_v46  ;;  %13257 = vmatprep.mubr.msk.f32.mxu0 %vm6189_vm0, %v19884_v44 }
 0x53d   :  { %13675 = vmatpush3.bf16.msra.mxu0 %v13672_v36  ;;  %v12647_v36 = vld [vmem:[%s20705_s3 + $0x108] sm:$0xff] }
 0x53e   :  { %13677 = vmatprep.subr.bf16.mxu0 %v13676_v17  ;;  %v13692_v50 = vpack.c.bf16 %v12647_v36, %v12646_v8 }
 0x53f   :  { %13165 = vmatmul.mubr.msk.f32.gmra.mrb[6].mxu1 %vm6189_vm0, %v19888_v18  ;;  %13258 = vmatmul.mubr.msk.f32.gmra.mrb[4].mxu0 %vm6189_vm0, %v19892_v56 }
 0x540   :  { %13167 = vmatprep.mubr.msk.f32.mxu1 %vm6189_vm0, %v7041_v31  ;;  %13260 = vmatprep.mubr.msk.f32.mxu0 %vm6189_vm0, %v19896_v13  ;;  %v21717_v31 = vmov 0.0  }
 0x541   :  { %10913 = vst.msk [vmem:[#allocation4] sm:$0xf] %vm9690_vm10, %v21717_v31  ;;  %10914 = vst.msk [vmem:[#allocation4 + $0x10] sm:$0xf] %vm9690_vm10, %v21717_v31 }
 0x542   :  { %10916 = vst.msk [vmem:[#allocation4 + $0xc] sm:$0xf] %vm9690_vm10, %v21717_v31  ;;  %10917 = vst.msk [vmem:[#allocation4 + $0x1c] sm:$0xf] %vm9690_vm10, %v21717_v31 }
 0x543   :  { %13168 = vmatmul.mubr.msk.f32.gmra.mrb[8].mxu1 %vm6189_vm0, %v7042_v48  ;;  %13261 = vmatmul.mubr.msk.f32.gmra.mrb[6].mxu0 %vm6189_vm0, %v19902_v34  ;;  %10918 = vst.msk [vmem:[#allocation4] sm:$0x1] %vm6200_vm2, %v21717_v31  ;;  %10921 = vst.msk [vmem:[#allocation4 + $0xc] sm:$0x1] %vm6200_vm2, %v21717_v31 }
 0x544   :  { %13170 = vmatprep.mubr.msk.f32.mxu1 %vm6189_vm0, %v19904_v35  ;;  %13263 = vmatprep.mubr.msk.f32.mxu0 %vm6189_vm0, %v7928_v60  ;;  %10922 = vst.msk [vmem:[#allocation4 + $0x10] sm:$0x1] %vm6200_vm2, %v21717_v31  ;;  %10925 = vst.msk [vmem:[#allocation4 + $0x1c] sm:$0x1] %vm6200_vm2, %v21717_v31 }
 0x545   :  { %10926 = vst.msk [vmem:[#allocation4 + $0x3] sm:$0x1] %vm6200_vm2, %v21717_v31  ;;  %10929 = vst.msk [vmem:[#allocation4 + $0xf] sm:$0x1] %vm6200_vm2, %v21717_v31 }
 0x546   :  { %10930 = vst.msk [vmem:[#allocation4 + $0x13] sm:$0x1] %vm6200_vm2, %v21717_v31  ;;  %10933 = vst.msk [vmem:[#allocation4 + $0x1f] sm:$0x1] %vm6200_vm2, %v21717_v31 }
 0x547   :  { %13171 = vmatmul.mubr.msk.f32.gmra.mrb[10].mxu1 %vm6189_vm0, %v19911_v11  ;;  %13264 = vmatmul.mubr.msk.f32.gmra.mrb[8].mxu0 %vm6189_vm0, %v19915_v47  ;;  %9468 = vst.msk [vmem:[#allocation3] sm:$0x3f] %vm9467_vm11, %v21717_v31  ;;  %9471 = vst.msk [vmem:[#allocation3 + $0x28] sm:$0x3f] %vm9467_vm11, %v21717_v31 }
 0x548   :  { %13173 = vmatprep.mubr.msk.f32.mxu1 %vm6189_vm0, %v19603_v3  ;;  %13266 = vmatprep.mubr.msk.f32.mxu0 %vm6189_vm0, %v19921_v51  ;;  %9469 = vst.msk [vmem:[#allocation3 + $0x30] sm:$0x3f] %vm9467_vm11, %v21717_v31  ;;  %9472 = vst.msk [vmem:[#allocation3 + $0x58] sm:$0x3f] %vm9467_vm11, %v21717_v31 }
 0x549   :  { %9473 = vst.msk [vmem:[#allocation3] sm:$0x1] %vm6200_vm2, %v21717_v31  ;;  %9478 = vst.msk [vmem:[#allocation3 + $0x28] sm:$0x1] %vm6200_vm2, %v21717_v31 }
 0x54a   :  { %9485 = vst.msk [vmem:[#allocation3 + $0x5] sm:$0x1] %vm6200_vm2, %v21717_v31  ;;  %9490 = vst.msk [vmem:[#allocation3 + $0x2d] sm:$0x1] %vm6200_vm2, %v21717_v31 }
 0x54b   :  { %13174 = vmatmul.mubr.msk.f32.gmra.mrb[12].mxu1 %vm6189_vm0, %v19738_v15  ;;  %13267 = vmatmul.mubr.msk.f32.gmra.mrb[10].mxu0 %vm6189_vm0, %v19601_v29  ;;  %9479 = vst.msk [vmem:[#allocation3 + $0x30] sm:$0x1] %vm6200_vm2, %v21717_v31  ;;  %9484 = vst.msk [vmem:[#allocation3 + $0x58] sm:$0x1] %vm6200_vm2, %v21717_v31 }
 0x54c   :  { %13176 = vmatprep.mubr.msk.f32.mxu1 %vm6189_vm0, %v19786_v19  ;;  %13269 = vmatprep.mubr.msk.f32.mxu0 %vm6189_vm0, %v19736_v57  ;;  %9491 = vst.msk [vmem:[#allocation3 + $0x35] sm:$0x1] %vm6200_vm2, %v21717_v31  ;;  %9496 = vst.msk [vmem:[#allocation3 + $0x5d] sm:$0x1] %vm6200_vm2, %v21717_v31 }
 0x54f   :  { %13177 = vmatmul.mubr.msk.f32.gmra.mrb[14].mxu1 %vm6189_vm0, %v19823_v4  ;;  %13270 = vmatmul.mubr.msk.f32.gmra.mrb[12].mxu0 %vm6189_vm0, %v19784_v33 }
 0x550   :  { %13205 = vmatprep.mubr.msk.f32.mxu1 %vm6189_vm0, %v19935_v0  ;;  %13272 = vmatprep.mubr.msk.f32.mxu0 %vm6189_vm0, %v19821_v37 }
 0x553   :  { %13206 = vmatmul.mubr.msk.f32.vlgmr.msra.gmra.mrb[12].mxu1 %vm6189_vm0, %v19943_v38  ;;  %13273 = vmatmul.mubr.msk.f32.gmra.mrb[14].mxu0 %vm6189_vm0, %v19950_v63 }
 0x554   :  { %13208 = vmatprep.mubr.msk.f32.mxu1 %vm6189_vm0, %v19952_v9  ;;  %13283 = vmatprep.mubr.msk.f32.mxu0 %vm6189_vm0, %v8150_v43 }
 0x557   :  { %13209 = vmatmul.mubr.msk.f32.gmra.mrb[14].mxu1 %vm6189_vm0, %v19962_v28  ;;  %13284 = vmatmul.mubr.msk.f32.vlgmr.msra.gmra.mrb[0].mxu0 %vm6189_vm0, %v19966_v32 }
 0x558   :  { %13679 = vmatpush3.bf16.msra.mxu0 %v13676_v17  ;;  %13286 = vmatprep.mubr.msk.f32.mxu0 %vm6189_vm0, %v19976_v30 }
 0x559   :  { %13681 = vmatprep.subr.bf16.mxu0 %v13680_v10 }
 0x55b   :  { %13287 = vmatmul.mubr.msk.f32.gmra.mrb[2].mxu0 %vm6189_vm0, %v19980_v52 }
 0x55c   :  { %13289 = vmatprep.mubr.msk.f32.mxu0 %vm6189_vm0, %v19984_v49  ;;  %13683 = vmatpush3.bf16.msra.mxu0 %v13680_v10 }
 0x55d   :  { %13685 = vmatprep.subr.bf16.mxu0 %v13684_v25 }
 0x55f   :  { %13290 = vmatmul.mubr.msk.f32.gmra.mrb[4].mxu0 %vm6189_vm0, %v19988_v42 }
 0x560   :  { %13292 = vmatprep.mubr.msk.f32.mxu0 %vm6189_vm0, %v19992_v14 }
 0x563   :  { %13293 = vmatmul.mubr.msk.f32.gmra.mrb[6].mxu0 %vm6189_vm0, %v19996_v27 }
 0x564   :  { %13295 = vmatprep.mubr.msk.f32.mxu0 %vm6189_vm0, %v8158_v58 }
 0x567   :  { %13296 = vmatmul.mubr.msk.f32.gmra.mrb[8].mxu0 %vm6189_vm0, %v20001_v55 }
 0x568   :  { %13298 = vmatprep.mubr.msk.f32.mxu0 %vm6189_vm0, %v20005_v39 }
 0x56b   :  { %13299 = vmatmul.mubr.msk.f32.gmra.mrb[10].mxu0 %vm6189_vm0, %v19935_v0 }
 0x56c   :  { %13301 = vmatprep.mubr.msk.f32.mxu0 %vm6189_vm0, %v19943_v38 }
 0x56f   :  { %13302 = vmatmul.mubr.msk.f32.gmra.mrb[12].mxu0 %vm6189_vm0, %v19952_v9 }
 0x570   :  { %13304 = vmatprep.mubr.msk.f32.mxu0 %vm6189_vm0, %v19962_v28 }
 0x573   :  { %13305 = vmatmul.mubr.msk.f32.gmra.mrb[14].mxu0 %vm6189_vm0, %v20017_v45 }
 0x574   :  { %13315 = vmatprep.mubr.msk.f32.mxu0 %vm6189_vm0, %v19830_v23  ;;  %v8387_v23 = vld [vmem:[#allocation2 + $0x80] sm:$0xff] }
 0x577   :  { %13316 = vmatmul.mubr.msk.f32.vlgmr.msra.gmra.mrb[0].mxu0 %vm6189_vm0, %v19847_v26  ;;  %v8388_v26 = vld [vmem:[#allocation2 + $0x90] sm:$0xff] }
 0x578   :  { %13687 = vmatpush3.bf16.msra.mxu0 %v13684_v25  ;;  %13318 = vmatprep.mubr.msk.f32.mxu0 %vm6189_vm0, %v19854_v21  ;;  %v8396_v21 = vld [vmem:[#allocation2 + $0x130] sm:$0xff] }
 0x579   :  { %13689 = vmatprep.subr.bf16.mxu0 %v13688_v54 }
 0x57b   :  { %13319 = vmatmul.mubr.msk.f32.gmra.mrb[2].mxu0 %vm6189_vm0, %v19871_v6 }
 0x57c   :  { %13321 = vmatprep.mubr.msk.f32.mxu0 %vm6189_vm0, %v19878_v46  ;;  %13691 = vmatpush3.bf16.msra.mxu0 %v13688_v54 }
 0x57d   :  { %13693 = vmatprep.subr.bf16.mxu0 %v13692_v50 }
 0x57f   :  { %13322 = vmatmul.mubr.msk.f32.gmra.mrb[4].mxu0 %vm6189_vm0, %v19888_v18 }
 0x580   :  { %13324 = vmatprep.mubr.msk.f32.mxu0 %vm6189_vm0, %v8387_v23 }
 0x583   :  { %13325 = vmatmul.mubr.msk.f32.gmra.mrb[6].mxu0 %vm6189_vm0, %v8388_v26 }
 0x584   :  { %13327 = vmatprep.mubr.msk.f32.mxu0 %vm6189_vm0, %v19904_v35  ;;  %v12700_v35 = vld [vmem:[%s20707_s5 + $0x28] sm:$0xff] }
 0x587   :  { %13328 = vmatmul.mubr.msk.f32.gmra.mrb[8].mxu0 %vm6189_vm0, %v19911_v11  ;;  %v12701_v11 = vld [vmem:[%s20707_s5 + $0x30] sm:$0xff] }
 0x588   :  { %13330 = vmatprep.mubr.msk.f32.mxu0 %vm6189_vm0, %v19603_v3  ;;  %v12649_v3 = vld [vmem:[%s20705_s3 + $0x118] sm:$0xff] }
 0x58b   :  { %13331 = vmatmul.mubr.msk.f32.gmra.mrb[10].mxu0 %vm6189_vm0, %v19738_v15  ;;  %v13696_v15 = vpack.c.bf16 %v12649_v3, %v12648_v20 }
 0x58c   :  { %13333 = vmatprep.mubr.msk.f32.mxu0 %vm6189_vm0, %v19786_v19  ;;  %v8618_v19 = vld [vmem:[#allocation2 + $0x91] sm:$0xff] }
 0x58f   :  { %13334 = vmatmul.mubr.msk.f32.gmra.mrb[12].mxu0 %vm6189_vm0, %v19823_v4  ;;  %v8626_v4 = vld [vmem:[#allocation2 + $0x131] sm:$0xff] }
 0x590   :  { %13336 = vmatprep.mubr.msk.f32.mxu0 %vm6189_vm0, %v19833_v53 }
 0x593   :  { %13337 = vmatmul.mubr.msk.f32.gmra.mrb[14].mxu0 %vm6189_vm0, %v8396_v21 }
 0x594   :  { %13347 = vmatprep.mubr.msk.f32.mxu0 %vm6189_vm0, %v19849_v59 }
 0x597   :  { %13348 = vmatmul.mubr.msk.f32.vlgmr.msra.gmra.mrb[0].mxu0 %vm6189_vm0, %v19866_v41 }
 0x598   :  { %13695 = vmatpush3.bf16.msra.mxu0 %v13692_v50  ;;  %13350 = vmatprep.mubr.msk.f32.mxu0 %vm6189_vm0, %v19876_v24 }
 0x599   :  { %13697 = vmatprep.subr.bf16.mxu0 %v13696_v15 }
 0x59b   :  { %13351 = vmatmul.mubr.msk.f32.gmra.mrb[2].mxu0 %vm6189_vm0, %v19884_v44 }
 0x59c   :  { %13353 = vmatprep.mubr.msk.f32.mxu0 %vm6189_vm0, %v19892_v56  ;;  %13699 = vmatpush3.bf16.msra.mxu0 %v13696_v15 }
 0x59f   :  { %13354 = vmatmul.mubr.msk.f32.gmra.mrb[4].mxu0 %vm6189_vm0, %v19896_v13 }
 0x5a0   :  { %13356 = vmatprep.mubr.msk.f32.mxu0 %vm6189_vm0, %v19902_v34  ;;  %v12699_v34 = vld [vmem:[%s20707_s5 + $0x20] sm:$0xff] }
 0x5a1   :  { %v13700_v60 = vpack.c.bf16 %v12700_v35, %v12699_v34 }
 0x5a3   :  { %13357 = vmatmul.mubr.msk.f32.gmra.mrb[6].mxu0 %vm6189_vm0, %v8618_v19  ;;  %13701 = vmatprep.subr.bf16.mxu1 %v13700_v60 }
 0x5a4   :  { %13359 = vmatprep.mubr.msk.f32.mxu0 %vm6189_vm0, %v19915_v47  ;;  %13703 = vmatpush3.bf16.msra.mxu1 %v13700_v60  ;;  %v12702_v47 = vld [vmem:[%s20707_s5 + $0x38] sm:$0xff] }
 0x5a7   :  { %13360 = vmatmul.mubr.msk.f32.gmra.mrb[8].mxu0 %vm6189_vm0, %v19921_v51  ;;  %v13704_v51 = vpack.c.bf16 %v12702_v47, %v12701_v11 }
 0x5a8   :  { %13362 = vmatprep.mubr.msk.f32.mxu0 %vm6189_vm0, %v19601_v29  ;;  %v8848_v29 = vld [vmem:[#allocation2 + $0x92] sm:$0xff] }
 0x5a9   :  { %13705 = vmatprep.subr.bf16.mxu1 %v13704_v51 }
 0x5aa   :  { %13707 = vmatpush3.bf16.msra.mxu1 %v13704_v51 }
 0x5ab   :  { %13363 = vmatmul.mubr.msk.f32.gmra.mrb[10].mxu0 %vm6189_vm0, %v19736_v57  ;;  %v8856_v57 = vld [vmem:[#allocation2 + $0x132] sm:$0xff] }
 0x5ac   :  { %13365 = vmatprep.mubr.msk.f32.mxu0 %vm6189_vm0, %v19784_v33 }
 0x5af   :  { %13366 = vmatmul.mubr.msk.f32.gmra.mrb[12].mxu0 %vm6189_vm0, %v19821_v37 }
 0x5b0   :  { %13368 = vmatprep.mubr.msk.f32.mxu0 %vm6189_vm0, %v19950_v63  ;;  %v12698_v63 = vld [vmem:[%s20706_s4] ss:$0 sm:$0xff]  ;;  %s11949_s4 = sshll.u32 %s14161_s11, 4  ;;  %s11950_s4 = int_to_ptr.vmem [resolvable:$true] %s11949_s4 }
 0x5b1   :  { %s14132_s12 = scalar_lea.vmem %s11950_s4, 32  ;;  %p14137_p1 = scmp.lt.s32.totalorder %s11950_s4, %s11950_s4 }
 0x5b2   :  { %p14133_p0 = scmp.ne.s32.totalorder %s11950_s4, %s14132_s12  ;;  %p14138_p2 = scmp.lt.s32.totalorder %s14132_s12, %s14132_s12 }
 0x5b3   :  { %13369 = vmatmul.mubr.msk.f32.gmra.mrb[14].mxu0 %vm6189_vm0, %v8626_v4 }
 0x5b4   :  { %13379 = vmatprep.mubr.msk.f32.mxu0 %vm6189_vm0, %v19966_v32  ;;  %p14139_p3 = por %p14138_p2, %p14137_p1 }
 0x5b6   :  { %p14140_p4 = pnand %p14139_p3, %p14133_p0 }
 0x5b7   :  { %13380 = vmatmul.mubr.msk.f32.vlgmr.msra.gmra.mrb[0].mxu0 %vm6189_vm0, %v19976_v30 }
 0x5b8   :  { %13382 = vmatprep.mubr.msk.f32.mxu0 %vm6189_vm0, %v19980_v52 }
 0x5bb   :  { %13383 = vmatmul.mubr.msk.f32.gmra.mrb[2].mxu0 %vm6189_vm0, %v19984_v49 }
 0x5bc   :  { %13385 = vmatprep.mubr.msk.f32.mxu0 %vm6189_vm0, %v19988_v42 }
 0x5bf   :  { %13386 = vmatmul.mubr.msk.f32.gmra.mrb[4].mxu0 %vm6189_vm0, %v19992_v14 }
 0x5c0   :  { %13388 = vmatprep.mubr.msk.f32.mxu0 %vm6189_vm0, %v19996_v27 }
 0x5c3   :  { %13389 = vmatmul.mubr.msk.f32.gmra.mrb[6].mxu0 %vm6189_vm0, %v8848_v29 }
 0x5c4   :  { %13391 = vmatprep.mubr.msk.f32.mxu0 %vm6189_vm0, %v20001_v55 }
 0x5c7   :  { %13392 = vmatmul.mubr.msk.f32.gmra.mrb[8].mxu0 %vm6189_vm0, %v20005_v39 }
 0x5c8   :  { %13394 = vmatprep.mubr.msk.f32.mxu0 %vm6189_vm0, %v19935_v0  ;;  %v9707_v0 = vld [vmem:[%s20707_s5] sm:$0xff] }
 0x5cb   :  { %13395 = vmatmul.mubr.msk.f32.gmra.mrb[10].mxu0 %vm6189_vm0, %v19943_v38  ;;  %v9708_v38 = vld [vmem:[%s20707_s5 + $0x8] sm:$0xff] }
 0x5cc   :  { %13397 = vmatprep.mubr.msk.f32.mxu0 %vm6189_vm0, %v19952_v9  ;;  %v20218_v61 = vpack.c.bf16 %v9708_v38, %v9707_v0 }
 0x5ce   :  { %13709 = vmatprep.subr.bf16.mxu1 %v20218_v61 }
 0x5cf   :  { %13398 = vmatmul.mubr.msk.f32.gmra.mrb[12].mxu0 %vm6189_vm0, %v19962_v28  ;;  %v20225_v28 = vrot.slane %v12698_v63, %v21633_v22 }
 0x5d0   :  { %13400 = vmatprep.mubr.msk.f32.mxu0 %vm6189_vm0, %v20017_v45  ;;  %v9709_v45 = vld [vmem:[%s20707_s5 + $0x10] sm:$0xff] }
 0x5d1   :  { %v20229_v40 = vcombine.high %v20225_v28, %v20225_v28  ;;  %v20242_v5 = vrot.slane %v20225_v28, 1  ;;  %v20250_v19 = vpack.c.bf16 %v9710_v2, %v9709_v45 }
 0x5d3   :  { %13401 = vmatmul.mubr.msk.f32.gmra.mrb[14].mxu0 %vm6189_vm0, %v8856_v57  ;;  %v20245_v54 = vrot.slane %v20229_v40, 1 }
 0x606   :  { %v13157_v33 = vpop.f32.mrb[0].mxu1 }
 0x607   :  { %v7381_v37 = vpop.f32.mrb[1].mxu1 }
 0x60a   :  { %v20128_v53 = vpop.f32.mrb[2].mxu1 }
 0x60b   :  { %v20130_v59 = vpop.f32.mrb[3].mxu1 }
 0x60e   :  { %v20132_v7 = vpop.f32.mrb[4].mxu1 }
 0x60f   :  { %v20134_v41 = vpop.f32.mrb[5].mxu1 }
 0x612   :  { %v20136_v12 = vpop.f32.mrb[6].mxu1 }
 0x613   :  { %v20138_v6 = vpop.f32.mrb[7].mxu1 }
 0x616   :  { %v20140_v17 = vpop.f32.mrb[8].mxu1 }
 0x617   :  { %v20142_v24 = vpop.f32.mrb[9].mxu1 }
 0x61a   :  { %v20144_v46 = vpop.f32.mrb[10].mxu1 }
 0x61b   :  { %v20146_v44 = vpop.f32.mrb[11].mxu1 }
 0x626   :  { %v20172_v18 = vpop.f32.mrb[12].mxu1 }
 0x627   :  { %v20174_v56 = vpop.f32.mrb[13].mxu1 }
 0x62a   :  { %v20176_v13 = vpop.f32.mrb[14].mxu1 }
 0x62b   :  { %v20178_v48 = vpop.f32.mrb[15].mxu1 }
 0x68a   :  { %v13381_v9 = vpop.f32.mrb[0].mxu0 }
 0x68b   :  { %v13830_v62 = vadd.f32 %v13381_v9, %v13157_v33  ;;  %v8976_v43 = vpop.f32.mrb[1].mxu0 }
 0x68c   :  { %v13831_v10 = vadd.f32 %v8976_v43, %v7381_v37 }
 0x68e   :  { %v9071_v32 = vmax.f32 %v13831_v10, %v13830_v62  ;;  %v13384_v1 = vpop.f32.mrb[2].mxu0 }
 0x68f   :  { %v13832_v30 = vadd.f32 %v13384_v1, %v20128_v53  ;;  %v8986_v25 = vpop.f32.mrb[3].mxu0 }
 0x690   :  { %v9087_v52 = vcombine.high %v9071_v32, %v9071_v32  ;;  %v9094_v49 = vrot.slane %v9071_v32, %v21633_v22  ;;  %v13833_v42 = vadd.f32 %v8986_v25, %v20130_v59 }
 0x692   :  { %v9101_v14 = vrot.slane %v9087_v52, %v21633_v22  ;;  %v9102_v27 = vcombine.high %v9094_v49, %v9094_v49  ;;  %v12666_v58 = vrot.slane %v9094_v49, 9  ;;  %v9072_v55 = vmax.f32 %v13833_v42, %v13832_v30  ;;  %v13387_v39 = vpop.f32.mrb[4].mxu0 }
 0x693   :  { %v13834_v8 = vadd.f32 %v13387_v39, %v20132_v7  ;;  %v8996_v36 = vpop.f32.mrb[5].mxu0 }
 0x694   :  { %v9103_v50 = vcombine.high %v9101_v14, %v9101_v14  ;;  %v12667_v23 = vrot.slane %v9102_v27, 9  ;;  %v12668_v26 = vrot.slane %v9101_v14, 9  ;;  %v9351_v21 = vmax.f32 %v9094_v49, %v12666_v58 }
 0x695   :  { %v9104_v20 = vcombine.high %v9072_v55, %v9072_v55  ;;  %v9111_v3 = vrot.slane %v9072_v55, %v21633_v22  ;;  %v13835_v15 = vadd.f32 %v8996_v36, %v20134_v41 }
 0x696   :  { %v12669_v4 = vrot.slane %v9103_v50, 9  ;;  %v9352_v29 = vmax.f32 %v9102_v27, %v12667_v23  ;;  %v9353_v57 = vmax.f32 %v9101_v14, %v12668_v26  ;;  %v9403_v33 = vadd.f32 %v20225_v28, %v9351_v21  ;;  %v13390_v37 = vpop.f32.mrb[6].mxu0 }
 0x697   :  { %v9118_v53 = vrot.slane %v9104_v20, %v21633_v22  ;;  %v9119_v59 = vcombine.high %v9111_v3, %v9111_v3  ;;  %v12670_v7 = vrot.slane %v9111_v3, 9  ;;  %v9073_v34 = vmax.f32 %v13835_v15, %v13834_v8  ;;  %v9006_v35 = vpop.f32.mrb[7].mxu0 }
 0x698   :  { %v9354_v60 = vmax.f32 %v9103_v50, %v12669_v4  ;;  %v9404_v11 = vadd.f32 %v20242_v5, %v9352_v29  ;;  %v9405_v47 = vadd.f32 %v20229_v40, %v9353_v57  ;;  %v9435_v41 = vmax.f32 %v9403_v33, 0.0 }
 0x699   :  { %v9120_v51 = vcombine.high %v9118_v53, %v9118_v53  ;;  %v12671_v0 = vrot.slane %v9119_v59, 9  ;;  %v12672_v38 = vrot.slane %v9118_v53, 9  ;;  %v9355_v63 = vmax.f32 %v9111_v3, %v12670_v7 }
 0x69a   :  { %v9406_v9 = vadd.f32 %v20245_v54, %v9354_v60  ;;  %v9436_v62 = vmax.f32 %v9404_v11, 0.0  ;;  %v9437_v43 = vmax.f32 %v9405_v47, 0.0  ;;  %v9532_v10 = vrot.slane %v9435_v41, %v16848_v16  ;;  %v13393_v32 = vpop.f32.mrb[8].mxu0 }
 0x69b   :  { %v12673_v1 = vrot.slane %v9120_v51, 9  ;;  %v9356_v30 = vmax.f32 %v9119_v59, %v12671_v0  ;;  %v9357_v25 = vmax.f32 %v9118_v53, %v12672_v38  ;;  %v9407_v52 = vadd.f32 %v20225_v28, %v9355_v63  ;;  %v9016_v49 = vpop.f32.mrb[9].mxu0 }
 0x69c   :  { %v9438_v42 = vmax.f32 %v9406_v9, 0.0  ;;  %v9536_v14 = vrot.slane %v9436_v62, %v16848_v16  ;;  %v9540_v27 = vrot.slane %v9437_v43, %v16848_v16  ;;  %v9121_v58 = vcombine.high %v9073_v34, %v9073_v34 }
 0x69d   :  { %v9358_v55 = vmax.f32 %v9120_v51, %v12673_v1  ;;  %v9408_v39 = vadd.f32 %v20242_v5, %v9356_v30  ;;  %v9409_v45 = vadd.f32 %v20229_v40, %v9357_v25  ;;  %v9439_v2 = vmax.f32 %v9407_v52, 0.0 }
 0x69e   :  { %v9544_v8 = vrot.slane %v9438_v42, %v16848_v16  ;;  %v9657_v36 = vsel %vm6881_vm3, %v9536_v14, %v9532_v10  ;;  %v9128_v50 = vrot.slane %v9073_v34, %v21633_v22  ;;  %v9135_v23 = vrot.slane %v9121_v58, %v21633_v22  ;;  %v13396_v26 = vpop.f32.mrb[10].mxu0 }
 0x69f   :  { %v9658_v21 = vsel %vm6883_vm4, %v9540_v27, %v9657_v36  ;;  %v9410_v20 = vadd.f32 %v20245_v54, %v9358_v55  ;;  %v9440_v3 = vmax.f32 %v9408_v39, 0.0  ;;  %v9441_v15 = vmax.f32 %v9409_v45, 0.0  ;;  %v9026_v4 = vpop.f32.mrb[11].mxu0 }
 0x6a0   :  { %v9659_v29 = vsel %vm6885_vm5, %v9544_v8, %v9658_v21  ;;  %v9548_v57 = vrot.slane %v9439_v2, %v16848_v16  ;;  %v9136_v33 = vcombine.high %v9128_v50, %v9128_v50  ;;  %v9137_v53 = vcombine.high %v9135_v23, %v9135_v23 }
 0x6a1   :  { %9691 = vst.msk [vmem:[#allocation3 + $0x9] sm:$0xf] %vm9690_vm10, %v9659_v29  ;;  %v9442_v59 = vmax.f32 %v9410_v20, 0.0  ;;  %v9552_v7 = vrot.slane %v9440_v3, %v16848_v16  ;;  %v9556_v34 = vrot.slane %v9441_v15, %v16848_v16  ;;  %v12674_v60 = vrot.slane %v9128_v50, 9 }
 0x6a2   :  { %v12675_v11 = vrot.slane %v9136_v33, 9  ;;  %v12676_v47 = vrot.slane %v9135_v23, 9  ;;  %v12677_v41 = vrot.slane %v9137_v53, 9  ;;  %v13836_v51 = vadd.f32 %v13390_v37, %v20136_v12  ;;  %v20275_v0 = vpop.f32.mrb[12].mxu0 }
 0x6a3   :  { %v9560_v38 = vrot.slane %v9442_v59, %v16848_v16  ;;  %v9660_v63 = vsel %vm6881_vm3, %v9552_v7, %v9548_v57  ;;  %v9359_v9 = vmax.f32 %v9128_v50, %v12674_v60  ;;  %v13837_v62 = vadd.f32 %v9006_v35, %v20138_v6  ;;  %v20280_v43 = vpop.f32.mrb[13].mxu0 }
 0x6a4   :  { %v9661_v10 = vsel %vm6883_vm4, %v9556_v34, %v9660_v63  ;;  %v9360_v1 = vmax.f32 %v9136_v33, %v12675_v11  ;;  %v9361_v30 = vmax.f32 %v9135_v23, %v12676_v47  ;;  %v9362_v25 = vmax.f32 %v9137_v53, %v12677_v41 }
 0x6a5   :  { %v9662_v52 = vsel %vm6885_vm5, %v9560_v38, %v9661_v10  ;;  %v9411_v12 = vadd.f32 %v20225_v28, %v9359_v9  ;;  %v9074_v37 = vmax.f32 %v13837_v62, %v13836_v51  ;;  %v13838_v42 = vadd.f32 %v13393_v32, %v20140_v17 }
 0x6a6   :  { %9692 = vst.msk [vmem:[#allocation3 + $0x11] sm:$0xf] %vm9690_vm10, %v9662_v52  ;;  %v9412_v14 = vadd.f32 %v20242_v5, %v9360_v1  ;;  %v9413_v6 = vadd.f32 %v20229_v40, %v9361_v30  ;;  %v9414_v35 = vadd.f32 %v20245_v54, %v9362_v25  ;;  %v13839_v27 = vadd.f32 %v9016_v49, %v20142_v24  ;;  %v20291_v58 = vpop.f32.mrb[14].mxu0 }
 0x6a7   :  { %v9443_v55 = vmax.f32 %v9411_v12, 0.0  ;;  %v9138_v39 = vcombine.high %v9074_v37, %v9074_v37  ;;  %v9145_v45 = vrot.slane %v9074_v37, %v21633_v22  ;;  %v13840_v2 = vadd.f32 %v13396_v26, %v20144_v46  ;;  %v20295_v8 = vpop.f32.mrb[15].mxu0 }
 0x6a8   :  { %v9444_v17 = vmax.f32 %v9412_v14, 0.0  ;;  %v9445_v32 = vmax.f32 %v9413_v6, 0.0  ;;  %v9446_v36 = vmax.f32 %v9414_v35, 0.0  ;;  %v9075_v50 = vmax.f32 %v13839_v27, %v13838_v42  ;;  %v14016_v49 = vld [vmem:[#allocation3 + $0x1] ss:$8 sps:$4 sm:$0xff]  }
 0x6a9   :  { %v9564_v23 = vrot.slane %v9443_v55, %v16848_v16  ;;  %v9152_v21 = vrot.slane %v9138_v39, %v21633_v22  ;;  %v9153_v20 = vcombine.high %v9145_v45, %v9145_v45  ;;  %v12678_v24 = vrot.slane %v9145_v45, 9  ;;  %13411 = vmatprep.mubr.msk.f32.mxu1 %vm6189_vm0, %v14016_v49 }
 0x6aa   :  { %v9568_v3 = vrot.slane %v9444_v17, %v16848_v16  ;;  %v9572_v15 = vrot.slane %v9445_v32, %v16848_v16  ;;  %v9576_v29 = vrot.slane %v9446_v36, %v16848_v16  ;;  %v9155_v46 = vcombine.high %v9075_v50, %v9075_v50 }
 0x6ab   :  { %v9154_v26 = vcombine.high %v9152_v21, %v9152_v21  ;;  %v12679_v57 = vrot.slane %v9153_v20, 9  ;;  %v12680_v33 = vrot.slane %v9152_v21, 9  ;;  %v9363_v53 = vmax.f32 %v9145_v45, %v12678_v24 }
 0x6ac   :  { %v9663_v59 = vsel %vm6881_vm3, %v9568_v3, %v9564_v23  ;;  %v9162_v7 = vrot.slane %v9075_v50, %v21633_v22  ;;  %v9169_v34 = vrot.slane %v9155_v46, %v21633_v22  ;;  %v13841_v60 = vadd.f32 %v9026_v4, %v20146_v44 }
 0x6ad   :  { %v9664_v11 = vsel %vm6883_vm4, %v9572_v15, %v9663_v59  ;;  %v12681_v47 = vrot.slane %v9154_v26, 9  ;;  %v9364_v41 = vmax.f32 %v9153_v20, %v12679_v57  ;;  %v9365_v51 = vmax.f32 %v9152_v21, %v12680_v33  ;;  %v12711_v33 = vld [vmem:[%s20707_s5 + $0x40] sm:$0xff] }
 0x6ae   :  { %v9665_v38 = vsel %vm6885_vm5, %v9576_v29, %v9664_v11  ;;  %v9415_v63 = vadd.f32 %v20225_v28, %v9363_v53  ;;  %v9170_v9 = vcombine.high %v9162_v7, %v9162_v7  ;;  %v9171_v62 = vcombine.high %v9169_v34, %v9169_v34 }
 0x6af   :  { %9693 = vst.msk [vmem:[#allocation3 + $0x19] sm:$0xf] %vm9690_vm10, %v9665_v38  ;;  %v9366_v10 = vmax.f32 %v9154_v26, %v12681_v47  ;;  %v9416_v1 = vadd.f32 %v20242_v5, %v9364_v41  ;;  %v9417_v30 = vadd.f32 %v20229_v40, %v9365_v51  ;;  %v12682_v25 = vrot.slane %v9162_v7, 9 }
 0x6b0   :  { %v9447_v44 = vmax.f32 %v9415_v63, 0.0  ;;  %v12683_v4 = vrot.slane %v9170_v9, 9  ;;  %v12684_v52 = vrot.slane %v9169_v34, 9  ;;  %v12685_v12 = vrot.slane %v9171_v62, 9 }
 0x6b1   :  { %v9418_v37 = vadd.f32 %v20245_v54, %v9366_v10  ;;  %v9448_v42 = vmax.f32 %v9416_v1, 0.0  ;;  %v9449_v14 = vmax.f32 %v9417_v30, 0.0  ;;  %v9367_v6 = vmax.f32 %v9162_v7, %v12682_v25 }
 0x6b2   :  { %v9580_v35 = vrot.slane %v9447_v44, %v16848_v16  ;;  %v9368_v27 = vmax.f32 %v9170_v9, %v12683_v4  ;;  %v9369_v55 = vmax.f32 %v9169_v34, %v12684_v52  ;;  %v9370_v39 = vmax.f32 %v9171_v62, %v12685_v12 }
 0x6b3   :  { %v9450_v45 = vmax.f32 %v9418_v37, 0.0  ;;  %v9584_v17 = vrot.slane %v9448_v42, %v16848_v16  ;;  %v9588_v32 = vrot.slane %v9449_v14, %v16848_v16  ;;  %v9419_v36 = vadd.f32 %v20225_v28, %v9367_v6 }
 0x6b4   :  { %v9420_v50 = vadd.f32 %v20242_v5, %v9368_v27  ;;  %v9421_v23 = vadd.f32 %v20229_v40, %v9369_v55  ;;  %v9422_v21 = vadd.f32 %v20245_v54, %v9370_v39  ;;  %v9076_v20 = vmax.f32 %v13841_v60, %v13840_v2 }
 0x6b5   :  { %v9592_v24 = vrot.slane %v9450_v45, %v16848_v16  ;;  %v9666_v49 = vsel %vm6881_vm3, %v9584_v17, %v9580_v35  ;;  %v9451_v3 = vmax.f32 %v9419_v36, 0.0  ;;  %v13842_v15 = vadd.f32 %v20275_v0, %v20172_v18  ;;  %v12712_v18 = vld [vmem:[%s20707_s5 + $0x48] sm:$0xff] }
 0x6b6   :  { %v9667_v29 = vsel %vm6883_vm4, %v9588_v32, %v9666_v49  ;;  %v9452_v46 = vmax.f32 %v9420_v50, 0.0  ;;  %v9453_v26 = vmax.f32 %v9421_v23, 0.0  ;;  %v9454_v57 = vmax.f32 %v9422_v21, 0.0  ;;  %v14017_v34 = vld [vmem:[#allocation3 + $0x11] ss:$8 sps:$4 sm:$0xff]  }
 0x6b7   :  { %v9668_v53 = vsel %vm6885_vm5, %v9592_v24, %v9667_v29  ;;  %v9596_v2 = vrot.slane %v9451_v3, %v16848_v16  ;;  %v9172_v59 = vcombine.high %v9076_v20, %v9076_v20  ;;  %v9179_v7 = vrot.slane %v9076_v20, %v21633_v22  ;;  %13412 = vmatmul.mubr.msk.f32.vlgmr.msra.gmra.mrb[16].mxu1 %vm6189_vm0, %v14017_v34 }
 0x6b8   :  { %9694 = vst.msk [vmem:[#allocation3 + $0x21] sm:$0xf] %vm9690_vm10, %v9668_v53  ;;  %v9600_v0 = vrot.slane %v9452_v46, %v16848_v16  ;;  %v9604_v60 = vrot.slane %v9453_v26, %v16848_v16  ;;  %v9608_v11 = vrot.slane %v9454_v57, %v16848_v16  ;;  %v13843_v47 = vadd.f32 %v20280_v43, %v20174_v56 }
 0x6b9   :  { %v9186_v41 = vrot.slane %v9172_v59, %v21633_v22  ;;  %v9187_v51 = vcombine.high %v9179_v7, %v9179_v7  ;;  %v12686_v38 = vrot.slane %v9179_v7, 9  ;;  %v13844_v63 = vadd.f32 %v20291_v58, %v20176_v13  ;;  %13711 = vmatpush3.bf16.msra.mxu1 %v20218_v61 }
 0x6ba   :  { %v9669_v9 = vsel %vm6881_vm3, %v9600_v0, %v9596_v2  ;;  %v9077_v62 = vmax.f32 %v13843_v47, %v13842_v15  ;;  %v13845_v10 = vadd.f32 %v20295_v8, %v20178_v48  ;;  %v20349_v1 = vpack.c.bf16 %v12712_v18, %v12711_v33  ;;  %13713 = vmatprep.subr.bf16.mxu1 %v20250_v19 }
 0x6bb   :  { %v9670_v56 = vsel %vm6883_vm4, %v9604_v60, %v9669_v9  ;;  %v9188_v43 = vcombine.high %v9186_v41, %v9186_v41  ;;  %v12687_v30 = vrot.slane %v9187_v51, 9  ;;  %v12688_v25 = vrot.slane %v9186_v41, 9 }
 0x6bc   :  { %v9671_v13 = vsel %vm6885_vm5, %v9608_v11, %v9670_v56  ;;  %v9371_v58 = vmax.f32 %v9179_v7, %v12686_v38  ;;  %v9189_v44 = vcombine.high %v9077_v62, %v9077_v62  ;;  %v9196_v4 = vrot.slane %v9077_v62, %v21633_v22 }
 0x6bd   :  { %9695 = vst.msk [vmem:[#allocation3 + $0x39] sm:$0xf] %vm9690_vm10, %v9671_v13  ;;  %v12689_v48 = vrot.slane %v9188_v43, 9  ;;  %v9372_v8 = vmax.f32 %v9187_v51, %v12687_v30  ;;  %v9373_v61 = vmax.f32 %v9186_v41, %v12688_v25  ;;  %v9078_v52 = vmax.f32 %v13845_v10, %v13844_v63  ;;  %13715 = vmatpush3.bf16.msra.mxu1 %v20250_v19 }
 0x6be   :  { %v9423_v12 = vadd.f32 %v20225_v28, %v9371_v58  ;;  %v9203_v37 = vrot.slane %v9189_v44, %v21633_v22  ;;  %v9204_v42 = vcombine.high %v9196_v4, %v9196_v4  ;;  %v12690_v14 = vrot.slane %v9196_v4, 9  ;;  %13717 = vmatprep.subr.bf16.mxu1 %v20349_v1 }
 0x6bf   :  { %v9374_v6 = vmax.f32 %v9188_v43, %v12689_v48  ;;  %v9424_v35 = vadd.f32 %v20242_v5, %v9372_v8  ;;  %v9425_v27 = vadd.f32 %v20229_v40, %v9373_v61  ;;  %v9206_v55 = vcombine.high %v9078_v52, %v9078_v52 }
 0x6c0   :  { %v9455_v39 = vmax.f32 %v9423_v12, 0.0  ;;  %v9205_v45 = vcombine.high %v9203_v37, %v9203_v37  ;;  %v12691_v17 = vrot.slane %v9204_v42, 9  ;;  %v12692_v32 = vrot.slane %v9203_v37, 9 }
 0x6c1   :  { %v9426_v36 = vadd.f32 %v20245_v54, %v9374_v6  ;;  %v9456_v50 = vmax.f32 %v9424_v35, 0.0  ;;  %v9457_v23 = vmax.f32 %v9425_v27, 0.0  ;;  %v9375_v21 = vmax.f32 %v9196_v4, %v12690_v14 }
 0x6c2   :  { %v9612_v20 = vrot.slane %v9455_v39, %v16848_v16  ;;  %v12693_v19 = vrot.slane %v9205_v45, 9  ;;  %v9376_v24 = vmax.f32 %v9204_v42, %v12691_v17  ;;  %v9377_v49 = vmax.f32 %v9203_v37, %v12692_v32 }
 0x6c3   :  { %v9458_v3 = vmax.f32 %v9426_v36, 0.0  ;;  %v9616_v15 = vrot.slane %v9456_v50, %v16848_v16  ;;  %v9620_v29 = vrot.slane %v9457_v23, %v16848_v16  ;;  %v9427_v46 = vadd.f32 %v20225_v28, %v9375_v21  ;;  %v14020_v50 = vld [vmem:[#allocation3] ss:$8 sps:$4 sm:$0xff]   ;;  %v12714_v23 = vld [vmem:[%s20707_s5 + $0x58] sm:$0xff] }
 0x6c4   :  { %v9378_v26 = vmax.f32 %v9205_v45, %v12693_v19  ;;  %v9428_v57 = vadd.f32 %v20242_v5, %v9376_v24  ;;  %v9429_v33 = vadd.f32 %v20229_v40, %v9377_v49  ;;  %v9213_v53 = vrot.slane %v9078_v52, %v21633_v22  ;;  %v14018_v2 = vld [vmem:[#allocation3 + $0x31] ss:$8 sps:$4 sm:$0xff]   ;;  %v12719_v24 = vld [vmem:[%s20707_s5 + $0x60] sm:$0xff]  ;;  %v12720_v49 = vld [vmem:[%s20707_s5 + $0x68] sm:$0xff] }
 0x6c5   :  { %v9624_v59 = vrot.slane %v9458_v3, %v16848_v16  ;;  %v9672_v7 = vsel %vm6881_vm3, %v9616_v15, %v9612_v20  ;;  %v9459_v34 = vmax.f32 %v9427_v46, 0.0  ;;  %v9220_v18 = vrot.slane %v9206_v55, %v21633_v22  ;;  %13414 = vmatprep.mubr.msk.f32.mxu1 %vm6189_vm0, %v14018_v2  ;;  %v14021_v21 = vld [vmem:[#allocation3 + $0x10] ss:$8 sps:$4 sm:$0xff]   ;;  %v12728_v2 = vld [vmem:[%s20707_s5 + $0x88] sm:$0xff] }
 0x6c6   :  { %v9673_v0 = vsel %vm6883_vm4, %v9620_v29, %v9672_v7  ;;  %v9430_v60 = vadd.f32 %v20245_v54, %v9378_v26  ;;  %v9460_v11 = vmax.f32 %v9428_v57, 0.0  ;;  %v9461_v47 = vmax.f32 %v9429_v33, 0.0  ;;  %v14022_v19 = vld [vmem:[#allocation3 + $0x30] ss:$8 sps:$4 sm:$0xff]   ;;  %v14024_v26 = vld [vmem:[#allocation3 + $0x2] ss:$8 sps:$4 sm:$0xff]  }
 0x6c7   :  { %v9674_v41 = vsel %vm6885_vm5, %v9624_v59, %v9673_v0  ;;  %v9628_v51 = vrot.slane %v9459_v34, %v16848_v16  ;;  %v9221_v38 = vcombine.high %v9213_v53, %v9213_v53  ;;  %v9222_v63 = vcombine.high %v9220_v18, %v9220_v18  ;;  %v12721_v29 = vld [vmem:[%s20707_s5 + $0x70] sm:$0xff]  ;;  %v12722_v46 = vld [vmem:[%s20707_s5 + $0x78] sm:$0xff] }
 0x6c8   :  { %9696 = vst.msk [vmem:[#allocation3 + $0x41] sm:$0xf] %vm9690_vm10, %v9674_v41  ;;  %v9462_v9 = vmax.f32 %v9430_v60, 0.0  ;;  %v9632_v62 = vrot.slane %v9460_v11, %v16848_v16  ;;  %v9636_v10 = vrot.slane %v9461_v47, %v16848_v16  ;;  %v12694_v56 = vrot.slane %v9213_v53, 9  ;;  %v14026_v33 = vld [vmem:[#allocation3 + $0x32] ss:$8 sps:$4 sm:$0xff]  }
 0x6c9   :  { %v12695_v43 = vrot.slane %v9221_v38, 9  ;;  %v12696_v30 = vrot.slane %v9220_v18, 9  ;;  %v12697_v25 = vrot.slane %v9222_v63, 9  ;;  %v13724_v15 = vpack.c.bf16 %v12720_v49, %v12719_v24  ;;  %v14028_v34 = vld [vmem:[#allocation3 + $0x8] ss:$8 sps:$4 sm:$0xff]   ;;  %v12730_v0 = vld [vmem:[%s20707_s5 + $0x98] sm:$0xff] }
 0x6ca   :  { %v9640_v13 = vrot.slane %v9462_v9, %v16848_v16  ;;  %v9675_v58 = vsel %vm6881_vm3, %v9632_v62, %v9628_v51  ;;  %v9379_v44 = vmax.f32 %v9213_v53, %v12694_v56  ;;  %v13728_v57 = vpack.c.bf16 %v12722_v46, %v12721_v29  ;;  %v12727_v53 = vld [vmem:[%s20707_s5 + $0x80] sm:$0xff]  ;;  %v12736_v51 = vld [vmem:[%s20707_s5 + $0xa8] sm:$0xff]  ;;  %v12737_v62 = vld [vmem:[%s20707_s5 + $0xb0] sm:$0xff] }
 0x6cb   :  { %v9676_v4 = vsel %vm6883_vm4, %v9636_v10, %v9675_v58  ;;  %v9380_v48 = vmax.f32 %v9221_v38, %v12695_v43  ;;  %v9381_v8 = vmax.f32 %v9220_v18, %v12696_v30  ;;  %v9382_v61 = vmax.f32 %v9222_v63, %v12697_v25  ;;  %v12729_v18 = vld [vmem:[%s20707_s5 + $0x90] sm:$0xff]  ;;  %v14029_v60 = vld [vmem:[#allocation3 + $0x18] ss:$8 sps:$4 sm:$0xff]   ;;  %v12777_v46 = vld [vmem:[%s20709_s7 + $0x28] sm:$0xff] }
 0x6cc   :  { %v9677_v52 = vsel %vm6885_vm5, %v9640_v13, %v9676_v4  ;;  %v9431_v12 = vadd.f32 %v20225_v28, %v9379_v44  ;;  %v13732_v7 = vpack.c.bf16 %v12728_v2, %v12727_v53  ;;  %v13736_v11 = vpack.c.bf16 %v12730_v0, %v12729_v18  ;;  %v12735_v41 = vld [vmem:[%s20707_s5 + $0xa0] sm:$0xff]  ;;  %v14032_v9 = vld [vmem:[#allocation3 + $0x9] ss:$8 sps:$4 sm:$0xff]   ;;  %v12738_v10 = vld [vmem:[%s20707_s5 + $0xb8] sm:$0xff] }
 0x6cd   :  { %9697 = vst.msk [vmem:[#allocation3 + $0x49] sm:$0xf] %vm9690_vm10, %v9677_v52  ;;  %v9432_v37 = vadd.f32 %v20242_v5, %v9380_v48  ;;  %v9433_v42 = vadd.f32 %v20229_v40, %v9381_v8  ;;  %v9434_v14 = vadd.f32 %v20245_v54, %v9382_v61  ;;  %v12713_v40 = vld [vmem:[%s20707_s5 + $0x50] sm:$0xff]  ;;  %v13740_v63 = vpack.c.bf16 %v12736_v51, %v12735_v41  ;;  %v14033_v56 = vld [vmem:[#allocation3 + $0x19] ss:$8 sps:$4 sm:$0xff]   ;;  %v12744_v13 = vld [vmem:[%s20707_s5 + $0xc8] sm:$0xff] }
 0x6ce   :  { %v9463_v6 = vmax.f32 %v9431_v12, 0.0  ;;  %v13720_v20 = vpack.c.bf16 %v12714_v23, %v12713_v40  ;;  %v13744_v43 = vpack.c.bf16 %v12738_v10, %v12737_v62  ;;  %v12743_v25 = vld [vmem:[%s20707_s5 + $0xc0] sm:$0xff]  ;;  %v14036_v4 = vld [vmem:[#allocation3 + $0xa] ss:$8 sps:$4 sm:$0xff]   ;;  %v12746_v8 = vld [vmem:[%s20707_s5 + $0xd8] sm:$0xff] }
 0x6cf   :  { %v9464_v35 = vmax.f32 %v9432_v37, 0.0  ;;  %v9465_v27 = vmax.f32 %v9433_v42, 0.0  ;;  %v9466_v55 = vmax.f32 %v9434_v14, 0.0  ;;  %v14030_v47 = vld [vmem:[#allocation3 + $0x38] ss:$8 sps:$4 sm:$0xff]   ;;  %v13748_v44 = vpack.c.bf16 %v12744_v13, %v12743_v25  ;;  %v12745_v48 = vld [vmem:[%s20707_s5 + $0xd0] sm:$0xff] }
 0x6d0   :  { %v9644_v39 = vrot.slane %v9463_v6, %v16848_v16  ;;  %v14034_v30 = vld [vmem:[#allocation3 + $0x39] ss:$8 sps:$4 sm:$0xff]   ;;  %v13752_v52 = vpack.c.bf16 %v12746_v8, %v12745_v48  ;;  %v12752_v42 = vld [vmem:[%s20707_s5 + $0xe8] sm:$0xff] }
 0x6d1   :  { %v9648_v45 = vrot.slane %v9464_v35, %v16848_v16  ;;  %v9652_v17 = vrot.slane %v9465_v27, %v16848_v16  ;;  %v9656_v28 = vrot.slane %v9466_v55, %v16848_v16  ;;  %v14037_v61 = vld [vmem:[#allocation3 + $0x1a] ss:$8 sps:$4 sm:$0xff]   ;;  %v12753_v27 = vld [vmem:[%s20707_s5 + $0xf0] sm:$0xff] }
 0x6d2   :  { %v14038_v12 = vld [vmem:[#allocation3 + $0x3a] ss:$8 sps:$4 sm:$0xff]  }
 0x6d3   :  { %v9678_v32 = vsel %vm6881_vm3, %v9648_v45, %v9644_v39  ;;  %v12751_v37 = vld [vmem:[%s20707_s5 + $0xe0] sm:$0xff]  ;;  %v14040_v35 = vld [vmem:[#allocation3 + $0x10] ss:$8 sps:$4 sm:$0xff]  }
 0x6d4   :  { %v9679_v5 = vsel %vm6883_vm4, %v9652_v17, %v9678_v32  ;;  %v14019_v54 = vld [vmem:[#allocation3 + $0x41] ss:$8 sps:$4 sm:$0xff]   ;;  %v13756_v6 = vpack.c.bf16 %v12752_v42, %v12751_v37  ;;  %v12754_v55 = vld [vmem:[%s20707_s5 + $0xf8] sm:$0xff] }
 0x6d5   :  { %v9680_v36 = vsel %vm6885_vm5, %v9656_v28, %v9679_v5  ;;  %13415 = vmatmul.mubr.msk.f32.gmra.mrb[18].mxu1 %vm6189_vm0, %v14019_v54  ;;  %v14023_v3 = vld [vmem:[#allocation3 + $0x40] ss:$8 sps:$4 sm:$0xff]   ;;  %v13760_v45 = vpack.c.bf16 %v12754_v55, %v12753_v27  ;;  %v14044_v54 = vld [vmem:[#allocation3 + $0x11] ss:$8 sps:$4 sm:$0xff]  }
 0x6d6   :  { %9698 = vst.msk [vmem:[#allocation3 + $0x51] sm:$0xf] %vm9690_vm10, %v9680_v36  ;;  %13425 = vmatprep.mubr.msk.f32.mxu1 %vm6189_vm0, %v14020_v50  ;;  %v14027_v59 = vld [vmem:[#allocation3 + $0x42] ss:$8 sps:$4 sm:$0xff]   ;;  %v12761_v36 = vld [vmem:[%s20707_s5 + $0x110] sm:$0xff]  ;;  %v12762_v50 = vld [vmem:[%s20707_s5 + $0x118] sm:$0xff] }
 0x6d7   :  { %v14041_v39 = vld [vmem:[#allocation3 + $0x20] ss:$8 sps:$4 sm:$0xff]   ;;  %v14048_v24 = vld [vmem:[#allocation3 + $0x12] ss:$8 sps:$4 sm:$0xff]  }
 0x6d8   :  { %v14042_v17 = vld [vmem:[#allocation3 + $0x40] ss:$8 sps:$4 sm:$0xff]  }
 0x6d9   :  { %13426 = vmatmul.mubr.msk.f32.vlgmr.msra.gmra.mrb[16].mxu1 %vm6189_vm0, %v14021_v21  ;;  %v12759_v28 = vld [vmem:[%s20707_s5 + $0x100] sm:$0xff]  ;;  %v12760_v32 = vld [vmem:[%s20707_s5 + $0x108] sm:$0xff]  ;;  %v13768_v21 = vpack.c.bf16 %v12762_v50, %v12761_v36 }
 0x6da   :  { %13719 = vmatpush3.bf16.msra.mxu1 %v20349_v1  ;;  %13428 = vmatprep.mubr.msk.f32.mxu1 %vm6189_vm0, %v14022_v19  ;;  %v14025_v1 = vld [vmem:[#allocation3 + $0x12] ss:$8 sps:$4 sm:$0xff]   ;;  %v13764_v5 = vpack.c.bf16 %v12760_v32, %v12759_v28  ;;  %v14045_v23 = vld [vmem:[#allocation3 + $0x21] ss:$8 sps:$4 sm:$0xff]  }
 0x6db   :  { %13721 = vmatprep.subr.bf16.mxu1 %v13720_v20  ;;  %v14049_v49 = vld [vmem:[#allocation3 + $0x22] ss:$8 sps:$4 sm:$0xff]  }
 0x6dc   :  { %v12776_v29 = vld [vmem:[%s20709_s7 + $0x20] sm:$0xff] }
 0x6dd   :  { %13429 = vmatmul.mubr.msk.f32.gmra.mrb[18].mxu1 %vm6189_vm0, %v14023_v3  ;;  %v14031_v38 = vld [vmem:[#allocation3 + $0x48] ss:$8 sps:$4 sm:$0xff]  }
 0x6de   :  { %13723 = vmatpush3.bf16.msra.mxu1 %v13720_v20  ;;  %13439 = vmatprep.mubr.msk.f32.mxu1 %vm6189_vm0, %v14024_v26  ;;  %v14035_v58 = vld [vmem:[#allocation3 + $0x49] ss:$8 sps:$4 sm:$0xff]  }
 0x6df   :  { %13725 = vmatprep.subr.bf16.mxu1 %v13724_v15  ;;  %v14039_v14 = vld [vmem:[#allocation3 + $0x4a] ss:$8 sps:$4 sm:$0xff]  }
 0x6e0   :  { %v14043_v40 = vld [vmem:[#allocation3 + $0x50] ss:$8 sps:$4 sm:$0xff]   ;;  %v14046_v20 = vld [vmem:[#allocation3 + $0x41] ss:$8 sps:$4 sm:$0xff]  }
 0x6e1   :  { %13440 = vmatmul.mubr.msk.f32.vlgmr.msra.gmra.mrb[16].mxu1 %vm6189_vm0, %v14025_v1  ;;  %v14047_v19 = vld [vmem:[#allocation3 + $0x51] ss:$8 sps:$4 sm:$0xff]   ;;  %v14050_v3 = vld [vmem:[#allocation3 + $0x42] ss:$8 sps:$4 sm:$0xff]   ;;  %v14159_v1 = vmov 0.0|0.0  }
 0x6e2   :  { %13727 = vmatpush3.bf16.msra.mxu1 %v13724_v15  ;;  %13442 = vmatprep.mubr.msk.f32.mxu1 %vm6189_vm0, %v14026_v33  ;;  %v14051_v15 = vld [vmem:[#allocation3 + $0x52] ss:$8 sps:$4 sm:$0xff]  }
 0x6e3   :  { %13729 = vmatprep.subr.bf16.mxu1 %v13728_v57  ;;  %v12778_v26 = vld [vmem:[%s20709_s7 + $0x30] sm:$0xff]  ;;  %v12779_v33 = vld [vmem:[%s20709_s7 + $0x38] sm:$0xff] }
 0x6e4   :  { %v13776_v53 = vpack.c.bf16 %v12779_v33, %v12778_v26 }
 0x6e5   :  { %13443 = vmatmul.mubr.msk.f32.gmra.mrb[18].mxu1 %vm6189_vm0, %v14027_v59 }
 0x6e6   :  { %13731 = vmatpush3.bf16.msra.mxu1 %v13728_v57  ;;  %13453 = vmatprep.mubr.msk.f32.mxu1 %vm6189_vm0, %v14028_v34  ;;  %v13773_v57 = vpack.c.bf16 %v12777_v46, %v12776_v29  ;;  %v12775_v34 = vld [vmem:[%s20708_s6] ss:$0 sm:$0xff] }
 0x6e7   :  { %13733 = vmatprep.subr.bf16.mxu1 %v13732_v7  ;;  %v10893_v41 = vrot.slane %v12775_v34, %v21633_v22 }
 0x6e9   :  { %13454 = vmatmul.mubr.msk.f32.vlgmr.msra.gmra.mrb[16].mxu1 %vm6189_vm0, %v14029_v60 }
 0x6ea   :  { %13735 = vmatpush3.bf16.msra.mxu1 %v13732_v7  ;;  %13456 = vmatprep.mubr.msk.f32.mxu1 %vm6189_vm0, %v14030_v47 }
 0x6eb   :  { %13737 = vmatprep.subr.bf16.mxu1 %v13736_v11 }
 0x6ed   :  { %13457 = vmatmul.mubr.msk.f32.gmra.mrb[18].mxu1 %vm6189_vm0, %v14031_v38 }
 0x6ee   :  { %13739 = vmatpush3.bf16.msra.mxu1 %v13736_v11  ;;  %13467 = vmatprep.mubr.msk.f32.mxu1 %vm6189_vm0, %v14032_v9 }
 0x6ef   :  { %13741 = vmatprep.subr.bf16.mxu1 %v13740_v63 }
 0x6f1   :  { %13468 = vmatmul.mubr.msk.f32.vlgmr.msra.gmra.mrb[16].mxu1 %vm6189_vm0, %v14033_v56 }
 0x6f2   :  { %13743 = vmatpush3.bf16.msra.mxu1 %v13740_v63  ;;  %13470 = vmatprep.mubr.msk.f32.mxu1 %vm6189_vm0, %v14034_v30 }
 0x6f3   :  { %13745 = vmatprep.subr.bf16.mxu1 %v13744_v43 }
 0x6f5   :  { %13471 = vmatmul.mubr.msk.f32.gmra.mrb[18].mxu1 %vm6189_vm0, %v14035_v58 }
 0x6f6   :  { %13747 = vmatpush3.bf16.msra.mxu1 %v13744_v43  ;;  %13481 = vmatprep.mubr.msk.f32.mxu1 %vm6189_vm0, %v14036_v4 }
 0x6f7   :  { %13749 = vmatprep.subr.bf16.mxu1 %v13748_v44 }
 0x6f9   :  { %13482 = vmatmul.mubr.msk.f32.vlgmr.msra.gmra.mrb[16].mxu1 %vm6189_vm0, %v14037_v61 }
 0x6fa   :  { %13751 = vmatpush3.bf16.msra.mxu1 %v13748_v44  ;;  %13484 = vmatprep.mubr.msk.f32.mxu1 %vm6189_vm0, %v14038_v12  ;;  %v10894_v44 = vrot.slane %v10893_v41, 1 }
 0x6fb   :  { %13753 = vmatprep.subr.bf16.mxu1 %v13752_v52 }
 0x6fd   :  { %13485 = vmatmul.mubr.msk.f32.gmra.mrb[18].mxu1 %vm6189_vm0, %v14039_v14 }
 0x6fe   :  { %13755 = vmatpush3.bf16.msra.mxu1 %v13752_v52  ;;  %13495 = vmatprep.mubr.msk.f32.mxu1 %vm6189_vm0, %v14040_v35 }
 0x6ff   :  { %13757 = vmatprep.subr.bf16.mxu1 %v13756_v6 }
 0x701   :  { %13496 = vmatmul.mubr.msk.f32.vlgmr.msra.gmra.mrb[16].mxu1 %vm6189_vm0, %v14041_v39 }
 0x702   :  { %13759 = vmatpush3.bf16.msra.mxu1 %v13756_v6  ;;  %13498 = vmatprep.mubr.msk.f32.mxu1 %vm6189_vm0, %v14042_v17 }
 0x703   :  { %13761 = vmatprep.subr.bf16.mxu1 %v13760_v45 }
 0x705   :  { %13499 = vmatmul.mubr.msk.f32.gmra.mrb[18].mxu1 %vm6189_vm0, %v14043_v40 }
 0x706   :  { %13763 = vmatpush3.bf16.msra.mxu1 %v13760_v45  ;;  %13509 = vmatprep.mubr.msk.f32.mxu1 %vm6189_vm0, %v14044_v54 }
 0x707   :  { %13765 = vmatprep.subr.bf16.mxu1 %v13764_v5 }
 0x709   :  { %13510 = vmatmul.mubr.msk.f32.vlgmr.msra.gmra.mrb[16].mxu1 %vm6189_vm0, %v14045_v23 }
 0x70a   :  { %13767 = vmatpush3.bf16.msra.mxu1 %v13764_v5  ;;  %13512 = vmatprep.mubr.msk.f32.mxu1 %vm6189_vm0, %v14046_v20 }
 0x70b   :  { %13769 = vmatprep.subr.bf16.mxu1 %v13768_v21 }
 0x70d   :  { %13513 = vmatmul.mubr.msk.f32.gmra.mrb[18].mxu1 %vm6189_vm0, %v14047_v19 }
 0x70e   :  { %13771 = vmatpush3.bf16.msra.mxu1 %v13768_v21  ;;  %13523 = vmatprep.mubr.msk.f32.mxu1 %vm6189_vm0, %v14048_v24 }
 0x70f   :  { %13772 = vmatprep.subr.bf16.mxu1 %v14159_v1 }
 0x711   :  { %13524 = vmatmul.mubr.msk.f32.vlgmr.msra.gmra.mrb[16].mxu1 %vm6189_vm0, %v14049_v49 }
 0x712   :  { %13526 = vmatprep.mubr.msk.f32.mxu1 %vm6189_vm0, %v14050_v3  ;;  %13774 = vmatpush3.bf16.msra.mxu1 %v13773_v57 }
 0x713   :  { %13775 = vmatprep.subr.bf16.mxu1 %v14159_v1 }
 0x715   :  { %13527 = vmatmul.mubr.msk.f32.gmra.mrb[18].mxu1 %vm6189_vm0, %v14051_v15 }
 0x716   :  { %13537 = vmatprep.mubr.msk.f32.mxu1 %vm14160_vm12, %v21717_v31  ;;  %13777 = vmatpush3.bf16.msra.mxu1 %v13776_v53 }
 0x717   :  { %13778 = vmatprep.subr.bf16.mxu1 %v14159_v1 }
 0x7e4   :  { %v13525_v2 = vpop.f32.mrb[16].mxu1 }
 0x7e5   :  { %v10794_v59 = vcombine.high %v13525_v2, %v13525_v2  ;;  %v10766_v7 = vpop.f32.mrb[17].mxu1 }
 0x7e6   :  { %v10793_v18 = vcombine.high %v10766_v7, %v10766_v7 }
 0x7e7   :  { %v10802_v0 = vmax.f32 %v13525_v2, %v10794_v59 }
 0x7e8   :  { %v10801_v60 = vmax.f32 %v10766_v7, %v10793_v18  ;;  %v13528_v11 = vpop.f32.mrb[18].mxu1 }
 0x7e9   :  { %v10823_v47 = vrot.slane %v10802_v0, %v21633_v22  ;;  %v10796_v51 = vcombine.high %v13528_v11, %v13528_v11  ;;  %v10776_v38 = vpop.f32.mrb[19].mxu1 }
 0x7ea   :  { %v10815_v63 = vrot.slane %v10801_v60, %v21633_v22  ;;  %v10795_v9 = vcombine.high %v10776_v38, %v10776_v38 }
 0x7eb   :  { %v10824_v62 = vcombine.high %v10823_v47, %v10823_v47  ;;  %v12769_v10 = vrot.slane %v10823_v47, 9  ;;  %v10804_v56 = vmax.f32 %v13528_v11, %v10796_v51  ;;  %v10991_v11 = vld [vmem:[%s20709_s7] sm:$0xff] }
 0x7ec   :  { %v10816_v43 = vcombine.high %v10815_v63, %v10815_v63  ;;  %v12767_v30 = vrot.slane %v10815_v63, 9  ;;  %v10803_v25 = vmax.f32 %v10776_v38, %v10795_v9 }
 0x7ed   :  { %v12770_v13 = vrot.slane %v10824_v62, 9  ;;  %v10875_v58 = vmax.f32 %v10823_v47, %v12769_v10  ;;  %v10839_v4 = vrot.slane %v10804_v56, %v21633_v22  ;;  %v10992_v47 = vld [vmem:[%s20709_s7 + $0x8] sm:$0xff]  ;;  %v12782_v56 = vld [vmem:[%s20709_s7 + $0x40] sm:$0xff] }
 0x7ee   :  { %v12768_v48 = vrot.slane %v10816_v43, 9  ;;  %v10873_v8 = vmax.f32 %v10815_v63, %v12767_v30  ;;  %v10831_v61 = vrot.slane %v10803_v25, %v21633_v22  ;;  %v13779_v51 = vpack.c.bf16 %v10992_v47, %v10991_v11  ;;  %v10994_v63 = vld [vmem:[%s20709_s7 + $0x18] sm:$0xff] }
 0x7ef   :  { %v10876_v52 = vmax.f32 %v10824_v62, %v12770_v13  ;;  %v10899_v12 = vadd.f32 %v10893_v41, %v10875_v58  ;;  %v10840_v37 = vcombine.high %v10839_v4, %v10839_v4  ;;  %v12773_v42 = vrot.slane %v10839_v4, 9  ;;  %v12784_v13 = vld [vmem:[%s20709_s7 + $0x50] sm:$0xff]  ;;  %v12785_v58 = vld [vmem:[%s20709_s7 + $0x58] sm:$0xff] }
 0x7f0   :  { %v10874_v14 = vmax.f32 %v10816_v43, %v12768_v48  ;;  %v10897_v6 = vadd.f32 %v10893_v41, %v10873_v8  ;;  %v10832_v35 = vcombine.high %v10831_v61, %v10831_v61  ;;  %v12771_v27 = vrot.slane %v10831_v61, 9  ;;  %v12783_v43 = vld [vmem:[%s20709_s7 + $0x48] sm:$0xff]  ;;  %v12787_v8 = vld [vmem:[%s20709_s7 + $0x60] sm:$0xff] }
 0x7f1   :  { %v10900_v55 = vadd.f32 %v10894_v44, %v10876_v52  ;;  %v10907_v39 = vmax.f32 %v10899_v12, 0.0  ;;  %v12774_v45 = vrot.slane %v10840_v37, 9  ;;  %v10879_v17 = vmax.f32 %v10839_v4, %v12773_v42  ;;  %v12790_v42 = vld [vmem:[%s20709_s7 + $0x78] sm:$0xff] }
 0x7f2   :  { %v10898_v28 = vadd.f32 %v10894_v44, %v10874_v14  ;;  %v10905_v32 = vmax.f32 %v10897_v6, 0.0  ;;  %v12772_v40 = vrot.slane %v10832_v35, 9  ;;  %v10877_v5 = vmax.f32 %v10831_v61, %v12771_v27  ;;  %v12788_v61 = vld [vmem:[%s20709_s7 + $0x68] sm:$0xff]  ;;  %v12792_v27 = vld [vmem:[%s20709_s7 + $0x80] sm:$0xff] }
 0x7f3   :  { %v10908_v54 = vmax.f32 %v10900_v55, 0.0  ;;  %v10880_v36 = vmax.f32 %v10840_v37, %v12774_v45  ;;  %v10903_v50 = vadd.f32 %v10893_v41, %v10879_v17  ;;  %v10953_v20 = vrot.slane %v10907_v39, %v16848_v16  ;;  %v12789_v37 = vld [vmem:[%s20709_s7 + $0x70] sm:$0xff]  ;;  %v12793_v55 = vld [vmem:[%s20709_s7 + $0x88] sm:$0xff] }
 0x7f4   :  { %v10906_v22 = vmax.f32 %v10898_v28, 0.0  ;;  %v10878_v23 = vmax.f32 %v10832_v35, %v12772_v40  ;;  %v10901_v21 = vadd.f32 %v10893_v41, %v10877_v5  ;;  %v10945_v3 = vrot.slane %v10905_v32, %v16848_v16  ;;  %v12794_v17 = vld [vmem:[%s20709_s7 + $0x90] sm:$0xff]  ;;  %v12795_v28 = vld [vmem:[%s20709_s7 + $0x98] sm:$0xff] }
 0x7f5   :  { %v10957_v19 = vrot.slane %v10908_v54, %v16848_v16  ;;  %v10904_v24 = vadd.f32 %v10894_v44, %v10880_v36  ;;  %v10911_v49 = vmax.f32 %v10903_v50, 0.0  ;;  %v13785_v30 = vpack.c.bf16 %v12783_v43, %v12782_v56  ;;  %v12797_v54 = vld [vmem:[%s20709_s7 + $0xa0] sm:$0xff]  ;;  %v12798_v36 = vld [vmem:[%s20709_s7 + $0xa8] sm:$0xff] }
 0x7f6   :  { %v10949_v15 = vrot.slane %v10906_v22, %v16848_v16  ;;  %v10902_v29 = vadd.f32 %v10894_v44, %v10878_v23  ;;  %v10909_v46 = vmax.f32 %v10901_v21, 0.0  ;;  %v13788_v48 = vpack.c.bf16 %v12785_v58, %v12784_v13  ;;  %v12799_v23 = vld [vmem:[%s20709_s7 + $0xb0] sm:$0xff]  ;;  %v12800_v21 = vld [vmem:[%s20709_s7 + $0xb8] sm:$0xff] }
 0x7f7   :  { %v10975_v26 = vsel %vm6881_vm3, %v10957_v19, %v10953_v20  ;;  %v10912_v57 = vmax.f32 %v10904_v24, 0.0  ;;  %v10969_v2 = vrot.slane %v10911_v49, %v16848_v16  ;;  %v13791_v52 = vpack.c.bf16 %v12788_v61, %v12787_v8  ;;  %v12802_v49 = vld [vmem:[%s20709_s7 + $0xc0] sm:$0xff] }
 0x7f8   :  { %10984 = vst.msk [vmem:[#allocation4 + $0x9] sm:$0x3] %vm6191_vm1, %v10975_v26  ;;  %v10974_v33 = vsel %vm6881_vm3, %v10949_v15, %v10945_v3  ;;  %v10910_v53 = vmax.f32 %v10902_v29, 0.0  ;;  %v10961_v7 = vrot.slane %v10909_v46, %v16848_v16  ;;  %v13794_v35 = vpack.c.bf16 %v12790_v42, %v12789_v37  ;;  %v12803_v3 = vld [vmem:[%s20709_s7 + $0xc8] sm:$0xff]  ;;  %v12804_v46 = vld [vmem:[%s20709_s7 + $0xd0] sm:$0xff]  ;;  %v12805_v26 = vld [vmem:[%s20709_s7 + $0xd8] sm:$0xff] }
 0x7f9   :  { %10983 = vst.msk [vmem:[#allocation4 + $0x5] sm:$0x3] %vm6191_vm1, %v10974_v33  ;;  %v10973_v59 = vrot.slane %v10912_v57, %v16848_v16  ;;  %v13797_v39 = vpack.c.bf16 %v12793_v55, %v12792_v27  ;;  %v13800_v5 = vpack.c.bf16 %v12795_v28, %v12794_v17  ;;  %v13803_v50 = vpack.c.bf16 %v12798_v36, %v12797_v54 }
 0x7fa   :  { %v10965_v34 = vrot.slane %v10910_v53, %v16848_v16  ;;  %v10993_v16 = vld [vmem:[%s20709_s7 + $0x10] sm:$0xff]  ;;  %v13806_v24 = vpack.c.bf16 %v12800_v21, %v12799_v23  ;;  %v13809_v15 = vpack.c.bf16 %v12803_v3, %v12802_v49  ;;  %v13812_v53 = vpack.c.bf16 %v12805_v26, %v12804_v46 }
 0x7fb   :  { %v10977_v18 = vsel %vm6881_vm3, %v10973_v59, %v10969_v2  ;;  %v13782_v10 = vpack.c.bf16 %v10994_v63, %v10993_v16  ;;  %v12807_v2 = vld [vmem:[%s20709_s7 + $0xe0] sm:$0xff]  ;;  %v12808_v59 = vld [vmem:[%s20709_s7 + $0xe8] sm:$0xff]  ;;  %v12814_v63 = vld [vmem:[%s20709_s7 + $0x110] sm:$0xff] }
 0x7fc   :  { %10986 = vst.msk [vmem:[#allocation4 + $0x19] sm:$0x3] %vm6191_vm1, %v10977_v18  ;;  %v10976_v0 = vsel %vm6881_vm3, %v10965_v34, %v10961_v7  ;;  %v13815_v7 = vpack.c.bf16 %v12808_v59, %v12807_v2  ;;  %v12809_v18 = vld [vmem:[%s20709_s7 + $0xf0] sm:$0xff] }
 0x7fd   :  { %10985 = vst.msk [vmem:[#allocation4 + $0x15] sm:$0x3] %vm6191_vm1, %v10976_v0  ;;  %v12810_v0 = vld [vmem:[%s20709_s7 + $0xf8] sm:$0xff] }
 0x7fe   :  { %v13818_v47 = vpack.c.bf16 %v12810_v0, %v12809_v18 }
 0x7ff   :  { %v14127_v33 = vld.sshfl [vmem:[#allocation4 + $0x8] sm:$0xf pattern:$0x76325410] }
 0x800   :  { %v14114_v60 = vld.sshfl [vmem:[#allocation4 + $0x1] sm:$0xf pattern:$0x76325410] }
 0x801   :  { %v14117_v62 = vld.sshfl [vmem:[#allocation4] sm:$0xf pattern:$0x76325410] }
 0x802   :  { %v14119_v4 = vld.sshfl [vmem:[#allocation4 + $0x2] sm:$0xf pattern:$0x76325410] }
 0x803   :  { %v14121_v6 = vld.sshfl [vmem:[#allocation4 + $0x4] sm:$0xf pattern:$0x76325410] }
 0x804   :  { %v14115_v41 = vld.sshfl [vmem:[#allocation4 + $0x11] sm:$0xf pattern:$0x76325410] }
 0x805   :  { %v11024_v38 = vcombine.low %v14114_v60, %v14115_v41  ;;  %v14116_v9 = vld.sshfl [vmem:[#allocation4 + $0x10] sm:$0xf pattern:$0x76325410]  ;;  %v12812_v41 = vld [vmem:[%s20709_s7 + $0x100] sm:$0xff] }
 0x806   :  { %v11117_v25 = vcombine.low %v14117_v62, %v14116_v9  ;;  %v14118_v44 = vld.sshfl [vmem:[#allocation4 + $0x12] sm:$0xf pattern:$0x76325410]  ;;  %v12815_v9 = vld [vmem:[%s20709_s7 + $0x118] sm:$0xff] }
 0x807   :  { %13538 = vmatmul.mubr.msk.f32.vlgmr.msra.gmra.mrb[20].mxu1 %vm6189_vm0, %v11024_v38  ;;  %v11219_v12 = vcombine.low %v14119_v4, %v14118_v44  ;;  %v14120_v14 = vld.sshfl [vmem:[#allocation4 + $0x14] sm:$0xf pattern:$0x76325410]  ;;  %v13824_v56 = vpack.c.bf16 %v12815_v9, %v12814_v63 }
 0x808   :  { %13780 = vmatpush3.bf16.msra.mxu1 %v13779_v51  ;;  %13548 = vmatprep.mubr.msk.f32.mxu1 %vm14160_vm12, %v21717_v31  ;;  %v11322_v45 = vcombine.low %v14121_v6, %v14120_v14  ;;  %v14122_v32 = vld.sshfl [vmem:[#allocation4 + $0x15] sm:$0xf pattern:$0x76325410]  ;;  %v12813_v51 = vld [vmem:[%s20709_s7 + $0x108] sm:$0xff] }
 0x809   :  { %13781 = vmatprep.subr.bf16.mxu1 %v14159_v1  ;;  %v14123_v40 = vld.sshfl [vmem:[#allocation4 + $0x5] sm:$0xf pattern:$0x76325410]  ;;  %v13821_v16 = vpack.c.bf16 %v12813_v51, %v12812_v41 }
 0x80a   :  { %v11425_v22 = vcombine.low %v14123_v40, %v14122_v32  ;;  %v14124_v20 = vld.sshfl [vmem:[#allocation4 + $0x16] sm:$0xf pattern:$0x76325410] }
 0x80b   :  { %v14125_v19 = vld.sshfl [vmem:[#allocation4 + $0x6] sm:$0xf pattern:$0x76325410] }
 0x80c   :  { %13783 = vmatpush3.bf16.msra.mxu1 %v13782_v10  ;;  %v11528_v29 = vcombine.low %v14125_v19, %v14124_v20  ;;  %v14126_v57 = vld.sshfl [vmem:[#allocation4 + $0x18] sm:$0xf pattern:$0x76325410] }
 0x80d   :  { %13784 = vmatprep.subr.bf16.mxu1 %v14159_v1  ;;  %v11632_v34 = vcombine.low %v14127_v33, %v14126_v57  ;;  %v14128_v60 = vld.sshfl [vmem:[#allocation4 + $0x19] sm:$0xf pattern:$0x76325410] }
 0x80e   :  { %v14129_v11 = vld.sshfl [vmem:[#allocation4 + $0x9] sm:$0xf pattern:$0x76325410] }
 0x80f   :  { %13549 = vmatmul.mubr.msk.f32.vlgmr.msra.gmra.mrb[20].mxu1 %vm6189_vm0, %v11117_v25  ;;  %v11735_v38 = vcombine.low %v14129_v11, %v14128_v60  ;;  %v14130_v62 = vld.sshfl [vmem:[#allocation4 + $0x1a] sm:$0xf pattern:$0x76325410] }
 0x810   :  { %13786 = vmatpush3.bf16.msra.mxu1 %v13785_v30  ;;  %13559 = vmatprep.mubr.msk.f32.mxu1 %vm14160_vm12, %v21717_v31  ;;  %v14131_v10 = vld.sshfl [vmem:[#allocation4 + $0xa] sm:$0xf pattern:$0x76325410] }
 0x811   :  { %13787 = vmatprep.subr.bf16.mxu1 %v14159_v1  ;;  %v11838_v43 = vcombine.low %v14131_v10, %v14130_v62 }
 0x814   :  { %13789 = vmatpush3.bf16.msra.mxu1 %v13788_v48 }
 0x815   :  { %13790 = vmatprep.subr.bf16.mxu1 %v14159_v1 }
 0x817   :  { %13560 = vmatmul.mubr.msk.f32.vlgmr.msra.gmra.mrb[20].mxu1 %vm6189_vm0, %v11219_v12 }
 0x818   :  { %13792 = vmatpush3.bf16.msra.mxu1 %v13791_v52  ;;  %13570 = vmatprep.mubr.msk.f32.mxu1 %vm14160_vm12, %v21717_v31 }
 0x819   :  { %13793 = vmatprep.subr.bf16.mxu1 %v14159_v1 }
 0x81c   :  { %13795 = vmatpush3.bf16.msra.mxu1 %v13794_v35 }
 0x81d   :  { %13796 = vmatprep.subr.bf16.mxu1 %v14159_v1 }
 0x81f   :  { %13571 = vmatmul.mubr.msk.f32.vlgmr.msra.gmra.mrb[20].mxu1 %vm6189_vm0, %v11322_v45 }
 0x820   :  { %13798 = vmatpush3.bf16.msra.mxu1 %v13797_v39  ;;  %13581 = vmatprep.mubr.msk.f32.mxu1 %vm14160_vm12, %v21717_v31 }
 0x821   :  { %13799 = vmatprep.subr.bf16.mxu1 %v14159_v1 }
 0x824   :  { %13801 = vmatpush3.bf16.msra.mxu1 %v13800_v5 }
 0x825   :  { %13802 = vmatprep.subr.bf16.mxu1 %v14159_v1 }
 0x827   :  { %13582 = vmatmul.mubr.msk.f32.vlgmr.msra.gmra.mrb[20].mxu1 %vm6189_vm0, %v11425_v22 }
 0x828   :  { %13804 = vmatpush3.bf16.msra.mxu1 %v13803_v50  ;;  %13592 = vmatprep.mubr.msk.f32.mxu1 %vm14160_vm12, %v21717_v31 }
 0x829   :  { %13805 = vmatprep.subr.bf16.mxu1 %v14159_v1 }
 0x82c   :  { %13807 = vmatpush3.bf16.msra.mxu1 %v13806_v24 }
 0x82d   :  { %13808 = vmatprep.subr.bf16.mxu1 %v14159_v1 }
 0x82f   :  { %13593 = vmatmul.mubr.msk.f32.vlgmr.msra.gmra.mrb[20].mxu1 %vm6189_vm0, %v11528_v29 }
 0x830   :  { %13810 = vmatpush3.bf16.msra.mxu1 %v13809_v15  ;;  %13603 = vmatprep.mubr.msk.f32.mxu1 %vm14160_vm12, %v21717_v31 }
 0x831   :  { %13811 = vmatprep.subr.bf16.mxu1 %v14159_v1 }
 0x834   :  { %13813 = vmatpush3.bf16.msra.mxu1 %v13812_v53 }
 0x835   :  { %13814 = vmatprep.subr.bf16.mxu1 %v14159_v1 }
 0x837   :  { %13604 = vmatmul.mubr.msk.f32.vlgmr.msra.gmra.mrb[20].mxu1 %vm6189_vm0, %v11632_v34 }
 0x838   :  { %13816 = vmatpush3.bf16.msra.mxu1 %v13815_v7  ;;  %13614 = vmatprep.mubr.msk.f32.mxu1 %vm14160_vm12, %v21717_v31 }
 0x839   :  { %13817 = vmatprep.subr.bf16.mxu1 %v14159_v1 }
 0x83c   :  { %13819 = vmatpush3.bf16.msra.mxu1 %v13818_v47 }
 0x83d   :  { %13820 = vmatprep.subr.bf16.mxu1 %v14159_v1 }
 0x83f   :  { %13615 = vmatmul.mubr.msk.f32.vlgmr.msra.gmra.mrb[20].mxu1 %vm6189_vm0, %v11735_v38 }
 0x840   :  { %13822 = vmatpush3.bf16.msra.mxu1 %v13821_v16  ;;  %13625 = vmatprep.mubr.msk.f32.mxu1 %vm14160_vm12, %v21717_v31 }
 0x841   :  { %13823 = vmatprep.subr.bf16.mxu1 %v14159_v1  ;;  %v12817_v1 = vld [vmem:[%s20710_s8] ss:$0 sm:$0xff] }
 0x844   :  { %13825 = vmatpush3.bf16.msra.mxu1 %v13824_v56 }
 0x847   :  { %13626 = vmatmul.mubr.msk.f32.vlgmr.msra.gmra.mrb[20].mxu1 %vm6189_vm0, %v11838_v43 }
 0x91a   :  { %v11907_v30 = vpop.f32.mrb[20].mxu1 }
 0x91b   :  { %v11913_v25 = vcombine.high %v11907_v30, %v11907_v30  ;;  %v11916_v13 = vsel %vm11915_vm13, %v11907_v30, -inf  ;;  %v13627_v58 = vpop.f32.mrb[21].mxu1 }
 0x91c   :  { %v11917_v44 = vrot.slane %v11916_v13, 4 }
 0x91d   :  { %v11923_v4 = vsel %vm11915_vm13, %v11913_v25, -inf }
 0x91e   :  { %v11918_v48 = vmax.f32 %v11916_v13, %v11917_v44  ;;  %v11924_v8 = vrot.slane %v11923_v4, 4 }
 0x920   :  { %v11919_v61 = vrot.slane %v11918_v48, 2  ;;  %v11925_v52 = vmax.f32 %v11923_v4, %v11924_v8 }
 0x922   :  { %v11920_v12 = vmax.f32 %v11918_v48, %v11919_v61  ;;  %v11926_v37 = vrot.slane %v11925_v52, 2 }
 0x924   :  { %v11921_v31 = vrot.slane %v11920_v12, 1  ;;  %v11927_v42 = vmax.f32 %v11925_v52, %v11926_v37 }
 0x926   :  { %v11922_v14 = vmax.f32 %v11920_v12, %v11921_v31  ;;  %v11928_v6 = vrot.slane %v11927_v42, 1 }
 0x928   :  { %v11929_v35 = vmax.f32 %v11927_v42, %v11928_v6  ;;  %v11937_v27 = vadd.f32 %v12817_v1, %v11922_v14 }
 0x92a   :  { %v11938_v55 = vadd.f32 %v12817_v1, %v11929_v35  ;;  %v11939_v39 = vmax.f32 %v11937_v27, 0.0 }
 0x92c   :  { %v11940_v45 = vmax.f32 %v11938_v55, 0.0  ;;  %11942 = vst.msk [vmem:[#allocation5] sm:$0x1] %vm11941_vm14, %v11939_v39 }
 0x92e   :  { %11943 = vst.msk [vmem:[#allocation5 + $0x1] sm:$0x1] %vm11941_vm14, %v11940_v45 }
 0x92f   :  { %14143 = shalt.err (!%p14140_p4)
}
 0x930   :  { %s14144_s14 = scalar_lea.hbm %s20711_s9, 32 }
 0x931   :  { %p14145_p5 = scmp.ne.s32.totalorder %s20711_s9, %s14144_s14  ;;  %p14148_p6 = scmp.lt.u32.totalorder %s14144_s14, %s20711_s9 }
 0x933   :  { %p14150_p7 = pnand %p14148_p6, %p14145_p5 }
 0x935   :  { %14153 = shalt.err (!%p14150_p7)
}
 0x936   :  { %s14162_s5 = smov 16   ;;  %s14163_s1 = smov 1  }
 0x937   :  { %11955 = dma.vmem_to_hbm [thread:$0]  %s11950_s4, 32, %s20711_s9, [#allocation6], %s14162_s5, %s14162_s5, %s14163_s1  }
 0x938   :  { %14154 = dma.done.wait [#allocation6], 32  }
 0x939   :  { %14155 = vsyncadd [#allocation6], 4294967264 }
 0x93a   :  { %11959 = vsyncpa [#allocation6], 1 }

</bundles_post_ra>
